<compile_context>
chip_gen: v6e
topology: v6e:2x2x1
jax: 0.10.0
libtpu: 0.0.40
codegen_flags: <defaults>
</compile_context>

<pallas_src>
import jax
import jax.numpy as jnp
from jax.experimental import pallas as pl
from jax.experimental.pallas import tpu as pltpu

IN_DIM = 5
IN_PAD = 16          # K padded to a clean bf16 sublane tile
OUT_DIM = 3
OUT_PAD = 128        # lane-dense padded output width
LAYER_DIMS = [(5, 256), (256, 512), (512, 512), (512, 1024), (1024, 3)]


def dqn_kernel(x_ref,
               w1_ref, b1_ref,
               w2_ref, s2_ref, b2_ref,
               w3_ref, s3_ref, b3_ref,
               w4_ref, s4_ref, b4_ref,
               w5_ref, s5_ref, b5_ref,
               o_ref):
    """Fused 5-layer MLP: bf16 MXU operands, f32 accumulation/bias/ReLU."""
    h = x_ref[...].astype(jnp.bfloat16)

    # Layer 1 (tiny 16x256 bf16 weights, K padded with zero rows).
    h = jnp.dot(h, w1_ref[...], preferred_element_type=jnp.float32)
    h = jnp.maximum(h + b1_ref[...], 0.0).astype(jnp.bfloat16)

    # Layers 2..5: int8 weights; per-output-channel scale applied to the f32
    # accumulator (identical math to dequantizing the weights, less VPU work).
    h = jnp.dot(h, w2_ref[...].astype(jnp.bfloat16),
                preferred_element_type=jnp.float32)
    h = jnp.maximum(h * s2_ref[...] + b2_ref[...], 0.0).astype(jnp.bfloat16)

    h = jnp.dot(h, w3_ref[...].astype(jnp.bfloat16),
                preferred_element_type=jnp.float32)
    h = jnp.maximum(h * s3_ref[...] + b3_ref[...], 0.0).astype(jnp.bfloat16)

    h = jnp.dot(h, w4_ref[...].astype(jnp.bfloat16),
                preferred_element_type=jnp.float32)
    h = jnp.maximum(h * s4_ref[...] + b4_ref[...], 0.0).astype(jnp.bfloat16)

    out = jnp.dot(h, w5_ref[...].astype(jnp.bfloat16),
                  preferred_element_type=jnp.float32)
    o_ref[...] = out * s5_ref[...] + b5_ref[...]


def init_params(key):
    """Mimics PyTorch nn.Linear default init (uniform +-1/sqrt(fan_in)).

    Weights stored as (in, out) f32; biases as (1, out) f32."""
    params = []
    for (fan_in, fan_out) in LAYER_DIMS:
        key, kw, kb = jax.random.split(key, 3)
        bound = 1.0 / jnp.sqrt(jnp.float32(fan_in))
        w = jax.random.uniform(kw, (fan_in, fan_out), jnp.float32, -bound, bound)
        b = jax.random.uniform(kb, (1, fan_out), jnp.float32, -bound, bound)
        params.append((w, b))
    return params


def _quantize_int8(w):
    """Symmetric per-output-channel int8 quantization. w: (in, out) f32."""
    amax = jnp.max(jnp.abs(w), axis=0, keepdims=True)              # (1, out)
    scale = jnp.where(amax > 0.0, amax / 127.0, 1.0)
    wq = jnp.clip(jnp.round(w / scale), -127.0, 127.0).astype(jnp.int8)
    return wq, scale.astype(jnp.float32)


def prepare_params(params):
    """Kernel-ready params: W1 bf16 (K padded 5->16); W2..W5 int8 + f32 scales;
    last layer zero-padded to OUT_PAD lanes; biases f32."""
    (w1, b1), *rest = params
    w1 = jnp.pad(w1, ((0, IN_PAD - w1.shape[0]), (0, 0))).astype(jnp.bfloat16)
    layers = []
    for i, (w, b) in enumerate(rest):
        if i == len(rest) - 1:
            w = jnp.pad(w, ((0, 0), (0, OUT_PAD - w.shape[1])))
            b = jnp.pad(b, ((0, 0), (0, OUT_PAD - b.shape[1])))
        wq, s = _quantize_int8(w)
        layers.append((wq, s, b.astype(jnp.float32)))
    return {"w1": w1, "b1": b1.astype(jnp.float32), "layers": layers}


def dqn_forward(x, prepared, *, tile_b=512):
    """x: (B, 5) float32.  prepared: output of prepare_params()."""
    B = x.shape[0]
    x = jnp.pad(x, ((0, 0), (0, IN_PAD - x.shape[1]))).astype(jnp.float32)

    if B <= tile_b:
        # Single grid step: whole batch in one tile (rows padded to 8).
        B_pad = max(8, ((B + 7) // 8) * 8)
        tile = B_pad
    else:
        B_pad = ((B + tile_b - 1) // tile_b) * tile_b
        tile = tile_b
    if B_pad != B:
        x = jnp.pad(x, ((0, B_pad - B), (0, 0)))
    grid = (B_pad // tile,)

    # Only shard the batch axis across megacore TCs when per-core MXU work
    # outweighs a duplicated per-core weight fetch.
    semantics = ("parallel",) if B_pad >= 4096 else ("arbitrary",)

    flat_inputs = [x, prepared["w1"], prepared["b1"]]
    for wq, s, b in prepared["layers"]:
        flat_inputs.extend((wq, s, b))

    def resident_spec(a):
        # Constant block index: fetched once, VMEM-resident; single-buffered.
        return pl.BlockSpec(a.shape, lambda i: (0, 0),
                            pipeline_mode=pl.Buffered(1))

    in_specs = [pl.BlockSpec((tile, IN_PAD), lambda i: (i, 0))]
    in_specs += [resident_spec(a) for a in flat_inputs[1:]]
    out_spec = pl.BlockSpec((tile, OUT_PAD), lambda i: (i, 0))

    out_padded = pl.pallas_call(
        dqn_kernel,
        out_shape=jax.ShapeDtypeStruct((B_pad, OUT_PAD), jnp.float32),
        grid=grid,
        in_specs=in_specs,
        out_specs=out_spec,
        compiler_params=pltpu.CompilerParams(
            dimension_semantics=semantics,
            vmem_limit_bytes=32 << 20,
        ),
    )(*flat_inputs)

    return out_padded[:B, :OUT_DIM]


def dqn_forward_ref(x, prepared):
    """Pure-JAX reference mirroring the kernel numerics exactly
    (bf16 activations, int8 weights, f32 accumulation + scale + bias)."""
    x = jnp.pad(x, ((0, 0), (0, IN_PAD - x.shape[1])))
    h = x.astype(jnp.bfloat16)
    h = jnp.dot(h, prepared["w1"], preferred_element_type=jnp.float32)
    h = jnp.maximum(h + prepared["b1"], 0.0).astype(jnp.bfloat16)
    n = len(prepared["layers"])
    for i, (wq, s, b) in enumerate(prepared["layers"]):
        h = jnp.dot(h, wq.astype(jnp.bfloat16),
                    preferred_element_type=jnp.float32) * s + b
        if i < n - 1:
            h = jnp.maximum(h, 0.0).astype(jnp.bfloat16)
    return h[:, :OUT_DIM]


if __name__ == "__main__":
    key = jax.random.PRNGKey(0)
    key, kx = jax.random.split(key)

    B = 256  # inference-sized batch -> single grid step (tile_b defaults to 512)
    x = jax.random.normal(kx, (B, IN_DIM), jnp.float32)

    params = init_params(key)          # f32 master params (PyTorch-style init)
    prepared = prepare_params(params)  # bf16 W1 + int8 W2..W5 kernel params

    out = dqn_forward(x, prepared)
    out = jax.block_until_ready(out)

    ref = dqn_forward_ref(x, prepared)
    assert out.shape == (B, OUT_DIM)
    assert jnp.allclose(out, ref, atol=2e-3, rtol=2e-3), \
        float(jnp.max(jnp.abs(out - ref)))

    print("KERNEL_OK")
</pallas_src>

<mosaic_0001>
module attributes {stable_mosaic.version = 11 : i64} {
  func.func @dqn_kernel(%arg0: i32, %arg1: memref<256x16xf32, #tpu.memory_space<vmem>>, %arg2: memref<16x256xbf16, #tpu.memory_space<vmem>>, %arg3: memref<1x256xf32, #tpu.memory_space<vmem>>, %arg4: memref<256x512xi8, #tpu.memory_space<vmem>>, %arg5: memref<1x512xf32, #tpu.memory_space<vmem>>, %arg6: memref<1x512xf32, #tpu.memory_space<vmem>>, %arg7: memref<512x512xi8, #tpu.memory_space<vmem>>, %arg8: memref<1x512xf32, #tpu.memory_space<vmem>>, %arg9: memref<1x512xf32, #tpu.memory_space<vmem>>, %arg10: memref<512x1024xi8, #tpu.memory_space<vmem>>, %arg11: memref<1x1024xf32, #tpu.memory_space<vmem>>, %arg12: memref<1x1024xf32, #tpu.memory_space<vmem>>, %arg13: memref<1024x128xi8, #tpu.memory_space<vmem>>, %arg14: memref<1x128xf32, #tpu.memory_space<vmem>>, %arg15: memref<1x128xf32, #tpu.memory_space<vmem>>, %arg16: memref<256x128xf32, #tpu.memory_space<vmem>>) attributes {dimension_semantics = [#tpu.dimension_semantics<arbitrary>], iteration_bounds = array<i64: 1>, scalar_prefetch = 0 : i64, scratch_operands = 0 : i64, tpu.core_type = #tpu.core_type<tc>, window_params = [{transform_indices = @transform_0, window_bounds = array<i64: 256, 16>}, {pipeline_mode = #tpu.pipeline_mode<synchronous>, transform_indices = @transform_1, window_bounds = array<i64: 16, 256>}, {pipeline_mode = #tpu.pipeline_mode<synchronous>, transform_indices = @transform_2, window_bounds = array<i64: 1, 256>}, {pipeline_mode = #tpu.pipeline_mode<synchronous>, transform_indices = @transform_3, window_bounds = array<i64: 256, 512>}, {pipeline_mode = #tpu.pipeline_mode<synchronous>, transform_indices = @transform_4, window_bounds = array<i64: 1, 512>}, {pipeline_mode = #tpu.pipeline_mode<synchronous>, transform_indices = @transform_5, window_bounds = array<i64: 1, 512>}, {pipeline_mode = #tpu.pipeline_mode<synchronous>, transform_indices = @transform_6, window_bounds = array<i64: 512, 512>}, {pipeline_mode = #tpu.pipeline_mode<synchronous>, transform_indices = @transform_7, window_bounds = array<i64: 1, 512>}, {pipeline_mode = #tpu.pipeline_mode<synchronous>, transform_indices = @transform_8, window_bounds = array<i64: 1, 512>}, {pipeline_mode = #tpu.pipeline_mode<synchronous>, transform_indices = @transform_9, window_bounds = array<i64: 512, 1024>}, {pipeline_mode = #tpu.pipeline_mode<synchronous>, transform_indices = @transform_10, window_bounds = array<i64: 1, 1024>}, {pipeline_mode = #tpu.pipeline_mode<synchronous>, transform_indices = @transform_11, window_bounds = array<i64: 1, 1024>}, {pipeline_mode = #tpu.pipeline_mode<synchronous>, transform_indices = @transform_12, window_bounds = array<i64: 1024, 128>}, {pipeline_mode = #tpu.pipeline_mode<synchronous>, transform_indices = @transform_13, window_bounds = array<i64: 1, 128>}, {pipeline_mode = #tpu.pipeline_mode<synchronous>, transform_indices = @transform_14, window_bounds = array<i64: 1, 128>}, {transform_indices = @transform_15, window_bounds = array<i64: 256, 128>}]} {
    %c0 = arith.constant 0 : index
    %c0_0 = arith.constant 0 : index
    %0 = vector.load %arg1[%c0, %c0_0] : memref<256x16xf32, #tpu.memory_space<vmem>>, vector<256x16xf32>
    %1 = arith.truncf %0 : vector<256x16xf32> to vector<256x16xbf16>
    %c0_1 = arith.constant 0 : index
    %c0_2 = arith.constant 0 : index
    %2 = vector.load %arg2[%c0_1, %c0_2] : memref<16x256xbf16, #tpu.memory_space<vmem>>, vector<16x256xbf16>
    %cst = arith.constant dense<0.000000e+00> : vector<256x256xf32>
    %3 = tpu.matmul %1, %2, %cst {dimension_numbers = #tpu.dot_dimension_numbers<[1], [0], [0], [1], [0, 0, 1, 1], [], []>} : vector<256x16xbf16>, vector<16x256xbf16>, vector<256x256xf32> -> vector<256x256xf32>
    %c0_3 = arith.constant 0 : index
    %c0_4 = arith.constant 0 : index
    %4 = vector.load %arg3[%c0_3, %c0_4] : memref<1x256xf32, #tpu.memory_space<vmem>>, vector<1x256xf32>
    %5 = vector.broadcast %4 : vector<1x256xf32> to vector<256x256xf32>
    %6 = arith.addf %3, %5 : vector<256x256xf32>
    %cst_5 = arith.constant 0.000000e+00 : f32
    %7 = vector.broadcast %cst_5 : f32 to vector<256x256xf32>
    %8 = arith.maximumf %6, %7 : vector<256x256xf32>
    %9 = arith.truncf %8 : vector<256x256xf32> to vector<256x256xbf16>
    %c0_6 = arith.constant 0 : index
    %c0_7 = arith.constant 0 : index
    %10 = vector.load %arg4[%c0_6, %c0_7] : memref<256x512xi8, #tpu.memory_space<vmem>>, vector<256x512xi8>
    %11 = arith.sitofp %10 : vector<256x512xi8> to vector<256x512xbf16>
    %cst_8 = arith.constant dense<0.000000e+00> : vector<256x512xf32>
    %12 = tpu.matmul %9, %11, %cst_8 {dimension_numbers = #tpu.dot_dimension_numbers<[1], [0], [0], [1], [0, 0, 1, 1], [], []>} : vector<256x256xbf16>, vector<256x512xbf16>, vector<256x512xf32> -> vector<256x512xf32>
    %c0_9 = arith.constant 0 : index
    %c0_10 = arith.constant 0 : index
    %13 = vector.load %arg5[%c0_9, %c0_10] : memref<1x512xf32, #tpu.memory_space<vmem>>, vector<1x512xf32>
    %14 = vector.broadcast %13 : vector<1x512xf32> to vector<256x512xf32>
    %15 = arith.mulf %12, %14 : vector<256x512xf32>
    %c0_11 = arith.constant 0 : index
    %c0_12 = arith.constant 0 : index
    %16 = vector.load %arg6[%c0_11, %c0_12] : memref<1x512xf32, #tpu.memory_space<vmem>>, vector<1x512xf32>
    %17 = vector.broadcast %16 : vector<1x512xf32> to vector<256x512xf32>
    %18 = arith.addf %15, %17 : vector<256x512xf32>
    %cst_13 = arith.constant 0.000000e+00 : f32
    %19 = vector.broadcast %cst_13 : f32 to vector<256x512xf32>
    %20 = arith.maximumf %18, %19 : vector<256x512xf32>
    %21 = arith.truncf %20 : vector<256x512xf32> to vector<256x512xbf16>
    %c0_14 = arith.constant 0 : index
    %c0_15 = arith.constant 0 : index
    %22 = vector.load %arg7[%c0_14, %c0_15] : memref<512x512xi8, #tpu.memory_space<vmem>>, vector<512x512xi8>
    %23 = arith.sitofp %22 : vector<512x512xi8> to vector<512x512xbf16>
    %cst_16 = arith.constant dense<0.000000e+00> : vector<256x512xf32>
    %24 = tpu.matmul %21, %23, %cst_16 {dimension_numbers = #tpu.dot_dimension_numbers<[1], [0], [0], [1], [0, 0, 1, 1], [], []>} : vector<256x512xbf16>, vector<512x512xbf16>, vector<256x512xf32> -> vector<256x512xf32>
    %c0_17 = arith.constant 0 : index
    %c0_18 = arith.constant 0 : index
    %25 = vector.load %arg8[%c0_17, %c0_18] : memref<1x512xf32, #tpu.memory_space<vmem>>, vector<1x512xf32>
    %26 = vector.broadcast %25 : vector<1x512xf32> to vector<256x512xf32>
    %27 = arith.mulf %24, %26 : vector<256x512xf32>
    %c0_19 = arith.constant 0 : index
    %c0_20 = arith.constant 0 : index
    %28 = vector.load %arg9[%c0_19, %c0_20] : memref<1x512xf32, #tpu.memory_space<vmem>>, vector<1x512xf32>
    %29 = vector.broadcast %28 : vector<1x512xf32> to vector<256x512xf32>
    %30 = arith.addf %27, %29 : vector<256x512xf32>
    %cst_21 = arith.constant 0.000000e+00 : f32
    %31 = vector.broadcast %cst_21 : f32 to vector<256x512xf32>
    %32 = arith.maximumf %30, %31 : vector<256x512xf32>
    %33 = arith.truncf %32 : vector<256x512xf32> to vector<256x512xbf16>
    %c0_22 = arith.constant 0 : index
    %c0_23 = arith.constant 0 : index
    %34 = vector.load %arg10[%c0_22, %c0_23] : memref<512x1024xi8, #tpu.memory_space<vmem>>, vector<512x1024xi8>
    %35 = arith.sitofp %34 : vector<512x1024xi8> to vector<512x1024xbf16>
    %cst_24 = arith.constant dense<0.000000e+00> : vector<256x1024xf32>
    %36 = tpu.matmul %33, %35, %cst_24 {dimension_numbers = #tpu.dot_dimension_numbers<[1], [0], [0], [1], [0, 0, 1, 1], [], []>} : vector<256x512xbf16>, vector<512x1024xbf16>, vector<256x1024xf32> -> vector<256x1024xf32>
    %c0_25 = arith.constant 0 : index
    %c0_26 = arith.constant 0 : index
    %37 = vector.load %arg11[%c0_25, %c0_26] : memref<1x1024xf32, #tpu.memory_space<vmem>>, vector<1x1024xf32>
    %38 = vector.broadcast %37 : vector<1x1024xf32> to vector<256x1024xf32>
    %39 = arith.mulf %36, %38 : vector<256x1024xf32>
    %c0_27 = arith.constant 0 : index
    %c0_28 = arith.constant 0 : index
    %40 = vector.load %arg12[%c0_27, %c0_28] : memref<1x1024xf32, #tpu.memory_space<vmem>>, vector<1x1024xf32>
    %41 = vector.broadcast %40 : vector<1x1024xf32> to vector<256x1024xf32>
    %42 = arith.addf %39, %41 : vector<256x1024xf32>
    %cst_29 = arith.constant 0.000000e+00 : f32
    %43 = vector.broadcast %cst_29 : f32 to vector<256x1024xf32>
    %44 = arith.maximumf %42, %43 : vector<256x1024xf32>
    %45 = arith.truncf %44 : vector<256x1024xf32> to vector<256x1024xbf16>
    %c0_30 = arith.constant 0 : index
    %c0_31 = arith.constant 0 : index
    %46 = vector.load %arg13[%c0_30, %c0_31] : memref<1024x128xi8, #tpu.memory_space<vmem>>, vector<1024x128xi8>
    %47 = arith.sitofp %46 : vector<1024x128xi8> to vector<1024x128xbf16>
    %cst_32 = arith.constant dense<0.000000e+00> : vector<256x128xf32>
    %48 = tpu.matmul %45, %47, %cst_32 {dimension_numbers = #tpu.dot_dimension_numbers<[1], [0], [0], [1], [0, 0, 1, 1], [], []>} : vector<256x1024xbf16>, vector<1024x128xbf16>, vector<256x128xf32> -> vector<256x128xf32>
    %c0_33 = arith.constant 0 : index
    %c0_34 = arith.constant 0 : index
    %49 = vector.load %arg14[%c0_33, %c0_34] : memref<1x128xf32, #tpu.memory_space<vmem>>, vector<1x128xf32>
    %50 = vector.broadcast %49 : vector<1x128xf32> to vector<256x128xf32>
    %51 = arith.mulf %48, %50 : vector<256x128xf32>
    %c0_35 = arith.constant 0 : index
    %c0_36 = arith.constant 0 : index
    %52 = vector.load %arg15[%c0_35, %c0_36] : memref<1x128xf32, #tpu.memory_space<vmem>>, vector<1x128xf32>
    %53 = vector.broadcast %52 : vector<1x128xf32> to vector<256x128xf32>
    %54 = arith.addf %51, %53 : vector<256x128xf32>
    %c0_37 = arith.constant 0 : index
    %c0_38 = arith.constant 0 : index
    %55 = vector.load %arg16[%c0_37, %c0_38] : memref<256x128xf32, #tpu.memory_space<vmem>>, vector<256x128xf32>
    tpu.vector_store %arg16[%c0_37, %c0_38], %54 {strides = array<i32>} : memref<256x128xf32, #tpu.memory_space<vmem>>, vector<256x128xf32>,
    return
  }
  func.func @transform_0(%arg0: i32) -> (i32, i32) {
    %c0_i32 = arith.constant 0 : i32
    %c0_i32_0 = arith.constant 0 : i32
    return %arg0, %c0_i32 : i32, i32
  }
  func.func @transform_1(%arg0: i32) -> (i32, i32) {
    %c0_i32 = arith.constant 0 : i32
    %c0_i32_0 = arith.constant 0 : i32
    %c0_i32_1 = arith.constant 0 : i32
    return %c0_i32, %c0_i32_0 : i32, i32
  }
  func.func @transform_2(%arg0: i32) -> (i32, i32) {
    %c0_i32 = arith.constant 0 : i32
    %c0_i32_0 = arith.constant 0 : i32
    %c0_i32_1 = arith.constant 0 : i32
    return %c0_i32, %c0_i32_0 : i32, i32
  }
  func.func @transform_3(%arg0: i32) -> (i32, i32) {
    %c0_i32 = arith.constant 0 : i32
    %c0_i32_0 = arith.constant 0 : i32
    %c0_i32_1 = arith.constant 0 : i32
    return %c0_i32, %c0_i32_0 : i32, i32
  }
  func.func @transform_4(%arg0: i32) -> (i32, i32) {
    %c0_i32 = arith.constant 0 : i32
    %c0_i32_0 = arith.constant 0 : i32
    %c0_i32_1 = arith.constant 0 : i32
    return %c0_i32, %c0_i32_0 : i32, i32
  }
  func.func @transform_5(%arg0: i32) -> (i32, i32) {
    %c0_i32 = arith.constant 0 : i32
    %c0_i32_0 = arith.constant 0 : i32
    %c0_i32_1 = arith.constant 0 : i32
    return %c0_i32, %c0_i32_0 : i32, i32
  }
  func.func @transform_6(%arg0: i32) -> (i32, i32) {
    %c0_i32 = arith.constant 0 : i32
    %c0_i32_0 = arith.constant 0 : i32
    %c0_i32_1 = arith.constant 0 : i32
    return %c0_i32, %c0_i32_0 : i32, i32
  }
  func.func @transform_7(%arg0: i32) -> (i32, i32) {
    %c0_i32 = arith.constant 0 : i32
    %c0_i32_0 = arith.constant 0 : i32
    %c0_i32_1 = arith.constant 0 : i32
    return %c0_i32, %c0_i32_0 : i32, i32
  }
  func.func @transform_8(%arg0: i32) -> (i32, i32) {
    %c0_i32 = arith.constant 0 : i32
    %c0_i32_0 = arith.constant 0 : i32
    %c0_i32_1 = arith.constant 0 : i32
    return %c0_i32, %c0_i32_0 : i32, i32
  }
  func.func @transform_9(%arg0: i32) -> (i32, i32) {
    %c0_i32 = arith.constant 0 : i32
    %c0_i32_0 = arith.constant 0 : i32
    %c0_i32_1 = arith.constant 0 : i32
    return %c0_i32, %c0_i32_0 : i32, i32
  }
  func.func @transform_10(%arg0: i32) -> (i32, i32) {
    %c0_i32 = arith.constant 0 : i32
    %c0_i32_0 = arith.constant 0 : i32
    %c0_i32_1 = arith.constant 0 : i32
    return %c0_i32, %c0_i32_0 : i32, i32
  }
  func.func @transform_11(%arg0: i32) -> (i32, i32) {
    %c0_i32 = arith.constant 0 : i32
    %c0_i32_0 = arith.constant 0 : i32
    %c0_i32_1 = arith.constant 0 : i32
    return %c0_i32, %c0_i32_0 : i32, i32
  }
  func.func @transform_12(%arg0: i32) -> (i32, i32) {
    %c0_i32 = arith.constant 0 : i32
    %c0_i32_0 = arith.constant 0 : i32
    %c0_i32_1 = arith.constant 0 : i32
    return %c0_i32, %c0_i32_0 : i32, i32
  }
  func.func @transform_13(%arg0: i32) -> (i32, i32) {
    %c0_i32 = arith.constant 0 : i32
    %c0_i32_0 = arith.constant 0 : i32
    %c0_i32_1 = arith.constant 0 : i32
    return %c0_i32, %c0_i32_0 : i32, i32
  }
  func.func @transform_14(%arg0: i32) -> (i32, i32) {
    %c0_i32 = arith.constant 0 : i32
    %c0_i32_0 = arith.constant 0 : i32
    %c0_i32_1 = arith.constant 0 : i32
    return %c0_i32, %c0_i32_0 : i32, i32
  }
  func.func @transform_15(%arg0: i32) -> (i32, i32) {
    %c0_i32 = arith.constant 0 : i32
    %c0_i32_0 = arith.constant 0 : i32
    return %arg0, %c0_i32 : i32, i32
  }
}

</mosaic_0001>

<bundles_post_ra>
// kernel: tpu_custom_call.1
= control target key start
LH: loop header
LB: loop body
LE: loop exit
PB: predicated region body
PF: predicated region fallthrough
CT: control target
= control target key end

     0   :  { %20 = vsyncpa [#allocation3], 0  ;;  %s12183_s0 = inlined_call_operand.vmem [shape: f32[256,16], index: 0, kind: input, shape index: {}]   ;;  %s12184_s1 = inlined_call_operand.vmem [shape: bf16[16,256], index: 1, kind: input, shape index: {}]   ;;  %s12185_s2 = inlined_call_operand.hbm [shape: f32[1,256], index: 2, kind: input, shape index: {}]   ;;  %s12186_s3 = inlined_call_operand.vmem [shape: s8[256,512], index: 3, kind: input, shape index: {}]   ;;  %s12187_s4 = inlined_call_operand.vmem [shape: f32[1,512], index: 4, kind: input, shape index: {}]   ;;  %s12188_s5 = inlined_call_operand.hbm [shape: f32[1,512], index: 5, kind: input, shape index: {}]   ;;  %s12189_s6 = inlined_call_operand.hbm [shape: s8[512,512], index: 6, kind: input, shape index: {}]   ;;  %s12190_s7 = inlined_call_operand.vmem [shape: f32[1,512], index: 7, kind: input, shape index: {}]   ;;  %s12191_s8 = inlined_call_operand.vmem [shape: f32[1,512], index: 8, kind: input, shape index: {}]   ;;  %s12192_s9 = inlined_call_operand.hbm [shape: s8[512,1024], index: 9, kind: input, shape index: {}]   ;;  %s12193_s10 = inlined_call_operand.vmem [shape: f32[1,1024], index: 10, kind: input, shape index: {}]   ;;  %s12194_s11 = inlined_call_operand.vmem [shape: f32[1,1024], index: 11, kind: input, shape index: {}]   ;;  %s12195_s12 = inlined_call_operand.hbm [shape: s8[1024,128], index: 12, kind: input, shape index: {}]   ;;  %s12196_s13 = inlined_call_operand.vmem [shape: f32[1,128], index: 13, kind: input, shape index: {}]   ;;  %s12197_s14 = inlined_call_operand.vmem [shape: f32[1,128], index: 14, kind: input, shape index: {}]   ;;  %s12198_s15 = inlined_call_operand.hbm [shape: f32[256,128], index: 15, kind: output, shape index: {}]  }
   0x1   :  { %21 = vsyncpa [#allocation6], 0 }
   0x2   :  { %22 = vsyncpa [#allocation9], 0 }
   0x3   :  { %23 = vsyncpa [#allocation4], 0  ;;  %s7353_s18 = smov [#allocation5]   ;;  %s7354_s20 = smov [#allocation8]  }
   0x4   :  { %s48_s19 = sshll.u32 %s7353_s18, 4  ;;  %s73_s21 = sshll.u32 %s7354_s20, 4  ;;  %s49_s19 = int_to_ptr.vmem [resolvable:$true] %s48_s19  ;;  %s74_s21 = int_to_ptr.vmem [resolvable:$true] %s73_s21 }
   0x5   :  { %s7233_s22 = scalar_lea.vmem %s49_s19, 64  ;;  %p7238_p1 = scmp.lt.s32.totalorder %s49_s19, %s49_s19 }
   0x6   :  { %p7234_p0 = scmp.ne.s32.totalorder %s49_s19, %s7233_s22  ;;  %p7239_p2 = scmp.lt.s32.totalorder %s7233_s22, %s7233_s22 }
   0x8   :  { %p7240_p3 = por %p7239_p2, %p7238_p1 }
   0xa   :  { %p7241_p4 = pnand %p7240_p3, %p7234_p0 }
   0xc   :  { %7244 = shalt.err (!%p7241_p4)
}
   0xd   :  { %51 = dma.hbm_to_vmem [thread:$0]  %s12188_s5, 64, %s49_s19, [#allocation6]  }
   0xe   :  { %s7253_s25 = scalar_lea.vmem %s74_s21, 16384  ;;  %p7258_p6 = scmp.lt.s32.totalorder %s74_s21, %s74_s21 }
   0xf   :  { %p7254_p5 = scmp.ne.s32.totalorder %s74_s21, %s7253_s25  ;;  %p7259_p7 = scmp.lt.s32.totalorder %s7253_s25, %s7253_s25 }
  0x11   :  { %p7260_p8 = por %p7259_p7, %p7258_p6 }
  0x13   :  { %p7261_p9 = pnand %p7260_p8, %p7254_p5 }
  0x15   :  { %7264 = shalt.err (!%p7261_p9)
}
  0x16   :  { %s7355_s26 = smov 1024   ;;  %s7356_s27 = smov 64  }
  0x17   :  { %79 = dma.hbm_to_vmem [thread:$0]  %s12192_s9, 16384, %s74_s21, [#allocation9], %s7355_s26, %s7355_s26, %s7356_s27  }
  0x18   :  { %s7357_s30 = smov [#allocation2]   ;;  %s7358_s17 = smov [#allocation7]  }
  0x19   :  { %s34_s16 = sshll.u32 %s7357_s30, 4  ;;  %s57_s18 = sshll.u32 %s7358_s17, 4  ;;  %s35_s16 = int_to_ptr.vmem [resolvable:$true] %s34_s16  ;;  %s58_s18 = int_to_ptr.vmem [resolvable:$true] %s57_s18 }
  0x1a   :  { %s7273_s5 = scalar_lea.vmem %s35_s16, 32  ;;  %p7278_p11 = scmp.lt.s32.totalorder %s35_s16, %s35_s16 }
  0x1b   :  { %p7274_p10 = scmp.ne.s32.totalorder %s35_s16, %s7273_s5  ;;  %p7279_p12 = scmp.lt.s32.totalorder %s7273_s5, %s7273_s5 }
  0x1d   :  { %p7280_p13 = por %p7279_p12, %p7278_p11 }
  0x1f   :  { %p7281_p0 = pnand %p7280_p13, %p7274_p10 }
  0x21   :  { %7284 = shalt.err (!%p7281_p0)
}
  0x22   :  { %37 = dma.hbm_to_vmem [thread:$0]  %s12185_s2, 32, %s35_s16, [#allocation3]  }
  0x23   :  { %s7293_s22 = scalar_lea.vmem %s58_s18, 8192  ;;  %p7298_p2 = scmp.lt.s32.totalorder %s58_s18, %s58_s18 }
  0x24   :  { %p7294_p1 = scmp.ne.s32.totalorder %s58_s18, %s7293_s22  ;;  %p7299_p3 = scmp.lt.s32.totalorder %s7293_s22, %s7293_s22 }
  0x26   :  { %p7300_p4 = por %p7299_p3, %p7298_p2 }
  0x28   :  { %p7301_p5 = pnand %p7300_p4, %p7294_p1 }
  0x2a   :  { %7304 = shalt.err (!%p7301_p5)
}
  0x2b   :  { %s7359_s9 = smov 512   ;;  %s7360_s21 = smov 32  }
  0x2c   :  { %63 = dma.hbm_to_vmem [thread:$0]  %s12189_s6, 8192, %s58_s18, [#allocation6], %s7359_s9, %s7359_s9, %s7360_s21  }
  0x2d   :  { %s7361_s25 = smov [#allocation10]  }
  0x2e   :  { %s89_s26 = sshll.u32 %s7361_s25, 4  ;;  %s90_s26 = int_to_ptr.vmem [resolvable:$true] %s89_s26 }
  0x2f   :  { %s7313_s27 = scalar_lea.vmem %s90_s26, 4096  ;;  %p7318_p7 = scmp.lt.s32.totalorder %s90_s26, %s90_s26 }
  0x30   :  { %p7314_p6 = scmp.ne.s32.totalorder %s90_s26, %s7313_s27  ;;  %p7319_p8 = scmp.lt.s32.totalorder %s7313_s27, %s7313_s27 }
  0x32   :  { %p7320_p9 = por %p7319_p8, %p7318_p7 }
  0x34   :  { %p7321_p10 = pnand %p7320_p9, %p7314_p6 }
  0x36   :  { %7324 = shalt.err (!%p7321_p10)
}
  0x37   :  { %s7362_s2 = smov 128   ;;  %s7363_s28 = smov 8  }
  0x38   :  { %95 = dma.hbm_to_vmem [thread:$0]  %s12195_s12, 4096, %s90_s26, [#allocation9], %s7362_s2, %s7362_s2, %s7363_s28  }
  0x39   :  { %7345 = dma.done.wait [#allocation3], 32  }
  0x3a   :  { %7346 = vsyncadd [#allocation3], 4294967264 }
  0x3b   :  { %7347 = dma.done.wait [#allocation6], 8256  }
  0x3c   :  { %7348 = vsyncadd [#allocation6], 4294959040 }
  0x3d   :  { %7349 = dma.done.wait [#allocation9], 20480  }
  0x3e   :  { %7350 = vsyncadd [#allocation9], 4294946816  ;;  %v7364_v0 = vmov 0   ;;  %v7216_v1 = vld [vmem:[%s12184_s1 + $0x4] ss:$8 sps:$4 sm:$0xff]   ;;  %vm188_vm0 = vcmask 130048  }
  0x3f   :  { %269 = vmatprep.mubr.bf16.mxu0 %v7364_v0  ;;  %349 = vmatprep.mubr.bf16.mxu1 %v7364_v0  ;;  %v7218_v2 = vld [vmem:[%s12184_s1] ss:$8 sps:$4 sm:$0xff]   ;;  %v118_v7 = vld [vmem:[%s12183_s0 + $0x10] sm:$0xff]  ;;  %v119_v8 = vld [vmem:[%s12183_s0 + $0x18] sm:$0xff] }
  0x40   :  { %v116_v3 = vld [vmem:[%s12183_s0] sm:$0xff]  ;;  %v117_v4 = vld [vmem:[%s12183_s0 + $0x8] sm:$0xff]  ;;  %251 = vmatprep.subr.bf16.mxu0 %v7216_v1  ;;  %7201 = vmatprep.subr.bf16.mxu1 %v7216_v1  ;;  %v149_v11 = vpack.c.bf16 %v119_v8, %v118_v7  ;;  %v134_v12 = vld [vmem:[%s12183_s0 + $0x90] sm:$0xff] }
  0x41   :  { %v148_v5 = vpack.c.bf16 %v117_v4, %v116_v3  ;;  %252 = vmatpush1.bf16.msra.mxu0 %v7218_v2  ;;  %7202 = vmatpush1.bf16.msra.mxu1 %v7218_v2  ;;  %v132_v6 = vld [vmem:[%s12183_s0 + $0x80] sm:$0xff]  ;;  %v133_v9 = vld [vmem:[%s12183_s0 + $0x88] sm:$0xff]  ;;  %v135_v13 = vld [vmem:[%s12183_s0 + $0x98] sm:$0xff] }
  0x42   :  { %v156_v10 = vpack.c.bf16 %v133_v9, %v132_v6  ;;  %v539_v14 = vld [vmem:[%s12186_s3 + $0x68] sm:$0xff]  ;;  %v541_v15 = vld [vmem:[%s12186_s3 + $0x78] sm:$0xff]  ;;  %v538_v16 = vld [vmem:[%s12186_s3 + $0x60] sm:$0xff]  ;;  %v157_v22 = vpack.c.bf16 %v135_v13, %v134_v12 }
  0x43   :  { %v587_v17 = vunpack.c.h.s8.bf16 %v539_v14  ;;  %v589_v18 = vunpack.c.h.s8.bf16 %v541_v15  ;;  %v586_v19 = vunpack.c.h.s8.bf16 %v538_v16  ;;  %v540_v20 = vld [vmem:[%s12186_s3 + $0x70] sm:$0xff]  ;;  %v583_v21 = vunpack.c.l.s8.bf16 %v539_v14  ;;  %v535_v25 = vld [vmem:[%s12186_s3 + $0x48] sm:$0xff]  ;;  %v120_v26 = vld [vmem:[%s12183_s0 + $0x20] sm:$0xff] }
  0x44   :  { %6735 = vmatmul.mubr.msk.bf16.vlgmr.msra.gmra.mxu0 %vm188_vm0, %v148_v5  ;;  %6743 = vmatmul.mubr.msk.bf16.vlgmr.msra.gmra.mxu1 %vm188_vm0, %v156_v10  ;;  %v588_v23 = vunpack.c.h.s8.bf16 %v540_v20  ;;  %v585_v24 = vunpack.c.l.s8.bf16 %v541_v15  ;;  %v121_v27 = vld [vmem:[%s12183_s0 + $0x28] sm:$0xff]  ;;  %v537_v28 = vld [vmem:[%s12186_s3 + $0x58] sm:$0xff]  ;;  %v582_v29 = vunpack.c.l.s8.bf16 %v538_v16  ;;  %v584_v30 = vunpack.c.l.s8.bf16 %v540_v20  ;;  %v534_v32 = vld [vmem:[%s12186_s3 + $0x40] sm:$0xff] }
  0x45   :  { %279 = vmatprep.mubr.bf16.mxu0 %v7364_v0  ;;  %359 = vmatprep.mubr.bf16.mxu1 %v7364_v0  ;;  %v579_v31 = vunpack.c.h.s8.bf16 %v535_v25  ;;  %v150_v33 = vpack.c.bf16 %v121_v27, %v120_v26  ;;  %v581_v34 = vunpack.c.h.s8.bf16 %v537_v28  ;;  %v536_v35 = vld [vmem:[%s12186_s3 + $0x50] sm:$0xff]  ;;  %v136_v36 = vld [vmem:[%s12183_s0 + $0xa0] sm:$0xff]  ;;  %v137_v37 = vld [vmem:[%s12183_s0 + $0xa8] sm:$0xff]  ;;  %v578_v38 = vunpack.c.h.s8.bf16 %v534_v32 }
  0x46   :  { %622 = vmatprep.subr.bf16.mxu1 %v587_v17  ;;  %815 = vmatprep.subr.bf16.mxu0 %v589_v18  ;;  %v580_v39 = vunpack.c.h.s8.bf16 %v536_v35  ;;  %v575_v40 = vunpack.c.l.s8.bf16 %v535_v25  ;;  %v158_v41 = vpack.c.bf16 %v137_v37, %v136_v36  ;;  %v577_v42 = vunpack.c.l.s8.bf16 %v537_v28  ;;  %v531_v43 = vld [vmem:[%s12186_s3 + $0x28] sm:$0xff]  ;;  %v122_v44 = vld [vmem:[%s12183_s0 + $0x30] sm:$0xff]  ;;  %v123_v45 = vld [vmem:[%s12183_s0 + $0x38] sm:$0xff] }
  0x47   :  { %623 = vmatpush1.bf16.msra.mxu1 %v586_v19  ;;  %816 = vmatpush1.bf16.msra.mxu0 %v588_v23  ;;  %v533_v46 = vld [vmem:[%s12186_s3 + $0x38] sm:$0xff]  ;;  %v574_v47 = vunpack.c.l.s8.bf16 %v534_v32  ;;  %v576_v48 = vunpack.c.l.s8.bf16 %v536_v35  ;;  %v571_v49 = vunpack.c.h.s8.bf16 %v531_v43  ;;  %v530_v50 = vld [vmem:[%s12186_s3 + $0x20] sm:$0xff]  ;;  %v151_v51 = vpack.c.bf16 %v123_v45, %v122_v44  ;;  %v532_v53 = vld [vmem:[%s12186_s3 + $0x30] sm:$0xff] }
  0x48   :  { %624 = vmatprep.subr.bf16.mxu1 %v583_v21  ;;  %817 = vmatprep.subr.bf16.mxu0 %v585_v24  ;;  %v573_v52 = vunpack.c.h.s8.bf16 %v533_v46  ;;  %v138_v54 = vld [vmem:[%s12183_s0 + $0xb0] sm:$0xff]  ;;  %v139_v55 = vld [vmem:[%s12183_s0 + $0xb8] sm:$0xff]  ;;  %v570_v56 = vunpack.c.h.s8.bf16 %v530_v50  ;;  %v572_v57 = vunpack.c.h.s8.bf16 %v532_v53  ;;  %v567_v58 = vunpack.c.l.s8.bf16 %v531_v43  ;;  %v527_v61 = vld [vmem:[%s12186_s3 + $0x8] sm:$0xff] }
  0x49   :  { %v159_v59 = vpack.c.bf16 %v139_v55, %v138_v54  ;;  %v569_v60 = vunpack.c.l.s8.bf16 %v533_v46  ;;  %v124_v62 = vld [vmem:[%s12183_s0 + $0x40] sm:$0xff]  ;;  %v125_v63 = vld [vmem:[%s12183_s0 + $0x48] sm:$0xff]  ;;  %v529_v1 = vld [vmem:[%s12186_s3 + $0x18] sm:$0xff]  ;;  %v566_v2 = vunpack.c.l.s8.bf16 %v530_v50  ;;  %v568_v3 = vunpack.c.l.s8.bf16 %v532_v53 }
  0x4a   :  { %v563_v4 = vunpack.c.h.s8.bf16 %v527_v61  ;;  %v526_v5 = vld [vmem:[%s12186_s3] sm:$0xff]  ;;  %v152_v6 = vpack.c.bf16 %v125_v63, %v124_v62  ;;  %v565_v7 = vunpack.c.h.s8.bf16 %v529_v1  ;;  %v528_v8 = vld [vmem:[%s12186_s3 + $0x10] sm:$0xff]  ;;  %v141_v10 = vld [vmem:[%s12183_s0 + $0xc8] sm:$0xff]  ;;  %v559_v13 = vunpack.c.l.s8.bf16 %v527_v61 }
  0x4b   :  { %625 = vmatpush1.bf16.msra.mxu1 %v582_v29  ;;  %818 = vmatpush1.bf16.msra.mxu0 %v584_v30  ;;  %v140_v9 = vld [vmem:[%s12183_s0 + $0xc0] sm:$0xff]  ;;  %v564_v12 = vunpack.c.h.s8.bf16 %v528_v8  ;;  %v561_v15 = vunpack.c.l.s8.bf16 %v529_v1  ;;  %v555_v16 = vld [vmem:[%s12186_s3 + $0xe8] sm:$0xff]  ;;  %v126_v17 = vld [vmem:[%s12183_s0 + $0x50] sm:$0xff]  ;;  %v558_v20 = vunpack.c.l.s8.bf16 %v526_v5  ;;  %v560_v21 = vunpack.c.l.s8.bf16 %v528_v8 }
  0x4c   :  { %6736 = vmatmul.mubr.msk.bf16.gmra.mxu0 %vm188_vm0, %v149_v11  ;;  %6744 = vmatmul.mubr.msk.bf16.gmra.mxu1 %vm188_vm0, %v157_v22  ;;  %v562_v11 = vunpack.c.h.s8.bf16 %v526_v5  ;;  %v160_v14 = vpack.c.bf16 %v141_v10, %v140_v9  ;;  %v127_v18 = vld [vmem:[%s12183_s0 + $0x58] sm:$0xff]  ;;  %v619_v22 = vunpack.c.h.s8.bf16 %v555_v16  ;;  %v554_v23 = vld [vmem:[%s12186_s3 + $0xe0] sm:$0xff]  ;;  %v556_v26 = vld [vmem:[%s12186_s3 + $0xf0] sm:$0xff] }
  0x4d   :  { %289 = vmatprep.mubr.bf16.mxu0 %v7364_v0  ;;  %369 = vmatprep.mubr.bf16.mxu1 %v7364_v0  ;;  %v557_v19 = vld [vmem:[%s12186_s3 + $0xf8] sm:$0xff]  ;;  %v153_v24 = vpack.c.bf16 %v127_v18, %v126_v17  ;;  %v142_v27 = vld [vmem:[%s12183_s0 + $0xd0] sm:$0xff]  ;;  %v618_v29 = vunpack.c.h.s8.bf16 %v554_v23  ;;  %v620_v30 = vunpack.c.h.s8.bf16 %v556_v26  ;;  %v128_v35 = vld [vmem:[%s12183_s0 + $0x60] sm:$0xff] }
  0x4e   :  { %626 = vmatprep.subr.bf16.mxu1 %v579_v31  ;;  %819 = vmatprep.subr.bf16.mxu0 %v581_v34  ;;  %v621_v25 = vunpack.c.h.s8.bf16 %v557_v19  ;;  %v143_v28 = vld [vmem:[%s12183_s0 + $0xd8] sm:$0xff]  ;;  %v615_v31 = vunpack.c.l.s8.bf16 %v555_v16  ;;  %v551_v34 = vld [vmem:[%s12186_s3 + $0xc8] sm:$0xff]  ;;  %v552_v44 = vld [vmem:[%s12186_s3 + $0xd0] sm:$0xff] }
  0x4f   :  { %627 = vmatpush1.bf16.msra.mxu1 %v578_v38  ;;  %820 = vmatpush1.bf16.msra.mxu0 %v580_v39  ;;  %v161_v32 = vpack.c.bf16 %v143_v28, %v142_v27  ;;  %v129_v36 = vld [vmem:[%s12183_s0 + $0x68] sm:$0xff]  ;;  %v553_v37 = vld [vmem:[%s12186_s3 + $0xd8] sm:$0xff]  ;;  %v614_v38 = vunpack.c.l.s8.bf16 %v554_v23  ;;  %v616_v39 = vunpack.c.l.s8.bf16 %v556_v26  ;;  %v144_v45 = vld [vmem:[%s12183_s0 + $0xe0] sm:$0xff] }
  0x50   :  { %628 = vmatprep.subr.bf16.mxu1 %v575_v40  ;;  %821 = vmatprep.subr.bf16.mxu0 %v577_v42  ;;  %v611_v40 = vunpack.c.h.s8.bf16 %v551_v34  ;;  %v154_v42 = vpack.c.bf16 %v129_v36, %v128_v35  ;;  %v613_v43 = vunpack.c.h.s8.bf16 %v553_v37  ;;  %v145_v46 = vld [vmem:[%s12183_s0 + $0xe8] sm:$0xff]  ;;  %v130_v53 = vld [vmem:[%s12183_s0 + $0x70] sm:$0xff]  ;;  %v131_v54 = vld [vmem:[%s12183_s0 + $0x78] sm:$0xff] }
  0x51   :  { %v162_v50 = vpack.c.bf16 %v145_v46, %v144_v45  ;;  %v549_v55 = vld [vmem:[%s12186_s3 + $0xb8] sm:$0xff]  ;;  %v548_v62 = vld [vmem:[%s12186_s3 + $0xb0] sm:$0xff]  ;;  %v543_v8 = vld [vmem:[%s12186_s3 + $0x88] sm:$0xff] }
  0x52   :  { %v605_v61 = vunpack.c.h.s8.bf16 %v549_v55  ;;  %v146_v63 = vld [vmem:[%s12183_s0 + $0xf0] sm:$0xff]  ;;  %v147_v1 = vld [vmem:[%s12183_s0 + $0xf8] sm:$0xff]  ;;  %v601_v5 = vunpack.c.l.s8.bf16 %v549_v55  ;;  %v595_v10 = vunpack.c.h.s8.bf16 %v543_v8  ;;  %v591_v16 = vunpack.c.l.s8.bf16 %v543_v8  ;;  %v166_v28 = vld [vmem:[#allocation2] sm:$0x3] }
  0x53   :  { %629 = vmatpush1.bf16.msra.mxu1 %v574_v47  ;;  %822 = vmatpush1.bf16.msra.mxu0 %v576_v48  ;;  %v612_v48 = vunpack.c.h.s8.bf16 %v552_v44  ;;  %v545_v9 = vld [vmem:[%s12186_s3 + $0x98] sm:$0xff]  ;;  %v1544_v45 = vld [vmem:[#allocation7 + $0x160] sm:$0xff] }
  0x54   :  { %6737 = vmatmul.mubr.msk.bf16.gmra.mxu0 %vm188_vm0, %v150_v33  ;;  %6745 = vmatmul.mubr.msk.bf16.gmra.mxu1 %vm188_vm0, %v158_v41  ;;  %v617_v33 = vunpack.c.l.s8.bf16 %v557_v19  ;;  %v550_v41 = vld [vmem:[%s12186_s3 + $0xc0] sm:$0xff]  ;;  %v593_v17 = vunpack.c.l.s8.bf16 %v545_v9 }
  0x55   :  { %299 = vmatprep.mubr.bf16.mxu0 %v7364_v0  ;;  %379 = vmatprep.mubr.bf16.mxu1 %v7364_v0  ;;  %v610_v47 = vunpack.c.h.s8.bf16 %v550_v41 }
  0x56   :  { %630 = vmatprep.subr.bf16.mxu1 %v571_v49  ;;  %823 = vmatprep.subr.bf16.mxu0 %v573_v52  ;;  %v607_v49 = vunpack.c.l.s8.bf16 %v551_v34  ;;  %v547_v52 = vld [vmem:[%s12186_s3 + $0xa8] sm:$0xff] }
  0x57   :  { %631 = vmatpush1.bf16.msra.mxu1 %v570_v56  ;;  %824 = vmatpush1.bf16.msra.mxu0 %v572_v57  ;;  %v606_v56 = vunpack.c.l.s8.bf16 %v550_v41  ;;  %v608_v57 = vunpack.c.l.s8.bf16 %v552_v44  ;;  %v1512_v44 = vld [vmem:[#allocation7 + $0x60] sm:$0xff] }
  0x58   :  { %632 = vmatprep.subr.bf16.mxu1 %v567_v58  ;;  %825 = vmatprep.subr.bf16.mxu0 %v569_v60  ;;  %v603_v58 = vunpack.c.h.s8.bf16 %v547_v52  ;;  %v155_v60 = vpack.c.bf16 %v131_v54, %v130_v53  ;;  %v1656_v53 = vunpack.c.h.s8.bf16 %v1544_v45 }
  0x5b   :  { %633 = vmatpush1.bf16.msra.mxu1 %v566_v2  ;;  %826 = vmatpush1.bf16.msra.mxu0 %v568_v3  ;;  %v604_v3 = vunpack.c.h.s8.bf16 %v548_v62 }
  0x5c   :  { %6738 = vmatmul.mubr.msk.bf16.gmra.mxu0 %vm188_vm0, %v151_v51  ;;  %6746 = vmatmul.mubr.msk.bf16.gmra.mxu1 %vm188_vm0, %v159_v59  ;;  %v609_v51 = vunpack.c.l.s8.bf16 %v553_v37  ;;  %v546_v59 = vld [vmem:[%s12186_s3 + $0xa0] sm:$0xff] }
  0x5d   :  { %309 = vmatprep.mubr.bf16.mxu0 %v7364_v0  ;;  %389 = vmatprep.mubr.bf16.mxu1 %v7364_v0  ;;  %v602_v2 = vunpack.c.h.s8.bf16 %v546_v59 }
  0x5e   :  { %634 = vmatprep.subr.bf16.mxu1 %v563_v4  ;;  %827 = vmatprep.subr.bf16.mxu0 %v565_v7  ;;  %v163_v4 = vpack.c.bf16 %v147_v1, %v146_v63  ;;  %v600_v7 = vunpack.c.l.s8.bf16 %v548_v62  ;;  %v1541_v62 = vld [vmem:[#allocation7 + $0x148] sm:$0xff] }
  0x5f   :  { %635 = vmatpush1.bf16.msra.mxu1 %v562_v11  ;;  %828 = vmatpush1.bf16.msra.mxu0 %v564_v12  ;;  %v597_v11 = vunpack.c.h.s8.bf16 %v545_v9  ;;  %v542_v12 = vld [vmem:[%s12186_s3 + $0x80] sm:$0xff]  ;;  %v1649_v9 = vunpack.c.h.s8.bf16 %v1541_v62 }
  0x60   :  { %636 = vmatprep.subr.bf16.mxu1 %v559_v13  ;;  %829 = vmatprep.subr.bf16.mxu0 %v561_v15  ;;  %v544_v13 = vld [vmem:[%s12186_s3 + $0x90] sm:$0xff]  ;;  %v590_v18 = vunpack.c.l.s8.bf16 %v542_v12 }
  0x61   :  { %v596_v15 = vunpack.c.h.s8.bf16 %v544_v13  ;;  %v592_v19 = vunpack.c.l.s8.bf16 %v544_v13 }
  0x63   :  { %637 = vmatpush1.bf16.msra.mxu1 %v558_v20  ;;  %830 = vmatpush1.bf16.msra.mxu0 %v560_v21  ;;  %v1513_v20 = vld [vmem:[#allocation7 + $0x68] sm:$0xff] }
  0x64   :  { %6739 = vmatmul.mubr.msk.bf16.gmra.mxu0 %vm188_vm0, %v152_v6  ;;  %6747 = vmatmul.mubr.msk.bf16.gmra.mxu1 %vm188_vm0, %v160_v14  ;;  %v598_v6 = vunpack.c.l.s8.bf16 %v546_v59  ;;  %v594_v14 = vunpack.c.h.s8.bf16 %v542_v12  ;;  %v1545_v21 = vld [vmem:[#allocation7 + $0x168] sm:$0xff] }
  0x65   :  { %319 = vmatprep.mubr.bf16.mxu0 %v7364_v0  ;;  %399 = vmatprep.mubr.bf16.mxu1 %v7364_v0  ;;  %v1657_v23 = vunpack.c.h.s8.bf16 %v1545_v21 }
  0x66   :  { %638 = vmatprep.subr.bf16.mxu1 %v619_v22  ;;  %831 = vmatprep.subr.bf16.mxu0 %v621_v25  ;;  %v1593_v22 = vunpack.c.h.s8.bf16 %v1513_v20 }
  0x67   :  { %639 = vmatpush2.bf16.msra.mxu1 %v618_v29  ;;  %832 = vmatpush2.bf16.msra.mxu0 %v620_v30 }
  0x68   :  { %640 = vmatprep.subr.bf16.mxu1 %v615_v31  ;;  %833 = vmatprep.subr.bf16.mxu0 %v617_v33 }
  0x6b   :  { %641 = vmatpush2.bf16.msra.mxu1 %v614_v38  ;;  %834 = vmatpush2.bf16.msra.mxu0 %v616_v39 }
  0x6c   :  { %6740 = vmatmul.mubr.msk.bf16.gmra.mxu0 %vm188_vm0, %v153_v24  ;;  %6748 = vmatmul.mubr.msk.bf16.gmra.mxu1 %vm188_vm0, %v161_v32  ;;  %v168_v24 = vlaneseq }
  0x6d   :  { %329 = vmatprep.mubr.bf16.mxu0 %v7364_v0  ;;  %409 = vmatprep.mubr.bf16.mxu1 %v7364_v0 }
  0x6e   :  { %642 = vmatprep.subr.bf16.mxu1 %v611_v40  ;;  %835 = vmatprep.subr.bf16.mxu0 %v613_v43  ;;  %v7694_v25 = vshrl.u32 %v168_v24, 7  ;;  %v1645_v24 = vunpack.c.l.s8.bf16 %v1541_v62 }
  0x6f   :  { %643 = vmatpush2.bf16.msra.mxu1 %v610_v47  ;;  %836 = vmatpush2.bf16.msra.mxu0 %v612_v48 }
  0x70   :  { %644 = vmatprep.subr.bf16.mxu1 %v607_v49  ;;  %837 = vmatprep.subr.bf16.mxu0 %v609_v51  ;;  %12382 = vst [vmem:[#allocation16_spill] sm:$0xff] %v7694_v25  ;;  %v7697_v26 = vsub.s32 1, %v7694_v25  ;;  %v7700_v27 = vsub.s32 0, %v7694_v25 }
  0x72   :  { %12383 = vst [vmem:[#allocation17_spill] sm:$0xff] %v7697_v26  ;;  %12384 = vst [vmem:[#allocation18_spill] sm:$0xff] %v7700_v27  ;;  %v7703_v30 = vrot.slane %v166_v28, %v7697_v26  ;;  %v7706_v31 = vrot.slane %v166_v28, %v7700_v27 }
  0x73   :  { %645 = vmatpush2.bf16.msra.mxu1 %v606_v56  ;;  %838 = vmatpush2.bf16.msra.mxu0 %v608_v57  ;;  %v1589_v57 = vunpack.c.l.s8.bf16 %v1513_v20 }
  0x74   :  { %6741 = vmatmul.mubr.msk.bf16.gmra.mxu0 %vm188_vm0, %v154_v42  ;;  %6749 = vmatmul.mubr.msk.bf16.gmra.mxu1 %vm188_vm0, %v162_v50 }
  0x75   :  { %339 = vmatprep.mubr.bf16.mxu0 %v7364_v0  ;;  %419 = vmatprep.mubr.bf16.mxu1 %v7364_v0  ;;  %v599_v0 = vunpack.c.l.s8.bf16 %v547_v52  ;;  %v1592_v52 = vunpack.c.h.s8.bf16 %v1512_v44 }
  0x76   :  { %646 = vmatprep.subr.bf16.mxu1 %v603_v58  ;;  %839 = vmatprep.subr.bf16.mxu0 %v605_v61  ;;  %v1653_v58 = vunpack.c.l.s8.bf16 %v1545_v21  ;;  %v1509_v61 = vld [vmem:[#allocation7 + $0x48] sm:$0xff] }
  0x77   :  { %647 = vmatpush2.bf16.msra.mxu1 %v602_v2  ;;  %840 = vmatpush2.bf16.msra.mxu0 %v604_v3  ;;  %v1585_v8 = vunpack.c.h.s8.bf16 %v1509_v61 }
  0x78   :  { %648 = vmatprep.subr.bf16.mxu1 %v599_v0  ;;  %841 = vmatprep.subr.bf16.mxu0 %v601_v5  ;;  %v1652_v0 = vunpack.c.l.s8.bf16 %v1544_v45 }
  0x7b   :  { %649 = vmatpush2.bf16.msra.mxu1 %v598_v6  ;;  %842 = vmatpush2.bf16.msra.mxu0 %v600_v7 }
  0x7c   :  { %6742 = vmatmul.mubr.msk.bf16.gmra.mxu0 %vm188_vm0, %v155_v60  ;;  %6750 = vmatmul.mubr.msk.bf16.gmra.mxu1 %vm188_vm0, %v163_v4  ;;  %v1588_v4 = vunpack.c.l.s8.bf16 %v1512_v44 }
  0x7d   :  { %650 = vmatprep.subr.bf16.mxu1 %v595_v10  ;;  %843 = vmatprep.subr.bf16.mxu0 %v597_v11  ;;  %v1508_v10 = vld [vmem:[#allocation7 + $0x40] sm:$0xff] }
  0x7e   :  { %v1540_v11 = vld [vmem:[#allocation7 + $0x140] sm:$0xff] }
  0x7f   :  { %651 = vmatpush2.bf16.msra.mxu1 %v594_v14  ;;  %844 = vmatpush2.bf16.msra.mxu0 %v596_v15 }
  0x80   :  { %652 = vmatprep.subr.bf16.mxu1 %v591_v16  ;;  %845 = vmatprep.subr.bf16.mxu0 %v593_v17 }
  0x83   :  { %653 = vmatpush2.bf16.msra.mxu1 %v590_v18  ;;  %846 = vmatpush2.bf16.msra.mxu0 %v592_v19  ;;  %v1584_v18 = vunpack.c.h.s8.bf16 %v1508_v10  ;;  %v1648_v19 = vunpack.c.h.s8.bf16 %v1540_v11 }
  0x84   :  { %1692 = vmatprep.subr.bf16.mxu1 %v1593_v22  ;;  %1885 = vmatprep.subr.bf16.mxu0 %v1657_v23  ;;  %v1581_v23 = vunpack.c.l.s8.bf16 %v1509_v61 }
 0x104   :  { %v271_v29 = vpop.f32.mrf.mxu0  ;;  %v7708_v34 = vpop.f32.mrf.mxu1 }
 0x105   :  { %v272_v37 = vadd.f32 %v271_v29, %v7706_v31 }
 0x106   :  { %v273_v32 = vpop.f32.mrf.mxu0  ;;  %v7713_v39 = vpop.f32.mrf.mxu1 }
 0x107   :  { %v274_v35 = vadd.f32 %v273_v32, %v7703_v30  ;;  %v430_v48 = vmax.f32 %v272_v37, 0.0  ;;  %v1505_v32 = vld [vmem:[#allocation7 + $0x28] sm:$0xff] }
 0x108   :  { %v275_v33 = vpop.f32.mrf.mxu0  ;;  %v7716_v43 = vpop.f32.mrf.mxu1  ;;  %v1577_v45 = vunpack.c.h.s8.bf16 %v1505_v32  ;;  %v1573_v61 = vunpack.c.l.s8.bf16 %v1505_v32 }
 0x109   :  { %v276_v36 = vadd.f32 %v275_v33, %v7706_v31  ;;  %v431_v46 = vmax.f32 %v274_v35, 0.0  ;;  %v1537_v33 = vld [vmem:[#allocation7 + $0x128] sm:$0xff] }
 0x10a   :  { %v277_v38 = vpop.f32.mrf.mxu0  ;;  %v7718_v50 = vpop.f32.mrf.mxu1  ;;  %v1637_v62 = vunpack.c.l.s8.bf16 %v1537_v33 }
 0x10b   :  { %v278_v40 = vadd.f32 %v277_v38, %v7703_v30  ;;  %v432_v41 = vmax.f32 %v276_v36, 0.0  ;;  %v1580_v38 = vunpack.c.l.s8.bf16 %v1508_v10 }
 0x10c   :  { %v281_v42 = vpop.f32.mrf.mxu0  ;;  %v7720_v56 = vpop.f32.mrf.mxu1 }
 0x10d   :  { %v433_v47 = vmax.f32 %v278_v40, 0.0  ;;  %v494_v54 = vpack.c.bf16 %v432_v41, %v430_v48  ;;  %v282_v63 = vadd.f32 %v281_v42, %v7706_v31  ;;  %v1644_v40 = vunpack.c.l.s8.bf16 %v1540_v11  ;;  %v1536_v48 = vld [vmem:[#allocation7 + $0x120] sm:$0xff] }
 0x10e   :  { %v283_v49 = vpop.f32.mrf.mxu0  ;;  %v7725_v2 = vpop.f32.mrf.mxu1 }
 0x10f   :  { %v495_v51 = vpack.c.bf16 %v433_v47, %v431_v46  ;;  %v284_v59 = vadd.f32 %v283_v49, %v7703_v30  ;;  %v434_v14 = vmax.f32 %v282_v63, 0.0  ;;  %v1641_v46 = vunpack.c.h.s8.bf16 %v1537_v33  ;;  %v1504_v47 = vld [vmem:[#allocation7 + $0x20] sm:$0xff] }
 0x110   :  { %v285_v55 = vpop.f32.mrf.mxu0  ;;  %v7728_v7 = vpop.f32.mrf.mxu1 }
 0x111   :  { %v286_v60 = vadd.f32 %v285_v55, %v7706_v31  ;;  %654 = vmatprep.mubr.bf16.mxu1 %v495_v51  ;;  %847 = vmatprep.mubr.bf16.mxu0 %v495_v51  ;;  %v435_v12 = vmax.f32 %v284_v59, 0.0  ;;  %v1576_v55 = vunpack.c.h.s8.bf16 %v1504_v47 }
 0x112   :  { %v287_v1 = vpop.f32.mrf.mxu0  ;;  %655 = vmatmul.mubr.bf16.vlgmr.msra.gmra.mxu1 %v494_v54  ;;  %848 = vmatmul.mubr.bf16.vlgmr.msra.gmra.mxu0 %v494_v54  ;;  %v7730_v16 = vpop.f32.mrf.mxu1 }
 0x113   :  { %v288_v3 = vadd.f32 %v287_v1, %v7703_v30  ;;  %1693 = vmatpush1.bf16.msra.mxu1 %v1592_v52  ;;  %1886 = vmatpush1.bf16.msra.mxu0 %v1656_v53  ;;  %v436_v5 = vmax.f32 %v286_v60, 0.0 }
 0x114   :  { %v291_v6 = vpop.f32.mrf.mxu0  ;;  %1694 = vmatprep.subr.bf16.mxu1 %v1589_v57  ;;  %1887 = vmatprep.subr.bf16.mxu0 %v1653_v58  ;;  %v7732_v22 = vpop.f32.mrf.mxu1  ;;  %v1640_v57 = vunpack.c.h.s8.bf16 %v1536_v48 }
 0x115   :  { %v437_v13 = vmax.f32 %v288_v3, 0.0  ;;  %v496_v20 = vpack.c.bf16 %v436_v5, %v434_v14  ;;  %v292_v35 = vadd.f32 %v291_v6, %v7706_v31  ;;  %v1501_v3 = vld [vmem:[#allocation7 + $0x8] sm:$0xff] }
 0x116   :  { %v293_v15 = vpop.f32.mrf.mxu0  ;;  %v7738_v44 = vpop.f32.mrf.mxu1 }
 0x117   :  { %v497_v17 = vpack.c.bf16 %v437_v13, %v435_v12  ;;  %1695 = vmatpush1.bf16.msra.mxu1 %v1588_v4  ;;  %1888 = vmatpush1.bf16.msra.mxu0 %v1652_v0  ;;  %v294_v28 = vadd.f32 %v293_v15, %v7703_v30  ;;  %v438_v52 = vmax.f32 %v292_v35, 0.0  ;;  %v1533_v4 = vld [vmem:[#allocation7 + $0x108] sm:$0xff]  ;;  %v1569_v13 = vunpack.c.h.s8.bf16 %v1501_v3  ;;  %v1500_v15 = vld [vmem:[#allocation7] sm:$0xff] }
 0x118   :  { %v295_v21 = vpop.f32.mrf.mxu0  ;;  %1696 = vmatprep.subr.bf16.mxu1 %v1585_v8  ;;  %1889 = vmatprep.subr.bf16.mxu0 %v1649_v9  ;;  %v7740_v60 = vpop.f32.mrf.mxu1  ;;  %v1572_v8 = vunpack.c.l.s8.bf16 %v1504_v47  ;;  %v1636_v9 = vunpack.c.l.s8.bf16 %v1536_v48  ;;  %v1633_v14 = vunpack.c.h.s8.bf16 %v1533_v4  ;;  %v1565_v35 = vunpack.c.l.s8.bf16 %v1501_v3 }
 0x119   :  { %v296_v29 = vadd.f32 %v295_v21, %v7706_v31  ;;  %664 = vmatprep.mubr.bf16.mxu1 %v497_v17  ;;  %857 = vmatprep.mubr.bf16.mxu0 %v497_v17  ;;  %v439_v49 = vmax.f32 %v294_v28, 0.0  ;;  %v1532_v17 = vld [vmem:[#allocation7 + $0x100] sm:$0xff]  ;;  %v1564_v47 = vunpack.c.l.s8.bf16 %v1500_v15 }
 0x11a   :  { %v297_v36 = vpop.f32.mrf.mxu0  ;;  %665 = vmatmul.mubr.bf16.gmra.mxu1 %v496_v20  ;;  %858 = vmatmul.mubr.bf16.gmra.mxu0 %v496_v20  ;;  %v7746_v12 = vpop.f32.mrf.mxu1  ;;  %v1632_v28 = vunpack.c.h.s8.bf16 %v1532_v17  ;;  %v1628_v48 = vunpack.c.l.s8.bf16 %v1532_v17 }
 0x11b   :  { %v298_v37 = vadd.f32 %v297_v36, %v7703_v30  ;;  %1697 = vmatpush1.bf16.msra.mxu1 %v1584_v18  ;;  %1890 = vmatpush1.bf16.msra.mxu0 %v1648_v19  ;;  %v440_v41 = vmax.f32 %v296_v29, 0.0  ;;  %v1629_v36 = vunpack.c.l.s8.bf16 %v1533_v4 }
 0x11c   :  { %v301_v42 = vpop.f32.mrf.mxu0  ;;  %1698 = vmatprep.subr.bf16.mxu1 %v1581_v23  ;;  %1891 = vmatprep.subr.bf16.mxu0 %v1645_v24  ;;  %v1568_v24 = vunpack.c.h.s8.bf16 %v1500_v15  ;;  %v7748_v33 = vpop.f32.mrf.mxu1 }
 0x11d   :  { %v441_v51 = vmax.f32 %v298_v37, 0.0  ;;  %v498_v58 = vpack.c.bf16 %v440_v41, %v438_v52  ;;  %v302_v0 = vadd.f32 %v301_v42, %v7706_v31  ;;  %v1561_v41 = vld [vmem:[#allocation7 + $0x1e8] sm:$0xff] }
 0x11e   :  { %v303_v53 = vpop.f32.mrf.mxu0  ;;  %v7754_v52 = vpop.f32.mrf.mxu1 }
 0x11f   :  { %v499_v54 = vpack.c.bf16 %v441_v51, %v439_v49  ;;  %1699 = vmatpush1.bf16.msra.mxu1 %v1580_v38  ;;  %1892 = vmatpush1.bf16.msra.mxu0 %v1644_v40  ;;  %v304_v63 = vadd.f32 %v303_v53, %v7703_v30  ;;  %v442_v20 = vmax.f32 %v302_v0, 0.0  ;;  %v1529_v40 = vld [vmem:[#allocation7 + $0xe8] sm:$0xff] }
 0x120   :  { %v305_v59 = vpop.f32.mrf.mxu0  ;;  %1700 = vmatprep.subr.bf16.mxu1 %v1577_v45  ;;  %1893 = vmatprep.subr.bf16.mxu0 %v1641_v46  ;;  %v1625_v53 = vunpack.c.h.s8.bf16 %v1529_v40 }
 0x121   :  { %v306_v1 = vadd.f32 %v305_v59, %v7706_v31  ;;  %674 = vmatprep.mubr.bf16.mxu1 %v499_v54  ;;  %867 = vmatprep.mubr.bf16.mxu0 %v499_v54  ;;  %v443_v18 = vmax.f32 %v304_v63, 0.0  ;;  %v1689_v54 = vunpack.c.h.s8.bf16 %v1561_v41 }
 0x122   :  { %v307_v5 = vpop.f32.mrf.mxu0  ;;  %675 = vmatmul.mubr.bf16.gmra.mxu1 %v498_v58  ;;  %868 = vmatmul.mubr.bf16.gmra.mxu0 %v498_v58 }
 0x123   :  { %v308_v6 = vadd.f32 %v307_v5, %v7703_v30  ;;  %1701 = vmatpush1.bf16.msra.mxu1 %v1576_v55  ;;  %1894 = vmatpush1.bf16.msra.mxu0 %v1640_v57  ;;  %v444_v10 = vmax.f32 %v306_v1, 0.0  ;;  %v1528_v55 = vld [vmem:[#allocation7 + $0xe0] sm:$0xff]  ;;  %v7756_v5 = vpop.f32.mrf.mxu1 }
 0x124   :  { %v311_v11 = vpop.f32.mrf.mxu0  ;;  %1702 = vmatprep.subr.bf16.mxu1 %v1573_v61  ;;  %1895 = vmatprep.subr.bf16.mxu0 %v1637_v62  ;;  %v1560_v57 = vld [vmem:[#allocation7 + $0x1e0] sm:$0xff]  ;;  %v1624_v1 = vunpack.c.h.s8.bf16 %v1528_v55 }
 0x125   :  { %v445_v19 = vmax.f32 %v308_v6, 0.0  ;;  %v500_v29 = vpack.c.bf16 %v444_v10, %v442_v20  ;;  %v312_v42 = vadd.f32 %v311_v11, %v7706_v31  ;;  %v1688_v3 = vunpack.c.h.s8.bf16 %v1560_v57  ;;  %v1525_v11 = vld [vmem:[#allocation7 + $0xc8] sm:$0xff] }
 0x126   :  { %v313_v21 = vpop.f32.mrf.mxu0  ;;  %v1621_v6 = vunpack.c.l.s8.bf16 %v1529_v40 }
 0x127   :  { %v501_v23 = vpack.c.bf16 %v445_v19, %v443_v18  ;;  %1703 = vmatpush1.bf16.msra.mxu1 %v1572_v8  ;;  %1896 = vmatpush1.bf16.msra.mxu0 %v1636_v9  ;;  %v314_v37 = vadd.f32 %v313_v21, %v7703_v30  ;;  %v446_v61 = vmax.f32 %v312_v42, 0.0  ;;  %v1685_v8 = vunpack.c.l.s8.bf16 %v1561_v41 }
 0x128   :  { %v315_v32 = vpop.f32.mrf.mxu0  ;;  %1704 = vmatprep.subr.bf16.mxu1 %v1569_v13  ;;  %1897 = vmatprep.subr.bf16.mxu0 %v1633_v14  ;;  %v1557_v13 = vld [vmem:[#allocation7 + $0x1c8] sm:$0xff]  ;;  %v1620_v18 = vunpack.c.l.s8.bf16 %v1528_v55  ;;  %v1684_v19 = vunpack.c.l.s8.bf16 %v1560_v57 }
 0x129   :  { %v316_v38 = vadd.f32 %v315_v32, %v7706_v31  ;;  %684 = vmatprep.mubr.bf16.mxu1 %v501_v23  ;;  %877 = vmatprep.mubr.bf16.mxu0 %v501_v23  ;;  %v447_v58 = vmax.f32 %v314_v37, 0.0  ;;  %v7762_v23 = vpop.f32.mrf.mxu1  ;;  %v1556_v32 = vld [vmem:[#allocation7 + $0x1c0] sm:$0xff]  ;;  %v1553_v55 = vld [vmem:[#allocation7 + $0x1a8] sm:$0xff] }
 0x12a   :  { %v317_v45 = vpop.f32.mrf.mxu0  ;;  %685 = vmatmul.mubr.bf16.gmra.mxu1 %v500_v29  ;;  %878 = vmatmul.mubr.bf16.gmra.mxu0 %v500_v29  ;;  %v1524_v29 = vld [vmem:[#allocation7 + $0xc0] sm:$0xff]  ;;  %v1680_v42 = vunpack.c.h.s8.bf16 %v1556_v32 }
 0x12b   :  { %v318_v46 = vadd.f32 %v317_v45, %v7703_v30  ;;  %1705 = vmatpush1.bf16.msra.mxu1 %v1568_v24  ;;  %1898 = vmatpush1.bf16.msra.mxu0 %v1632_v28  ;;  %v448_v49 = vmax.f32 %v316_v38, 0.0  ;;  %v1617_v24 = vunpack.c.h.s8.bf16 %v1525_v11  ;;  %v1681_v28 = vunpack.c.h.s8.bf16 %v1557_v13 }
 0x12c   :  { %v321_v51 = vpop.f32.mrf.mxu0  ;;  %1706 = vmatprep.subr.bf16.mxu1 %v1565_v35  ;;  %1899 = vmatprep.subr.bf16.mxu0 %v1629_v36  ;;  %v1616_v41 = vunpack.c.h.s8.bf16 %v1524_v29 }
 0x12d   :  { %v449_v59 = vmax.f32 %v318_v46, 0.0  ;;  %v502_v4 = vpack.c.bf16 %v448_v49, %v446_v61  ;;  %v322_v14 = vadd.f32 %v321_v51, %v7706_v31  ;;  %v1677_v49 = vunpack.c.l.s8.bf16 %v1557_v13 }
 0x12e   :  { %v323_v62 = vpop.f32.mrf.mxu0  ;;  %v1612_v61 = vunpack.c.l.s8.bf16 %v1524_v29  ;;  %v1669_v29 = vunpack.c.l.s8.bf16 %v1553_v55 }
 0x12f   :  { %v503_v63 = vpack.c.bf16 %v449_v59, %v447_v58  ;;  %1707 = vmatpush1.bf16.msra.mxu1 %v1564_v47  ;;  %1900 = vmatpush1.bf16.msra.mxu0 %v1628_v48  ;;  %v324_v9 = vadd.f32 %v323_v62, %v7703_v30  ;;  %v450_v37 = vmax.f32 %v322_v14, 0.0  ;;  %v7764_v47 = vpop.f32.mrf.mxu1  ;;  %v1613_v48 = vunpack.c.l.s8.bf16 %v1525_v11 }
 0x130   :  { %v325_v0 = vpop.f32.mrf.mxu0  ;;  %1708 = vmatprep.subr.bf16.mxu1 %v1625_v53  ;;  %1901 = vmatprep.subr.bf16.mxu0 %v1689_v54  ;;  %v1521_v54 = vld [vmem:[#allocation7 + $0xa8] sm:$0xff]  ;;  %v1676_v62 = vunpack.c.l.s8.bf16 %v1556_v32  ;;  %v354_v14 = vadd.f32 %v7713_v39, %v7703_v30 }
 0x131   :  { %v326_v10 = vadd.f32 %v325_v0, %v7706_v31  ;;  %694 = vmatprep.mubr.bf16.mxu1 %v503_v63  ;;  %887 = vmatprep.mubr.bf16.mxu0 %v503_v63  ;;  %v451_v35 = vmax.f32 %v324_v9, 0.0  ;;  %v1673_v0 = vunpack.c.h.s8.bf16 %v1553_v55 }
 0x132   :  { %v327_v15 = vpop.f32.mrf.mxu0  ;;  %695 = vmatmul.mubr.bf16.gmra.mxu1 %v502_v4  ;;  %888 = vmatmul.mubr.bf16.gmra.mxu0 %v502_v4  ;;  %v1609_v4 = vunpack.c.h.s8.bf16 %v1521_v54 }
 0x133   :  { %v328_v17 = vadd.f32 %v327_v15, %v7703_v30  ;;  %1709 = vmatpush2.bf16.msra.mxu1 %v1624_v1  ;;  %1902 = vmatpush2.bf16.msra.mxu0 %v1688_v3  ;;  %v452_v20 = vmax.f32 %v326_v10, 0.0  ;;  %v7770_v3 = vpop.f32.mrf.mxu1 }
 0x134   :  { %v331_v21 = vpop.f32.mrf.mxu0  ;;  %1710 = vmatprep.subr.bf16.mxu1 %v1621_v6  ;;  %1903 = vmatprep.subr.bf16.mxu0 %v1685_v8  ;;  %v1520_v6 = vld [vmem:[#allocation7 + $0xa0] sm:$0xff] }
 0x135   :  { %v453_v36 = vmax.f32 %v328_v17, 0.0  ;;  %v504_v45 = vpack.c.bf16 %v452_v20, %v450_v37  ;;  %v332_v57 = vadd.f32 %v331_v21, %v7706_v31  ;;  %v1552_v8 = vld [vmem:[#allocation7 + $0x1a0] sm:$0xff]  ;;  %v358_v17 = vadd.f32 %v7718_v50, %v7703_v30  ;;  %v7782_v50 = vld [vmem:[#allocation7 + $0x188] sm:$0xff] }
 0x136   :  { %v333_v38 = vpop.f32.mrf.mxu0  ;;  %v463_v37 = vmax.f32 %v354_v14, 0.0 }
 0x137   :  { %v505_v40 = vpack.c.bf16 %v453_v36, %v451_v35  ;;  %1711 = vmatpush2.bf16.msra.mxu1 %v1620_v18  ;;  %1904 = vmatpush2.bf16.msra.mxu0 %v1684_v19  ;;  %v334_v51 = vadd.f32 %v333_v38, %v7703_v30  ;;  %v454_v11 = vmax.f32 %v332_v57, 0.0  ;;  %v1608_v18 = vunpack.c.h.s8.bf16 %v1520_v6  ;;  %v7780_v35 = vld [vmem:[#allocation7 + $0x88] sm:$0xff] }
 0x138   :  { %v335_v46 = vpop.f32.mrf.mxu0  ;;  %1712 = vmatprep.subr.bf16.mxu1 %v1617_v24  ;;  %1905 = vmatprep.subr.bf16.mxu0 %v1681_v28  ;;  %v1672_v19 = vunpack.c.h.s8.bf16 %v1552_v8  ;;  %v7776_v24 = vpop.f32.mrf.mxu1  ;;  %v1605_v28 = vunpack.c.l.s8.bf16 %v1521_v54  ;;  %v364_v57 = vadd.f32 %v7725_v2, %v7703_v30 }
 0x139   :  { %v336_v53 = vadd.f32 %v335_v46, %v7706_v31  ;;  %704 = vmatprep.mubr.bf16.mxu1 %v505_v40  ;;  %897 = vmatprep.mubr.bf16.mxu0 %v505_v40  ;;  %v455_v9 = vmax.f32 %v334_v51, 0.0  ;;  %v1665_v51 = vunpack.c.h.s8.bf16 %v7782_v50 }
 0x13a   :  { %v337_v58 = vpop.f32.mrf.mxu0  ;;  %705 = vmatmul.mubr.bf16.gmra.mxu1 %v504_v45  ;;  %898 = vmatmul.mubr.bf16.gmra.mxu0 %v504_v45  ;;  %v1668_v45 = vunpack.c.l.s8.bf16 %v1552_v8  ;;  %v467_v2 = vmax.f32 %v364_v57, 0.0 }
 0x13b   :  { %v338_v59 = vadd.f32 %v337_v58, %v7703_v30  ;;  %1713 = vmatpush2.bf16.msra.mxu1 %v1616_v41  ;;  %1906 = vmatpush2.bf16.msra.mxu0 %v1680_v42  ;;  %v456_v63 = vmax.f32 %v336_v53, 0.0  ;;  %v465_v41 = vmax.f32 %v358_v17, 0.0  ;;  %v1604_v42 = vunpack.c.l.s8.bf16 %v1520_v6 }
 0x13c   :  { %v341_v1 = vpop.f32.mrf.mxu0  ;;  %1714 = vmatprep.subr.bf16.mxu1 %v1613_v48  ;;  %1907 = vmatprep.subr.bf16.mxu0 %v1677_v49  ;;  %v7786_v48 = vpop.f32.mrf.mxu1  ;;  %v1601_v49 = vunpack.c.h.s8.bf16 %v7780_v35 }
 0x13d   :  { %v457_v10 = vmax.f32 %v338_v59, 0.0  ;;  %v506_v20 = vpack.c.bf16 %v456_v63, %v454_v11  ;;  %v342_v36 = vadd.f32 %v341_v1, %v7706_v31  ;;  %v511_v59 = vpack.c.bf16 %v465_v41, %v463_v37 }
 0x13e   :  { %v343_v13 = vpop.f32.mrf.mxu0  ;;  %v356_v1 = vadd.f32 %v7716_v43, %v7706_v31  ;;  %v362_v11 = vadd.f32 %v7720_v56, %v7706_v31  ;;  %v384_v56 = vadd.f32 %v7754_v52, %v7703_v30 }
 0x13f   :  { %v507_v15 = vpack.c.bf16 %v457_v10, %v455_v9  ;;  %1715 = vmatpush2.bf16.msra.mxu1 %v1612_v61  ;;  %1908 = vmatpush2.bf16.msra.mxu0 %v1676_v62  ;;  %v344_v32 = vadd.f32 %v343_v13, %v7703_v30  ;;  %v458_v55 = vmax.f32 %v342_v36, 0.0  ;;  %v368_v61 = vadd.f32 %v7730_v16, %v7703_v30 }
 0x140   :  { %v345_v21 = vpop.f32.mrf.mxu0  ;;  %1716 = vmatprep.subr.bf16.mxu1 %v1609_v4  ;;  %1909 = vmatprep.subr.bf16.mxu0 %v1673_v0  ;;  %v352_v62 = vadd.f32 %v7708_v34, %v7706_v31  ;;  %v7798_v4 = vpop.f32.mrf.mxu1  ;;  %v464_v6 = vmax.f32 %v356_v1, 0.0  ;;  %v374_v34 = vadd.f32 %v7738_v44, %v7703_v30  ;;  %v378_v9 = vadd.f32 %v7746_v12, %v7703_v30 }
 0x141   :  { %v346_v39 = vadd.f32 %v345_v21, %v7706_v31  ;;  %714 = vmatprep.mubr.bf16.mxu1 %v507_v15  ;;  %907 = vmatprep.mubr.bf16.mxu0 %v507_v15  ;;  %v459_v53 = vmax.f32 %v344_v32, 0.0  ;;  %v469_v16 = vmax.f32 %v368_v61, 0.0  ;;  %v366_v13 = vadd.f32 %v7728_v7, %v7706_v31  ;;  %v1516_v21 = vld [vmem:[#allocation7 + $0x80] sm:$0xff]  ;;  %v7834_v61 = vld [vmem:[#allocation7 + $0x178] sm:$0xff] }
 0x142   :  { %v347_v38 = vpop.f32.mrf.mxu0  ;;  %715 = vmatmul.mubr.bf16.gmra.mxu1 %v506_v20  ;;  %908 = vmatmul.mubr.bf16.gmra.mxu0 %v506_v20  ;;  %v462_v0 = vmax.f32 %v352_v62, 0.0  ;;  %v7800_v8 = vpop.f32.mrf.mxu1  ;;  %v471_v15 = vmax.f32 %v374_v34, 0.0  ;;  %v473_v17 = vmax.f32 %v378_v9, 0.0  ;;  %v466_v44 = vmax.f32 %v362_v11, 0.0 }
 0x143   :  { %v348_v40 = vadd.f32 %v347_v38, %v7703_v30  ;;  %1717 = vmatpush2.bf16.msra.mxu1 %v1608_v18  ;;  %1910 = vmatpush2.bf16.msra.mxu0 %v1672_v19  ;;  %v460_v46 = vmax.f32 %v346_v39, 0.0  ;;  %v513_v43 = vpack.c.bf16 %v469_v16, %v467_v2  ;;  %v468_v18 = vmax.f32 %v366_v13, 0.0 }
 0x144   :  { %1718 = vmatprep.subr.bf16.mxu1 %v1605_v28  ;;  %1911 = vmatprep.subr.bf16.mxu0 %v1669_v29  ;;  %v510_v10 = vpack.c.bf16 %v464_v6, %v462_v0  ;;  %v7810_v14 = vpop.f32.mrf.mxu1  ;;  %v372_v12 = vadd.f32 %v7732_v22, %v7706_v31  ;;  %v515_v20 = vpack.c.bf16 %v473_v17, %v471_v15  ;;  %v1548_v28 = vld [vmem:[#allocation7 + $0x180] sm:$0xff]  ;;  %v1600_v36 = vunpack.c.h.s8.bf16 %v1516_v21 }
 0x145   :  { %v461_v54 = vmax.f32 %v348_v40, 0.0  ;;  %v508_v63 = vpack.c.bf16 %v460_v46, %v458_v55  ;;  %v388_v7 = vadd.f32 %v7762_v23, %v7703_v30  ;;  %v512_v29 = vpack.c.bf16 %v468_v18, %v466_v44 }
 0x146   :  { %v407_v19 = vpop.f32.mrf.mxu1  ;;  %v376_v32 = vadd.f32 %v7740_v60, %v7706_v31  ;;  %v1664_v37 = vunpack.c.h.s8.bf16 %v1548_v28  ;;  %v475_v22 = vmax.f32 %v384_v56, 0.0  ;;  %v470_v38 = vmax.f32 %v372_v12, 0.0 }
 0x147   :  { %v509_v58 = vpack.c.bf16 %v461_v54, %v459_v53  ;;  %1719 = vmatpush2.bf16.msra.mxu1 %v1604_v42  ;;  %1912 = vmatpush2.bf16.msra.mxu0 %v1668_v45  ;;  %v477_v52 = vmax.f32 %v388_v7, 0.0  ;;  %v1597_v23 = vunpack.c.l.s8.bf16 %v7780_v35  ;;  %v1661_v42 = vunpack.c.l.s8.bf16 %v7782_v50 }
 0x148   :  { %1720 = vmatprep.subr.bf16.mxu1 %v1601_v49  ;;  %1913 = vmatprep.subr.bf16.mxu0 %v1665_v51  ;;  %v7820_v39 = vpop.f32.mrf.mxu1  ;;  %v472_v40 = vmax.f32 %v376_v32, 0.0  ;;  %v1596_v60 = vunpack.c.l.s8.bf16 %v1516_v21  ;;  %v1660_v45 = vunpack.c.l.s8.bf16 %v1548_v28  ;;  %v394_v46 = vadd.f32 %v7770_v3, %v7703_v30 }
 0x149   :  { %724 = vmatprep.mubr.bf16.mxu1 %v509_v58  ;;  %917 = vmatprep.mubr.bf16.mxu0 %v509_v58  ;;  %v517_v49 = vpack.c.bf16 %v477_v52, %v475_v22  ;;  %v398_v51 = vadd.f32 %v7786_v48, %v7703_v30  ;;  %v382_v54 = vadd.f32 %v7748_v33, %v7706_v31 }
 0x14a   :  { %725 = vmatmul.mubr.bf16.gmra.mxu1 %v508_v63  ;;  %918 = vmatmul.mubr.bf16.gmra.mxu0 %v508_v63  ;;  %v413_v41 = vpop.f32.mrf.mxu1  ;;  %v514_v53 = vpack.c.bf16 %v472_v40, %v470_v38  ;;  %v386_v35 = vadd.f32 %v7756_v5, %v7706_v31  ;;  %v479_v50 = vmax.f32 %v394_v46, 0.0  ;;  %v1659_v5 = vunpack.c.h.s8.bf16 %v7834_v61 }
 0x14b   :  { %734 = vmatprep.mubr.bf16.mxu1 %v511_v59  ;;  %927 = vmatprep.mubr.bf16.mxu0 %v511_v59  ;;  %v481_v3 = vmax.f32 %v398_v51, 0.0  ;;  %v474_v57 = vmax.f32 %v382_v54, 0.0  ;;  %v7832_v59 = vld [vmem:[#allocation7 + $0x78] sm:$0xff]  ;;  %v404_v62 = vadd.f32 %v7800_v8, %v7703_v30  ;;  %v408_v1 = vadd.f32 %v407_v19, %v7703_v30  ;;  %v7872_v51 = vld [vmem:[#allocation7 + $0x170] sm:$0xff] }
 0x14c   :  { %1721 = vmatpush2.bf16.msra.mxu1 %v1600_v36  ;;  %1914 = vmatpush2.bf16.msra.mxu0 %v1664_v37  ;;  %v415_v55 = vpop.f32.mrf.mxu1  ;;  %v476_v48 = vmax.f32 %v386_v35, 0.0  ;;  %v1595_v33 = vunpack.c.h.s8.bf16 %v7832_v59  ;;  %v392_v16 = vadd.f32 %v7764_v47, %v7706_v31  ;;  %v396_v0 = vadd.f32 %v7776_v24, %v7706_v31 }
 0x14d   :  { %1722 = vmatprep.subr.bf16.mxu1 %v1597_v23  ;;  %1915 = vmatprep.subr.bf16.mxu0 %v1661_v42  ;;  %v519_v63 = vpack.c.bf16 %v481_v3, %v479_v50  ;;  %v483_v34 = vmax.f32 %v404_v62, 0.0  ;;  %v414_v11 = vadd.f32 %v413_v41, %v7703_v30  ;;  %v402_v24 = vadd.f32 %v7798_v4, %v7706_v31  ;;  %v1008_v42 = vld [vmem:[%s12187_s4] sm:$0xf]  ;;  %v7902_v62 = vld [vmem:[#allocation7 + $0x150] sm:$0xff] }
 0x14e   :  { %v417_v58 = vpop.f32.mrf.mxu1  ;;  %v516_v2 = vpack.c.bf16 %v476_v48, %v474_v57  ;;  %v478_v8 = vmax.f32 %v392_v16, 0.0  ;;  %v480_v9 = vmax.f32 %v396_v0, 0.0  ;;  %v406_v17 = vadd.f32 %v7810_v14, %v7706_v31  ;;  %v7886_v50 = vld [vmem:[#allocation7 + $0x58] sm:$0xff]  ;;  %v7890_v57 = vld [vmem:[#allocation7 + $0x50] sm:$0xff] }
 0x14f   :  { %v418_v47 = vadd.f32 %v417_v58, %v7703_v30  ;;  %v487_v18 = vmax.f32 %v414_v11, 0.0  ;;  %v482_v12 = vmax.f32 %v402_v24, 0.0  ;;  %v412_v4 = vadd.f32 %v7820_v39, %v7706_v31  ;;  %v7888_v3 = vld [vmem:[#allocation7 + $0x158] sm:$0xff] }
 0x150   :  { %1723 = vmatpush2.bf16.msra.mxu1 %v1596_v60  ;;  %1916 = vmatpush2.bf16.msra.mxu0 %v1660_v45  ;;  %v421_v6 = vpop.f32.mrf.mxu1  ;;  %v518_v15 = vpack.c.bf16 %v480_v9, %v478_v8  ;;  %v484_v56 = vmax.f32 %v406_v17, 0.0  ;;  %v416_v14 = vadd.f32 %v415_v55, %v7706_v31  ;;  %v7862_v60 = vsub.s32 2, %v7694_v25  ;;  %v1158_v45 = vld [vmem:[#allocation5] sm:$0xf] }
 0x151   :  { %2078 = vmatprep.subr.bf16.mxu1 %v1595_v33  ;;  %2271 = vmatprep.subr.bf16.mxu0 %v1659_v5  ;;  %v489_v19 = vmax.f32 %v418_v47, 0.0  ;;  %v486_v37 = vmax.f32 %v412_v4, 0.0  ;;  %v422_v40 = vadd.f32 %v421_v6, %v7706_v31  ;;  %v7865_v46 = vsub.s32 3, %v7694_v25  ;;  %v7908_v0 = vld [vmem:[#allocation7 + $0x38] sm:$0xff]  ;;  %v7918_v47 = vld [vmem:[#allocation7 + $0x130] sm:$0xff] }
 0x152   :  { %735 = vmatmul.mubr.bf16.gmra.mxu1 %v510_v10  ;;  %928 = vmatmul.mubr.bf16.gmra.mxu0 %v510_v10  ;;  %v423_v10 = vpop.f32.mrf.mxu1  ;;  %v488_v22 = vmax.f32 %v416_v14, 0.0  ;;  %12385 = vst [vmem:[#allocation19_spill] sm:$0xff] %v7862_v60  ;;  %v7878_v54 = vrot.slane %v1008_v42, %v7862_v60  ;;  %v7881_v35 = vrot.slane %v1158_v45, %v7862_v60  ;;  %v7910_v6 = vld [vmem:[#allocation7 + $0x138] sm:$0xff]  ;;  %v1654_v8 = vunpack.c.l.s8.bf16 %v7872_v51 }
 0x153   :  { %744 = vmatprep.mubr.bf16.mxu1 %v513_v43  ;;  %937 = vmatprep.mubr.bf16.mxu0 %v513_v43  ;;  %v485_v43 = vmax.f32 %v408_v1, 0.0  ;;  %v424_v7 = vadd.f32 %v423_v10, %v7703_v30  ;;  %v523_v21 = vpack.c.bf16 %v489_v19, %v487_v18  ;;  %v490_v39 = vmax.f32 %v422_v40, 0.0  ;;  %12386 = vst [vmem:[#allocation20_spill] sm:$0xff] %v7865_v46 }
 0x154   :  { %v425_v44 = vpop.f32.mrf.mxu1  ;;  %v522_v38 = vpack.c.bf16 %v488_v22, %v486_v37  ;;  %v7884_v55 = vrot.slane %v1008_v42, %v7697_v26  ;;  %v7893_v48 = vrot.slane %v1158_v45, %v7697_v26  ;;  %v7896_v58 = vrot.slane %v1008_v42, %v7865_v46  ;;  %v7938_v37 = vld [vmem:[#allocation7 + $0x110] sm:$0xff] }
 0x155   :  { %v521_v13 = vpack.c.bf16 %v485_v43, %v483_v34  ;;  %v491_v32 = vmax.f32 %v424_v7, 0.0  ;;  %v7899_v33 = vrot.slane %v1158_v45, %v7865_v46  ;;  %v1591_v1 = vunpack.c.l.s8.bf16 %v7832_v59 }
 0x156   :  { %v1587_v9 = vunpack.c.h.s8.bf16 %v7886_v50  ;;  %v1651_v10 = vunpack.c.h.s8.bf16 %v7888_v3  ;;  %v1586_v11 = vunpack.c.h.s8.bf16 %v7890_v57 }
 0x15a   :  { %745 = vmatmul.mubr.bf16.gmra.mxu1 %v512_v29  ;;  %938 = vmatmul.mubr.bf16.gmra.mxu0 %v512_v29  ;;  %v520_v29 = vpack.c.bf16 %v484_v56, %v482_v12 }
 0x15b   :  { %754 = vmatprep.mubr.bf16.mxu1 %v515_v20  ;;  %947 = vmatprep.mubr.bf16.mxu0 %v515_v20  ;;  %v427_v20 = vpop.f32.mrf.mxu1 }
 0x15c   :  { %v428_v28 = vadd.f32 %v427_v20, %v7703_v30  ;;  %v426_v30 = vadd.f32 %v425_v44, %v7706_v31  ;;  %v7867_v31 = vld [vmem:[#allocation7 + $0x70] sm:$0xff] }
 0x15d   :  { %v1594_v5 = vunpack.c.h.s8.bf16 %v7867_v31  ;;  %v1590_v16 = vunpack.c.l.s8.bf16 %v7867_v31 }
 0x15e   :  { %v493_v36 = vmax.f32 %v428_v28, 0.0  ;;  %v492_v41 = vmax.f32 %v426_v30, 0.0  ;;  %v7930_v28 = vld [vmem:[#allocation7 + $0x118] sm:$0xff] }
 0x160   :  { %v525_v52 = vpack.c.bf16 %v493_v36, %v491_v32  ;;  %v524_v23 = vpack.c.bf16 %v492_v41, %v490_v39 }
 0x162   :  { %755 = vmatmul.mubr.bf16.gmra.mxu1 %v514_v53  ;;  %948 = vmatmul.mubr.bf16.gmra.mxu0 %v514_v53  ;;  %v7875_v53 = vrot.slane %v1158_v45, %v7700_v27 }
 0x163   :  { %764 = vmatprep.mubr.bf16.mxu1 %v517_v49  ;;  %957 = vmatprep.mubr.bf16.mxu0 %v517_v49  ;;  %v7870_v49 = vrot.slane %v1008_v42, %v7700_v27 }
 0x16a   :  { %765 = vmatmul.mubr.bf16.gmra.mxu1 %v516_v2  ;;  %958 = vmatmul.mubr.bf16.gmra.mxu0 %v516_v2  ;;  %v1655_v2 = vunpack.c.l.s8.bf16 %v7834_v61 }
 0x16b   :  { %774 = vmatprep.mubr.bf16.mxu1 %v519_v63  ;;  %967 = vmatprep.mubr.bf16.mxu0 %v519_v63  ;;  %v1658_v63 = vunpack.c.h.s8.bf16 %v7872_v51 }
 0x172   :  { %775 = vmatmul.mubr.bf16.gmra.mxu1 %v518_v15  ;;  %968 = vmatmul.mubr.bf16.gmra.mxu0 %v518_v15 }
 0x173   :  { %784 = vmatprep.mubr.bf16.mxu1 %v521_v13  ;;  %977 = vmatprep.mubr.bf16.mxu0 %v521_v13  ;;  %v7916_v13 = vld [vmem:[#allocation7 + $0x30] sm:$0xff] }
 0x174   :  { %v12394_v31 = vunpack.c.h.s8.bf16 %v7916_v13 }
 0x17a   :  { %785 = vmatmul.mubr.bf16.gmra.mxu1 %v520_v29  ;;  %978 = vmatmul.mubr.bf16.gmra.mxu0 %v520_v29  ;;  %v7932_v29 = vld [vmem:[#allocation7 + $0x10] sm:$0xff] }
 0x17b   :  { %794 = vmatprep.mubr.bf16.mxu1 %v523_v21  ;;  %987 = vmatprep.mubr.bf16.mxu0 %v523_v21  ;;  %v7928_v21 = vld [vmem:[#allocation7 + $0x18] sm:$0xff] }
 0x182   :  { %795 = vmatmul.mubr.bf16.gmra.mxu1 %v522_v38  ;;  %988 = vmatmul.mubr.bf16.gmra.mxu0 %v522_v38 }
 0x183   :  { %804 = vmatprep.mubr.bf16.mxu1 %v525_v52  ;;  %997 = vmatprep.mubr.bf16.mxu0 %v525_v52 }
 0x18a   :  { %805 = vmatmul.mubr.bf16.gmra.mxu1 %v524_v23  ;;  %998 = vmatmul.mubr.bf16.gmra.mxu0 %v524_v23 }
 0x1d2   :  { %v656_v34 = vpop.f32.mrf.mxu1  ;;  %v849_v43 = vpop.f32.mrf.mxu0 }
 0x1d3   :  { %v1030_v18 = vmul.f32 %v7870_v49, %v656_v34  ;;  %v1032_v4 = vmul.f32 %v7878_v54, %v849_v43 }
 0x1d4   :  { %v658_v19 = vpop.f32.mrf.mxu1  ;;  %v851_v12 = vpop.f32.mrf.mxu0 }
 0x1d5   :  { %v1031_v14 = vmul.f32 %v7884_v55, %v658_v19  ;;  %v1033_v22 = vmul.f32 %v7896_v58, %v851_v12  ;;  %v1180_v34 = vadd.f32 %v7875_v53, %v1030_v18  ;;  %v1182_v39 = vadd.f32 %v7881_v35, %v1032_v4 }
 0x1d6   :  { %v660_v52 = vpop.f32.mrf.mxu1  ;;  %v853_v38 = vpop.f32.mrf.mxu0 }
 0x1d7   :  { %v1034_v43 = vmul.f32 %v7870_v49, %v660_v52  ;;  %v1036_v19 = vmul.f32 %v7878_v54, %v853_v38  ;;  %v1181_v41 = vadd.f32 %v7893_v48, %v1031_v14  ;;  %v1183_v45 = vadd.f32 %v7899_v33, %v1033_v22 }
 0x1d8   :  { %v662_v12 = vpop.f32.mrf.mxu1  ;;  %v855_v40 = vpop.f32.mrf.mxu0  ;;  %v1308_v7 = vmax.f32 %v1180_v34, 0.0 }
 0x1d9   :  { %v1035_v23 = vmul.f32 %v7884_v55, %v662_v12  ;;  %v1037_v42 = vmul.f32 %v7896_v58, %v855_v40  ;;  %v1184_v18 = vadd.f32 %v7875_v53, %v1034_v43  ;;  %v1186_v52 = vadd.f32 %v7881_v35, %v1036_v19  ;;  %v7982_v43 = vld [vmem:[#allocation7 + $0x1f8] sm:$0xff] }
 0x1da   :  { %v666_v36 = vpop.f32.mrf.mxu1  ;;  %v859_v38 = vpop.f32.mrf.mxu0  ;;  %v1310_v19 = vmax.f32 %v1182_v39, 0.0  ;;  %v1309_v44 = vmax.f32 %v1181_v41, 0.0  ;;  %v1311_v32 = vmax.f32 %v1183_v45, 0.0  ;;  %v7972_v41 = vld [vmem:[#allocation7 + $0xf8] sm:$0xff] }
 0x1db   :  { %v1185_v30 = vadd.f32 %v7893_v48, %v1035_v23  ;;  %v1187_v4 = vadd.f32 %v7899_v33, %v1037_v42  ;;  %v1038_v14 = vmul.f32 %v7870_v49, %v666_v36  ;;  %v1312_v40 = vmax.f32 %v1184_v18, 0.0 }
 0x1dc   :  { %v1314_v20 = vmax.f32 %v1186_v52, 0.0  ;;  %v668_v22 = vpop.f32.mrf.mxu1  ;;  %v861_v56 = vpop.f32.mrf.mxu0  ;;  %v1040_v23 = vmul.f32 %v7878_v54, %v859_v38 }
 0x1dd   :  { %v1313_v17 = vmax.f32 %v1185_v30, 0.0  ;;  %v1315_v24 = vmax.f32 %v1187_v4, 0.0  ;;  %v1039_v42 = vmul.f32 %v7884_v55, %v668_v22  ;;  %v1041_v36 = vmul.f32 %v7896_v58, %v861_v56 }
 0x1de   :  { %v670_v15 = vpop.f32.mrf.mxu1  ;;  %v863_v12 = vpop.f32.mrf.mxu0  ;;  %v1188_v34 = vadd.f32 %v7875_v53, %v1038_v14  ;;  %v7974_v30 = vpack.c.bf16 %v1312_v40, %v1308_v7  ;;  %v7976_v45 = vpack.c.bf16 %v1314_v20, %v1310_v19  ;;  %v1190_v7 = vadd.f32 %v7881_v35, %v1040_v23 }
 0x1df   :  { %v1042_v18 = vmul.f32 %v7870_v49, %v670_v15  ;;  %v1044_v52 = vmul.f32 %v7878_v54, %v863_v12  ;;  %v7978_v22 = vpack.c.bf16 %v1313_v17, %v1309_v44  ;;  %v7980_v56 = vpack.c.bf16 %v1315_v24, %v1311_v32 }
 0x1e0   :  { %v672_v38 = vpop.f32.mrf.mxu1  ;;  %v865_v4 = vpop.f32.mrf.mxu0  ;;  %v1189_v20 = vadd.f32 %v7893_v48, %v1039_v42  ;;  %v1191_v40 = vadd.f32 %v7899_v33, %v1041_v36  ;;  %v1316_v42 = vmax.f32 %v1188_v34, 0.0  ;;  %v8011_v34 = vld [vmem:[#allocation7 + $0xf0] sm:$0xff] }
 0x1e1   :  { %v1192_v15 = vadd.f32 %v7875_v53, %v1042_v18  ;;  %v1194_v14 = vadd.f32 %v7881_v35, %v1044_v52  ;;  %v1043_v12 = vmul.f32 %v7884_v55, %v672_v38  ;;  %v1045_v39 = vmul.f32 %v7896_v58, %v865_v4  ;;  %1724 = vmatprep.mubr.bf16.mxu1 %v7978_v22 }
 0x1e2   :  { %1917 = vmatprep.mubr.bf16.mxu0 %v7980_v56  ;;  %v676_v24 = vpop.f32.mrf.mxu1  ;;  %v869_v17 = vpop.f32.mrf.mxu0  ;;  %1725 = vmatmul.mubr.bf16.vlgmr.msra.gmra.mxu1 %v7974_v30 }
 0x1e3   :  { %v1320_v32 = vmax.f32 %v1192_v15, 0.0  ;;  %v1193_v19 = vadd.f32 %v7893_v48, %v1043_v12  ;;  %v1195_v18 = vadd.f32 %v7899_v33, %v1045_v39  ;;  %1918 = vmatmul.mubr.bf16.vlgmr.msra.gmra.mxu0 %v7976_v45  ;;  %v1322_v36 = vmax.f32 %v1194_v14, 0.0  ;;  %2079 = vmatpush1.bf16.msra.mxu1 %v1594_v5 }
 0x1e4   :  { %v1046_v52 = vmul.f32 %v7870_v49, %v676_v24  ;;  %v1048_v38 = vmul.f32 %v7878_v54, %v869_v17  ;;  %2272 = vmatpush1.bf16.msra.mxu0 %v1658_v63  ;;  %v678_v4 = vpop.f32.mrf.mxu1  ;;  %v871_v39 = vpop.f32.mrf.mxu0  ;;  %2080 = vmatprep.subr.bf16.mxu1 %v1591_v1  ;;  %v1318_v5 = vmax.f32 %v1190_v7, 0.0  ;;  %v1317_v14 = vmax.f32 %v1189_v20, 0.0 }
 0x1e5   :  { %v1321_v15 = vmax.f32 %v1193_v19, 0.0  ;;  %v1323_v12 = vmax.f32 %v1195_v18, 0.0  ;;  %v1047_v44 = vmul.f32 %v7884_v55, %v678_v4  ;;  %v1049_v23 = vmul.f32 %v7896_v58, %v871_v39  ;;  %2273 = vmatprep.subr.bf16.mxu0 %v1655_v2  ;;  %v8014_v18 = vld [vmem:[#allocation7 + $0x1f0] sm:$0xff] }
 0x1e6   :  { %v1319_v24 = vmax.f32 %v1191_v40, 0.0  ;;  %v1196_v63 = vadd.f32 %v7875_v53, %v1046_v52  ;;  %v680_v17 = vpop.f32.mrf.mxu1  ;;  %v873_v19 = vpop.f32.mrf.mxu0  ;;  %v8017_v4 = vadd.f32 %v7881_v35, %v1048_v38  ;;  %v8021_v61 = vpack.c.bf16 %v1320_v32, %v1316_v42 }
 0x1e7   :  { %v1050_v59 = vmul.f32 %v7870_v49, %v680_v17  ;;  %v1052_v1 = vmul.f32 %v7878_v54, %v873_v19  ;;  %v8023_v7 = vpack.c.bf16 %v1321_v15, %v1317_v14  ;;  %v8027_v40 = vpack.c.bf16 %v1322_v36, %v1318_v5  ;;  %2081 = vmatpush1.bf16.msra.mxu1 %v1590_v16 }
 0x1e8   :  { %v682_v2 = vpop.f32.mrf.mxu1  ;;  %v875_v39 = vpop.f32.mrf.mxu0  ;;  %v8025_v20 = vpack.c.bf16 %v1323_v12, %v1319_v24  ;;  %2274 = vmatpush1.bf16.msra.mxu0 %v1654_v8  ;;  %v1197_v38 = vadd.f32 %v7893_v48, %v1047_v44  ;;  %v1199_v32 = vadd.f32 %v7899_v33, %v1049_v23  ;;  %2082 = vmatprep.subr.bf16.mxu1 %v1587_v9  ;;  %v1324_v5 = vmax.f32 %v1196_v63, 0.0 }
 0x1e9   :  { %v1200_v42 = vadd.f32 %v7875_v53, %v1050_v59  ;;  %2275 = vmatprep.subr.bf16.mxu0 %v1651_v10  ;;  %v1202_v16 = vadd.f32 %v7881_v35, %v1052_v1  ;;  %v1051_v51 = vmul.f32 %v7884_v55, %v682_v2  ;;  %v1053_v8 = vmul.f32 %v7896_v58, %v875_v39  ;;  %v8067_v1 = vld [vmem:[#allocation7 + $0xd8] sm:$0xff] }
 0x1ea   :  { %1734 = vmatprep.mubr.bf16.mxu1 %v8023_v7  ;;  %1927 = vmatprep.mubr.bf16.mxu0 %v8025_v20  ;;  %v686_v44 = vpop.f32.mrf.mxu1  ;;  %v879_v23 = vpop.f32.mrf.mxu0  ;;  %v12387_v59 = vunpack.c.h.s8.bf16 %v7902_v62  ;;  %v1326_v2 = vmax.f32 %v8017_v4, 0.0  ;;  %v1325_v39 = vmax.f32 %v1197_v38, 0.0 }
 0x1eb   :  { %v1328_v9 = vmax.f32 %v1200_v42, 0.0  ;;  %v1054_v15 = vmul.f32 %v7870_v49, %v686_v44  ;;  %1735 = vmatmul.mubr.bf16.gmra.mxu1 %v8021_v61  ;;  %1928 = vmatmul.mubr.bf16.gmra.mxu0 %v8027_v40  ;;  %v1201_v14 = vadd.f32 %v7893_v48, %v1051_v51  ;;  %v1203_v24 = vadd.f32 %v7899_v33, %v1053_v8 }
 0x1ec   :  { %v688_v17 = vpop.f32.mrf.mxu1  ;;  %v881_v19 = vpop.f32.mrf.mxu0  ;;  %2083 = vmatpush1.bf16.msra.mxu1 %v1586_v11  ;;  %2276 = vmatpush1.bf16.msra.mxu0 %v12387_v59  ;;  %v12388_v51 = vunpack.c.l.s8.bf16 %v7886_v50  ;;  %v1327_v8 = vmax.f32 %v1199_v32, 0.0  ;;  %v1330_v44 = vmax.f32 %v1202_v16, 0.0  ;;  %v12389_v59 = vunpack.c.l.s8.bf16 %v7888_v3  ;;  %v8076_v32 = vld [vmem:[#allocation7 + $0x1d8] sm:$0xff] }
 0x1ed   :  { %v1055_v42 = vmul.f32 %v7884_v55, %v688_v17  ;;  %v1057_v63 = vmul.f32 %v7896_v58, %v881_v19  ;;  %v1329_v12 = vmax.f32 %v1201_v14, 0.0  ;;  %v1331_v10 = vmax.f32 %v1203_v24, 0.0 }
 0x1ee   :  { %2084 = vmatprep.subr.bf16.mxu1 %v12388_v51  ;;  %v690_v11 = vpop.f32.mrf.mxu1  ;;  %v883_v36 = vpop.f32.mrf.mxu0  ;;  %2277 = vmatprep.subr.bf16.mxu0 %v12389_v59  ;;  %v8070_v4 = vadd.f32 %v7875_v53, %v1054_v15  ;;  %v1056_v38 = vmul.f32 %v7878_v54, %v879_v23  ;;  %v8074_v50 = vpack.c.bf16 %v1328_v9, %v1324_v5  ;;  %v12390_v15 = vunpack.c.l.s8.bf16 %v7890_v57 }
 0x1ef   :  { %v1205_v17 = vadd.f32 %v7893_v48, %v1055_v42  ;;  %v1058_v16 = vmul.f32 %v7870_v49, %v690_v11  ;;  %v1060_v14 = vmul.f32 %v7878_v54, %v883_v36  ;;  %v8080_v19 = vpack.c.bf16 %v1329_v12, %v1325_v39  ;;  %v8094_v39 = vld [vmem:[#allocation7 + $0xd0] sm:$0xff] }
 0x1f0   :  { %v692_v24 = vpop.f32.mrf.mxu1  ;;  %v885_v3 = vpop.f32.mrf.mxu0  ;;  %v8082_v51 = vpack.c.bf16 %v1331_v10, %v1327_v8  ;;  %2085 = vmatpush1.bf16.msra.mxu1 %v12390_v15  ;;  %v1207_v23 = vadd.f32 %v7899_v33, %v1057_v63  ;;  %v12391_v42 = vunpack.c.l.s8.bf16 %v7902_v62  ;;  %v12392_v36 = vunpack.c.h.s8.bf16 %v7908_v0  ;;  %v8096_v10 = vld [vmem:[#allocation7 + $0x1d0] sm:$0xff] }
 0x1f1   :  { %v1059_v9 = vmul.f32 %v7884_v55, %v692_v24  ;;  %v1061_v5 = vmul.f32 %v7896_v58, %v885_v3  ;;  %v1208_v57 = vadd.f32 %v7875_v53, %v1058_v16  ;;  %v1210_v63 = vadd.f32 %v7881_v35, %v1060_v14  ;;  %1744 = vmatprep.mubr.bf16.mxu1 %v8080_v19 }
 0x1f2   :  { %2278 = vmatpush1.bf16.msra.mxu0 %v12391_v42  ;;  %2086 = vmatprep.subr.bf16.mxu1 %v12392_v36  ;;  %v696_v8 = vpop.f32.mrf.mxu1  ;;  %v889_v62 = vpop.f32.mrf.mxu0  ;;  %v8102_v11 = vpack.c.bf16 %v1330_v44, %v1326_v2  ;;  %v1206_v24 = vadd.f32 %v7881_v35, %v1056_v38  ;;  %v1332_v14 = vmax.f32 %v8070_v4, 0.0  ;;  %v12393_v44 = vunpack.c.h.s8.bf16 %v7910_v6 }
 0x1f3   :  { %1937 = vmatprep.mubr.bf16.mxu0 %v8082_v51  ;;  %v1209_v3 = vadd.f32 %v7893_v48, %v1059_v9  ;;  %v1211_v15 = vadd.f32 %v7899_v33, %v1061_v5  ;;  %v1062_v16 = vmul.f32 %v7870_v49, %v696_v8  ;;  %1745 = vmatmul.mubr.bf16.gmra.mxu1 %v8074_v50  ;;  %v1336_v42 = vmax.f32 %v1208_v57, 0.0 }
 0x1f4   :  { %1938 = vmatmul.mubr.bf16.gmra.mxu0 %v8102_v11  ;;  %v698_v36 = vpop.f32.mrf.mxu1  ;;  %v891_v2 = vpop.f32.mrf.mxu0  ;;  %2279 = vmatprep.subr.bf16.mxu0 %v12393_v44  ;;  %v1333_v59 = vmax.f32 %v1205_v17, 0.0  ;;  %v1335_v5 = vmax.f32 %v1207_v23, 0.0  ;;  %v12395_v4 = vunpack.c.h.s8.bf16 %v7918_v47  ;;  %v1338_v57 = vmax.f32 %v1210_v63, 0.0 }
 0x1f5   :  { %v1337_v12 = vmax.f32 %v1209_v3, 0.0  ;;  %v1339_v8 = vmax.f32 %v1211_v15, 0.0  ;;  %2087 = vmatpush1.bf16.msra.mxu1 %v12394_v31  ;;  %v1064_v52 = vmul.f32 %v7878_v54, %v889_v62  ;;  %v1063_v25 = vmul.f32 %v7884_v55, %v698_v36 }
 0x1f6   :  { %2280 = vmatpush1.bf16.msra.mxu0 %v12395_v4  ;;  %v1065_v44 = vmul.f32 %v7896_v58, %v891_v2  ;;  %v700_v38 = vpop.f32.mrf.mxu1  ;;  %v893_v46 = vpop.f32.mrf.mxu0  ;;  %v12396_v17 = vunpack.c.l.s8.bf16 %v7908_v0  ;;  %v1334_v23 = vmax.f32 %v1206_v24, 0.0  ;;  %v1212_v3 = vadd.f32 %v7875_v53, %v1062_v16 }
 0x1f7   :  { %v1066_v31 = vmul.f32 %v7870_v49, %v700_v38  ;;  %v1068_v15 = vmul.f32 %v7878_v54, %v893_v46  ;;  %v12397_v63 = vunpack.c.l.s8.bf16 %v7910_v6  ;;  %v1213_v62 = vadd.f32 %v7893_v48, %v1063_v25 }
 0x1f8   :  { %2088 = vmatprep.subr.bf16.mxu1 %v12396_v17  ;;  %v702_v36 = vpop.f32.mrf.mxu1  ;;  %v895_v4 = vpop.f32.mrf.mxu0  ;;  %v8131_v2 = vpack.c.bf16 %v1337_v12, %v1333_v59  ;;  %v8133_v9 = vpack.c.bf16 %v1339_v8, %v1335_v5  ;;  %v8135_v0 = vpack.c.bf16 %v1336_v42, %v1332_v14  ;;  %v1215_v24 = vadd.f32 %v7899_v33, %v1065_v44 }
 0x1f9   :  { %2281 = vmatprep.subr.bf16.mxu0 %v12397_v63  ;;  %v1216_v16 = vadd.f32 %v7875_v53, %v1066_v31  ;;  %v1067_v38 = vmul.f32 %v7884_v55, %v702_v36  ;;  %v1069_v46 = vmul.f32 %v7896_v58, %v895_v4  ;;  %v12398_v6 = vunpack.c.l.s8.bf16 %v7916_v13 }
 0x1fa   :  { %v1214_v25 = vadd.f32 %v7881_v35, %v1064_v52  ;;  %v1218_v12 = vadd.f32 %v7881_v35, %v1068_v15  ;;  %1754 = vmatprep.mubr.bf16.mxu1 %v8131_v2  ;;  %1947 = vmatprep.mubr.bf16.mxu0 %v8133_v9  ;;  %v706_v59 = vpop.f32.mrf.mxu1  ;;  %v899_v14 = vpop.f32.mrf.mxu0  ;;  %v8147_v42 = vpack.c.bf16 %v1338_v57, %v1334_v23  ;;  %v12399_v13 = vunpack.c.l.s8.bf16 %v7918_v47 }
 0x1fb   :  { %2089 = vmatpush1.bf16.msra.mxu1 %v12398_v6  ;;  %v1217_v8 = vadd.f32 %v7893_v48, %v1067_v38  ;;  %v1219_v44 = vadd.f32 %v7899_v33, %v1069_v46  ;;  %v1340_v31 = vmax.f32 %v1212_v3, 0.0  ;;  %v1344_v15 = vmax.f32 %v1216_v16, 0.0 }
 0x1fc   :  { %1755 = vmatmul.mubr.bf16.gmra.mxu1 %v8135_v0  ;;  %2282 = vmatpush1.bf16.msra.mxu0 %v12399_v13  ;;  %v1070_v57 = vmul.f32 %v7870_v49, %v706_v59  ;;  %v708_v23 = vpop.f32.mrf.mxu1  ;;  %v901_v63 = vpop.f32.mrf.mxu0  ;;  %v12400_v36 = vunpack.c.h.s8.bf16 %v7928_v21  ;;  %v1341_v38 = vmax.f32 %v1213_v62, 0.0  ;;  %v1343_v47 = vmax.f32 %v1215_v24, 0.0 }
 0x1fd   :  { %1948 = vmatmul.mubr.bf16.gmra.mxu0 %v8147_v42  ;;  %v1345_v46 = vmax.f32 %v1217_v8, 0.0  ;;  %v1347_v6 = vmax.f32 %v1219_v44, 0.0  ;;  %v12401_v13 = vunpack.c.h.s8.bf16 %v7930_v28  ;;  %v12402_v3 = vunpack.c.h.s8.bf16 %v7932_v29 }
 0x1fe   :  { %2090 = vmatprep.subr.bf16.mxu1 %v12400_v36  ;;  %v1342_v16 = vmax.f32 %v1214_v25, 0.0  ;;  %v1346_v59 = vmax.f32 %v1218_v12, 0.0  ;;  %v1071_v17 = vmul.f32 %v7884_v55, %v708_v23  ;;  %v1073_v52 = vmul.f32 %v7896_v58, %v901_v63  ;;  %v710_v5 = vpop.f32.mrf.mxu1  ;;  %v903_v36 = vpop.f32.mrf.mxu0  ;;  %v8178_v12 = vld [vmem:[#allocation7 + $0xb8] sm:$0xff] }
 0x1ff   :  { %2283 = vmatprep.subr.bf16.mxu0 %v12401_v13  ;;  %2091 = vmatpush1.bf16.msra.mxu1 %v12402_v3  ;;  %v12403_v4 = vunpack.c.l.s8.bf16 %v7928_v21  ;;  %v1074_v62 = vmul.f32 %v7870_v49, %v710_v5  ;;  %v1076_v24 = vmul.f32 %v7878_v54, %v903_v36  ;;  %v8172_v8 = vpack.c.bf16 %v1345_v46, %v1341_v38  ;;  %v8180_v23 = vld [vmem:[#allocation7 + $0x1b8] sm:$0xff]  ;;  %v8189_v46 = vld [vmem:[#allocation7 + $0xb0] sm:$0xff] }
 0x200   :  { %v8174_v44 = vpack.c.bf16 %v1347_v6, %v1343_v47  ;;  %v12404_v25 = vunpack.c.h.s8.bf16 %v7938_v37  ;;  %v8182_v63 = vpack.c.bf16 %v1344_v15, %v1340_v31  ;;  %v1220_v21 = vadd.f32 %v7875_v53, %v1070_v57  ;;  %v712_v13 = vpop.f32.mrf.mxu1  ;;  %v905_v38 = vpop.f32.mrf.mxu0  ;;  %v8191_v6 = vld [vmem:[#allocation7 + $0x1b0] sm:$0xff] }
 0x201   :  { %2092 = vmatprep.subr.bf16.mxu1 %v12403_v4  ;;  %v1072_v4 = vmul.f32 %v7878_v54, %v899_v14  ;;  %v1221_v5 = vadd.f32 %v7893_v48, %v1071_v17  ;;  %v12405_v47 = vunpack.c.l.s8.bf16 %v7930_v28  ;;  %v1223_v3 = vadd.f32 %v7899_v33, %v1073_v52  ;;  %1764 = vmatprep.mubr.bf16.mxu1 %v8172_v8 }
 0x202   :  { %2284 = vmatpush1.bf16.msra.mxu0 %v12404_v25  ;;  %v1224_v31 = vadd.f32 %v7875_v53, %v1074_v62  ;;  %v1075_v15 = vmul.f32 %v7884_v55, %v712_v13  ;;  %v1077_v57 = vmul.f32 %v7896_v58, %v905_v38  ;;  %v8198_v14 = vpack.c.bf16 %v1346_v59, %v1342_v16  ;;  %v716_v28 = vpop.f32.mrf.mxu1  ;;  %v909_v36 = vpop.f32.mrf.mxu0 }
 0x203   :  { %2285 = vmatprep.subr.bf16.mxu0 %v12405_v47  ;;  %v1226_v17 = vadd.f32 %v7881_v35, %v1076_v24  ;;  %1957 = vmatprep.mubr.bf16.mxu0 %v8174_v44  ;;  %v12407_v25 = vunpack.c.l.s8.bf16 %v7932_v29  ;;  %v12408_v16 = vunpack.c.l.s8.bf16 %v7938_v37  ;;  %v1348_v47 = vmax.f32 %v1220_v21, 0.0 }
 0x204   :  { %12406 = vst [vmem:[#allocation21_spill] sm:$0xff] %v8198_v14  ;;  %v1225_v13 = vadd.f32 %v7893_v48, %v1075_v15  ;;  %v1227_v38 = vadd.f32 %v7899_v33, %v1077_v57  ;;  %1765 = vmatmul.mubr.bf16.gmra.mxu1 %v8182_v63  ;;  %v1222_v29 = vadd.f32 %v7881_v35, %v1072_v4  ;;  %v718_v15 = vpop.f32.mrf.mxu1  ;;  %v911_v62 = vpop.f32.mrf.mxu0  ;;  %v12409_v57 = vunpack.c.h.s8.bf16 %v7972_v41 }
 0x205   :  { %2093 = vmatpush1.bf16.msra.mxu1 %v12407_v25  ;;  %v1352_v25 = vmax.f32 %v1224_v31, 0.0  ;;  %v1078_v52 = vmul.f32 %v7870_v49, %v716_v28  ;;  %1958 = vmatmul.mubr.bf16.gmra.mxu0 %v8198_v14  ;;  %v1349_v60 = vmax.f32 %v1221_v5, 0.0  ;;  %v1351_v37 = vmax.f32 %v1223_v3, 0.0 }
 0x206   :  { %2286 = vmatpush1.bf16.msra.mxu0 %v12408_v16  ;;  %2094 = vmatprep.subr.bf16.mxu1 %v12409_v57  ;;  %v1353_v16 = vmax.f32 %v1225_v13, 0.0  ;;  %v1355_v27 = vmax.f32 %v1227_v38, 0.0  ;;  %v12410_v59 = vunpack.c.h.s8.bf16 %v7982_v43  ;;  %v1354_v21 = vmax.f32 %v1226_v17, 0.0  ;;  %v720_v24 = vpop.f32.mrf.mxu1  ;;  %v913_v26 = vpop.f32.mrf.mxu0 }
 0x207   :  { %v1080_v4 = vmul.f32 %v7878_v54, %v909_v36  ;;  %v1079_v31 = vmul.f32 %v7884_v55, %v718_v15  ;;  %v1081_v28 = vmul.f32 %v7896_v58, %v911_v62  ;;  %v12411_v14 = vunpack.c.h.s8.bf16 %v8011_v34 }
 0x208   :  { %2287 = vmatprep.subr.bf16.mxu0 %v12410_v59  ;;  %v1082_v5 = vmul.f32 %v7870_v49, %v720_v24  ;;  %v1084_v3 = vmul.f32 %v7878_v54, %v913_v26  ;;  %v8227_v13 = vpack.c.bf16 %v1353_v16, %v1349_v60  ;;  %v8229_v38 = vpack.c.bf16 %v1355_v27, %v1351_v37  ;;  %v722_v57 = vpop.f32.mrf.mxu1 }
 0x209   :  { %2095 = vmatpush2.bf16.msra.mxu1 %v12411_v14  ;;  %v12412_v17 = vunpack.c.h.s8.bf16 %v8014_v18  ;;  %v1350_v36 = vmax.f32 %v1222_v29, 0.0  ;;  %v8233_v59 = vpack.c.bf16 %v1352_v25, %v1348_v47  ;;  %v1228_v62 = vadd.f32 %v7875_v53, %v1078_v52  ;;  %v915_v14 = vpop.f32.mrf.mxu0 }
 0x20a   :  { %v1229_v15 = vadd.f32 %v7893_v48, %v1079_v31  ;;  %v12413_v24 = vunpack.c.l.s8.bf16 %v7972_v41  ;;  %v12414_v26 = vunpack.c.l.s8.bf16 %v7982_v43  ;;  %v1231_v27 = vadd.f32 %v7899_v33, %v1081_v28  ;;  %1774 = vmatprep.mubr.bf16.mxu1 %v8227_v13  ;;  %1967 = vmatprep.mubr.bf16.mxu0 %v8229_v38  ;;  %v726_v41 = vpop.f32.mrf.mxu1 }
 0x20b   :  { %2288 = vmatpush2.bf16.msra.mxu0 %v12412_v17  ;;  %v1232_v60 = vadd.f32 %v7875_v53, %v1082_v5  ;;  %v1083_v29 = vmul.f32 %v7884_v55, %v722_v57  ;;  %v1085_v47 = vmul.f32 %v7896_v58, %v915_v14  ;;  %v8246_v52 = vpack.c.bf16 %v1354_v21, %v1350_v36  ;;  %v919_v37 = vpop.f32.mrf.mxu0 }
 0x20c   :  { %2096 = vmatprep.subr.bf16.mxu1 %v12413_v24  ;;  %2289 = vmatprep.subr.bf16.mxu0 %v12414_v26  ;;  %v1234_v25 = vadd.f32 %v7881_v35, %v1084_v3  ;;  %v12415_v43 = vunpack.c.l.s8.bf16 %v8011_v34  ;;  %v12416_v21 = vunpack.c.l.s8.bf16 %v8014_v18  ;;  %v1356_v36 = vmax.f32 %v1228_v62, 0.0  ;;  %v728_v24 = vpop.f32.mrf.mxu1 }
 0x20d   :  { %v1233_v28 = vadd.f32 %v7893_v48, %v1083_v29  ;;  %v1235_v5 = vadd.f32 %v7899_v33, %v1085_v47  ;;  %1775 = vmatmul.mubr.bf16.gmra.mxu1 %v8233_v59  ;;  %v1230_v34 = vadd.f32 %v7881_v35, %v1080_v4  ;;  %v1360_v57 = vmax.f32 %v1232_v60, 0.0  ;;  %1968 = vmatmul.mubr.bf16.gmra.mxu0 %v8246_v52  ;;  %v921_v26 = vpop.f32.mrf.mxu0 }
 0x20e   :  { %2097 = vmatpush2.bf16.msra.mxu1 %v12415_v43  ;;  %v1086_v14 = vmul.f32 %v7870_v49, %v726_v41  ;;  %v12417_v29 = vunpack.c.h.s8.bf16 %v8067_v1  ;;  %v1357_v47 = vmax.f32 %v1229_v15, 0.0  ;;  %v1359_v18 = vmax.f32 %v1231_v27, 0.0  ;;  %v730_v17 = vpop.f32.mrf.mxu1 }
 0x20f   :  { %2290 = vmatpush2.bf16.msra.mxu0 %v12416_v21  ;;  %v1361_v43 = vmax.f32 %v1233_v28, 0.0  ;;  %v1363_v21 = vmax.f32 %v1235_v5, 0.0  ;;  %v12418_v3 = vunpack.c.h.s8.bf16 %v8076_v32  ;;  %v1362_v62 = vmax.f32 %v1234_v25, 0.0  ;;  %v923_v31 = vpop.f32.mrf.mxu0 }
 0x210   :  { %2098 = vmatprep.subr.bf16.mxu1 %v12417_v29  ;;  %v1088_v4 = vmul.f32 %v7878_v54, %v919_v37  ;;  %v1087_v60 = vmul.f32 %v7884_v55, %v728_v24  ;;  %v1089_v41 = vmul.f32 %v7896_v58, %v921_v26  ;;  %v12419_v16 = vunpack.c.h.s8.bf16 %v8094_v39  ;;  %v8281_v37 = vld [vmem:[#allocation7 + $0x98] sm:$0xff]  ;;  %v732_v29 = vpop.f32.mrf.mxu1 }
 0x211   :  { %2291 = vmatprep.subr.bf16.mxu0 %v12418_v3  ;;  %v1090_v15 = vmul.f32 %v7870_v49, %v730_v17  ;;  %v1092_v27 = vmul.f32 %v7878_v54, %v923_v31  ;;  %v8275_v28 = vpack.c.bf16 %v1361_v43, %v1357_v47  ;;  %v8277_v5 = vpack.c.bf16 %v1363_v21, %v1359_v18  ;;  %v8283_v3 = vld [vmem:[#allocation7 + $0x198] sm:$0xff]  ;;  %v925_v31 = vpop.f32.mrf.mxu0  ;;  %v8293_v43 = vld [vmem:[#allocation7 + $0x90] sm:$0xff] }
 0x212   :  { %2099 = vmatpush2.bf16.msra.mxu1 %v12419_v16  ;;  %v12422_v25 = vunpack.c.h.s8.bf16 %v8096_v10  ;;  %v1358_v24 = vmax.f32 %v1230_v34, 0.0  ;;  %v8285_v26 = vpack.c.bf16 %v1360_v57, %v1356_v36  ;;  %v1236_v16 = vadd.f32 %v7875_v53, %v1086_v14  ;;  %v8295_v21 = vld [vmem:[#allocation7 + $0x190] sm:$0xff] }
 0x213   :  { %12420 = vst [vmem:[#allocation22_spill] sm:$0xff] %v8275_v28  ;;  %12421 = vst [vmem:[#allocation23_spill] sm:$0xff] %v8277_v5  ;;  %v1237_v17 = vadd.f32 %v7893_v48, %v1087_v60  ;;  %v12424_v47 = vunpack.c.l.s8.bf16 %v8067_v1  ;;  %v12425_v18 = vunpack.c.l.s8.bf16 %v8076_v32  ;;  %v1239_v34 = vadd.f32 %v7899_v33, %v1089_v41  ;;  %1784 = vmatprep.mubr.bf16.mxu1 %v8275_v28  ;;  %v736_v32 = vpop.f32.mrf.mxu1 }
 0x214   :  { %2292 = vmatpush2.bf16.msra.mxu0 %v12422_v25  ;;  %12423 = vst [vmem:[#allocation24_spill] sm:$0xff] %v8285_v26  ;;  %v1240_v36 = vadd.f32 %v7875_v53, %v1090_v15  ;;  %v1091_v57 = vmul.f32 %v7884_v55, %v732_v29  ;;  %v1093_v14 = vmul.f32 %v7896_v58, %v925_v31  ;;  %v929_v25 = vpop.f32.mrf.mxu0  ;;  %v12431_v28 = vunpack.c.h.s8.bf16 %v8189_v46 }
 0x215   :  { %2100 = vmatprep.subr.bf16.mxu1 %v12424_v47  ;;  %2293 = vmatprep.subr.bf16.mxu0 %v12425_v18  ;;  %v8302_v60 = vpack.c.bf16 %v1362_v62, %v1358_v24  ;;  %v1242_v1 = vadd.f32 %v7881_v35, %v1092_v27  ;;  %v12427_v47 = vunpack.c.l.s8.bf16 %v8094_v39  ;;  %v12428_v62 = vunpack.c.l.s8.bf16 %v8096_v10 }
 0x216   :  { %1977 = vmatprep.mubr.bf16.mxu0 %v8277_v5  ;;  %v1241_v29 = vadd.f32 %v7893_v48, %v1091_v57  ;;  %v1243_v31 = vadd.f32 %v7899_v33, %v1093_v14  ;;  %1785 = vmatmul.mubr.bf16.gmra.mxu1 %v8285_v26  ;;  %v1364_v18 = vmax.f32 %v1236_v16, 0.0  ;;  %v1238_v39 = vadd.f32 %v7881_v35, %v1088_v4  ;;  %v738_v57 = vpop.f32.mrf.mxu1  ;;  %v931_v15 = vpop.f32.mrf.mxu0 }
 0x217   :  { %12426 = vst [vmem:[#allocation25_spill] sm:$0xff] %v8302_v60  ;;  %2101 = vmatpush2.bf16.msra.mxu1 %v12427_v47  ;;  %v1368_v47 = vmax.f32 %v1240_v36, 0.0  ;;  %v1094_v41 = vmul.f32 %v7870_v49, %v736_v32  ;;  %1978 = vmatmul.mubr.bf16.gmra.mxu0 %v8302_v60  ;;  %v12429_v14 = vunpack.c.h.s8.bf16 %v8178_v12  ;;  %v1365_v26 = vmax.f32 %v1237_v17, 0.0 }
 0x218   :  { %2294 = vmatpush2.bf16.msra.mxu0 %v12428_v62  ;;  %v1367_v10 = vmax.f32 %v1239_v34, 0.0  ;;  %v1369_v62 = vmax.f32 %v1241_v29, 0.0  ;;  %v1371_v5 = vmax.f32 %v1243_v31, 0.0  ;;  %v12430_v27 = vunpack.c.h.s8.bf16 %v8180_v23  ;;  %v740_v24 = vpop.f32.mrf.mxu1  ;;  %v933_v60 = vpop.f32.mrf.mxu0 }
 0x219   :  { %2102 = vmatprep.subr.bf16.mxu1 %v12429_v14  ;;  %v1370_v16 = vmax.f32 %v1242_v1, 0.0  ;;  %v1096_v4 = vmul.f32 %v7878_v54, %v929_v25  ;;  %v1095_v36 = vmul.f32 %v7884_v55, %v738_v57  ;;  %v1097_v32 = vmul.f32 %v7896_v58, %v931_v15 }
 0x21a   :  { %2295 = vmatprep.subr.bf16.mxu0 %v12430_v27  ;;  %v1098_v17 = vmul.f32 %v7870_v49, %v740_v24  ;;  %v1100_v34 = vmul.f32 %v7878_v54, %v933_v60  ;;  %v8331_v29 = vpack.c.bf16 %v1369_v62, %v1365_v26  ;;  %v8333_v31 = vpack.c.bf16 %v1371_v5, %v1367_v10  ;;  %v742_v14 = vpop.f32.mrf.mxu1 }
 0x21b   :  { %2103 = vmatpush2.bf16.msra.mxu1 %v12431_v28  ;;  %v12434_v1 = vunpack.c.h.s8.bf16 %v8191_v6  ;;  %v1366_v25 = vmax.f32 %v1238_v39, 0.0  ;;  %v8337_v27 = vpack.c.bf16 %v1368_v47, %v1364_v18  ;;  %v1244_v15 = vadd.f32 %v7875_v53, %v1094_v41  ;;  %v935_v28 = vpop.f32.mrf.mxu0 }
 0x21c   :  { %12432 = vst [vmem:[#allocation26_spill] sm:$0xff] %v8331_v29  ;;  %12433 = vst [vmem:[#allocation27_spill] sm:$0xff] %v8333_v31  ;;  %v1245_v57 = vadd.f32 %v7893_v48, %v1095_v36  ;;  %v12436_v24 = vunpack.c.l.s8.bf16 %v8178_v12  ;;  %v12437_v26 = vunpack.c.l.s8.bf16 %v8180_v23  ;;  %v1247_v5 = vadd.f32 %v7899_v33, %v1097_v32  ;;  %1794 = vmatprep.mubr.bf16.mxu1 %v8331_v29  ;;  %v746_v12 = vpop.f32.mrf.mxu1 }
 0x21d   :  { %2296 = vmatpush2.bf16.msra.mxu0 %v12434_v1  ;;  %12435 = vst [vmem:[#allocation28_spill] sm:$0xff] %v8337_v27  ;;  %v1248_v60 = vadd.f32 %v7875_v53, %v1098_v17  ;;  %v1099_v39 = vmul.f32 %v7884_v55, %v742_v14  ;;  %v1101_v18 = vmul.f32 %v7896_v58, %v935_v28  ;;  %v939_v10 = vpop.f32.mrf.mxu0  ;;  %v12439_v23 = vunpack.c.l.s8.bf16 %v8189_v46 }
 0x21e   :  { %2104 = vmatprep.subr.bf16.mxu1 %v12436_v24  ;;  %2297 = vmatprep.subr.bf16.mxu0 %v12437_v26  ;;  %v8350_v41 = vpack.c.bf16 %v1370_v16, %v1366_v25  ;;  %v1250_v47 = vadd.f32 %v7881_v35, %v1100_v34  ;;  %v1599_v62 = vunpack.c.l.s8.bf16 %v8281_v37  ;;  %v1663_v36 = vunpack.c.l.s8.bf16 %v8283_v3  ;;  %v748_v24 = vpop.f32.mrf.mxu1 }
 0x21f   :  { %1987 = vmatprep.mubr.bf16.mxu0 %v8333_v31  ;;  %2105 = vmatpush2.bf16.msra.mxu1 %v12439_v23  ;;  %v1249_v32 = vadd.f32 %v7893_v48, %v1099_v39  ;;  %v1251_v17 = vadd.f32 %v7899_v33, %v1101_v18  ;;  %v12440_v16 = vunpack.c.l.s8.bf16 %v8191_v6  ;;  %v1598_v34 = vunpack.c.l.s8.bf16 %v8293_v43  ;;  %v941_v26 = vpop.f32.mrf.mxu0 }
 0x220   :  { %12438 = vst [vmem:[#allocation29_spill] sm:$0xff] %v8350_v41  ;;  %1795 = vmatmul.mubr.bf16.gmra.mxu1 %v8337_v27  ;;  %v1662_v1 = vunpack.c.l.s8.bf16 %v8295_v21  ;;  %v1372_v25 = vmax.f32 %v1244_v15, 0.0  ;;  %v1246_v46 = vadd.f32 %v7881_v35, %v1096_v4  ;;  %v1376_v14 = vmax.f32 %v1248_v60, 0.0  ;;  %1988 = vmatmul.mubr.bf16.gmra.mxu0 %v8350_v41  ;;  %v750_v41 = vpop.f32.mrf.mxu1 }
 0x221   :  { %2298 = vmatpush2.bf16.msra.mxu0 %v12440_v16  ;;  %v1102_v28 = vmul.f32 %v7870_v49, %v746_v12  ;;  %v12441_v39 = vunpack.c.h.s8.bf16 %v8281_v37  ;;  %v1373_v18 = vmax.f32 %v1245_v57, 0.0  ;;  %v1375_v6 = vmax.f32 %v1247_v5, 0.0  ;;  %v943_v31 = vpop.f32.mrf.mxu0 }
 0x222   :  { %v1377_v23 = vmax.f32 %v1249_v32, 0.0  ;;  %v1379_v16 = vmax.f32 %v1251_v17, 0.0  ;;  %v12442_v27 = vunpack.c.h.s8.bf16 %v8283_v3  ;;  %v1378_v15 = vmax.f32 %v1250_v47, 0.0 }
 0x223   :  { %2106 = vmatprep.subr.bf16.mxu1 %v12441_v39  ;;  %v1104_v4 = vmul.f32 %v7878_v54, %v939_v10  ;;  %v1103_v60 = vmul.f32 %v7884_v55, %v748_v24  ;;  %v1105_v12 = vmul.f32 %v7896_v58, %v941_v26  ;;  %v12443_v29 = vunpack.c.h.s8.bf16 %v8293_v43  ;;  %v752_v43 = vpop.f32.mrf.mxu1 }
 0x224   :  { %2299 = vmatprep.subr.bf16.mxu0 %v12442_v27  ;;  %v1106_v37 = vmul.f32 %v7870_v49, %v750_v41  ;;  %v1108_v57 = vmul.f32 %v7878_v54, %v943_v31  ;;  %v8379_v5 = vpack.c.bf16 %v1377_v23, %v1373_v18  ;;  %v8381_v3 = vpack.c.bf16 %v1379_v16, %v1375_v6 }
 0x225   :  { %2107 = vmatpush2.bf16.msra.mxu1 %v12443_v29  ;;  %v12444_v27 = vunpack.c.h.s8.bf16 %v8295_v21  ;;  %v1374_v47 = vmax.f32 %v1246_v46, 0.0  ;;  %v8385_v10 = vpack.c.bf16 %v1376_v14, %v1372_v25  ;;  %v1252_v32 = vadd.f32 %v7875_v53, %v1102_v28  ;;  %v945_v29 = vpop.f32.mrf.mxu0  ;;  %v8394_v25 = vld [vmem:[#allocation8 + $0xc8] sm:$0xff] }
 0x226   :  { %v1253_v17 = vadd.f32 %v7893_v48, %v1103_v60  ;;  %2108 = vmatprep.subr.bf16.mxu1 %v1599_v62  ;;  %v1255_v31 = vadd.f32 %v7899_v33, %v1105_v12  ;;  %v1256_v41 = vadd.f32 %v7875_v53, %v1106_v37  ;;  %v1107_v24 = vmul.f32 %v7884_v55, %v752_v43  ;;  %v756_v62 = vpop.f32.mrf.mxu1 }
 0x227   :  { %2300 = vmatpush2.bf16.msra.mxu0 %v12444_v27  ;;  %v1109_v21 = vmul.f32 %v7896_v58, %v945_v29  ;;  %1804 = vmatprep.mubr.bf16.mxu1 %v8379_v5  ;;  %v8396_v46 = vpack.c.bf16 %v1378_v15, %v1374_v47  ;;  %v1254_v14 = vadd.f32 %v7881_v35, %v1104_v4  ;;  %v3141_v26 = vunpack.c.h.s8.bf16 %v8394_v25 }
 0x228   :  { %2301 = vmatprep.subr.bf16.mxu0 %v1663_v36  ;;  %v1258_v28 = vadd.f32 %v7881_v35, %v1108_v57  ;;  %1997 = vmatprep.mubr.bf16.mxu0 %v8381_v3  ;;  %v949_v36 = vpop.f32.mrf.mxu0  ;;  %v1257_v39 = vadd.f32 %v7893_v48, %v1107_v24  ;;  %v1380_v6 = vmax.f32 %v1252_v32, 0.0  ;;  %v1384_v23 = vmax.f32 %v1256_v41, 0.0  ;;  %v758_v15 = vpop.f32.mrf.mxu1 }
 0x229   :  { %2109 = vmatpush2.bf16.msra.mxu1 %v1598_v34  ;;  %v1259_v18 = vadd.f32 %v7899_v33, %v1109_v21  ;;  %v1110_v16 = vmul.f32 %v7870_v49, %v756_v62  ;;  %1998 = vmatmul.mubr.bf16.gmra.mxu0 %v8396_v46  ;;  %v1381_v60 = vmax.f32 %v1253_v17, 0.0  ;;  %v1383_v34 = vmax.f32 %v1255_v31, 0.0 }
 0x22a   :  { %1805 = vmatmul.mubr.bf16.gmra.mxu1 %v8385_v10  ;;  %v951_v4 = vpop.f32.mrf.mxu0  ;;  %3340 = vmatprep.subr.bf16.mxu1 %v3141_v26  ;;  %v1385_v12 = vmax.f32 %v1257_v39, 0.0  ;;  %v1382_v57 = vmax.f32 %v1254_v14, 0.0  ;;  %v1386_v27 = vmax.f32 %v1258_v28, 0.0  ;;  %v1111_v47 = vmul.f32 %v7884_v55, %v758_v15 }
 0x22b   :  { %2302 = vmatpush2.bf16.msra.mxu0 %v1662_v1  ;;  %v1387_v37 = vmax.f32 %v1259_v18, 0.0  ;;  %v1113_v43 = vmul.f32 %v7896_v58, %v951_v4  ;;  %v760_v1 = vpop.f32.mrf.mxu1  ;;  %v8415_v17 = vpack.c.bf16 %v1384_v23, %v1380_v6  ;;  %v1260_v31 = vadd.f32 %v7875_v53, %v1110_v16 }
 0x22c   :  { %v953_v32 = vpop.f32.mrf.mxu0  ;;  %v1114_v29 = vmul.f32 %v7870_v49, %v760_v1  ;;  %v8411_v24 = vpack.c.bf16 %v1385_v12, %v1381_v60  ;;  %v1112_v14 = vmul.f32 %v7878_v54, %v949_v36  ;;  %v1261_v28 = vadd.f32 %v7893_v48, %v1111_v47 }
 0x22d   :  { %v1116_v41 = vmul.f32 %v7878_v54, %v953_v32  ;;  %v8413_v21 = vpack.c.bf16 %v1387_v37, %v1383_v34  ;;  %12447 = vst [vmem:[#allocation32_spill] sm:$0xff] %v8415_v17  ;;  %v762_v62 = vpop.f32.mrf.mxu1  ;;  %v1263_v39 = vadd.f32 %v7899_v33, %v1113_v43  ;;  %v8425_v6 = vpack.c.bf16 %v1386_v27, %v1382_v57 }
 0x22e   :  { %12445 = vst [vmem:[#allocation30_spill] sm:$0xff] %v8411_v24  ;;  %v955_v26 = vpop.f32.mrf.mxu0  ;;  %v1264_v18 = vadd.f32 %v7875_v53, %v1114_v29  ;;  %v1115_v15 = vmul.f32 %v7884_v55, %v762_v62  ;;  %1814 = vmatprep.mubr.bf16.mxu1 %v8411_v24  ;;  %v1388_v12 = vmax.f32 %v1260_v31, 0.0  ;;  %v1262_v37 = vadd.f32 %v7881_v35, %v1112_v14 }
 0x22f   :  { %12446 = vst [vmem:[#allocation31_spill] sm:$0xff] %v8413_v21  ;;  %v1117_v4 = vmul.f32 %v7896_v58, %v955_v26  ;;  %12448 = vst [vmem:[#allocation33_spill] sm:$0xff] %v8425_v6  ;;  %v1266_v23 = vadd.f32 %v7881_v35, %v1116_v41  ;;  %2007 = vmatprep.mubr.bf16.mxu0 %v8413_v21  ;;  %v766_v36 = vpop.f32.mrf.mxu1  ;;  %v1389_v1 = vmax.f32 %v1261_v28, 0.0  ;;  %v1391_v32 = vmax.f32 %v1263_v39, 0.0 }
 0x230   :  { %v959_v16 = vpop.f32.mrf.mxu0  ;;  %v1265_v60 = vadd.f32 %v7893_v48, %v1115_v15  ;;  %v1392_v47 = vmax.f32 %v1264_v18, 0.0  ;;  %v1118_v43 = vmul.f32 %v7870_v49, %v766_v36  ;;  %v1390_v28 = vmax.f32 %v1262_v37, 0.0 }
 0x231   :  { %v1267_v34 = vadd.f32 %v7899_v33, %v1117_v4  ;;  %2008 = vmatmul.mubr.bf16.gmra.mxu0 %v8425_v6  ;;  %v768_v57 = vpop.f32.mrf.mxu1  ;;  %v1394_v62 = vmax.f32 %v1266_v23, 0.0  ;;  %v1120_v26 = vmul.f32 %v7878_v54, %v959_v16 }
 0x232   :  { %1815 = vmatmul.mubr.bf16.gmra.mxu1 %v8415_v17  ;;  %v961_v27 = vpop.f32.mrf.mxu0  ;;  %v1393_v29 = vmax.f32 %v1265_v60, 0.0  ;;  %v1119_v15 = vmul.f32 %v7884_v55, %v768_v57  ;;  %v8444_v39 = vpack.c.bf16 %v1392_v47, %v1388_v12  ;;  %v1268_v23 = vadd.f32 %v7875_v53, %v1118_v43 }
 0x233   :  { %v1395_v41 = vmax.f32 %v1267_v34, 0.0  ;;  %v1121_v31 = vmul.f32 %v7896_v58, %v961_v27  ;;  %v770_v4 = vpop.f32.mrf.mxu1  ;;  %v1270_v12 = vadd.f32 %v7881_v35, %v1120_v26 }
 0x234   :  { %v963_v14 = vpop.f32.mrf.mxu0  ;;  %v1122_v18 = vmul.f32 %v7870_v49, %v770_v4  ;;  %v8440_v6 = vpack.c.bf16 %v1393_v29, %v1389_v1  ;;  %12451 = vst [vmem:[#allocation36_spill] sm:$0xff] %v8444_v39  ;;  %v1269_v16 = vadd.f32 %v7893_v48, %v1119_v15  ;;  %v1396_v15 = vmax.f32 %v1268_v23, 0.0 }
 0x235   :  { %v1124_v36 = vmul.f32 %v7878_v54, %v963_v14  ;;  %v8442_v17 = vpack.c.bf16 %v1395_v41, %v1391_v32  ;;  %v772_v60 = vpop.f32.mrf.mxu1  ;;  %v1271_v57 = vadd.f32 %v7899_v33, %v1121_v31  ;;  %v8453_v32 = vpack.c.bf16 %v1394_v62, %v1390_v28 }
 0x236   :  { %12449 = vst [vmem:[#allocation34_spill] sm:$0xff] %v8440_v6  ;;  %v965_v34 = vpop.f32.mrf.mxu0  ;;  %v1272_v27 = vadd.f32 %v7875_v53, %v1122_v18  ;;  %v1123_v4 = vmul.f32 %v7884_v55, %v772_v60  ;;  %1824 = vmatprep.mubr.bf16.mxu1 %v8440_v6  ;;  %v1397_v18 = vmax.f32 %v1269_v16, 0.0 }
 0x237   :  { %12450 = vst [vmem:[#allocation35_spill] sm:$0xff] %v8442_v17  ;;  %v1125_v1 = vmul.f32 %v7896_v58, %v965_v34  ;;  %12452 = vst [vmem:[#allocation37_spill] sm:$0xff] %v8453_v32  ;;  %v1274_v37 = vadd.f32 %v7881_v35, %v1124_v36  ;;  %2017 = vmatprep.mubr.bf16.mxu0 %v8442_v17  ;;  %v776_v47 = vpop.f32.mrf.mxu1  ;;  %v1399_v36 = vmax.f32 %v1271_v57, 0.0  ;;  %v1398_v34 = vmax.f32 %v1270_v12, 0.0 }
 0x238   :  { %v969_v43 = vpop.f32.mrf.mxu0  ;;  %v1273_v29 = vadd.f32 %v7893_v48, %v1123_v4  ;;  %v1400_v31 = vmax.f32 %v1272_v27, 0.0  ;;  %v1126_v14 = vmul.f32 %v7870_v49, %v776_v47 }
 0x239   :  { %v1275_v41 = vadd.f32 %v7899_v33, %v1125_v1  ;;  %2018 = vmatmul.mubr.bf16.gmra.mxu0 %v8453_v32  ;;  %v778_v62 = vpop.f32.mrf.mxu1  ;;  %v1402_v17 = vmax.f32 %v1274_v37, 0.0  ;;  %v1128_v12 = vmul.f32 %v7878_v54, %v969_v43 }
 0x23a   :  { %1825 = vmatmul.mubr.bf16.gmra.mxu1 %v8444_v39  ;;  %v971_v26 = vpop.f32.mrf.mxu0  ;;  %v1401_v28 = vmax.f32 %v1273_v29, 0.0  ;;  %v1127_v4 = vmul.f32 %v7884_v55, %v778_v62  ;;  %v8471_v16 = vpack.c.bf16 %v1400_v31, %v1396_v15  ;;  %v1276_v57 = vadd.f32 %v7875_v53, %v1126_v14 }
 0x23b   :  { %v1403_v60 = vmax.f32 %v1275_v41, 0.0  ;;  %v1129_v1 = vmul.f32 %v7896_v58, %v971_v26  ;;  %v780_v6 = vpop.f32.mrf.mxu1  ;;  %v8481_v15 = vpack.c.bf16 %v1402_v17, %v1398_v34 }
 0x23c   :  { %v973_v39 = vpop.f32.mrf.mxu0  ;;  %v1130_v23 = vmul.f32 %v7870_v49, %v780_v6  ;;  %v8467_v47 = vpack.c.bf16 %v1401_v28, %v1397_v18  ;;  %12455 = vst [vmem:[#allocation40_spill] sm:$0xff] %v8471_v16  ;;  %v1277_v37 = vadd.f32 %v7893_v48, %v1127_v4  ;;  %v1404_v28 = vmax.f32 %v1276_v57, 0.0 }
 0x23d   :  { %v1132_v27 = vmul.f32 %v7878_v54, %v973_v39  ;;  %v8469_v32 = vpack.c.bf16 %v1403_v60, %v1399_v36  ;;  %v782_v29 = vpop.f32.mrf.mxu1  ;;  %v1279_v62 = vadd.f32 %v7899_v33, %v1129_v1  ;;  %12456 = vst [vmem:[#allocation41_spill] sm:$0xff] %v8481_v15  ;;  %v1278_v60 = vadd.f32 %v7881_v35, %v1128_v12 }
 0x23e   :  { %12453 = vst [vmem:[#allocation38_spill] sm:$0xff] %v8467_v47  ;;  %v975_v41 = vpop.f32.mrf.mxu0  ;;  %v1280_v6 = vadd.f32 %v7875_v53, %v1130_v23  ;;  %v1131_v39 = vmul.f32 %v7884_v55, %v782_v29  ;;  %1834 = vmatprep.mubr.bf16.mxu1 %v8467_v47  ;;  %v1405_v23 = vmax.f32 %v1277_v37, 0.0  ;;  %v8500_v37 = vld [vmem:[#allocation8 + $0x2c8] sm:$0xff] }
 0x23f   :  { %12454 = vst [vmem:[#allocation39_spill] sm:$0xff] %v8469_v32  ;;  %v1133_v26 = vmul.f32 %v7896_v58, %v975_v41  ;;  %v1282_v31 = vadd.f32 %v7881_v35, %v1132_v27  ;;  %2027 = vmatprep.mubr.bf16.mxu0 %v8469_v32  ;;  %v786_v43 = vpop.f32.mrf.mxu1  ;;  %v1407_v27 = vmax.f32 %v1279_v62, 0.0  ;;  %v1406_v62 = vmax.f32 %v1278_v60, 0.0 }
 0x240   :  { %v979_v14 = vpop.f32.mrf.mxu0  ;;  %v1281_v18 = vadd.f32 %v7893_v48, %v1131_v39  ;;  %v1408_v4 = vmax.f32 %v1280_v6, 0.0  ;;  %v1134_v1 = vmul.f32 %v7870_v49, %v786_v43 }
 0x241   :  { %v1283_v36 = vadd.f32 %v7899_v33, %v1133_v26  ;;  %2028 = vmatmul.mubr.bf16.gmra.mxu0 %v8481_v15  ;;  %v788_v17 = vpop.f32.mrf.mxu1  ;;  %v1410_v32 = vmax.f32 %v1282_v31, 0.0  ;;  %v1136_v39 = vmul.f32 %v7878_v54, %v979_v14 }
 0x242   :  { %1835 = vmatmul.mubr.bf16.gmra.mxu1 %v8471_v16  ;;  %v981_v34 = vpop.f32.mrf.mxu0  ;;  %v1409_v29 = vmax.f32 %v1281_v18, 0.0  ;;  %v1135_v26 = vmul.f32 %v7884_v55, %v788_v17  ;;  %v8502_v31 = vpack.c.bf16 %v1408_v4, %v1404_v28  ;;  %v1284_v14 = vadd.f32 %v7875_v53, %v1134_v1 }
 0x243   :  { %v1411_v41 = vmax.f32 %v1283_v36, 0.0  ;;  %v1137_v57 = vmul.f32 %v7896_v58, %v981_v34  ;;  %v790_v16 = vpop.f32.mrf.mxu1  ;;  %v1286_v28 = vadd.f32 %v7881_v35, %v1136_v39 }
 0x244   :  { %v983_v12 = vpop.f32.mrf.mxu0  ;;  %v1138_v6 = vmul.f32 %v7870_v49, %v790_v16  ;;  %v8496_v15 = vpack.c.bf16 %v1409_v29, %v1405_v23  ;;  %12459 = vst [vmem:[#allocation44_spill] sm:$0xff] %v8502_v31  ;;  %v1285_v18 = vadd.f32 %v7893_v48, %v1135_v26  ;;  %v8511_v29 = vpack.c.bf16 %v1410_v32, %v1406_v62 }
 0x245   :  { %v1140_v43 = vmul.f32 %v7878_v54, %v983_v12  ;;  %v8498_v47 = vpack.c.bf16 %v1411_v41, %v1407_v27  ;;  %v792_v36 = vpop.f32.mrf.mxu1  ;;  %v1287_v34 = vadd.f32 %v7899_v33, %v1137_v57  ;;  %v3269_v41 = vunpack.c.h.s8.bf16 %v8500_v37 }
 0x246   :  { %12457 = vst [vmem:[#allocation42_spill] sm:$0xff] %v8496_v15  ;;  %v985_v17 = vpop.f32.mrf.mxu0  ;;  %v1288_v16 = vadd.f32 %v7875_v53, %v1138_v6  ;;  %v1139_v23 = vmul.f32 %v7884_v55, %v792_v36  ;;  %1844 = vmatprep.mubr.bf16.mxu1 %v8496_v15  ;;  %12460 = vst [vmem:[#allocation45_spill] sm:$0xff] %v8511_v29  ;;  %v1412_v12 = vmax.f32 %v1284_v14, 0.0  ;;  %v1413_v62 = vmax.f32 %v1285_v18, 0.0 }
 0x247   :  { %12458 = vst [vmem:[#allocation43_spill] sm:$0xff] %v8498_v47  ;;  %v1141_v27 = vmul.f32 %v7896_v58, %v985_v17  ;;  %v1290_v60 = vadd.f32 %v7881_v35, %v1140_v43  ;;  %2037 = vmatprep.mubr.bf16.mxu0 %v8498_v47  ;;  %v796_v4 = vpop.f32.mrf.mxu1  ;;  %3533 = vmatprep.subr.bf16.mxu0 %v3269_v41  ;;  %v1415_v36 = vmax.f32 %v1287_v34, 0.0  ;;  %v1414_v15 = vmax.f32 %v1286_v28, 0.0 }
 0x248   :  { %v989_v1 = vpop.f32.mrf.mxu0  ;;  %v1289_v26 = vadd.f32 %v7893_v48, %v1139_v23  ;;  %v1416_v6 = vmax.f32 %v1288_v16, 0.0  ;;  %v1142_v32 = vmul.f32 %v7870_v49, %v796_v4 }
 0x249   :  { %v1291_v57 = vadd.f32 %v7899_v33, %v1141_v27  ;;  %2038 = vmatmul.mubr.bf16.gmra.mxu0 %v8511_v29  ;;  %v798_v39 = vpop.f32.mrf.mxu1  ;;  %v1418_v21 = vmax.f32 %v1290_v60, 0.0  ;;  %v1144_v28 = vmul.f32 %v7878_v54, %v989_v1 }
 0x24a   :  { %1845 = vmatmul.mubr.bf16.gmra.mxu1 %v8502_v31  ;;  %v991_v43 = vpop.f32.mrf.mxu0  ;;  %v1417_v17 = vmax.f32 %v1289_v26, 0.0  ;;  %v1143_v23 = vmul.f32 %v7884_v55, %v798_v39  ;;  %v8530_v18 = vpack.c.bf16 %v1416_v6, %v1412_v12  ;;  %v1292_v34 = vadd.f32 %v7875_v53, %v1142_v32 }
 0x24b   :  { %v1419_v47 = vmax.f32 %v1291_v57, 0.0  ;;  %v1145_v27 = vmul.f32 %v7896_v58, %v991_v43  ;;  %v800_v31 = vpop.f32.mrf.mxu1 }
 0x24c   :  { %v993_v14 = vpop.f32.mrf.mxu0  ;;  %v1146_v16 = vmul.f32 %v7870_v49, %v800_v31  ;;  %v8526_v29 = vpack.c.bf16 %v1417_v17, %v1413_v62  ;;  %12462 = vst [vmem:[#allocation47_spill] sm:$0xff] %v8530_v18  ;;  %v1293_v60 = vadd.f32 %v7893_v48, %v1143_v23  ;;  %v1294_v17 = vadd.f32 %v7881_v35, %v1144_v28 }
 0x24d   :  { %v1148_v4 = vmul.f32 %v7878_v54, %v993_v14  ;;  %v8528_v24 = vpack.c.bf16 %v1419_v47, %v1415_v36  ;;  %v802_v41 = vpop.f32.mrf.mxu1  ;;  %v1295_v57 = vadd.f32 %v7899_v33, %v1145_v27  ;;  %v8540_v47 = vpack.c.bf16 %v1418_v21, %v1414_v15 }
 0x24e   :  { %v995_v26 = vpop.f32.mrf.mxu0  ;;  %v1296_v31 = vadd.f32 %v7875_v53, %v1146_v16  ;;  %v1147_v39 = vmul.f32 %v7884_v55, %v802_v41  ;;  %1854 = vmatprep.mubr.bf16.mxu1 %v8526_v29  ;;  %v1420_v36 = vmax.f32 %v1292_v34, 0.0  ;;  %v1421_v27 = vmax.f32 %v1293_v60, 0.0 }
 0x24f   :  { %12461 = vst [vmem:[#allocation46_spill] sm:$0xff] %v8528_v24  ;;  %v1149_v43 = vmul.f32 %v7896_v58, %v995_v26  ;;  %12463 = vst [vmem:[#allocation48_spill] sm:$0xff] %v8540_v47  ;;  %v1298_v12 = vadd.f32 %v7881_v35, %v1148_v4  ;;  %2047 = vmatprep.mubr.bf16.mxu0 %v8528_v24  ;;  %v806_v1 = vpop.f32.mrf.mxu1  ;;  %v1423_v14 = vmax.f32 %v1295_v57, 0.0  ;;  %v1422_v60 = vmax.f32 %v1294_v17, 0.0 }
 0x250   :  { %v999_v6 = vpop.f32.mrf.mxu0  ;;  %v1297_v32 = vadd.f32 %v7893_v48, %v1147_v39  ;;  %v1424_v23 = vmax.f32 %v1296_v31, 0.0  ;;  %v1150_v26 = vmul.f32 %v7870_v49, %v806_v1 }
 0x251   :  { %v1299_v62 = vadd.f32 %v7899_v33, %v1149_v43  ;;  %2048 = vmatmul.mubr.bf16.gmra.mxu0 %v8540_v47  ;;  %v808_v21 = vpop.f32.mrf.mxu1  ;;  %v1426_v41 = vmax.f32 %v1298_v12, 0.0  ;;  %v1152_v12 = vmul.f32 %v7878_v54, %v999_v6 }
 0x252   :  { %1855 = vmatmul.mubr.bf16.gmra.mxu1 %v8530_v18  ;;  %v1001_v15 = vpop.f32.mrf.mxu0  ;;  %v1425_v16 = vmax.f32 %v1297_v32, 0.0  ;;  %v1151_v39 = vmul.f32 %v7884_v55, %v808_v21  ;;  %v8558_v57 = vpack.c.bf16 %v1424_v23, %v1420_v36 }
 0x253   :  { %v1427_v4 = vmax.f32 %v1299_v62, 0.0  ;;  %v1153_v43 = vmul.f32 %v7896_v58, %v1001_v15  ;;  %v810_v18 = vpop.f32.mrf.mxu1 }
 0x254   :  { %v1003_v34 = vpop.f32.mrf.mxu0  ;;  %v1154_v28 = vmul.f32 %v7870_v49, %v810_v18  ;;  %v8554_v47 = vpack.c.bf16 %v1425_v16, %v1421_v27  ;;  %v1301_v1 = vadd.f32 %v7893_v48, %v1151_v39  ;;  %v8567_v27 = vpack.c.bf16 %v1426_v41, %v1422_v60 }
 0x255   :  { %v1156_v31 = vmul.f32 %v7878_v54, %v1003_v34  ;;  %v8556_v24 = vpack.c.bf16 %v1427_v4, %v1423_v14  ;;  %v812_v32 = vpop.f32.mrf.mxu1  ;;  %v1303_v21 = vadd.f32 %v7899_v33, %v1153_v43  ;;  %v1300_v54 = vadd.f32 %v7875_v53, %v1150_v26  ;;  %v3044_v34 = vld [vmem:[#allocation8 + $0x2c0] sm:$0xff] }
 0x256   :  { %v1005_v62 = vpop.f32.mrf.mxu0  ;;  %v1304_v15 = vadd.f32 %v7875_v53, %v1154_v28  ;;  %v1155_v49 = vmul.f32 %v7884_v55, %v812_v32  ;;  %1864 = vmatprep.mubr.bf16.mxu1 %v8554_v47  ;;  %v1302_v55 = vadd.f32 %v7881_v35, %v1152_v12  ;;  %v1429_v23 = vmax.f32 %v1301_v1, 0.0  ;;  %v2973_v12 = vld [vmem:[#allocation8 + $0x88] sm:$0xff] }
 0x257   :  { %v1157_v18 = vmul.f32 %v7896_v58, %v1005_v62  ;;  %v1306_v36 = vadd.f32 %v7881_v35, %v1156_v31  ;;  %2057 = vmatprep.mubr.bf16.mxu0 %v8556_v24  ;;  %v1431_v58 = vmax.f32 %v1303_v21, 0.0  ;;  %v1428_v39 = vmax.f32 %v1300_v54, 0.0  ;;  %v3037_v32 = vld [vmem:[#allocation8 + $0x288] sm:$0xff]  ;;  %v2972_v62 = vld [vmem:[#allocation8 + $0x80] sm:$0xff] }
 0x258   :  { %v1305_v6 = vadd.f32 %v7893_v48, %v1155_v49  ;;  %v1432_v14 = vmax.f32 %v1304_v15, 0.0  ;;  %v1430_v48 = vmax.f32 %v1302_v55, 0.0  ;;  %v3133_v31 = vunpack.c.l.s8.bf16 %v8394_v25  ;;  %v3029_v49 = vld [vmem:[#allocation8 + $0x248] sm:$0xff]  ;;  %v2964_v54 = vld [vmem:[#allocation8 + $0x40] sm:$0xff] }
 0x259   :  { %v1307_v17 = vadd.f32 %v7899_v33, %v1157_v18  ;;  %2058 = vmatmul.mubr.bf16.gmra.mxu0 %v8567_v27  ;;  %v1434_v41 = vmax.f32 %v1306_v36, 0.0  ;;  %v2980_v33 = vld [vmem:[#allocation8 + $0xc0] sm:$0xff]  ;;  %v3268_v60 = vunpack.c.h.s8.bf16 %v3044_v34  ;;  %v3261_v1 = vunpack.c.l.s8.bf16 %v8500_v37 }
 0x25a   :  { %1865 = vmatmul.mubr.bf16.gmra.mxu1 %v8558_v57  ;;  %v1433_v16 = vmax.f32 %v1305_v6, 0.0  ;;  %v8581_v26 = vpack.c.bf16 %v1432_v14, %v1428_v39  ;;  %v3140_v28 = vunpack.c.h.s8.bf16 %v2980_v33  ;;  %v3260_v25 = vunpack.c.l.s8.bf16 %v3044_v34  ;;  %v3077_v34 = vld [vmem:[#allocation8 + $0x3c8] sm:$0xff] }
 0x25b   :  { %v1435_v4 = vmax.f32 %v1307_v17, 0.0  ;;  %v8585_v35 = vpack.c.bf16 %v1434_v41, %v1430_v48  ;;  %v3253_v21 = vunpack.c.h.s8.bf16 %v3037_v32  ;;  %v3124_v15 = vunpack.c.h.s8.bf16 %v2972_v62 }
 0x25c   :  { %v8577_v43 = vpack.c.bf16 %v1433_v16, %v1429_v23  ;;  %v3117_v37 = vunpack.c.l.s8.bf16 %v2973_v12  ;;  %v3116_v18 = vunpack.c.l.s8.bf16 %v2972_v62  ;;  %v3237_v17 = vunpack.c.h.s8.bf16 %v3029_v49 }
 0x25d   :  { %v8579_v53 = vpack.c.bf16 %v1435_v4, %v1431_v58  ;;  %v3108_v55 = vunpack.c.h.s8.bf16 %v2964_v54  ;;  %v3021_v58 = vld [vmem:[#allocation8 + $0x208] sm:$0xff]  ;;  %v3100_v14 = vunpack.c.l.s8.bf16 %v2964_v54  ;;  %v2956_v4 = vld [vmem:[#allocation8] sm:$0xff] }
 0x25e   :  { %1874 = vmatprep.mubr.bf16.mxu1 %v8577_v43  ;;  %v3221_v39 = vunpack.c.h.s8.bf16 %v3021_v58  ;;  %v3092_v48 = vunpack.c.h.s8.bf16 %v2956_v4 }
 0x25f   :  { %2067 = vmatprep.mubr.bf16.mxu0 %v8579_v53 }
 0x261   :  { %2068 = vmatmul.mubr.bf16.gmra.mxu0 %v8585_v35 }
 0x262   :  { %1875 = vmatmul.mubr.bf16.gmra.mxu1 %v8581_v26  ;;  %2303 = vmatprep.mubr.bf16.mxu0 %v7980_v56  ;;  %v3125_v56 = vunpack.c.h.s8.bf16 %v2973_v12 }
 0x263   :  { %2110 = vmatprep.mubr.bf16.mxu1 %v7978_v22  ;;  %v3132_v22 = vunpack.c.l.s8.bf16 %v2980_v33 }
 0x269   :  { %2304 = vmatmul.mubr.bf16.vlgmr.msra.gmra.mxu0 %v7976_v45 }
 0x26a   :  { %2111 = vmatmul.mubr.bf16.vlgmr.msra.gmra.mxu1 %v7974_v30  ;;  %2313 = vmatprep.mubr.bf16.mxu0 %v8025_v20  ;;  %v3036_v30 = vld [vmem:[#allocation8 + $0x280] sm:$0xff]  ;;  %v3245_v20 = vunpack.c.l.s8.bf16 %v3037_v32 }
 0x26b   :  { %2120 = vmatprep.mubr.bf16.mxu1 %v8023_v7  ;;  %3341 = vmatpush1.bf16.msra.mxu1 %v3140_v28  ;;  %v3252_v45 = vunpack.c.h.s8.bf16 %v3036_v30  ;;  %v2965_v7 = vld [vmem:[#allocation8 + $0x48] sm:$0xff]  ;;  %v3244_v6 = vunpack.c.l.s8.bf16 %v3036_v30  ;;  %v3084_v28 = vunpack.c.l.s8.bf16 %v2956_v4 }
 0x26c   :  { %3342 = vmatprep.subr.bf16.mxu1 %v3133_v31  ;;  %3534 = vmatpush1.bf16.msra.mxu0 %v3268_v60  ;;  %v3109_v36 = vunpack.c.h.s8.bf16 %v2965_v7  ;;  %v3101_v23 = vunpack.c.l.s8.bf16 %v2965_v7  ;;  %v3012_v60 = vld [vmem:[#allocation8 + $0x1c0] sm:$0xff]  ;;  %v12466_v7 = vld [vmem:[#allocation23_spill] sm:$0xff] }
 0x26d   :  { %3535 = vmatprep.subr.bf16.mxu0 %v3261_v1  ;;  %v3333_v1 = vunpack.c.h.s8.bf16 %v3077_v34  ;;  %v3204_v32 = vunpack.c.h.s8.bf16 %v3012_v60  ;;  %v3196_v62 = vunpack.c.l.s8.bf16 %v3012_v60  ;;  %v12474_v60 = vld [vmem:[#allocation31_spill] sm:$0xff] }
 0x26f   :  { %3343 = vmatpush1.bf16.msra.mxu1 %v3132_v22 }
 0x270   :  { %3344 = vmatprep.subr.bf16.mxu1 %v3125_v56  ;;  %3536 = vmatpush1.bf16.msra.mxu0 %v3260_v25  ;;  %v12464_v56 = vld [vmem:[#allocation21_spill] sm:$0xff] }
 0x271   :  { %3537 = vmatprep.subr.bf16.mxu0 %v3253_v21  ;;  %2314 = vmatmul.mubr.bf16.gmra.mxu0 %v8027_v40  ;;  %v3004_v21 = vld [vmem:[#allocation8 + $0x180] sm:$0xff] }
 0x272   :  { %2121 = vmatmul.mubr.bf16.gmra.mxu1 %v8021_v61  ;;  %2323 = vmatprep.mubr.bf16.mxu0 %v8082_v51  ;;  %v3028_v61 = vld [vmem:[#allocation8 + $0x240] sm:$0xff]  ;;  %v3229_v51 = vunpack.c.l.s8.bf16 %v3029_v49 }
 0x273   :  { %2130 = vmatprep.mubr.bf16.mxu1 %v8080_v19  ;;  %3345 = vmatpush1.bf16.msra.mxu1 %v3124_v15  ;;  %v3236_v40 = vunpack.c.h.s8.bf16 %v3028_v61  ;;  %v2957_v19 = vld [vmem:[#allocation8 + $0x8] sm:$0xff]  ;;  %v3228_v41 = vunpack.c.l.s8.bf16 %v3028_v61  ;;  %v3188_v15 = vunpack.c.h.s8.bf16 %v3004_v21  ;;  %v3068_v49 = vld [vmem:[#allocation8 + $0x380] sm:$0xff] }
 0x274   :  { %3346 = vmatprep.subr.bf16.mxu1 %v3117_v37  ;;  %3538 = vmatpush1.bf16.msra.mxu0 %v3252_v45  ;;  %v3093_v16 = vunpack.c.h.s8.bf16 %v2957_v19  ;;  %v3085_v33 = vunpack.c.l.s8.bf16 %v2957_v19  ;;  %v2997_v37 = vld [vmem:[#allocation8 + $0x148] sm:$0xff]  ;;  %v3316_v54 = vunpack.c.h.s8.bf16 %v3068_v49 }
 0x275   :  { %3539 = vmatprep.subr.bf16.mxu0 %v3245_v20  ;;  %v3069_v45 = vld [vmem:[#allocation8 + $0x388] sm:$0xff]  ;;  %v3180_v20 = vunpack.c.l.s8.bf16 %v3004_v21  ;;  %v12478_v21 = vld [vmem:[#allocation35_spill] sm:$0xff] }
 0x276   :  { %v3309_v61 = vunpack.c.l.s8.bf16 %v3069_v45 }
 0x277   :  { %3347 = vmatpush1.bf16.msra.mxu1 %v3116_v18  ;;  %v3173_v18 = vunpack.c.h.s8.bf16 %v2997_v37 }
 0x278   :  { %3348 = vmatprep.subr.bf16.mxu1 %v3109_v36  ;;  %3540 = vmatpush1.bf16.msra.mxu0 %v3244_v6  ;;  %v2996_v36 = vld [vmem:[#allocation8 + $0x140] sm:$0xff]  ;;  %v3165_v6 = vunpack.c.l.s8.bf16 %v2997_v37 }
 0x279   :  { %3541 = vmatprep.subr.bf16.mxu0 %v3237_v17  ;;  %2324 = vmatmul.mubr.bf16.gmra.mxu0 %v8102_v11  ;;  %v12467_v17 = vld [vmem:[#allocation24_spill] sm:$0xff]  ;;  %v3164_v19 = vunpack.c.l.s8.bf16 %v2996_v36 }
 0x27a   :  { %2131 = vmatmul.mubr.bf16.gmra.mxu1 %v8074_v50  ;;  %2333 = vmatprep.mubr.bf16.mxu0 %v8133_v9  ;;  %v3020_v50 = vld [vmem:[#allocation8 + $0x200] sm:$0xff]  ;;  %v3213_v9 = vunpack.c.l.s8.bf16 %v3021_v58 }
 0x27b   :  { %2140 = vmatprep.mubr.bf16.mxu1 %v8131_v2  ;;  %3349 = vmatpush1.bf16.msra.mxu1 %v3108_v55  ;;  %v3220_v11 = vunpack.c.h.s8.bf16 %v3020_v50  ;;  %v3013_v2 = vld [vmem:[#allocation8 + $0x1c8] sm:$0xff]  ;;  %v3212_v12 = vunpack.c.l.s8.bf16 %v3020_v50  ;;  %v3052_v37 = vld [vmem:[#allocation8 + $0x300] sm:$0xff] }
 0x27c   :  { %3350 = vmatprep.subr.bf16.mxu1 %v3101_v23  ;;  %3542 = vmatpush1.bf16.msra.mxu0 %v3236_v40  ;;  %v3205_v31 = vunpack.c.h.s8.bf16 %v3013_v2  ;;  %v3197_v22 = vunpack.c.l.s8.bf16 %v3013_v2  ;;  %v12468_v55 = vld [vmem:[#allocation25_spill] sm:$0xff]  ;;  %v12469_v23 = vld [vmem:[#allocation26_spill] sm:$0xff]  ;;  %v12470_v40 = vld [vmem:[#allocation27_spill] sm:$0xff] }
 0x27d   :  { %3543 = vmatprep.subr.bf16.mxu0 %v3229_v51  ;;  %v3308_v51 = vunpack.c.l.s8.bf16 %v3068_v49  ;;  %v12472_v50 = vld [vmem:[#allocation29_spill] sm:$0xff] }
 0x27f   :  { %3351 = vmatpush1.bf16.msra.mxu1 %v3100_v14  ;;  %v2988_v14 = vld [vmem:[#allocation8 + $0x100] sm:$0xff] }
 0x280   :  { %3352 = vmatprep.subr.bf16.mxu1 %v3093_v16  ;;  %3544 = vmatpush1.bf16.msra.mxu0 %v3228_v41  ;;  %v3156_v16 = vunpack.c.h.s8.bf16 %v2988_v14  ;;  %v12471_v41 = vld [vmem:[#allocation28_spill] sm:$0xff] }
 0x281   :  { %3545 = vmatprep.subr.bf16.mxu0 %v3221_v39  ;;  %2334 = vmatmul.mubr.bf16.gmra.mxu0 %v8147_v42  ;;  %v3061_v39 = vld [vmem:[#allocation8 + $0x348] sm:$0xff] }
 0x282   :  { %2141 = vmatmul.mubr.bf16.gmra.mxu1 %v8135_v0  ;;  %2343 = vmatprep.mubr.bf16.mxu0 %v8174_v44  ;;  %v3076_v0 = vld [vmem:[#allocation8 + $0x3c0] sm:$0xff]  ;;  %v3325_v44 = vunpack.c.l.s8.bf16 %v3077_v34 }
 0x283   :  { %2150 = vmatprep.mubr.bf16.mxu1 %v8172_v8  ;;  %3353 = vmatpush1.bf16.msra.mxu1 %v3092_v48  ;;  %v3332_v42 = vunpack.c.h.s8.bf16 %v3076_v0  ;;  %v3005_v8 = vld [vmem:[#allocation8 + $0x188] sm:$0xff]  ;;  %v3324_v30 = vunpack.c.l.s8.bf16 %v3076_v0  ;;  %v3301_v48 = vunpack.c.h.s8.bf16 %v3061_v39 }
 0x284   :  { %3354 = vmatprep.subr.bf16.mxu1 %v3085_v33  ;;  %3546 = vmatpush1.bf16.msra.mxu0 %v3220_v11  ;;  %v3189_v25 = vunpack.c.h.s8.bf16 %v3005_v8  ;;  %v3148_v33 = vunpack.c.l.s8.bf16 %v2988_v14  ;;  %v3060_v11 = vld [vmem:[#allocation8 + $0x340] sm:$0xff] }
 0x285   :  { %3547 = vmatprep.subr.bf16.mxu0 %v3213_v9  ;;  %v3300_v2 = vunpack.c.h.s8.bf16 %v3060_v11  ;;  %v8625_v9 = vld [vmem:[#allocation8 + $0xd8] sm:$0xff]  ;;  %v3292_v0 = vunpack.c.l.s8.bf16 %v3060_v11  ;;  %v12483_v14 = vld [vmem:[#allocation40_spill] sm:$0xff] }
 0x287   :  { %3355 = vmatpush1.bf16.msra.mxu1 %v3084_v28 }
 0x288   :  { %3356 = vmatprep.subr.bf16.mxu1 %v3205_v31  ;;  %3548 = vmatpush1.bf16.msra.mxu0 %v3212_v12  ;;  %v3143_v31 = vunpack.c.h.s8.bf16 %v8625_v9 }
 0x289   :  { %3549 = vmatprep.subr.bf16.mxu0 %v3333_v1  ;;  %2344 = vmatmul.mubr.bf16.gmra.mxu0 %v12464_v56  ;;  %v3053_v56 = vld [vmem:[#allocation8 + $0x308] sm:$0xff] }
 0x28a   :  { %2151 = vmatmul.mubr.bf16.gmra.mxu1 %v8182_v63  ;;  %2353 = vmatprep.mubr.bf16.mxu0 %v8229_v38  ;;  %v3181_v63 = vunpack.c.l.s8.bf16 %v3005_v8  ;;  %v3317_v38 = vunpack.c.h.s8.bf16 %v3069_v45  ;;  %v3277_v49 = vunpack.c.l.s8.bf16 %v3053_v56 }
 0x28b   :  { %2160 = vmatprep.mubr.bf16.mxu1 %v8227_v13  ;;  %3357 = vmatpush2.bf16.msra.mxu1 %v3204_v32  ;;  %v12465_v13 = vld [vmem:[#allocation22_spill] sm:$0xff] }
 0x28c   :  { %3358 = vmatprep.subr.bf16.mxu1 %v3197_v22  ;;  %3550 = vmatpush2.bf16.msra.mxu0 %v3332_v42 }
 0x28d   :  { %3551 = vmatprep.subr.bf16.mxu0 %v3325_v44  ;;  %v12475_v44 = vld [vmem:[#allocation32_spill] sm:$0xff] }
 0x28f   :  { %3359 = vmatpush2.bf16.msra.mxu1 %v3196_v62  ;;  %v12476_v62 = vld [vmem:[#allocation33_spill] sm:$0xff] }
 0x290   :  { %3360 = vmatprep.subr.bf16.mxu1 %v3189_v25  ;;  %3552 = vmatpush2.bf16.msra.mxu0 %v3324_v30  ;;  %v12477_v25 = vld [vmem:[#allocation34_spill] sm:$0xff] }
 0x291   :  { %2354 = vmatmul.mubr.bf16.gmra.mxu0 %v8246_v52  ;;  %3553 = vmatprep.subr.bf16.mxu0 %v3317_v38  ;;  %v2989_v52 = vld [vmem:[#allocation8 + $0x108] sm:$0xff]  ;;  %v3284_v38 = vunpack.c.h.s8.bf16 %v3052_v37 }
 0x292   :  { %2161 = vmatmul.mubr.bf16.gmra.mxu1 %v8233_v59  ;;  %2363 = vmatprep.mubr.bf16.mxu0 %v12466_v7  ;;  %v3172_v59 = vunpack.c.h.s8.bf16 %v2996_v36  ;;  %v3157_v58 = vunpack.c.h.s8.bf16 %v2989_v52  ;;  %v3149_v4 = vunpack.c.l.s8.bf16 %v2989_v52  ;;  %v12479_v36 = vld [vmem:[#allocation36_spill] sm:$0xff]  ;;  %v12482_v52 = vld [vmem:[#allocation39_spill] sm:$0xff] }
 0x293   :  { %2170 = vmatprep.mubr.bf16.mxu1 %v12465_v13  ;;  %3361 = vmatpush2.bf16.msra.mxu1 %v3188_v15 }
 0x294   :  { %3362 = vmatprep.subr.bf16.mxu1 %v3181_v63  ;;  %3554 = vmatpush2.bf16.msra.mxu0 %v3316_v54  ;;  %v3285_v63 = vunpack.c.h.s8.bf16 %v3053_v56  ;;  %v3276_v54 = vunpack.c.l.s8.bf16 %v3052_v37  ;;  %v12489_v56 = vld [vmem:[#allocation45_spill] sm:$0xff] }
 0x295   :  { %3555 = vmatprep.subr.bf16.mxu0 %v3309_v61 }
 0x297   :  { %3363 = vmatpush2.bf16.msra.mxu1 %v3180_v20 }
 0x298   :  { %3364 = vmatprep.subr.bf16.mxu1 %v3173_v18  ;;  %3556 = vmatpush2.bf16.msra.mxu0 %v3308_v51 }
 0x299   :  { %2364 = vmatmul.mubr.bf16.gmra.mxu0 %v12468_v55  ;;  %3557 = vmatprep.subr.bf16.mxu0 %v3301_v48  ;;  %v12487_v48 = vld [vmem:[#allocation43_spill] sm:$0xff] }
 0x29a   :  { %2171 = vmatmul.mubr.bf16.gmra.mxu1 %v12467_v17  ;;  %2373 = vmatprep.mubr.bf16.mxu0 %v12470_v40  ;;  %v12481_v17 = vld [vmem:[#allocation38_spill] sm:$0xff] }
 0x29b   :  { %2180 = vmatprep.mubr.bf16.mxu1 %v12469_v23  ;;  %3365 = vmatpush2.bf16.msra.mxu1 %v3172_v59 }
 0x29c   :  { %3366 = vmatprep.subr.bf16.mxu1 %v3165_v6  ;;  %3558 = vmatpush2.bf16.msra.mxu0 %v3300_v2  ;;  %v12480_v6 = vld [vmem:[#allocation37_spill] sm:$0xff] }
 0x29f   :  { %3367 = vmatpush2.bf16.msra.mxu1 %v3164_v19 }
 0x2a0   :  { %3368 = vmatprep.subr.bf16.mxu1 %v3157_v58 }
 0x2a1   :  { %2374 = vmatmul.mubr.bf16.gmra.mxu0 %v12472_v50 }
 0x2a2   :  { %2181 = vmatmul.mubr.bf16.gmra.mxu1 %v12471_v41  ;;  %2383 = vmatprep.mubr.bf16.mxu0 %v8381_v3  ;;  %v8627_v34 = vpop.f32.mrf.mxu1  ;;  %v12473_v3 = vld [vmem:[#allocation30_spill] sm:$0xff]  ;;  %v12485_v41 = vld [vmem:[#allocation41_spill] sm:$0xff] }
 0x2a3   :  { %2190 = vmatprep.mubr.bf16.mxu1 %v8379_v5  ;;  %3369 = vmatpush2.bf16.msra.mxu1 %v3156_v16  ;;  %v8629_v28 = vpop.f32.mrf.mxu0  ;;  %v3293_v5 = vunpack.c.l.s8.bf16 %v3061_v39  ;;  %v8687_v16 = vld [vmem:[#allocation8 + $0x2d8] sm:$0xff]  ;;  %v12486_v39 = vld [vmem:[#allocation42_spill] sm:$0xff] }
 0x2a4   :  { %3370 = vmatprep.subr.bf16.mxu1 %v3149_v4  ;;  %v8636_v12 = vpop.f32.mrf.mxu1  ;;  %12484 = vst [vmem:[#allocation21_spill] sm:$0xff] %v8687_v16  ;;  %v3271_v50 = vunpack.c.h.s8.bf16 %v8687_v16 }
 0x2a5   :  { %v8638_v1 = vpop.f32.mrf.mxu0  ;;  %3559 = vmatprep.subr.bf16.mxu0 %v3293_v5 }
 0x2a6   :  { %v8640_v32 = vpop.f32.mrf.mxu1  ;;  %3560 = vmatpush2.bf16.msra.mxu0 %v3292_v0  ;;  %v12488_v0 = vld [vmem:[#allocation44_spill] sm:$0xff] }
 0x2a7   :  { %3371 = vmatpush2.bf16.msra.mxu1 %v3148_v33  ;;  %v8642_v22 = vpop.f32.mrf.mxu0  ;;  %3561 = vmatprep.subr.bf16.mxu0 %v3285_v63 }
 0x2a8   :  { %3726 = vmatprep.subr.bf16.mxu1 %v3143_v31 }
 0x2a9   :  { %2384 = vmatmul.mubr.bf16.gmra.mxu0 %v8396_v46  ;;  %v1925_v42 = vpop.f32.mrf.mxu0 }
 0x2aa   :  { %2191 = vmatmul.mubr.bf16.gmra.mxu1 %v8385_v10  ;;  %2393 = vmatprep.mubr.bf16.mxu0 %v12474_v60  ;;  %v1732_v10 = vpop.f32.mrf.mxu1 }
 0x2ab   :  { %2200 = vmatprep.mubr.bf16.mxu1 %v12473_v3  ;;  %v8646_v46 = vpop.f32.mrf.mxu0  ;;  %3562 = vmatpush2.bf16.msra.mxu0 %v3284_v38 }
 0x2ac   :  { %v8644_v8 = vpop.f32.mrf.mxu1  ;;  %3563 = vmatprep.subr.bf16.mxu0 %v3277_v49  ;;  %v1926_v49 = vadd.f32 %v1925_v42, %v1732_v10  ;;  %v12494_v10 = vld [vmem:[#allocation48_spill] sm:$0xff] }
 0x2ad   :  { %v8654_v15 = vpop.f32.mrf.mxu0 }
 0x2ae   :  { %v8652_v30 = vpop.f32.mrf.mxu1 }
 0x2af   :  { %v8658_v13 = vpop.f32.mrf.mxu0  ;;  %3564 = vmatpush2.bf16.msra.mxu0 %v3276_v54  ;;  %v8730_v54 = vld [vmem:[%s12190_s7] sm:$0xf] }
 0x2b0   :  { %v8656_v45 = vpop.f32.mrf.mxu1  ;;  %3919 = vmatprep.subr.bf16.mxu0 %v3271_v50  ;;  %12491 = vst [vmem:[#allocation22_spill] sm:$0xff] %v8730_v54 }
 0x2b1   :  { %2394 = vmatmul.mubr.bf16.gmra.mxu0 %v12476_v62  ;;  %v8662_v20 = vpop.f32.mrf.mxu0  ;;  %v12490_v62 = vld [vmem:[#allocation46_spill] sm:$0xff] }
 0x2b2   :  { %2201 = vmatmul.mubr.bf16.gmra.mxu1 %v12475_v44  ;;  %2403 = vmatprep.mubr.bf16.mxu0 %v12478_v21  ;;  %v8660_v7 = vpop.f32.mrf.mxu1 }
 0x2b3   :  { %2210 = vmatprep.mubr.bf16.mxu1 %v12477_v25 }
 0x2b4   :  { %v8664_v18 = vpop.f32.mrf.mxu1  ;;  %v8667_v59 = vpop.f32.mrf.mxu0 }
 0x2b6   :  { %v8672_v61 = vpop.f32.mrf.mxu1  ;;  %v8674_v55 = vpop.f32.mrf.mxu0 }
 0x2b8   :  { %v8676_v23 = vpop.f32.mrf.mxu1  ;;  %v8678_v40 = vpop.f32.mrf.mxu0 }
 0x2b9   :  { %2404 = vmatmul.mubr.bf16.gmra.mxu0 %v12480_v6  ;;  %v12492_v6 = vld [vmem:[#allocation47_spill] sm:$0xff] }
 0x2ba   :  { %2211 = vmatmul.mubr.bf16.gmra.mxu1 %v12479_v36  ;;  %2413 = vmatprep.mubr.bf16.mxu0 %v12482_v52  ;;  %v8680_v19 = vpop.f32.mrf.mxu1  ;;  %v8682_v51 = vpop.f32.mrf.mxu0  ;;  %v12493_v52 = vld [vmem:[#allocation17_spill] sm:$0xff] }
 0x2bb   :  { %2220 = vmatprep.mubr.bf16.mxu1 %v12481_v17  ;;  %v1922_v17 = vadd.f32 %v8638_v1, %v8636_v12  ;;  %v8754_v12 = vld [vmem:[%s12191_s8] sm:$0xf] }
 0x2bc   :  { %v8684_v58 = vpop.f32.mrf.mxu1  ;;  %12495 = vst [vmem:[#allocation23_spill] sm:$0xff] %v8754_v12 }
 0x2bd   :  { %v8689_v4 = vpop.f32.mrf.mxu0 }
 0x2be   :  { %v8695_v33 = vpop.f32.mrf.mxu1 }
 0x2bf   :  { %v8697_v11 = vpop.f32.mrf.mxu0 }
 0x2c0   :  { %v8699_v2 = vpop.f32.mrf.mxu1 }
 0x2c1   :  { %2414 = vmatmul.mubr.bf16.gmra.mxu0 %v12485_v41  ;;  %v8701_v5 = vpop.f32.mrf.mxu0 }
 0x2c2   :  { %2221 = vmatmul.mubr.bf16.gmra.mxu1 %v12483_v14  ;;  %2423 = vmatprep.mubr.bf16.mxu0 %v12487_v48  ;;  %v8703_v31 = vpop.f32.mrf.mxu1  ;;  %v8739_v14 = vrot.slane %v8730_v54, %v12493_v52 }
 0x2c3   :  { %2230 = vmatprep.mubr.bf16.mxu1 %v12486_v39  ;;  %v8705_v3 = vpop.f32.mrf.mxu0 }
 0x2c4   :  { %v8707_v60 = vpop.f32.mrf.mxu1  ;;  %v2491_v39 = vmul.f32 %v8739_v14, %v1926_v49  ;;  %v2487_v48 = vmul.f32 %v8739_v14, %v1922_v17  ;;  %v1936_v49 = vadd.f32 %v8662_v20, %v8660_v7  ;;  %v1920_v17 = vadd.f32 %v8629_v28, %v8627_v34 }
 0x2c5   :  { %v8710_v44 = vpop.f32.mrf.mxu0 }
 0x2c6   :  { %v8715_v25 = vpop.f32.mrf.mxu1 }
 0x2c7   :  { %v8717_v21 = vpop.f32.mrf.mxu0 }
 0x2c8   :  { %v8719_v63 = vpop.f32.mrf.mxu1 }
 0x2c9   :  { %2424 = vmatmul.mubr.bf16.gmra.mxu0 %v12489_v56  ;;  %v8721_v37 = vpop.f32.mrf.mxu0 }
 0x2ca   :  { %2231 = vmatmul.mubr.bf16.gmra.mxu1 %v12488_v0  ;;  %2433 = vmatprep.mubr.bf16.mxu0 %v12490_v62  ;;  %v8723_v38 = vpop.f32.mrf.mxu1  ;;  %v1924_v0 = vadd.f32 %v8642_v22, %v8640_v32  ;;  %v1932_v22 = vadd.f32 %v8654_v15, %v8652_v30 }
 0x2cb   :  { %2240 = vmatprep.mubr.bf16.mxu1 %v8526_v29  ;;  %v8725_v36 = vpop.f32.mrf.mxu0 }
 0x2cc   :  { %v2495_v15 = vmul.f32 %v8739_v14, %v1932_v22  ;;  %v1930_v22 = vadd.f32 %v8646_v46, %v8644_v8  ;;  %v2982_v8 = vld [vmem:[#allocation8 + $0xd0] sm:$0xff] }
 0x2cd   :  { %v8732_v29 = vpop.f32.mrf.mxu1  ;;  %v8741_v41 = vpop.f32.mrf.mxu0 }
 0x2cf   :  { %v8746_v42 = vpop.f32.mrf.mxu1  ;;  %v8749_v50 = vpop.f32.mrf.mxu0 }
 0x2d1   :  { %2434 = vmatmul.mubr.bf16.gmra.mxu0 %v12494_v10  ;;  %v8756_v1 = vpop.f32.mrf.mxu1  ;;  %v12496_v10 = vld [vmem:[#allocation18_spill] sm:$0xff] }
 0x2d2   :  { %2241 = vmatmul.mubr.bf16.gmra.mxu1 %v12492_v6  ;;  %2443 = vmatprep.mubr.bf16.mxu0 %v8556_v24  ;;  %v8763_v24 = vpop.f32.mrf.mxu0  ;;  %v8800_v30 = vrot.slane %v8754_v12, %v12496_v10 }
 0x2d3   :  { %2250 = vmatprep.mubr.bf16.mxu1 %v8554_v47  ;;  %v8761_v47 = vrot.slane %v8754_v12, %v12493_v52  ;;  %v8767_v56 = vpop.f32.mrf.mxu1  ;;  %v8778_v52 = vrot.slane %v8730_v54, %v12496_v10  ;;  %v1946_v10 = vadd.f32 %v8682_v51, %v8680_v19 }
 0x2d4   :  { %v8772_v6 = vpop.f32.mrf.mxu0 }
 0x2d5   :  { %v2641_v62 = vadd.f32 %v8761_v47, %v2491_v39  ;;  %v2637_v32 = vadd.f32 %v8761_v47, %v2487_v48  ;;  %v2490_v34 = vmul.f32 %v8778_v52, %v1924_v0  ;;  %v2486_v48 = vmul.f32 %v8778_v52, %v1920_v17 }
 0x2d6   :  { %v8780_v16 = vpop.f32.mrf.mxu1 }
 0x2d7   :  { %v8786_v39 = vpop.f32.mrf.mxu0  ;;  %v2769_v7 = vmax.f32 %v2641_v62, 0.0  ;;  %v1934_v62 = vadd.f32 %v8658_v13, %v8656_v45  ;;  %v2645_v45 = vadd.f32 %v8761_v47, %v2495_v15  ;;  %v1942_v13 = vadd.f32 %v8674_v55, %v8672_v61 }
 0x2d8   :  { %v8792_v28 = vpop.f32.mrf.mxu1  ;;  %v2494_v61 = vmul.f32 %v8778_v52, %v1930_v22 }
 0x2d9   :  { %2444 = vmatmul.mubr.bf16.gmra.mxu0 %v8567_v27  ;;  %v8795_v20 = vpop.f32.mrf.mxu0  ;;  %v2498_v51 = vmul.f32 %v8778_v52, %v1934_v62  ;;  %v2773_v15 = vmax.f32 %v2645_v45, 0.0  ;;  %v1956_v45 = vadd.f32 %v8705_v3, %v8703_v31  ;;  %v3134_v3 = vunpack.c.l.s8.bf16 %v2982_v8 }
 0x2da   :  { %2251 = vmatmul.mubr.bf16.gmra.mxu1 %v8558_v57  ;;  %2453 = vmatprep.mubr.bf16.mxu0 %v8579_v53  ;;  %v2499_v57 = vmul.f32 %v8739_v14, %v1936_v49  ;;  %v8802_v27 = vpop.f32.mrf.mxu1  ;;  %v2640_v53 = vadd.f32 %v8800_v30, %v2490_v34 }
 0x2db   :  { %2260 = vmatprep.mubr.bf16.mxu1 %v8577_v43  ;;  %v2765_v43 = vmax.f32 %v2637_v32, 0.0  ;;  %v8805_v0 = vpop.f32.mrf.mxu0  ;;  %v2636_v32 = vadd.f32 %v8800_v30, %v2486_v48 }
 0x2dc   :  { %v8810_v49 = vpop.f32.mrf.mxu1  ;;  %v2649_v17 = vadd.f32 %v8761_v47, %v2499_v57  ;;  %v2768_v19 = vmax.f32 %v2640_v53, 0.0  ;;  %v3142_v53 = vunpack.c.h.s8.bf16 %v2982_v8 }
 0x2dd   :  { %v8815_v12 = vpop.f32.mrf.mxu0  ;;  %v8817_v54 = vpack.c.bf16 %v2769_v7, %v2765_v43  ;;  %v2764_v43 = vmax.f32 %v2636_v32, 0.0  ;;  %v3135_v32 = vunpack.c.l.s8.bf16 %v8625_v9 }
 0x2de   :  { %v2777_v46 = vmax.f32 %v2649_v17, 0.0 }
 0x2df   :  { %12497 = vst [vmem:[#allocation24_spill] sm:$0xff] %v8817_v54  ;;  %v8844_v62 = vpack.c.bf16 %v2768_v19, %v2764_v43  ;;  %v2975_v19 = vld [vmem:[#allocation8 + $0x98] sm:$0xff]  ;;  %v2644_v43 = vadd.f32 %v8800_v30, %v2494_v61 }
 0x2e0   :  { %v8822_v34 = vpop.f32.mrf.mxu1  ;;  %v8828_v57 = vpop.f32.mrf.mxu0 }
 0x2e1   :  { %12498 = vst [vmem:[#allocation25_spill] sm:$0xff] %v8822_v34  ;;  %12499 = vst [vmem:[#allocation26_spill] sm:$0xff] %v8828_v57  ;;  %2454 = vmatmul.mubr.bf16.gmra.mxu0 %v8585_v35  ;;  %v2503_v35 = vmul.f32 %v8739_v14, %v1942_v13  ;;  %v2648_v57 = vadd.f32 %v8800_v30, %v2498_v51  ;;  %v8857_v34 = vpack.c.bf16 %v2777_v46, %v2773_v15 }
 0x2e2   :  { %2261 = vmatmul.mubr.bf16.gmra.mxu1 %v8581_v26  ;;  %v8833_v7 = vpop.f32.mrf.mxu1  ;;  %v2507_v26 = vmul.f32 %v8739_v14, %v1946_v10  ;;  %v8836_v48 = vpop.f32.mrf.mxu0  ;;  %12500 = vst [vmem:[#allocation27_spill] sm:$0xff] %v8844_v62  ;;  %v1944_v10 = vadd.f32 %v8678_v40, %v8676_v23  ;;  %v1940_v51 = vadd.f32 %v8667_v59, %v8664_v18  ;;  %v3127_v18 = vunpack.c.h.s8.bf16 %v2975_v19  ;;  %v2974_v59 = vld [vmem:[#allocation8 + $0x90] sm:$0xff] }
 0x2e3   :  { %3372 = vmatprep.mubr.bf16.mxu1 %v8817_v54  ;;  %12501 = vst [vmem:[#allocation28_spill] sm:$0xff] %v8857_v34  ;;  %v2653_v9 = vadd.f32 %v8761_v47, %v2503_v35  ;;  %v1952_v40 = vadd.f32 %v8697_v11, %v8695_v33  ;;  %v2776_v46 = vmax.f32 %v2648_v57, 0.0  ;;  %v2515_v35 = vmul.f32 %v8739_v14, %v1956_v45 }
 0x2e4   :  { %v8839_v55 = vpop.f32.mrf.mxu1  ;;  %v8842_v54 = vpop.f32.mrf.mxu0  ;;  %v2657_v22 = vadd.f32 %v8761_v47, %v2507_v26  ;;  %v2506_v26 = vmul.f32 %v8778_v52, %v1944_v10  ;;  %v2772_v33 = vmax.f32 %v2644_v43, 0.0  ;;  %v2502_v11 = vmul.f32 %v8778_v52, %v1940_v51 }
 0x2e5   :  { %v2511_v57 = vmul.f32 %v8739_v14, %v1952_v40  ;;  %v3126_v10 = vunpack.c.h.s8.bf16 %v2974_v59  ;;  %v1954_v45 = vadd.f32 %v8701_v5, %v8699_v2  ;;  %v3119_v43 = vunpack.c.l.s8.bf16 %v2975_v19 }
 0x2e6   :  { %v8849_v17 = vpop.f32.mrf.mxu1  ;;  %v8855_v13 = vpop.f32.mrf.mxu0  ;;  %v2785_v15 = vmax.f32 %v2657_v22, 0.0  ;;  %v2656_v22 = vadd.f32 %v8800_v30, %v2506_v26  ;;  %v2665_v51 = vadd.f32 %v8761_v47, %v2515_v35  ;;  %v1950_v26 = vadd.f32 %v8689_v4, %v8684_v58  ;;  %v2966_v4 = vld [vmem:[#allocation8 + $0x50] sm:$0xff] }
 0x2e7   :  { %v2661_v5 = vadd.f32 %v8761_v47, %v2511_v57  ;;  %v1962_v19 = vadd.f32 %v8717_v21, %v8715_v25 }
 0x2e8   :  { %v2510_v21 = vmul.f32 %v8778_v52, %v1950_v26 }
 0x2e9   :  { %v8868_v31 = vpop.f32.mrf.mxu0 }
 0x2ea   :  { %v8862_v23 = vpop.f32.mrf.mxu1  ;;  %3373 = vmatmul.mubr.bf16.vlgmr.msra.gmra.mxu1 %v8844_v62  ;;  %12502 = vst [vmem:[#allocation29_spill] sm:$0xff] %v8868_v31 }
 0x2eb   :  { %3382 = vmatprep.mubr.bf16.mxu1 %v8857_v34  ;;  %3727 = vmatpush1.bf16.msra.mxu1 %v3142_v53  ;;  %v8875_v62 = vpop.f32.mrf.mxu0  ;;  %v2781_v53 = vmax.f32 %v2653_v9, 0.0  ;;  %v1966_v9 = vadd.f32 %v8725_v36, %v8723_v38  ;;  %v3118_v36 = vunpack.c.l.s8.bf16 %v2974_v59  ;;  %v2519_v59 = vmul.f32 %v8739_v14, %v1962_v19 }
 0x2ec   :  { %v8872_v61 = vpop.f32.mrf.mxu1  ;;  %3728 = vmatprep.subr.bf16.mxu1 %v3135_v32  ;;  %v8883_v32 = vpack.c.bf16 %v2776_v46, %v2772_v33  ;;  %v2967_v46 = vld [vmem:[#allocation8 + $0x58] sm:$0xff]  ;;  %v2652_v33 = vadd.f32 %v8800_v30, %v2502_v11  ;;  %v2793_v11 = vmax.f32 %v2665_v51, 0.0 }
 0x2ed   :  { %v8881_v8 = vpop.f32.mrf.mxu0  ;;  %v3111_v58 = vunpack.c.h.s8.bf16 %v2967_v46 }
 0x2ee   :  { %v8878_v31 = vpop.f32.mrf.mxu1  ;;  %12503 = vst [vmem:[#allocation30_spill] sm:$0xff] %v8883_v32  ;;  %v2780_v25 = vmax.f32 %v2652_v33, 0.0  ;;  %v3103_v33 = vunpack.c.l.s8.bf16 %v2967_v46  ;;  %v1972_v46 = vadd.f32 %v8749_v50, %v8746_v42 }
 0x2ef   :  { %3729 = vmatpush1.bf16.msra.mxu1 %v3134_v3  ;;  %v8893_v40 = vpop.f32.mrf.mxu0  ;;  %v8895_v3 = vpack.c.bf16 %v2785_v15, %v2781_v53  ;;  %v2514_v15 = vmul.f32 %v8778_v52, %v1954_v45  ;;  %v2523_v53 = vmul.f32 %v8739_v14, %v1966_v9  ;;  %v3110_v45 = vunpack.c.h.s8.bf16 %v2966_v4 }
 0x2f0   :  { %v8888_v34 = vpop.f32.mrf.mxu1  ;;  %3730 = vmatprep.subr.bf16.mxu1 %v3127_v18  ;;  %v2784_v18 = vmax.f32 %v2656_v22, 0.0  ;;  %v1964_v9 = vadd.f32 %v8721_v37, %v8719_v63  ;;  %v2669_v37 = vadd.f32 %v8761_v47, %v2519_v59 }
 0x2f1   :  { %12504 = vst [vmem:[#allocation31_spill] sm:$0xff] %v8895_v3  ;;  %v8906_v38 = vpop.f32.mrf.mxu0  ;;  %v2664_v51 = vadd.f32 %v8800_v30, %v2514_v15  ;;  %v2673_v26 = vadd.f32 %v8761_v47, %v2523_v53  ;;  %v1960_v15 = vadd.f32 %v8710_v44, %v8707_v60  ;;  %v2958_v44 = vld [vmem:[#allocation8 + $0x10] sm:$0xff] }
 0x2f2   :  { %v8900_v2 = vpop.f32.mrf.mxu1  ;;  %3383 = vmatmul.mubr.bf16.gmra.mxu1 %v8883_v32 }
 0x2f3   :  { %3392 = vmatprep.mubr.bf16.mxu1 %v8895_v3  ;;  %3731 = vmatpush1.bf16.msra.mxu1 %v3126_v10  ;;  %v8913_v57 = vpop.f32.mrf.mxu0  ;;  %v2789_v10 = vmax.f32 %v2661_v5, 0.0  ;;  %v1976_v5 = vadd.f32 %v8772_v6, %v8767_v56  ;;  %v3102_v6 = vunpack.c.l.s8.bf16 %v2966_v4  ;;  %v2518_v50 = vmul.f32 %v8778_v52, %v1960_v15 }
 0x2f4   :  { %v8910_v35 = vpop.f32.mrf.mxu1  ;;  %3732 = vmatprep.subr.bf16.mxu1 %v3119_v43  ;;  %v8921_v43 = vpack.c.bf16 %v2784_v18, %v2780_v25  ;;  %v2959_v18 = vld [vmem:[#allocation8 + $0x18] sm:$0xff]  ;;  %v2660_v25 = vadd.f32 %v8800_v30, %v2510_v21  ;;  %v2801_v21 = vmax.f32 %v2673_v26, 0.0  ;;  %v2527_v4 = vmul.f32 %v8739_v14, %v1972_v46 }
 0x2f5   :  { %v8919_v22 = vpop.f32.mrf.mxu0  ;;  %v3095_v60 = vunpack.c.h.s8.bf16 %v2959_v18 }
 0x2f6   :  { %v8916_v32 = vpop.f32.mrf.mxu1  ;;  %12505 = vst [vmem:[#allocation32_spill] sm:$0xff] %v8921_v43  ;;  %v2788_v42 = vmax.f32 %v2660_v25, 0.0  ;;  %v3087_v25 = vunpack.c.l.s8.bf16 %v2959_v18  ;;  %v1982_v18 = vadd.f32 %v8795_v20, %v8792_v28 }
 0x2f7   :  { %3733 = vmatpush1.bf16.msra.mxu1 %v3118_v36  ;;  %v8931_v19 = vpop.f32.mrf.mxu0  ;;  %v8933_v36 = vpack.c.bf16 %v2793_v11, %v2789_v10  ;;  %v2522_v11 = vmul.f32 %v8778_v52, %v1964_v9  ;;  %v2531_v10 = vmul.f32 %v8739_v14, %v1976_v5  ;;  %v3094_v9 = vunpack.c.h.s8.bf16 %v2958_v44 }
 0x2f8   :  { %v8926_v3 = vpop.f32.mrf.mxu1  ;;  %3734 = vmatprep.subr.bf16.mxu1 %v3111_v58  ;;  %v2792_v58 = vmax.f32 %v2664_v51, 0.0  ;;  %v1974_v5 = vadd.f32 %v8763_v24, %v8756_v1  ;;  %v2677_v24 = vadd.f32 %v8761_v47, %v2527_v4 }
 0x2f9   :  { %12506 = vst [vmem:[#allocation33_spill] sm:$0xff] %v8933_v36  ;;  %v8944_v56 = vpop.f32.mrf.mxu0  ;;  %v2672_v26 = vadd.f32 %v8800_v30, %v2522_v11  ;;  %v2681_v15 = vadd.f32 %v8761_v47, %v2531_v10  ;;  %v1970_v11 = vadd.f32 %v8741_v41, %v8732_v29  ;;  %v3014_v41 = vld [vmem:[#allocation8 + $0x1d0] sm:$0xff] }
 0x2fa   :  { %v8938_v63 = vpop.f32.mrf.mxu1  ;;  %3393 = vmatmul.mubr.bf16.gmra.mxu1 %v8921_v43 }
 0x2fb   :  { %3402 = vmatprep.mubr.bf16.mxu1 %v8933_v36  ;;  %3735 = vmatpush1.bf16.msra.mxu1 %v3110_v45  ;;  %v8951_v59 = vpop.f32.mrf.mxu0  ;;  %v2797_v45 = vmax.f32 %v2669_v37, 0.0  ;;  %v1986_v37 = vadd.f32 %v8815_v12, %v8810_v49  ;;  %v3086_v49 = vunpack.c.l.s8.bf16 %v2958_v44  ;;  %v2526_v20 = vmul.f32 %v8778_v52, %v1970_v11 }
 0x2fc   :  { %v8948_v53 = vpop.f32.mrf.mxu1  ;;  %3736 = vmatprep.subr.bf16.mxu1 %v3103_v33  ;;  %v8959_v33 = vpack.c.bf16 %v2792_v58, %v2788_v42  ;;  %v3015_v58 = vld [vmem:[#allocation8 + $0x1d8] sm:$0xff]  ;;  %v2668_v42 = vadd.f32 %v8800_v30, %v2518_v50  ;;  %v2809_v50 = vmax.f32 %v2681_v15, 0.0  ;;  %v2535_v44 = vmul.f32 %v8739_v14, %v1982_v18 }
 0x2fd   :  { %v8957_v51 = vpop.f32.mrf.mxu0  ;;  %v3207_v29 = vunpack.c.h.s8.bf16 %v3015_v58 }
 0x2fe   :  { %v8954_v43 = vpop.f32.mrf.mxu1  ;;  %12507 = vst [vmem:[#allocation34_spill] sm:$0xff] %v8959_v33  ;;  %v2796_v28 = vmax.f32 %v2668_v42, 0.0  ;;  %v3199_v42 = vunpack.c.l.s8.bf16 %v3015_v58  ;;  %v1992_v58 = vadd.f32 %v8836_v48, %v8833_v7 }
 0x2ff   :  { %3737 = vmatpush1.bf16.msra.mxu1 %v3102_v6  ;;  %v8969_v46 = vpop.f32.mrf.mxu0  ;;  %v8971_v6 = vpack.c.bf16 %v2801_v21, %v2797_v45  ;;  %v2530_v21 = vmul.f32 %v8778_v52, %v1974_v5  ;;  %v2539_v45 = vmul.f32 %v8739_v14, %v1986_v37  ;;  %v3206_v5 = vunpack.c.h.s8.bf16 %v3014_v41 }
 0x300   :  { %v8964_v36 = vpop.f32.mrf.mxu1  ;;  %3738 = vmatprep.subr.bf16.mxu1 %v3095_v60  ;;  %v2800_v60 = vmax.f32 %v2672_v26, 0.0  ;;  %v1984_v37 = vadd.f32 %v8805_v0, %v8802_v27  ;;  %v2685_v0 = vadd.f32 %v8761_v47, %v2535_v44 }
 0x301   :  { %12508 = vst [vmem:[#allocation35_spill] sm:$0xff] %v8971_v6  ;;  %v8982_v12 = vpop.f32.mrf.mxu0  ;;  %v2680_v15 = vadd.f32 %v8800_v30, %v2530_v21  ;;  %v2689_v11 = vadd.f32 %v8761_v47, %v2539_v45  ;;  %v1980_v21 = vadd.f32 %v8786_v39, %v8780_v16  ;;  %v3006_v39 = vld [vmem:[#allocation8 + $0x190] sm:$0xff] }
 0x302   :  { %v8976_v1 = vpop.f32.mrf.mxu1  ;;  %3403 = vmatmul.mubr.bf16.gmra.mxu1 %v8959_v33 }
 0x303   :  { %3412 = vmatprep.mubr.bf16.mxu1 %v8971_v6  ;;  %3739 = vmatpush1.bf16.msra.mxu1 %v3094_v9  ;;  %v8989_v4 = vpop.f32.mrf.mxu0  ;;  %v2805_v9 = vmax.f32 %v2677_v24, 0.0  ;;  %v1996_v24 = vadd.f32 %v8855_v13, %v8849_v17  ;;  %v3198_v13 = vunpack.c.l.s8.bf16 %v3014_v41  ;;  %v2534_v48 = vmul.f32 %v8778_v52, %v1980_v21 }
 0x304   :  { %v8986_v10 = vpop.f32.mrf.mxu1  ;;  %3740 = vmatprep.subr.bf16.mxu1 %v3087_v25  ;;  %v8997_v25 = vpack.c.bf16 %v2800_v60, %v2796_v28  ;;  %v3007_v60 = vld [vmem:[#allocation8 + $0x198] sm:$0xff]  ;;  %v2676_v28 = vadd.f32 %v8800_v30, %v2526_v20  ;;  %v2817_v20 = vmax.f32 %v2689_v11, 0.0  ;;  %v2543_v41 = vmul.f32 %v8739_v14, %v1992_v58 }
 0x305   :  { %v8995_v26 = vpop.f32.mrf.mxu0  ;;  %v3191_v16 = vunpack.c.h.s8.bf16 %v3007_v60 }
 0x306   :  { %v8992_v33 = vpop.f32.mrf.mxu1  ;;  %12509 = vst [vmem:[#allocation36_spill] sm:$0xff] %v8997_v25  ;;  %v2804_v7 = vmax.f32 %v2676_v28, 0.0  ;;  %v3183_v28 = vunpack.c.l.s8.bf16 %v3007_v60  ;;  %v2002_v60 = vadd.f32 %v8875_v62, %v8872_v61 }
 0x307   :  { %3741 = vmatpush1.bf16.msra.mxu1 %v3086_v49  ;;  %v9007_v18 = vpop.f32.mrf.mxu0  ;;  %v9009_v49 = vpack.c.bf16 %v2809_v50, %v2805_v9  ;;  %v2538_v50 = vmul.f32 %v8778_v52, %v1984_v37  ;;  %v2547_v9 = vmul.f32 %v8739_v14, %v1996_v24  ;;  %v3190_v37 = vunpack.c.h.s8.bf16 %v3006_v39 }
 0x308   :  { %v9002_v6 = vpop.f32.mrf.mxu1  ;;  %3742 = vmatprep.subr.bf16.mxu1 %v3207_v29  ;;  %v2808_v29 = vmax.f32 %v2680_v15, 0.0  ;;  %v1994_v24 = vadd.f32 %v8842_v54, %v8839_v55  ;;  %v2693_v55 = vadd.f32 %v8761_v47, %v2543_v41 }
 0x309   :  { %12510 = vst [vmem:[#allocation37_spill] sm:$0xff] %v9009_v49  ;;  %v9020_v17 = vpop.f32.mrf.mxu0  ;;  %v2688_v11 = vadd.f32 %v8800_v30, %v2538_v50  ;;  %v2697_v21 = vadd.f32 %v8761_v47, %v2547_v9  ;;  %v12515_v50 = vld [vmem:[#allocation25_spill] sm:$0xff] }
 0x30a   :  { %v9014_v27 = vpop.f32.mrf.mxu1  ;;  %3413 = vmatmul.mubr.bf16.gmra.mxu1 %v8997_v25 }
 0x30b   :  { %3422 = vmatprep.mubr.bf16.mxu1 %v9009_v49  ;;  %3743 = vmatpush2.bf16.msra.mxu1 %v3206_v5  ;;  %v9027_v44 = vpop.f32.mrf.mxu0  ;;  %v2813_v5 = vmax.f32 %v2685_v0, 0.0  ;;  %v2006_v0 = vadd.f32 %v8893_v40, %v8888_v34  ;;  %v3182_v40 = vunpack.c.l.s8.bf16 %v3006_v39  ;;  %v2551_v39 = vmul.f32 %v8739_v14, %v2002_v60 }
 0x30c   :  { %v9024_v45 = vpop.f32.mrf.mxu1  ;;  %3744 = vmatprep.subr.bf16.mxu1 %v3199_v42  ;;  %v9035_v42 = vpack.c.bf16 %v2808_v29, %v2804_v7  ;;  %v2999_v29 = vld [vmem:[#allocation8 + $0x158] sm:$0xff]  ;;  %v2684_v7 = vadd.f32 %v8800_v30, %v2534_v48 }
 0x30d   :  { %v9033_v15 = vpop.f32.mrf.mxu0  ;;  %v3175_v48 = vunpack.c.h.s8.bf16 %v2999_v29  ;;  %v2555_v41 = vmul.f32 %v8739_v14, %v2006_v0  ;;  %v2004_v0 = vadd.f32 %v8881_v8, %v8878_v31 }
 0x30e   :  { %v9030_v25 = vpop.f32.mrf.mxu1  ;;  %12512 = vst [vmem:[#allocation39_spill] sm:$0xff] %v9033_v15  ;;  %12513 = vst [vmem:[#allocation40_spill] sm:$0xff] %v9035_v42  ;;  %v12516_v15 = vld [vmem:[#allocation26_spill] sm:$0xff]  ;;  %v2812_v62 = vmax.f32 %v2684_v7, 0.0  ;;  %v12520_v7 = vld [vmem:[#allocation29_spill] sm:$0xff] }
 0x30f   :  { %12511 = vst [vmem:[#allocation38_spill] sm:$0xff] %v9030_v25  ;;  %3745 = vmatpush2.bf16.msra.mxu1 %v3198_v13  ;;  %v9045_v58 = vpop.f32.mrf.mxu0  ;;  %v9047_v13 = vpack.c.bf16 %v2817_v20, %v2813_v5  ;;  %v1990_v25 = vadd.f32 %v12516_v15, %v12515_v50  ;;  %v2546_v20 = vmul.f32 %v8778_v52, %v1994_v24  ;;  %v2998_v5 = vld [vmem:[#allocation8 + $0x150] sm:$0xff]  ;;  %v2825_v15 = vmax.f32 %v2697_v21, 0.0 }
 0x310   :  { %v9040_v49 = vpop.f32.mrf.mxu1  ;;  %3746 = vmatprep.subr.bf16.mxu1 %v3191_v16  ;;  %v2816_v16 = vmax.f32 %v2688_v11, 0.0  ;;  %v3174_v24 = vunpack.c.h.s8.bf16 %v2998_v5  ;;  %v2705_v60 = vadd.f32 %v8761_v47, %v2555_v41  ;;  %v12525_v41 = vld [vmem:[#allocation23_spill] sm:$0xff] }
 0x311   :  { %12514 = vst [vmem:[#allocation41_spill] sm:$0xff] %v9047_v13  ;;  %v9058_v34 = vpop.f32.mrf.mxu0  ;;  %v2542_v61 = vmul.f32 %v8778_v52, %v1990_v25  ;;  %v2696_v21 = vadd.f32 %v8800_v30, %v2546_v20  ;;  %v3167_v25 = vunpack.c.l.s8.bf16 %v2999_v29  ;;  %v9089_v20 = vld [vmem:[#allocation8 + $0x118] sm:$0xff] }
 0x312   :  { %v9052_v54 = vpop.f32.mrf.mxu1  ;;  %3423 = vmatmul.mubr.bf16.gmra.mxu1 %v9035_v42  ;;  %v12523_v29 = vld [vmem:[#allocation19_spill] sm:$0xff] }
 0x313   :  { %3432 = vmatprep.mubr.bf16.mxu1 %v9047_v13  ;;  %3747 = vmatpush2.bf16.msra.mxu1 %v3190_v37  ;;  %v9065_v50 = vpop.f32.mrf.mxu0  ;;  %v2821_v37 = vmax.f32 %v2693_v55, 0.0  ;;  %v2000_v55 = vadd.f32 %v12520_v7, %v8862_v23  ;;  %v2692_v31 = vadd.f32 %v8800_v30, %v2542_v61  ;;  %v12527_v61 = vld [vmem:[#allocation20_spill] sm:$0xff]  ;;  %v9113_v7 = vld [vmem:[#allocation8 + $0x2d0] sm:$0xff] }
 0x314   :  { %v9062_v9 = vpop.f32.mrf.mxu1  ;;  %3748 = vmatprep.subr.bf16.mxu1 %v3183_v28  ;;  %v9073_v28 = vpack.c.bf16 %v2816_v16, %v2812_v62  ;;  %v9101_v62 = vrot.slane %v12525_v41, %v12523_v29 }
 0x315   :  { %v9071_v11 = vpop.f32.mrf.mxu0  ;;  %v9087_v16 = vpack.c.bf16 %v2825_v15, %v2821_v37 }
 0x316   :  { %v9068_v42 = vpop.f32.mrf.mxu1  ;;  %12518 = vst [vmem:[#allocation43_spill] sm:$0xff] %v9071_v11  ;;  %12519 = vst [vmem:[#allocation44_spill] sm:$0xff] %v9073_v28 }
 0x317   :  { %12517 = vst [vmem:[#allocation42_spill] sm:$0xff] %v9068_v42  ;;  %3749 = vmatpush2.bf16.msra.mxu1 %v3182_v40  ;;  %v2016_v40 = vadd.f32 %v8931_v19, %v8926_v3  ;;  %v9085_v11 = vpop.f32.mrf.mxu0  ;;  %12521 = vst [vmem:[#allocation45_spill] sm:$0xff] %v9087_v16  ;;  %v2701_v3 = vadd.f32 %v8761_v47, %v2551_v39  ;;  %v2012_v19 = vadd.f32 %v8913_v57, %v8910_v35  ;;  %v9121_v57 = vld [vmem:[#allocation8 + $0x110] sm:$0xff] }
 0x318   :  { %v9078_v13 = vpop.f32.mrf.mxu1  ;;  %3750 = vmatprep.subr.bf16.mxu1 %v3175_v48  ;;  %v12524_v48 = vld [vmem:[#allocation22_spill] sm:$0xff]  ;;  %v2014_v39 = vadd.f32 %v8919_v22, %v8916_v32  ;;  %v3159_v35 = vunpack.c.h.s8.bf16 %v9089_v20  ;;  %v2010_v32 = vadd.f32 %v8906_v38, %v8900_v2 }
 0x319   :  { %v9097_v23 = vrot.slane %v12524_v48, %v12523_v29  ;;  %v9106_v15 = vpop.f32.mrf.mxu0  ;;  %v9111_v37 = vrot.slane %v12524_v48, %v12527_v61  ;;  %v2554_v29 = vmul.f32 %v8778_v52, %v2004_v0  ;;  %v2550_v48 = vmul.f32 %v8778_v52, %v2000_v55 }
 0x31a   :  { %v9092_v8 = vpop.f32.mrf.mxu1  ;;  %3433 = vmatmul.mubr.bf16.gmra.mxu1 %v9073_v28  ;;  %12526 = vst [vmem:[#allocation47_spill] sm:$0xff] %v9106_v15  ;;  %v3166_v28 = vunpack.c.l.s8.bf16 %v2998_v5  ;;  %v2563_v15 = vmul.f32 %v8739_v14, %v2016_v40  ;;  %v9129_v5 = vrot.slane %v12525_v41, %v12527_v61  ;;  %v2829_v55 = vmax.f32 %v2701_v3, 0.0 }
 0x31b   :  { %12522 = vst [vmem:[#allocation46_spill] sm:$0xff] %v9092_v8  ;;  %3442 = vmatprep.mubr.bf16.mxu1 %v9087_v16  ;;  %3751 = vmatpush2.bf16.msra.mxu1 %v3174_v24  ;;  %v2824_v8 = vmax.f32 %v2696_v21, 0.0  ;;  %v2833_v16 = vmax.f32 %v2705_v60, 0.0  ;;  %v9125_v24 = vpop.f32.mrf.mxu0  ;;  %v2820_v21 = vmax.f32 %v2692_v31, 0.0  ;;  %v2559_v60 = vmul.f32 %v8739_v14, %v2012_v19  ;;  %v9152_v19 = vld [vmem:[#allocation8 + $0x290] sm:$0xff] }
 0x31c   :  { %v9118_v42 = vpop.f32.mrf.mxu1  ;;  %3752 = vmatprep.subr.bf16.mxu1 %v3167_v25  ;;  %12529 = vst [vmem:[#allocation25_spill] sm:$0xff] %v9125_v24  ;;  %v12530_v25 = vld [vmem:[#allocation21_spill] sm:$0xff]  ;;  %v9140_v24 = vld [vmem:[#allocation8 + $0x298] sm:$0xff]  ;;  %v3158_v41 = vunpack.c.h.s8.bf16 %v9121_v57  ;;  %v3151_v31 = vunpack.c.l.s8.bf16 %v9089_v20  ;;  %v2704_v2 = vadd.f32 %v8800_v30, %v2554_v29  ;;  %v2562_v38 = vmul.f32 %v8778_v52, %v2014_v39 }
 0x31d   :  { %12528 = vst [vmem:[#allocation48_spill] sm:$0xff] %v9118_v42  ;;  %v9138_v40 = vpop.f32.mrf.mxu0  ;;  %v9144_v61 = vpack.c.bf16 %v2824_v8, %v2820_v21  ;;  %v2026_v3 = vadd.f32 %v8969_v46, %v8964_v36  ;;  %v2713_v0 = vadd.f32 %v8761_v47, %v2563_v15  ;;  %v9158_v20 = vpack.c.bf16 %v2833_v16, %v2829_v55 }
 0x31e   :  { %v9133_v22 = vpop.f32.mrf.mxu1  ;;  %12531 = vst [vmem:[#allocation26_spill] sm:$0xff] %v9138_v40  ;;  %v2558_v29 = vmul.f32 %v8778_v52, %v2010_v32  ;;  %v2022_v36 = vadd.f32 %v8951_v59, %v8948_v53  ;;  %v2024_v46 = vadd.f32 %v8957_v51, %v8954_v43  ;;  %v3150_v53 = vunpack.c.l.s8.bf16 %v9121_v57 }
 0x31f   :  { %3753 = vmatpush2.bf16.msra.mxu1 %v3166_v28  ;;  %12532 = vst [vmem:[#allocation29_spill] sm:$0xff] %v9144_v61  ;;  %v2700_v28 = vadd.f32 %v8800_v30, %v2550_v48  ;;  %v9156_v40 = vpop.f32.mrf.mxu0  ;;  %12533 = vst [vmem:[#allocation22_spill] sm:$0xff] %v9158_v20  ;;  %v2832_v43 = vmax.f32 %v2704_v2, 0.0  ;;  %v2712_v59 = vadd.f32 %v8800_v30, %v2562_v38  ;;  %v2841_v48 = vmax.f32 %v2713_v0, 0.0 }
 0x320   :  { %v9150_v42 = vpop.f32.mrf.mxu1  ;;  %3754 = vmatprep.subr.bf16.mxu1 %v3159_v35  ;;  %v2709_v35 = vadd.f32 %v8761_v47, %v2559_v60  ;;  %v2020_v51 = vadd.f32 %v8944_v56, %v8938_v63  ;;  %v2571_v32 = vmul.f32 %v8739_v14, %v2026_v3  ;;  %v9183_v60 = vld [vmem:[#allocation8 + $0x258] sm:$0xff]  ;;  %v2708_v2 = vadd.f32 %v8800_v30, %v2558_v29 }
 0x321   :  { %v9171_v16 = vpop.f32.mrf.mxu0  ;;  %v2828_v15 = vmax.f32 %v2700_v28, 0.0  ;;  %v2567_v63 = vmul.f32 %v8739_v14, %v2022_v36  ;;  %v2570_v56 = vmul.f32 %v8778_v52, %v2024_v46  ;;  %v2036_v38 = vadd.f32 %v9007_v18, %v9002_v6 }
 0x322   :  { %v9166_v39 = vpop.f32.mrf.mxu1  ;;  %3443 = vmatmul.mubr.bf16.gmra.mxu1 %v9144_v61  ;;  %12534 = vst [vmem:[#allocation23_spill] sm:$0xff] %v9171_v16  ;;  %v2837_v0 = vmax.f32 %v2709_v35, 0.0  ;;  %v2840_v46 = vmax.f32 %v2712_v59, 0.0  ;;  %v2566_v6 = vmul.f32 %v8778_v52, %v2020_v51  ;;  %v2721_v18 = vadd.f32 %v8761_v47, %v2571_v32 }
 0x323   :  { %3452 = vmatprep.mubr.bf16.mxu1 %v9158_v20  ;;  %3755 = vmatpush2.bf16.msra.mxu1 %v3158_v41  ;;  %v2034_v41 = vadd.f32 %v8995_v26, %v8992_v33  ;;  %v9187_v21 = vpop.f32.mrf.mxu0  ;;  %v2030_v33 = vadd.f32 %v8982_v12, %v8976_v1  ;;  %v2032_v26 = vadd.f32 %v8989_v4, %v8986_v10 }
 0x324   :  { %v9181_v55 = vpop.f32.mrf.mxu1  ;;  %3756 = vmatprep.subr.bf16.mxu1 %v3151_v31  ;;  %v9197_v31 = vld [vmem:[#allocation8 + $0x250] sm:$0xff]  ;;  %v9206_v36 = vpack.c.bf16 %v2832_v43, %v2828_v15  ;;  %v9215_v12 = vpack.c.bf16 %v2841_v48, %v2837_v0  ;;  %v9221_v15 = vld [vmem:[#allocation8 + $0xe8] sm:$0xff]  ;;  %v2836_v43 = vmax.f32 %v2708_v2, 0.0  ;;  %v2717_v59 = vadd.f32 %v8761_v47, %v2567_v63 }
 0x325   :  { %v9203_v28 = vpop.f32.mrf.mxu0  ;;  %v2578_v35 = vmul.f32 %v8778_v52, %v2034_v41  ;;  %12537 = vst [vmem:[#allocation50_spill] sm:$0xff] %v9221_v15  ;;  %v2720_v51 = vadd.f32 %v8800_v30, %v2570_v56  ;;  %v2579_v32 = vmul.f32 %v8739_v14, %v2036_v38  ;;  %v2574_v48 = vmul.f32 %v8778_v52, %v2030_v33 }
 0x326   :  { %v9195_v3 = vpop.f32.mrf.mxu1  ;;  %12535 = vst [vmem:[#allocation21_spill] sm:$0xff] %v9206_v36  ;;  %12536 = vst [vmem:[#allocation49_spill] sm:$0xff] %v9215_v12  ;;  %v2575_v0 = vmul.f32 %v8739_v14, %v2032_v26  ;;  %v3145_v2 = vunpack.c.h.s8.bf16 %v9221_v15  ;;  %v9232_v29 = vpack.c.bf16 %v2840_v46, %v2836_v43  ;;  %v2716_v63 = vadd.f32 %v8800_v30, %v2566_v6  ;;  %v12540_v15 = vld [vmem:[#allocation39_spill] sm:$0xff] }
 0x327   :  { %3757 = vmatpush2.bf16.msra.mxu1 %v3150_v53  ;;  %v9213_v1 = vpop.f32.mrf.mxu0  ;;  %v9219_v53 = vld [vmem:[#allocation8 + $0x218] sm:$0xff]  ;;  %v2849_v56 = vmax.f32 %v2721_v18, 0.0  ;;  %v2040_v33 = vadd.f32 %v9020_v17, %v9014_v27  ;;  %v2042_v26 = vadd.f32 %v9027_v44, %v9024_v45  ;;  %v2845_v20 = vmax.f32 %v2717_v59, 0.0 }
 0x328   :  { %v9210_v57 = vpop.f32.mrf.mxu1  ;;  %12538 = vst [vmem:[#allocation51_spill] sm:$0xff] %v9232_v29  ;;  %4112 = vmatprep.subr.bf16.mxu1 %v3145_v2  ;;  %v2848_v46 = vmax.f32 %v2720_v51, 0.0  ;;  %v2729_v43 = vadd.f32 %v8761_v47, %v2579_v32  ;;  %v2724_v61 = vadd.f32 %v8800_v30, %v2574_v48  ;;  %v2725_v8 = vadd.f32 %v8761_v47, %v2575_v0 }
 0x329   :  { %v2305_v10 = vpop.f32.mrf.mxu0  ;;  %v2046_v27 = vadd.f32 %v9045_v58, %v9040_v49  ;;  %v2844_v45 = vmax.f32 %v2716_v63, 0.0  ;;  %v9249_v51 = vpack.c.bf16 %v2849_v56, %v2845_v20  ;;  %v2582_v32 = vmul.f32 %v8778_v52, %v2040_v33 }
 0x32a   :  { %v2112_v41 = vpop.f32.mrf.mxu1  ;;  %3453 = vmatmul.mubr.bf16.gmra.mxu1 %v9206_v36  ;;  %v2728_v36 = vadd.f32 %v8800_v30, %v2578_v35  ;;  %v12539_v35 = vld [vmem:[#allocation38_spill] sm:$0xff]  ;;  %v2857_v2 = vmax.f32 %v2729_v43, 0.0  ;;  %v2853_v20 = vmax.f32 %v2725_v8, 0.0 }
 0x32b   :  { %3462 = vmatprep.mubr.bf16.mxu1 %v9215_v12  ;;  %v2306_v12 = vadd.f32 %v2305_v10, %v2112_v41  ;;  %v2307_v4 = vpop.f32.mrf.mxu0  ;;  %v2044_v16 = vadd.f32 %v12540_v15, %v12539_v35  ;;  %12541 = vst [vmem:[#allocation38_spill] sm:$0xff] %v9249_v51  ;;  %v2583_v41 = vmul.f32 %v8739_v14, %v2042_v26 }
 0x32c   :  { %v2114_v38 = vpop.f32.mrf.mxu1  ;;  %v9254_v15 = vpack.c.bf16 %v2848_v46, %v2844_v45  ;;  %v2587_v56 = vmul.f32 %v8739_v14, %v2046_v27  ;;  %v9276_v45 = vpack.c.bf16 %v2857_v2, %v2853_v20  ;;  %v12545_v2 = vld [vmem:[#allocation42_spill] sm:$0xff] }
 0x32d   :  { %v2308_v6 = vadd.f32 %v2307_v4, %v2114_v38  ;;  %v2309_v17 = vpop.f32.mrf.mxu0  ;;  %v2856_v4 = vmax.f32 %v2728_v36, 0.0  ;;  %v2488_v48 = vmul.f32 %v9097_v23, %v2306_v12  ;;  %v2852_v38 = vmax.f32 %v2724_v61, 0.0 }
 0x32e   :  { %v2116_v18 = vpop.f32.mrf.mxu1  ;;  %12542 = vst [vmem:[#allocation39_spill] sm:$0xff] %v9254_v15  ;;  %v2586_v36 = vmul.f32 %v8778_v52, %v2044_v16  ;;  %v2050_v12 = vadd.f32 %v9058_v34, %v9052_v54  ;;  %v9269_v61 = vadd.f32 %v8800_v30, %v2582_v32  ;;  %v9272_v8 = vadd.f32 %v8761_v47, %v2583_v41 }
 0x32f   :  { %v2489_v44 = vmul.f32 %v9111_v37, %v2308_v6  ;;  %v2310_v10 = vadd.f32 %v2309_v17, %v2116_v18  ;;  %v2311_v0 = vpop.f32.mrf.mxu0  ;;  %v9266_v18 = vpack.c.bf16 %v2856_v4, %v2852_v38  ;;  %v2638_v16 = vadd.f32 %v9101_v62, %v2488_v48  ;;  %12544 = vst [vmem:[#allocation53_spill] sm:$0xff] %v9276_v45 }
 0x330   :  { %v2118_v59 = vpop.f32.mrf.mxu1  ;;  %v2737_v41 = vadd.f32 %v8761_v47, %v2587_v56  ;;  %v2590_v48 = vmul.f32 %v8778_v52, %v2050_v12 }
 0x331   :  { %v2492_v49 = vmul.f32 %v9097_v23, %v2310_v10  ;;  %v2312_v58 = vadd.f32 %v2311_v0, %v2118_v59  ;;  %v2315_v33 = vpop.f32.mrf.mxu0  ;;  %v2639_v26 = vadd.f32 %v9129_v5, %v2489_v44  ;;  %12543 = vst [vmem:[#allocation52_spill] sm:$0xff] %v9266_v18  ;;  %v9279_v44 = vadd.f32 %v8800_v30, %v2586_v36 }
 0x332   :  { %v2122_v63 = vpop.f32.mrf.mxu1  ;;  %3463 = vmatmul.mubr.bf16.gmra.mxu1 %v9232_v29  ;;  %v2052_v10 = vadd.f32 %v9065_v50, %v9062_v9  ;;  %v2056_v59 = vadd.f32 %v9085_v11, %v9078_v13  ;;  %v2766_v20 = vmax.f32 %v2638_v16, 0.0  ;;  %v2860_v50 = vmax.f32 %v9269_v61, 0.0 }
 0x333   :  { %3472 = vmatprep.mubr.bf16.mxu1 %v9249_v51  ;;  %v2642_v46 = vadd.f32 %v9101_v62, %v2492_v49  ;;  %v2493_v43 = vmul.f32 %v9111_v37, %v2312_v58  ;;  %v2317_v35 = vpop.f32.mrf.mxu0  ;;  %v2316_v34 = vadd.f32 %v2315_v33, %v2122_v63  ;;  %v2767_v0 = vmax.f32 %v2639_v26, 0.0  ;;  %v12546_v63 = vld [vmem:[#allocation43_spill] sm:$0xff] }
 0x334   :  { %v2124_v6 = vpop.f32.mrf.mxu1  ;;  %v2054_v38 = vadd.f32 %v12546_v63, %v12545_v2  ;;  %v2591_v12 = vmul.f32 %v8739_v14, %v2052_v10  ;;  %v2595_v26 = vmul.f32 %v8739_v14, %v2056_v59  ;;  %v9306_v10 = vadd.f32 %v8800_v30, %v2590_v48 }
 0x335   :  { %v2643_v54 = vadd.f32 %v9129_v5, %v2493_v43  ;;  %v2318_v27 = vadd.f32 %v2317_v35, %v2124_v6  ;;  %v2770_v4 = vmax.f32 %v2642_v46, 0.0  ;;  %v2319_v32 = vpop.f32.mrf.mxu0  ;;  %v2496_v13 = vmul.f32 %v9097_v23, %v2316_v34 }
 0x336   :  { %v2126_v17 = vpop.f32.mrf.mxu1  ;;  %v2861_v35 = vmax.f32 %v9272_v8, 0.0  ;;  %v2865_v34 = vmax.f32 %v2737_v41, 0.0  ;;  %v2594_v59 = vmul.f32 %v8778_v52, %v2054_v38  ;;  %v2741_v2 = vadd.f32 %v8761_v47, %v2591_v12  ;;  %v12550_v38 = vld [vmem:[#allocation46_spill] sm:$0xff] }
 0x337   :  { %v2771_v49 = vmax.f32 %v2643_v54, 0.0  ;;  %v2497_v36 = vmul.f32 %v9111_v37, %v2318_v27  ;;  %v2320_v33 = vadd.f32 %v2319_v32, %v2126_v17  ;;  %v2321_v9 = vpop.f32.mrf.mxu0  ;;  %v9297_v43 = vpack.c.bf16 %v2770_v4, %v2766_v20  ;;  %v12551_v20 = vld [vmem:[#allocation47_spill] sm:$0xff] }
 0x338   :  { %v2128_v58 = vpop.f32.mrf.mxu1  ;;  %v2864_v54 = vmax.f32 %v9279_v44, 0.0  ;;  %v2646_v8 = vadd.f32 %v9101_v62, %v2496_v13  ;;  %v2745_v63 = vadd.f32 %v8761_v47, %v2595_v26  ;;  %v12554_v13 = vunpack.c.l.s8.bf16 %v12530_v25 }
 0x339   :  { %v2322_v11 = vadd.f32 %v2321_v9, %v2128_v58  ;;  %v9293_v56 = vpack.c.bf16 %v2771_v49, %v2767_v0  ;;  %12548 = vst [vmem:[#allocation43_spill] sm:$0xff] %v9297_v43  ;;  %v2500_v6 = vmul.f32 %v9097_v23, %v2320_v33  ;;  %v2325_v16 = vpop.f32.mrf.mxu0  ;;  %v2647_v4 = vadd.f32 %v9129_v5, %v2497_v36  ;;  %v12552_v33 = vld [vmem:[#allocation48_spill] sm:$0xff]  ;;  %v12553_v9 = vld [vmem:[#allocation25_spill] sm:$0xff] }
 0x33a   :  { %v2132_v46 = vpop.f32.mrf.mxu1  ;;  %3473 = vmatmul.mubr.bf16.gmra.mxu1 %v9254_v15  ;;  %v12549_v58 = vunpack.c.h.s8.bf16 %v9113_v7  ;;  %v2060_v36 = vadd.f32 %v12551_v20, %v12550_v38  ;;  %v9326_v12 = vadd.f32 %v8800_v30, %v2594_v59  ;;  %v2066_v26 = vadd.f32 %v9156_v40, %v9150_v42 }
 0x33b   :  { %12547 = vst [vmem:[#allocation42_spill] sm:$0xff] %v9293_v56  ;;  %3482 = vmatprep.mubr.bf16.mxu1 %v9276_v45  ;;  %v2501_v27 = vmul.f32 %v9111_v37, %v2322_v11  ;;  %3565 = vmatprep.mubr.bf16.mxu0 %v9293_v56  ;;  %v2650_v32 = vadd.f32 %v9101_v62, %v2500_v6  ;;  %v2327_v0 = vpop.f32.mrf.mxu0  ;;  %v2873_v59 = vmax.f32 %v2745_v63, 0.0 }
 0x33c   :  { %v2134_v17 = vpop.f32.mrf.mxu1  ;;  %3566 = vmatmul.mubr.bf16.vlgmr.msra.gmra.mxu0 %v9297_v43  ;;  %v2326_v41 = vadd.f32 %v2325_v16, %v2132_v46  ;;  %v2062_v11 = vadd.f32 %v12553_v9, %v12552_v33  ;;  %v9330_v20 = vpack.c.bf16 %v2865_v34, %v2861_v35  ;;  %v2774_v33 = vmax.f32 %v2646_v8, 0.0 }
 0x33d   :  { %v2651_v44 = vadd.f32 %v9129_v5, %v2501_v27  ;;  %v2328_v49 = vadd.f32 %v2327_v0, %v2134_v17  ;;  %3920 = vmatpush1.bf16.msra.mxu0 %v12549_v58  ;;  %v2329_v6 = vpop.f32.mrf.mxu0  ;;  %v2778_v46 = vmax.f32 %v2650_v32, 0.0  ;;  %v2775_v58 = vmax.f32 %v2647_v4, 0.0 }
 0x33e   :  { %v2136_v48 = vpop.f32.mrf.mxu1  ;;  %3921 = vmatprep.subr.bf16.mxu0 %v12554_v13  ;;  %12555 = vst [vmem:[#allocation46_spill] sm:$0xff] %v9330_v20  ;;  %v2504_v25 = vmul.f32 %v9097_v23, %v2326_v41  ;;  %v2599_v42 = vmul.f32 %v8739_v14, %v2062_v11  ;;  %v12558_v34 = vunpack.c.h.s8.bf16 %v9140_v24  ;;  %v2868_v11 = vmax.f32 %v9306_v10, 0.0  ;;  %v12561_v10 = vld [vmem:[#allocation26_spill] sm:$0xff] }
 0x33f   :  { %v2779_v16 = vmax.f32 %v2651_v44, 0.0  ;;  %v2505_v27 = vmul.f32 %v9111_v37, %v2328_v49  ;;  %v2330_v17 = vadd.f32 %v2329_v6, %v2136_v48  ;;  %v2331_v38 = vpop.f32.mrf.mxu0  ;;  %v12556_v49 = vunpack.c.l.s8.bf16 %v9113_v7 }
 0x340   :  { %v2138_v0 = vpop.f32.mrf.mxu1  ;;  %v2598_v48 = vmul.f32 %v8778_v52, %v2060_v36  ;;  %v9344_v4 = vpack.c.bf16 %v2778_v46, %v2774_v33  ;;  %v9351_v36 = vpack.c.bf16 %v2864_v54, %v2860_v50  ;;  %v2869_v6 = vmax.f32 %v2741_v2, 0.0 }
 0x341   :  { %v2508_v32 = vmul.f32 %v9097_v23, %v2330_v17  ;;  %v2332_v44 = vadd.f32 %v2331_v38, %v2138_v0  ;;  %3922 = vmatpush1.bf16.msra.mxu0 %v12556_v49  ;;  %v2335_v40 = vpop.f32.mrf.mxu0  ;;  %v9340_v35 = vpack.c.bf16 %v2779_v16, %v2775_v58  ;;  %v2655_v8 = vadd.f32 %v9129_v5, %v2505_v27  ;;  %v9374_v49 = vld [vmem:[#allocation8 + $0x210] sm:$0xff] }
 0x342   :  { %v2142_v9 = vpop.f32.mrf.mxu1  ;;  %3483 = vmatmul.mubr.bf16.gmra.mxu1 %v9266_v18  ;;  %3923 = vmatprep.subr.bf16.mxu0 %v12558_v34  ;;  %12559 = vst [vmem:[#allocation48_spill] sm:$0xff] %v9344_v4  ;;  %12560 = vst [vmem:[#allocation25_spill] sm:$0xff] %v9351_v36  ;;  %v2603_v13 = vmul.f32 %v8739_v14, %v2066_v26  ;;  %v2654_v16 = vadd.f32 %v9101_v62, %v2504_v25  ;;  %v2872_v61 = vmax.f32 %v9326_v12, 0.0 }
 0x343   :  { %3492 = vmatprep.mubr.bf16.mxu1 %v9330_v20  ;;  %12557 = vst [vmem:[#allocation47_spill] sm:$0xff] %v9340_v35  ;;  %v2658_v7 = vadd.f32 %v9101_v62, %v2508_v32  ;;  %v2509_v41 = vmul.f32 %v9111_v37, %v2332_v44  ;;  %3575 = vmatprep.mubr.bf16.mxu0 %v9340_v35  ;;  %v2337_v46 = vpop.f32.mrf.mxu0  ;;  %v12562_v38 = vunpack.c.h.s8.bf16 %v9152_v19  ;;  %v2783_v33 = vmax.f32 %v2655_v8, 0.0 }
 0x344   :  { %v2144_v63 = vpop.f32.mrf.mxu1  ;;  %v2336_v17 = vadd.f32 %v2335_v40, %v2142_v9  ;;  %3576 = vmatmul.mubr.bf16.gmra.mxu0 %v9344_v4  ;;  %v9361_v50 = vadd.f32 %v8800_v30, %v2598_v48  ;;  %v9364_v54 = vadd.f32 %v8761_v47, %v2599_v42  ;;  %v2064_v2 = vadd.f32 %v12561_v10, %v9133_v22 }
 0x345   :  { %v2659_v27 = vadd.f32 %v9129_v5, %v2509_v41  ;;  %v2338_v0 = vadd.f32 %v2337_v46, %v2144_v63  ;;  %v2339_v26 = vpop.f32.mrf.mxu0  ;;  %3924 = vmatpush1.bf16.msra.mxu0 %v12562_v38  ;;  %v2786_v25 = vmax.f32 %v2658_v7, 0.0  ;;  %v9370_v9 = vpack.c.bf16 %v2873_v59, %v2869_v6 }
 0x346   :  { %v2146_v58 = vpop.f32.mrf.mxu1  ;;  %v12564_v12 = vunpack.c.l.s8.bf16 %v9140_v24  ;;  %v2753_v48 = vadd.f32 %v8761_v47, %v2603_v13  ;;  %v2076_v22 = vadd.f32 %v9213_v1, %v9210_v57  ;;  %v2782_v8 = vmax.f32 %v2654_v16, 0.0 }
 0x347   :  { %v2787_v32 = vmax.f32 %v2659_v27, 0.0  ;;  %12563 = vst [vmem:[#allocation26_spill] sm:$0xff] %v9370_v9  ;;  %v2513_v42 = vmul.f32 %v9111_v37, %v2338_v0  ;;  %v2340_v40 = vadd.f32 %v2339_v26, %v2146_v58  ;;  %v2341_v34 = vpop.f32.mrf.mxu0  ;;  %v2512_v7 = vmul.f32 %v9097_v23, %v2336_v17 }
 0x348   :  { %v2148_v44 = vpop.f32.mrf.mxu1  ;;  %3925 = vmatprep.subr.bf16.mxu0 %v12564_v12  ;;  %v2602_v63 = vmul.f32 %v8778_v52, %v2064_v2  ;;  %v2072_v6 = vadd.f32 %v9187_v21, %v9181_v55  ;;  %v12566_v13 = vunpack.c.l.s8.bf16 %v9152_v19  ;;  %v3222_v46 = vunpack.c.h.s8.bf16 %v9374_v49 }
 0x349   :  { %v2342_v41 = vadd.f32 %v2341_v34, %v2148_v44  ;;  %v9382_v24 = vpack.c.bf16 %v2787_v32, %v2783_v33  ;;  %v2516_v57 = vmul.f32 %v9097_v23, %v2340_v40  ;;  %v2345_v1 = vpop.f32.mrf.mxu0  ;;  %v9392_v16 = vpack.c.bf16 %v2872_v61, %v2868_v11 }
 0x34a   :  { %v2152_v59 = vpop.f32.mrf.mxu1  ;;  %3493 = vmatmul.mubr.bf16.gmra.mxu1 %v9351_v36  ;;  %3926 = vmatpush1.bf16.msra.mxu0 %v12566_v13  ;;  %v9394_v27 = vpack.c.bf16 %v2786_v25, %v2782_v8  ;;  %v12569_v21 = vunpack.c.h.s8.bf16 %v9183_v60  ;;  %v3215_v55 = vunpack.c.l.s8.bf16 %v9219_v53  ;;  %v2881_v58 = vmax.f32 %v2753_v48, 0.0 }
 0x34b   :  { %12565 = vst [vmem:[#allocation54_spill] sm:$0xff] %v9382_v24  ;;  %3502 = vmatprep.mubr.bf16.mxu1 %v9370_v9  ;;  %12567 = vst [vmem:[#allocation55_spill] sm:$0xff] %v9392_v16  ;;  %v2517_v17 = vmul.f32 %v9111_v37, %v2342_v41  ;;  %3585 = vmatprep.mubr.bf16.mxu0 %v9382_v24  ;;  %v2611_v19 = vmul.f32 %v8739_v14, %v2076_v22  ;;  %v2347_v61 = vpop.f32.mrf.mxu0  ;;  %v2877_v32 = vmax.f32 %v9364_v54, 0.0  ;;  %v12572_v54 = vld [vmem:[#allocation23_spill] sm:$0xff] }
 0x34c   :  { %12568 = vst [vmem:[#allocation56_spill] sm:$0xff] %v9394_v27  ;;  %v2154_v0 = vpop.f32.mrf.mxu1  ;;  %3927 = vmatprep.subr.bf16.mxu0 %v12569_v21  ;;  %v2663_v10 = vadd.f32 %v9129_v5, %v2513_v42  ;;  %v2666_v11 = vadd.f32 %v9101_v62, %v2516_v57  ;;  %v2662_v2 = vadd.f32 %v9101_v62, %v2512_v7  ;;  %v12570_v42 = vunpack.c.h.s8.bf16 %v9197_v31 }
 0x34d   :  { %v2667_v26 = vadd.f32 %v9129_v5, %v2517_v17  ;;  %v2346_v38 = vadd.f32 %v2345_v1, %v2152_v59  ;;  %v2348_v33 = vadd.f32 %v2347_v61, %v2154_v0  ;;  %3586 = vmatmul.mubr.bf16.gmra.mxu0 %v9394_v27  ;;  %v2752_v44 = vadd.f32 %v8800_v30, %v2602_v63  ;;  %v2349_v22 = vpop.f32.mrf.mxu0 }
 0x34e   :  { %v2156_v25 = vpop.f32.mrf.mxu1  ;;  %v2607_v12 = vmul.f32 %v8739_v14, %v2072_v6  ;;  %v2074_v48 = vadd.f32 %v9203_v28, %v9195_v3  ;;  %3928 = vmatpush1.bf16.msra.mxu0 %v12570_v42  ;;  %v2794_v40 = vmax.f32 %v2666_v11, 0.0  ;;  %v12571_v59 = vunpack.c.l.s8.bf16 %v9183_v60 }
 0x34f   :  { %v2795_v34 = vmax.f32 %v2667_v26, 0.0  ;;  %v2521_v8 = vmul.f32 %v9111_v37, %v2348_v33  ;;  %v2350_v7 = vadd.f32 %v2349_v22, %v2156_v25  ;;  %v2070_v63 = vadd.f32 %v12572_v54, %v9166_v39  ;;  %v2351_v3 = vpop.f32.mrf.mxu0  ;;  %v9439_v33 = vld [vmem:[#allocation8 + $0x3d8] sm:$0xff] }
 0x350   :  { %v2158_v41 = vpop.f32.mrf.mxu1  ;;  %3929 = vmatprep.subr.bf16.mxu0 %v12571_v59  ;;  %v2761_v14 = vadd.f32 %v8761_v47, %v2611_v19  ;;  %v2791_v6 = vmax.f32 %v2663_v10, 0.0  ;;  %v9420_v28 = vpack.c.bf16 %v2881_v58, %v2877_v32  ;;  %v2790_v57 = vmax.f32 %v2662_v2, 0.0 }
 0x351   :  { %v2520_v1 = vmul.f32 %v9097_v23, %v2346_v38  ;;  %v2524_v13 = vmul.f32 %v9097_v23, %v2350_v7  ;;  %v2352_v17 = vadd.f32 %v2351_v3, %v2158_v41  ;;  %v2880_v60 = vmax.f32 %v2752_v44, 0.0  ;;  %v2355_v11 = vpop.f32.mrf.mxu0 }
 0x352   :  { %12573 = vst [vmem:[#allocation23_spill] sm:$0xff] %v9420_v28  ;;  %v2162_v0 = vpop.f32.mrf.mxu1  ;;  %3503 = vmatmul.mubr.bf16.gmra.mxu1 %v9392_v16  ;;  %v2757_v21 = vadd.f32 %v8761_v47, %v2607_v12  ;;  %v2610_v39 = vmul.f32 %v8778_v52, %v2074_v48  ;;  %v9428_v19 = vpack.c.bf16 %v2795_v34, %v2791_v6  ;;  %v12575_v58 = vunpack.c.l.s8.bf16 %v9197_v31  ;;  %v3078_v6 = vld [vmem:[#allocation8 + $0x3d0] sm:$0xff] }
 0x353   :  { %3512 = vmatprep.mubr.bf16.mxu1 %v9420_v28  ;;  %v9432_v10 = vpack.c.bf16 %v2794_v40, %v2790_v57  ;;  %v2671_v61 = vadd.f32 %v9129_v5, %v2521_v8  ;;  %v2674_v2 = vadd.f32 %v9101_v62, %v2524_v13  ;;  %v2525_v26 = vmul.f32 %v9111_v37, %v2352_v17  ;;  %v2357_v44 = vpop.f32.mrf.mxu0 }
 0x354   :  { %12574 = vst [vmem:[#allocation57_spill] sm:$0xff] %v9428_v19  ;;  %3930 = vmatpush1.bf16.msra.mxu0 %v12575_v58  ;;  %v2164_v38 = vpop.f32.mrf.mxu1  ;;  %v12577_v47 = vunpack.c.h.s8.bf16 %v9219_v53  ;;  %v2876_v25 = vmax.f32 %v9361_v50, 0.0  ;;  %v2606_v32 = vmul.f32 %v8778_v52, %v2070_v63  ;;  %v2889_v31 = vmax.f32 %v2761_v14, 0.0  ;;  %3595 = vmatprep.mubr.bf16.mxu0 %v9428_v19 }
 0x355   :  { %12576 = vst [vmem:[#allocation58_spill] sm:$0xff] %v9432_v10  ;;  %v2670_v12 = vadd.f32 %v9101_v62, %v2520_v1  ;;  %v2675_v48 = vadd.f32 %v9129_v5, %v2525_v26  ;;  %v2356_v22 = vadd.f32 %v2355_v11, %v2162_v0  ;;  %v2358_v42 = vadd.f32 %v2357_v44, %v2164_v38  ;;  %v2359_v7 = vpop.f32.mrf.mxu0  ;;  %v3071_v26 = vld [vmem:[#allocation8 + $0x398] sm:$0xff] }
 0x356   :  { %3931 = vmatprep.subr.bf16.mxu0 %v12577_v47  ;;  %3596 = vmatmul.mubr.bf16.gmra.mxu0 %v9432_v10  ;;  %v2166_v40 = vpop.f32.mrf.mxu1  ;;  %v2885_v34 = vmax.f32 %v2757_v21, 0.0  ;;  %v2760_v8 = vadd.f32 %v8800_v30, %v2610_v39  ;;  %v3214_v52 = vunpack.c.l.s8.bf16 %v9374_v49  ;;  %v3335_v50 = vunpack.c.h.s8.bf16 %v9439_v33 }
 0x357   :  { %v9452_v41 = vpack.c.bf16 %v2880_v60, %v2876_v25  ;;  %v2799_v59 = vmax.f32 %v2671_v61, 0.0  ;;  %v2802_v54 = vmax.f32 %v2674_v2, 0.0  ;;  %v2803_v63 = vmax.f32 %v2675_v48, 0.0 }
 0x358   :  { %3932 = vmatpush1.bf16.msra.mxu0 %v3222_v46  ;;  %v2168_v14 = vpop.f32.mrf.mxu1  ;;  %v2756_v3 = vadd.f32 %v8800_v30, %v2606_v32  ;;  %v2529_v57 = vmul.f32 %v9111_v37, %v2358_v42  ;;  %v2360_v1 = vadd.f32 %v2359_v7, %v2166_v40  ;;  %v2361_v46 = vpop.f32.mrf.mxu0  ;;  %v9458_v13 = vpack.c.bf16 %v2889_v31, %v2885_v34 }
 0x359   :  { %12578 = vst [vmem:[#allocation59_spill] sm:$0xff] %v9452_v41  ;;  %3933 = vmatprep.subr.bf16.mxu0 %v3215_v55  ;;  %v2798_v49 = vmax.f32 %v2670_v12, 0.0  ;;  %v2528_v17 = vmul.f32 %v9097_v23, %v2356_v22  ;;  %v2362_v0 = vadd.f32 %v2361_v46, %v2168_v14  ;;  %v9462_v21 = vpack.c.bf16 %v2803_v63, %v2799_v59 }
 0x35a   :  { %12579 = vst [vmem:[#allocation60_spill] sm:$0xff] %v9458_v13  ;;  %v2172_v60 = vpop.f32.mrf.mxu1  ;;  %3513 = vmatmul.mubr.bf16.gmra.mxu1 %v9452_v41  ;;  %v2888_v53 = vmax.f32 %v2760_v8, 0.0  ;;  %v2532_v55 = vmul.f32 %v9097_v23, %v2360_v1  ;;  %v2365_v39 = vpop.f32.mrf.mxu0  ;;  %v3334_v30 = vunpack.c.h.s8.bf16 %v3078_v6  ;;  %v3327_v2 = vunpack.c.l.s8.bf16 %v9439_v33 }
 0x35b   :  { %12580 = vst [vmem:[#allocation61_spill] sm:$0xff] %v9462_v21  ;;  %3522 = vmatprep.mubr.bf16.mxu1 %v9458_v13  ;;  %v9466_v11 = vpack.c.bf16 %v2802_v54, %v2798_v49  ;;  %v2533_v58 = vmul.f32 %v9111_v37, %v2362_v0  ;;  %3605 = vmatprep.mubr.bf16.mxu0 %v9462_v21  ;;  %v2884_v38 = vmax.f32 %v2756_v3, 0.0  ;;  %v3326_v33 = vunpack.c.l.s8.bf16 %v3078_v6  ;;  %v3070_v54 = vld [vmem:[#allocation8 + $0x390] sm:$0xff]  ;;  %v12584_v0 = vld [vmem:[#allocation24_spill] sm:$0xff] }
 0x35c   :  { %3934 = vmatpush1.bf16.msra.mxu0 %v3214_v52  ;;  %v2174_v61 = vpop.f32.mrf.mxu1  ;;  %v2679_v47 = vadd.f32 %v9129_v5, %v2529_v57  ;;  %v2682_v25 = vadd.f32 %v9101_v62, %v2532_v55  ;;  %v2367_v32 = vpop.f32.mrf.mxu0  ;;  %v2678_v31 = vadd.f32 %v9101_v62, %v2528_v17  ;;  %v2366_v12 = vadd.f32 %v2365_v39, %v2172_v60 }
 0x35d   :  { %12581 = vst [vmem:[#allocation62_spill] sm:$0xff] %v9466_v11  ;;  %3935 = vmatprep.subr.bf16.mxu0 %v3335_v50  ;;  %v2683_v44 = vadd.f32 %v9129_v5, %v2533_v58  ;;  %v2368_v48 = vadd.f32 %v2367_v32, %v2174_v61  ;;  %v9476_v42 = vpack.c.bf16 %v2888_v53, %v2884_v38  ;;  %v3319_v34 = vunpack.c.h.s8.bf16 %v3071_v26  ;;  %v9491_v38 = vld [vmem:[#allocation8 + $0x358] sm:$0xff] }
 0x35e   :  { %3606 = vmatmul.mubr.bf16.gmra.mxu0 %v9466_v11  ;;  %v2176_v22 = vpop.f32.mrf.mxu1  ;;  %v2369_v40 = vpop.f32.mrf.mxu0  ;;  %v2810_v8 = vmax.f32 %v2682_v25, 0.0  ;;  %v2807_v63 = vmax.f32 %v2679_v47, 0.0  ;;  %v2806_v3 = vmax.f32 %v2678_v31, 0.0  ;;  %v2536_v57 = vmul.f32 %v9097_v23, %v2366_v12 }
 0x35f   :  { %12582 = vst [vmem:[#allocation63_spill] sm:$0xff] %v9476_v42  ;;  %v2811_v7 = vmax.f32 %v2683_v44, 0.0  ;;  %v2537_v52 = vmul.f32 %v9111_v37, %v2368_v48  ;;  %v2370_v50 = vadd.f32 %v2369_v40, %v2176_v22  ;;  %v3318_v60 = vunpack.c.h.s8.bf16 %v3070_v54  ;;  %v9496_v44 = vld [vmem:[#allocation8 + $0xe0] sm:$0xff] }
 0x360   :  { %3936 = vmatpush2.bf16.msra.mxu0 %v3334_v30  ;;  %v2178_v59 = vpop.f32.mrf.mxu1  ;;  %v2371_v14 = vpop.f32.mrf.mxu0  ;;  %v3311_v53 = vunpack.c.l.s8.bf16 %v3071_v26  ;;  %v9485_v55 = vpack.c.bf16 %v2810_v8, %v2806_v3  ;;  %v2686_v47 = vadd.f32 %v9101_v62, %v2536_v57  ;;  %v3310_v48 = vunpack.c.l.s8.bf16 %v3070_v54 }
 0x361   :  { %3937 = vmatprep.subr.bf16.mxu0 %v3327_v2  ;;  %v2540_v1 = vmul.f32 %v9097_v23, %v2370_v50  ;;  %v2372_v46 = vadd.f32 %v2371_v14, %v2178_v59  ;;  %v9482_v17 = vpack.c.bf16 %v2811_v7, %v2807_v63  ;;  %v2687_v39 = vadd.f32 %v9129_v5, %v2537_v52  ;;  %v9499_v7 = vld [vmem:[#allocation8 + $0x350] sm:$0xff] }
 0x362   :  { %v2182_v49 = vpop.f32.mrf.mxu1  ;;  %3523 = vmatmul.mubr.bf16.gmra.mxu1 %v9476_v42  ;;  %v2375_v6 = vpop.f32.mrf.mxu0  ;;  %12585 = vst [vmem:[#allocation65_spill] sm:$0xff] %v9485_v55  ;;  %v3303_v8 = vunpack.c.h.s8.bf16 %v9491_v38  ;;  %v3144_v63 = vunpack.c.h.s8.bf16 %v9496_v44  ;;  %v12586_v14 = vld [vmem:[#allocation50_spill] sm:$0xff]  ;;  %v2814_v57 = vmax.f32 %v2686_v47, 0.0 }
 0x363   :  { %12583 = vst [vmem:[#allocation64_spill] sm:$0xff] %v9482_v17  ;;  %3758 = vmatprep.mubr.bf16.mxu1 %v12584_v0  ;;  %v2690_v30 = vadd.f32 %v9101_v62, %v2540_v1  ;;  %v2541_v58 = vmul.f32 %v9111_v37, %v2372_v46  ;;  %3615 = vmatprep.mubr.bf16.mxu0 %v9482_v17  ;;  %v2815_v22 = vmax.f32 %v2687_v39, 0.0  ;;  %v3137_v3 = vunpack.c.l.s8.bf16 %v12586_v14  ;;  %v12589_v39 = vld [vmem:[#allocation28_spill] sm:$0xff] }
 0x364   :  { %3938 = vmatpush2.bf16.msra.mxu0 %v3326_v33  ;;  %v2184_v61 = vpop.f32.mrf.mxu1  ;;  %v2377_v2 = vpop.f32.mrf.mxu0  ;;  %v2376_v26 = vadd.f32 %v2375_v6, %v2182_v49  ;;  %v12587_v49 = vld [vmem:[#allocation27_spill] sm:$0xff] }
 0x365   :  { %3939 = vmatprep.subr.bf16.mxu0 %v3319_v34  ;;  %v2691_v25 = vadd.f32 %v9129_v5, %v2541_v58  ;;  %v2378_v32 = vadd.f32 %v2377_v2, %v2184_v61  ;;  %v2818_v40 = vmax.f32 %v2690_v30, 0.0  ;;  %v3302_v30 = vunpack.c.h.s8.bf16 %v9499_v7  ;;  %v9511_v58 = vld [vmem:[#allocation8 + $0xa8] sm:$0xff] }
 0x366   :  { %3616 = vmatmul.mubr.bf16.gmra.mxu0 %v9485_v55  ;;  %v2186_v31 = vpop.f32.mrf.mxu1  ;;  %v2379_v12 = vpop.f32.mrf.mxu0  ;;  %v2544_v54 = vmul.f32 %v9097_v23, %v2376_v26  ;;  %v9518_v26 = vld [vmem:[#allocation8 + $0x318] sm:$0xff] }
 0x367   :  { %v2819_v33 = vmax.f32 %v2691_v25, 0.0  ;;  %v2545_v52 = vmul.f32 %v9111_v37, %v2378_v32  ;;  %v2380_v50 = vadd.f32 %v2379_v12, %v2186_v31  ;;  %v9513_v61 = vpack.c.bf16 %v2818_v40, %v2814_v57 }
 0x368   :  { %3940 = vmatpush2.bf16.msra.mxu0 %v3318_v60  ;;  %v2188_v34 = vpop.f32.mrf.mxu1  ;;  %v2381_v59 = vpop.f32.mrf.mxu0  ;;  %v3295_v25 = vunpack.c.l.s8.bf16 %v9491_v38  ;;  %v2694_v40 = vadd.f32 %v9101_v62, %v2544_v54  ;;  %v3129_v38 = vunpack.c.h.s8.bf16 %v9511_v58 }
 0x369   :  { %3941 = vmatprep.subr.bf16.mxu0 %v3311_v53  ;;  %v2382_v1 = vadd.f32 %v2381_v59, %v2188_v34  ;;  %v9506_v6 = vpack.c.bf16 %v2819_v33, %v2815_v22  ;;  %v2548_v60 = vmul.f32 %v9097_v23, %v2380_v50  ;;  %12590 = vst [vmem:[#allocation66_spill] sm:$0xff] %v9513_v61  ;;  %v3136_v22 = vunpack.c.l.s8.bf16 %v9496_v44  ;;  %v9527_v50 = vld [vmem:[#allocation8 + $0xa0] sm:$0xff] }
 0x36a   :  { %v2192_v46 = vpop.f32.mrf.mxu1  ;;  %3759 = vmatmul.mubr.bf16.vlgmr.msra.gmra.mxu1 %v12587_v49  ;;  %v2385_v53 = vpop.f32.mrf.mxu0  ;;  %v2695_v32 = vadd.f32 %v9129_v5, %v2545_v52  ;;  %v3294_v59 = vunpack.c.l.s8.bf16 %v9499_v7 }
 0x36b   :  { %12588 = vst [vmem:[#allocation50_spill] sm:$0xff] %v9506_v6  ;;  %3768 = vmatprep.mubr.bf16.mxu1 %v12589_v39  ;;  %v2549_v2 = vmul.f32 %v9111_v37, %v2382_v1  ;;  %3625 = vmatprep.mubr.bf16.mxu0 %v9506_v6  ;;  %v2698_v31 = vadd.f32 %v9101_v62, %v2548_v60 }
 0x36c   :  { %3942 = vmatpush2.bf16.msra.mxu0 %v3310_v48  ;;  %v2194_v47 = vpop.f32.mrf.mxu1  ;;  %v2386_v12 = vadd.f32 %v2385_v53, %v2192_v46  ;;  %v2387_v48 = vpop.f32.mrf.mxu0  ;;  %4113 = vmatpush1.bf16.msra.mxu1 %v3144_v63  ;;  %v3287_v63 = vunpack.c.h.s8.bf16 %v9518_v26  ;;  %v9532_v46 = vld [vmem:[#allocation8 + $0x310] sm:$0xff] }
 0x36d   :  { %3943 = vmatprep.subr.bf16.mxu0 %v3303_v8  ;;  %v2699_v33 = vadd.f32 %v9129_v5, %v2549_v2  ;;  %v2388_v34 = vadd.f32 %v2387_v48, %v2194_v47  ;;  %4114 = vmatprep.subr.bf16.mxu1 %v3137_v3  ;;  %v2826_v44 = vmax.f32 %v2698_v31, 0.0  ;;  %v2823_v3 = vmax.f32 %v2695_v32, 0.0  ;;  %v12591_v48 = vld [vmem:[#allocation30_spill] sm:$0xff]  ;;  %v12593_v32 = vld [vmem:[#allocation31_spill] sm:$0xff] }
 0x36e   :  { %3626 = vmatmul.mubr.bf16.gmra.mxu0 %v9513_v61  ;;  %v2196_v8 = vpop.f32.mrf.mxu1  ;;  %v2389_v52 = vpop.f32.mrf.mxu0  ;;  %v2552_v60 = vmul.f32 %v9097_v23, %v2386_v12  ;;  %v2822_v2 = vmax.f32 %v2694_v40, 0.0  ;;  %v3286_v12 = vunpack.c.h.s8.bf16 %v9532_v46  ;;  %v9544_v40 = vld [vmem:[#allocation8 + $0x68] sm:$0xff] }
 0x36f   :  { %v2827_v14 = vmax.f32 %v2699_v33, 0.0  ;;  %v2553_v57 = vmul.f32 %v9111_v37, %v2388_v34  ;;  %v2390_v54 = vadd.f32 %v2389_v52, %v2196_v8  ;;  %v3121_v33 = vunpack.c.l.s8.bf16 %v9511_v58 }
 0x370   :  { %3944 = vmatpush2.bf16.msra.mxu0 %v3302_v30  ;;  %v2198_v1 = vpop.f32.mrf.mxu1  ;;  %v2391_v53 = vpop.f32.mrf.mxu0  ;;  %4115 = vmatpush1.bf16.msra.mxu1 %v3136_v22  ;;  %v3128_v30 = vunpack.c.h.s8.bf16 %v9527_v50  ;;  %v3279_v22 = vunpack.c.l.s8.bf16 %v9518_v26  ;;  %v9546_v8 = vpack.c.bf16 %v2826_v44, %v2822_v2  ;;  %v3120_v26 = vunpack.c.l.s8.bf16 %v9527_v50  ;;  %v2968_v2 = vld [vmem:[#allocation8 + $0x60] sm:$0xff] }
 0x371   :  { %3945 = vmatprep.subr.bf16.mxu0 %v3295_v25  ;;  %v2556_v7 = vmul.f32 %v9097_v23, %v2390_v54  ;;  %v2392_v47 = vadd.f32 %v2391_v53, %v2198_v1  ;;  %4116 = vmatprep.subr.bf16.mxu1 %v3129_v38  ;;  %v9539_v34 = vpack.c.bf16 %v2827_v14, %v2823_v3  ;;  %v9554_v1 = vld [vmem:[#allocation8 + $0x2e8] sm:$0xff] }
 0x372   :  { %v2202_v31 = vpop.f32.mrf.mxu1  ;;  %3769 = vmatmul.mubr.bf16.gmra.mxu1 %v12591_v48  ;;  %v2395_v25 = vpop.f32.mrf.mxu0  ;;  %12594 = vst [vmem:[#allocation68_spill] sm:$0xff] %v9546_v8  ;;  %v2703_v52 = vadd.f32 %v9129_v5, %v2553_v57  ;;  %v2702_v14 = vadd.f32 %v9101_v62, %v2552_v60 }
 0x373   :  { %12592 = vst [vmem:[#allocation67_spill] sm:$0xff] %v9539_v34  ;;  %3778 = vmatprep.mubr.bf16.mxu1 %v12593_v32  ;;  %v2706_v38 = vadd.f32 %v9101_v62, %v2556_v7  ;;  %v2557_v58 = vmul.f32 %v9111_v37, %v2392_v47  ;;  %3635 = vmatprep.mubr.bf16.mxu0 %v9539_v34  ;;  %v3278_v7 = vunpack.c.l.s8.bf16 %v9532_v46 }
 0x374   :  { %3946 = vmatpush2.bf16.msra.mxu0 %v3294_v59  ;;  %v2204_v54 = vpop.f32.mrf.mxu1  ;;  %v2397_v59 = vpop.f32.mrf.mxu0  ;;  %4117 = vmatpush1.bf16.msra.mxu1 %v3128_v30  ;;  %v2396_v3 = vadd.f32 %v2395_v25, %v2202_v31  ;;  %v2831_v30 = vmax.f32 %v2703_v52, 0.0  ;;  %v12595_v52 = vld [vmem:[#allocation32_spill] sm:$0xff] }
 0x375   :  { %3947 = vmatprep.subr.bf16.mxu0 %v3287_v63  ;;  %v2707_v44 = vadd.f32 %v9129_v5, %v2557_v58  ;;  %v2398_v57 = vadd.f32 %v2397_v59, %v2204_v54  ;;  %4118 = vmatprep.subr.bf16.mxu1 %v3121_v33  ;;  %v3113_v63 = vunpack.c.h.s8.bf16 %v9544_v40  ;;  %v2834_v47 = vmax.f32 %v2706_v38, 0.0 }
 0x376   :  { %3636 = vmatmul.mubr.bf16.gmra.mxu0 %v9546_v8  ;;  %v2206_v53 = vpop.f32.mrf.mxu1  ;;  %v2399_v60 = vpop.f32.mrf.mxu0  ;;  %v3273_v58 = vunpack.c.h.s8.bf16 %v9554_v1  ;;  %v3112_v33 = vunpack.c.h.s8.bf16 %v2968_v2  ;;  %v3105_v59 = vunpack.c.l.s8.bf16 %v9544_v40  ;;  %v2830_v8 = vmax.f32 %v2702_v14, 0.0 }
 0x377   :  { %v2835_v50 = vmax.f32 %v2707_v44, 0.0  ;;  %v2561_v31 = vmul.f32 %v9111_v37, %v2398_v57  ;;  %v2400_v25 = vadd.f32 %v2399_v60, %v2206_v53  ;;  %v12597_v57 = vld [vmem:[#allocation33_spill] sm:$0xff] }
 0x378   :  { %3948 = vmatpush2.bf16.msra.mxu0 %v3286_v12  ;;  %v2208_v32 = vpop.f32.mrf.mxu1  ;;  %v2401_v54 = vpop.f32.mrf.mxu0  ;;  %4119 = vmatpush1.bf16.msra.mxu1 %v3120_v26  ;;  %v2560_v12 = vmul.f32 %v9097_v23, %v2396_v3  ;;  %v2961_v26 = vld [vmem:[#allocation8 + $0x28] sm:$0xff]  ;;  %v9569_v53 = vpack.c.bf16 %v2834_v47, %v2830_v8 }
 0x379   :  { %3949 = vmatprep.subr.bf16.mxu0 %v3279_v22  ;;  %v2402_v48 = vadd.f32 %v2401_v54, %v2208_v32  ;;  %v9565_v38 = vpack.c.bf16 %v2835_v50, %v2831_v30  ;;  %4120 = vmatprep.subr.bf16.mxu1 %v3113_v63  ;;  %v2564_v22 = vmul.f32 %v9097_v23, %v2400_v25  ;;  %v3104_v30 = vunpack.c.l.s8.bf16 %v2968_v2  ;;  %v2960_v25 = vld [vmem:[#allocation8 + $0x20] sm:$0xff] }
 0x37a   :  { %v2212_v46 = vpop.f32.mrf.mxu1  ;;  %3779 = vmatmul.mubr.bf16.gmra.mxu1 %v12595_v52  ;;  %v2405_v44 = vpop.f32.mrf.mxu0  ;;  %12598 = vst [vmem:[#allocation70_spill] sm:$0xff] %v9569_v53  ;;  %v2711_v14 = vadd.f32 %v9129_v5, %v2561_v31  ;;  %v2710_v50 = vadd.f32 %v9101_v62, %v2560_v12  ;;  %v3097_v47 = vunpack.c.h.s8.bf16 %v2961_v26 }
 0x37b   :  { %12596 = vst [vmem:[#allocation69_spill] sm:$0xff] %v9565_v38  ;;  %3788 = vmatprep.mubr.bf16.mxu1 %v12597_v57  ;;  %v2565_v40 = vmul.f32 %v9111_v37, %v2402_v48  ;;  %3645 = vmatprep.mubr.bf16.mxu0 %v9565_v38  ;;  %v2714_v3 = vadd.f32 %v9101_v62, %v2564_v22  ;;  %v12599_v57 = vld [vmem:[#allocation34_spill] sm:$0xff] }
 0x37c   :  { %3950 = vmatpush2.bf16.msra.mxu0 %v3278_v7  ;;  %v2214_v32 = vpop.f32.mrf.mxu1  ;;  %v2406_v63 = vadd.f32 %v2405_v44, %v2212_v46  ;;  %v2407_v60 = vpop.f32.mrf.mxu0  ;;  %4121 = vmatpush1.bf16.msra.mxu1 %v3112_v33  ;;  %v2839_v33 = vmax.f32 %v2711_v14, 0.0  ;;  %v3017_v14 = vld [vmem:[#allocation8 + $0x1e8] sm:$0xff] }
 0x37d   :  { %4305 = vmatprep.subr.bf16.mxu0 %v3273_v58  ;;  %v2715_v7 = vadd.f32 %v9129_v5, %v2565_v40  ;;  %v2408_v8 = vadd.f32 %v2407_v60, %v2214_v32  ;;  %4122 = vmatprep.subr.bf16.mxu1 %v3105_v59  ;;  %v2842_v54 = vmax.f32 %v2714_v3, 0.0  ;;  %v3096_v40 = vunpack.c.h.s8.bf16 %v2960_v25 }
 0x37e   :  { %3646 = vmatmul.mubr.bf16.gmra.mxu0 %v9569_v53  ;;  %v2216_v48 = vpop.f32.mrf.mxu1  ;;  %v2409_v58 = vpop.f32.mrf.mxu0  ;;  %v2568_v2 = vmul.f32 %v9097_v23, %v2406_v63  ;;  %v2838_v32 = vmax.f32 %v2710_v50, 0.0  ;;  %v3089_v3 = vunpack.c.l.s8.bf16 %v2961_v26 }
 0x37f   :  { %v2843_v31 = vmax.f32 %v2715_v7, 0.0  ;;  %v2569_v22 = vmul.f32 %v9111_v37, %v2408_v8  ;;  %v2410_v46 = vadd.f32 %v2409_v58, %v2216_v48  ;;  %v12601_v8 = vld [vmem:[#allocation35_spill] sm:$0xff] }
 0x380   :  { %v2218_v44 = vpop.f32.mrf.mxu1  ;;  %v2411_v12 = vpop.f32.mrf.mxu0  ;;  %4123 = vmatpush1.bf16.msra.mxu1 %v3104_v30  ;;  %v9585_v48 = vpack.c.bf16 %v2842_v54, %v2838_v32 }
 0x381   :  { %v2572_v60 = vmul.f32 %v9097_v23, %v2410_v46  ;;  %v2412_v53 = vadd.f32 %v2411_v12, %v2218_v44  ;;  %4124 = vmatprep.subr.bf16.mxu1 %v3097_v47  ;;  %v9582_v52 = vpack.c.bf16 %v2843_v31, %v2839_v33  ;;  %v2719_v63 = vadd.f32 %v9129_v5, %v2569_v22  ;;  %v3016_v12 = vld [vmem:[#allocation8 + $0x1e0] sm:$0xff] }
 0x382   :  { %v2222_v59 = vpop.f32.mrf.mxu1  ;;  %3789 = vmatmul.mubr.bf16.gmra.mxu1 %v12599_v57  ;;  %v2415_v7 = vpop.f32.mrf.mxu0  ;;  %12602 = vst [vmem:[#allocation72_spill] sm:$0xff] %v9585_v48  ;;  %v2718_v46 = vadd.f32 %v9101_v62, %v2568_v2  ;;  %v3088_v47 = vunpack.c.l.s8.bf16 %v2960_v25  ;;  %v3209_v22 = vunpack.c.h.s8.bf16 %v3017_v14  ;;  %v3208_v25 = vunpack.c.h.s8.bf16 %v3016_v12 }
 0x383   :  { %12600 = vst [vmem:[#allocation71_spill] sm:$0xff] %v9582_v52  ;;  %3798 = vmatprep.mubr.bf16.mxu1 %v12601_v8  ;;  %v2722_v30 = vadd.f32 %v9101_v62, %v2572_v60  ;;  %v2573_v50 = vmul.f32 %v9111_v37, %v2412_v53  ;;  %3655 = vmatprep.mubr.bf16.mxu0 %v9582_v52  ;;  %v2847_v53 = vmax.f32 %v2719_v63, 0.0 }
 0x384   :  { %v2224_v58 = vpop.f32.mrf.mxu1  ;;  %v2417_v26 = vpop.f32.mrf.mxu0  ;;  %4125 = vmatpush1.bf16.msra.mxu1 %v3096_v40  ;;  %v2416_v44 = vadd.f32 %v2415_v7, %v2222_v59  ;;  %v2846_v59 = vmax.f32 %v2718_v46, 0.0 }
 0x385   :  { %v2723_v31 = vadd.f32 %v9129_v5, %v2573_v50  ;;  %v2418_v33 = vadd.f32 %v2417_v26, %v2224_v58  ;;  %4126 = vmatprep.subr.bf16.mxu1 %v3089_v3  ;;  %v2850_v60 = vmax.f32 %v2722_v30, 0.0  ;;  %v3201_v50 = vunpack.c.l.s8.bf16 %v3017_v14  ;;  %v12603_v3 = vld [vmem:[#allocation36_spill] sm:$0xff] }
 0x386   :  { %3656 = vmatmul.mubr.bf16.gmra.mxu0 %v9585_v48  ;;  %v2226_v54 = vpop.f32.mrf.mxu1  ;;  %v2419_v32 = vpop.f32.mrf.mxu0  ;;  %v2576_v7 = vmul.f32 %v9097_v23, %v2416_v44 }
 0x387   :  { %v2851_v8 = vmax.f32 %v2723_v31, 0.0  ;;  %v2577_v57 = vmul.f32 %v9111_v37, %v2418_v33  ;;  %v2420_v52 = vadd.f32 %v2419_v32, %v2226_v54  ;;  %v12605_v31 = vld [vmem:[#allocation37_spill] sm:$0xff]  ;;  %v9601_v54 = vpack.c.bf16 %v2850_v60, %v2846_v59  ;;  %v3008_v59 = vld [vmem:[#allocation8 + $0x1a0] sm:$0xff] }
 0x388   :  { %v2228_v2 = vpop.f32.mrf.mxu1  ;;  %v2421_v40 = vpop.f32.mrf.mxu0  ;;  %4127 = vmatpush1.bf16.msra.mxu1 %v3088_v47  ;;  %v3009_v33 = vld [vmem:[#allocation8 + $0x1a8] sm:$0xff] }
 0x389   :  { %v2422_v58 = vadd.f32 %v2421_v40, %v2228_v2  ;;  %v9597_v48 = vpack.c.bf16 %v2851_v8, %v2847_v53  ;;  %4128 = vmatprep.subr.bf16.mxu1 %v3209_v22  ;;  %v2580_v63 = vmul.f32 %v9097_v23, %v2420_v52  ;;  %12606 = vst [vmem:[#allocation74_spill] sm:$0xff] %v9601_v54  ;;  %v3200_v22 = vunpack.c.l.s8.bf16 %v3016_v12 }
 0x38a   :  { %v2232_v26 = vpop.f32.mrf.mxu1  ;;  %3799 = vmatmul.mubr.bf16.gmra.mxu1 %v12603_v3  ;;  %v2425_v30 = vpop.f32.mrf.mxu0  ;;  %v2727_v47 = vadd.f32 %v9129_v5, %v2577_v57  ;;  %v2726_v52 = vadd.f32 %v9101_v62, %v2576_v7  ;;  %v3193_v40 = vunpack.c.h.s8.bf16 %v3009_v33  ;;  %v12607_v3 = vld [vmem:[#allocation40_spill] sm:$0xff] }
 0x38b   :  { %12604 = vst [vmem:[#allocation73_spill] sm:$0xff] %v9597_v48  ;;  %3808 = vmatprep.mubr.bf16.mxu1 %v12605_v31  ;;  %v2581_v14 = vmul.f32 %v9111_v37, %v2422_v58  ;;  %3665 = vmatprep.mubr.bf16.mxu0 %v9597_v48  ;;  %v2730_v44 = vadd.f32 %v9101_v62, %v2580_v63 }
 0x38c   :  { %v2234_v46 = vpop.f32.mrf.mxu1  ;;  %v2426_v8 = vadd.f32 %v2425_v30, %v2232_v26  ;;  %v2427_v32 = vpop.f32.mrf.mxu0  ;;  %4129 = vmatpush2.bf16.msra.mxu1 %v3208_v25  ;;  %v2855_v25 = vmax.f32 %v2727_v47, 0.0  ;;  %v3001_v47 = vld [vmem:[#allocation8 + $0x168] sm:$0xff] }
 0x38d   :  { %v2731_v53 = vadd.f32 %v9129_v5, %v2581_v14  ;;  %v2428_v2 = vadd.f32 %v2427_v32, %v2234_v46  ;;  %4130 = vmatprep.subr.bf16.mxu1 %v3201_v50  ;;  %v2858_v31 = vmax.f32 %v2730_v44, 0.0  ;;  %v3192_v14 = vunpack.c.h.s8.bf16 %v3008_v59 }
 0x38e   :  { %3666 = vmatmul.mubr.bf16.gmra.mxu0 %v9601_v54  ;;  %v2236_v60 = vpop.f32.mrf.mxu1  ;;  %v2429_v58 = vpop.f32.mrf.mxu0  ;;  %v2584_v12 = vmul.f32 %v9097_v23, %v2426_v8  ;;  %v2854_v46 = vmax.f32 %v2726_v52, 0.0  ;;  %v3185_v44 = vunpack.c.l.s8.bf16 %v3009_v33 }
 0x38f   :  { %v2859_v57 = vmax.f32 %v2731_v53, 0.0  ;;  %v2585_v63 = vmul.f32 %v9111_v37, %v2428_v2  ;;  %v2430_v26 = vadd.f32 %v2429_v58, %v2236_v60  ;;  %v12609_v2 = vld [vmem:[#allocation41_spill] sm:$0xff] }
 0x390   :  { %v2238_v30 = vpop.f32.mrf.mxu1  ;;  %v2431_v7 = vpop.f32.mrf.mxu0  ;;  %4131 = vmatpush2.bf16.msra.mxu1 %v3200_v22  ;;  %v9617_v60 = vpack.c.bf16 %v2858_v31, %v2854_v46 }
 0x391   :  { %v2588_v32 = vmul.f32 %v9097_v23, %v2430_v26  ;;  %v2432_v54 = vadd.f32 %v2431_v7, %v2238_v30  ;;  %4132 = vmatprep.subr.bf16.mxu1 %v3193_v40  ;;  %v9614_v48 = vpack.c.bf16 %v2859_v57, %v2855_v25  ;;  %v2735_v8 = vadd.f32 %v9129_v5, %v2585_v63  ;;  %v3000_v7 = vld [vmem:[#allocation8 + $0x160] sm:$0xff] }
 0x392   :  { %v2242_v50 = vpop.f32.mrf.mxu1  ;;  %3809 = vmatmul.mubr.bf16.gmra.mxu1 %v12607_v3  ;;  %v2435_v53 = vpop.f32.mrf.mxu0  ;;  %12610 = vst [vmem:[#allocation76_spill] sm:$0xff] %v9617_v60  ;;  %v2734_v26 = vadd.f32 %v9101_v62, %v2584_v12  ;;  %v3184_v40 = vunpack.c.l.s8.bf16 %v3008_v59  ;;  %v3177_v63 = vunpack.c.h.s8.bf16 %v3001_v47  ;;  %v3176_v59 = vunpack.c.h.s8.bf16 %v3000_v7 }
 0x393   :  { %12608 = vst [vmem:[#allocation75_spill] sm:$0xff] %v9614_v48  ;;  %3818 = vmatprep.mubr.bf16.mxu1 %v12609_v2  ;;  %v2738_v22 = vadd.f32 %v9101_v62, %v2588_v32  ;;  %v2589_v52 = vmul.f32 %v9111_v37, %v2432_v54  ;;  %3675 = vmatprep.mubr.bf16.mxu0 %v9614_v48  ;;  %v2863_v54 = vmax.f32 %v2735_v8, 0.0 }
 0x394   :  { %v2244_v58 = vpop.f32.mrf.mxu1  ;;  %v2437_v33 = vpop.f32.mrf.mxu0  ;;  %4133 = vmatpush2.bf16.msra.mxu1 %v3192_v14  ;;  %v2436_v30 = vadd.f32 %v2435_v53, %v2242_v50  ;;  %v2862_v50 = vmax.f32 %v2734_v26, 0.0 }
 0x395   :  { %v2739_v57 = vadd.f32 %v9129_v5, %v2589_v52  ;;  %v2438_v25 = vadd.f32 %v2437_v33, %v2244_v58  ;;  %4134 = vmatprep.subr.bf16.mxu1 %v3185_v44  ;;  %v2866_v32 = vmax.f32 %v2738_v22, 0.0  ;;  %v3169_v52 = vunpack.c.l.s8.bf16 %v3001_v47  ;;  %v12611_v44 = vld [vmem:[#allocation44_spill] sm:$0xff] }
 0x396   :  { %3676 = vmatmul.mubr.bf16.gmra.mxu0 %v9617_v60  ;;  %v2246_v31 = vpop.f32.mrf.mxu1  ;;  %v2439_v46 = vpop.f32.mrf.mxu0  ;;  %v2592_v53 = vmul.f32 %v9097_v23, %v2436_v30 }
 0x397   :  { %v2867_v2 = vmax.f32 %v2739_v57, 0.0  ;;  %v2593_v3 = vmul.f32 %v9111_v37, %v2438_v25  ;;  %v2440_v48 = vadd.f32 %v2439_v46, %v2246_v31  ;;  %v12613_v57 = vld [vmem:[#allocation45_spill] sm:$0xff]  ;;  %v9633_v31 = vpack.c.bf16 %v2866_v32, %v2862_v50  ;;  %v2992_v50 = vld [vmem:[#allocation8 + $0x120] sm:$0xff] }
 0x398   :  { %v2248_v12 = vpop.f32.mrf.mxu1  ;;  %v2441_v14 = vpop.f32.mrf.mxu0  ;;  %4135 = vmatpush2.bf16.msra.mxu1 %v3184_v40  ;;  %v2993_v25 = vld [vmem:[#allocation8 + $0x128] sm:$0xff] }
 0x399   :  { %v2442_v58 = vadd.f32 %v2441_v14, %v2248_v12  ;;  %v9629_v60 = vpack.c.bf16 %v2867_v2, %v2863_v54  ;;  %4136 = vmatprep.subr.bf16.mxu1 %v3177_v63  ;;  %v2596_v8 = vmul.f32 %v9097_v23, %v2440_v48  ;;  %12614 = vst [vmem:[#allocation78_spill] sm:$0xff] %v9633_v31  ;;  %v3168_v63 = vunpack.c.l.s8.bf16 %v3000_v7 }
 0x39a   :  { %v2252_v33 = vpop.f32.mrf.mxu1  ;;  %3819 = vmatmul.mubr.bf16.gmra.mxu1 %v12611_v44  ;;  %v2445_v22 = vpop.f32.mrf.mxu0  ;;  %v2743_v40 = vadd.f32 %v9129_v5, %v2593_v3  ;;  %v2742_v48 = vadd.f32 %v9101_v62, %v2592_v53  ;;  %v3161_v14 = vunpack.c.h.s8.bf16 %v2993_v25  ;;  %v12615_v44 = vld [vmem:[#allocation29_spill] sm:$0xff] }
 0x39b   :  { %12612 = vst [vmem:[#allocation77_spill] sm:$0xff] %v9629_v60  ;;  %3828 = vmatprep.mubr.bf16.mxu1 %v12613_v57  ;;  %v2597_v47 = vmul.f32 %v9111_v37, %v2442_v58  ;;  %3685 = vmatprep.mubr.bf16.mxu0 %v9629_v60  ;;  %v2746_v30 = vadd.f32 %v9101_v62, %v2596_v8 }
 0x39c   :  { %v2254_v26 = vpop.f32.mrf.mxu1  ;;  %v2446_v2 = vadd.f32 %v2445_v22, %v2252_v33  ;;  %v2447_v46 = vpop.f32.mrf.mxu0  ;;  %4137 = vmatpush2.bf16.msra.mxu1 %v3176_v59  ;;  %v2871_v59 = vmax.f32 %v2743_v40, 0.0 }
 0x39d   :  { %v2747_v54 = vadd.f32 %v9129_v5, %v2597_v47  ;;  %v2448_v12 = vadd.f32 %v2447_v46, %v2254_v26  ;;  %4138 = vmatprep.subr.bf16.mxu1 %v3169_v52  ;;  %v2874_v57 = vmax.f32 %v2746_v30, 0.0  ;;  %v3160_v47 = vunpack.c.h.s8.bf16 %v2992_v50 }
 0x39e   :  { %3686 = vmatmul.mubr.bf16.gmra.mxu0 %v9633_v31  ;;  %v2256_v32 = vpop.f32.mrf.mxu1  ;;  %v2449_v58 = vpop.f32.mrf.mxu0  ;;  %v2600_v7 = vmul.f32 %v9097_v23, %v2446_v2  ;;  %v2870_v26 = vmax.f32 %v2742_v48, 0.0  ;;  %v3153_v30 = vunpack.c.l.s8.bf16 %v2993_v25  ;;  %v3152_v25 = vunpack.c.l.s8.bf16 %v2992_v50 }
 0x39f   :  { %v2875_v3 = vmax.f32 %v2747_v54, 0.0  ;;  %v2601_v8 = vmul.f32 %v9111_v37, %v2448_v12  ;;  %v2450_v33 = vadd.f32 %v2449_v58, %v2256_v32  ;;  %v12617_v12 = vld [vmem:[#allocation22_spill] sm:$0xff] }
 0x3a0   :  { %v2258_v22 = vpop.f32.mrf.mxu1  ;;  %v2451_v53 = vpop.f32.mrf.mxu0  ;;  %4139 = vmatpush2.bf16.msra.mxu1 %v3168_v63  ;;  %v9649_v40 = vpack.c.bf16 %v2874_v57, %v2870_v26  ;;  %v2750_v58 = vadd.f32 %v9101_v62, %v2600_v7 }
 0x3a1   :  { %v2604_v46 = vmul.f32 %v9097_v23, %v2450_v33  ;;  %v2452_v31 = vadd.f32 %v2451_v53, %v2258_v22  ;;  %4140 = vmatprep.subr.bf16.mxu1 %v3161_v14  ;;  %v9646_v60 = vpack.c.bf16 %v2875_v3, %v2871_v59  ;;  %v2751_v2 = vadd.f32 %v9129_v5, %v2601_v8 }
 0x3a2   :  { %v2262_v52 = vpop.f32.mrf.mxu1  ;;  %3829 = vmatmul.mubr.bf16.gmra.mxu1 %v12615_v44  ;;  %v2455_v54 = vpop.f32.mrf.mxu0  ;;  %12618 = vst [vmem:[#allocation80_spill] sm:$0xff] %v9649_v40  ;;  %v2878_v50 = vmax.f32 %v2750_v58, 0.0 }
 0x3a3   :  { %12616 = vst [vmem:[#allocation79_spill] sm:$0xff] %v9646_v60  ;;  %3838 = vmatprep.mubr.bf16.mxu1 %v12617_v12  ;;  %v2754_v63 = vadd.f32 %v9101_v62, %v2604_v46  ;;  %v2605_v48 = vmul.f32 %v9111_v37, %v2452_v31  ;;  %3695 = vmatprep.mubr.bf16.mxu0 %v9646_v60  ;;  %v2879_v59 = vmax.f32 %v2751_v2, 0.0 }
 0x3a4   :  { %v2264_v32 = vpop.f32.mrf.mxu1  ;;  %v2457_v14 = vpop.f32.mrf.mxu0  ;;  %4141 = vmatpush2.bf16.msra.mxu1 %v3160_v47  ;;  %v2456_v33 = vadd.f32 %v2455_v54, %v2262_v52  ;;  %v9659_v47 = vld [vmem:[#allocation8 + $0xf8] sm:$0xff] }
 0x3a5   :  { %v2755_v3 = vadd.f32 %v9129_v5, %v2605_v48  ;;  %v2458_v22 = vadd.f32 %v2457_v14, %v2264_v32  ;;  %4142 = vmatprep.subr.bf16.mxu1 %v3153_v30  ;;  %v2882_v53 = vmax.f32 %v2754_v63, 0.0  ;;  %v12619_v32 = vld [vmem:[#allocation21_spill] sm:$0xff]  ;;  %v3147_v14 = vunpack.c.h.s8.bf16 %v9659_v47 }
 0x3a6   :  { %3696 = vmatmul.mubr.bf16.gmra.mxu0 %v9649_v40  ;;  %v2266_v57 = vpop.f32.mrf.mxu1  ;;  %v2459_v8 = vpop.f32.mrf.mxu0  ;;  %v2608_v52 = vmul.f32 %v9097_v23, %v2456_v33  ;;  %v12621_v63 = vld [vmem:[#allocation49_spill] sm:$0xff] }
 0x3a7   :  { %v2883_v31 = vmax.f32 %v2755_v3, 0.0  ;;  %v2609_v26 = vmul.f32 %v9111_v37, %v2458_v22  ;;  %v2460_v46 = vadd.f32 %v2459_v8, %v2266_v57  ;;  %v9670_v3 = vpack.c.bf16 %v2882_v53, %v2878_v50 }
 0x3a8   :  { %v2268_v7 = vpop.f32.mrf.mxu1  ;;  %v2461_v12 = vpop.f32.mrf.mxu0  ;;  %4143 = vmatpush2.bf16.msra.mxu1 %v3152_v25  ;;  %v2758_v22 = vadd.f32 %v9101_v62, %v2608_v52  ;;  %v3048_v52 = vld [vmem:[#allocation8 + $0x2e0] sm:$0xff] }
 0x3a9   :  { %v2462_v54 = vadd.f32 %v2461_v12, %v2268_v7  ;;  %v9665_v30 = vpack.c.bf16 %v2883_v31, %v2879_v59  ;;  %v2612_v2 = vmul.f32 %v9097_v23, %v2460_v46  ;;  %12622 = vst [vmem:[#allocation82_spill] sm:$0xff] %v9670_v3  ;;  %v2759_v25 = vadd.f32 %v9129_v5, %v2609_v26 }
 0x3aa   :  { %v9662_v48 = vpop.f32.mrf.mxu1  ;;  %3839 = vmatmul.mubr.bf16.gmra.mxu1 %v12619_v32  ;;  %4498 = vmatprep.subr.bf16.mxu1 %v3147_v14 }
 0x3ab   :  { %12620 = vst [vmem:[#allocation81_spill] sm:$0xff] %v9665_v30  ;;  %3848 = vmatprep.mubr.bf16.mxu1 %v12621_v63  ;;  %v2613_v58 = vmul.f32 %v9111_v37, %v2462_v54  ;;  %3705 = vmatprep.mubr.bf16.mxu0 %v9665_v30  ;;  %v2762_v33 = vadd.f32 %v9101_v62, %v2612_v2  ;;  %v2887_v8 = vmax.f32 %v2759_v25, 0.0  ;;  %v2886_v37 = vmax.f32 %v2758_v22, 0.0 }
 0x3ac   :  { %v9675_v12 = vpop.f32.mrf.mxu1  ;;  %v3272_v2 = vunpack.c.h.s8.bf16 %v3048_v52  ;;  %v3265_v25 = vunpack.c.l.s8.bf16 %v9554_v1  ;;  %v3264_v22 = vunpack.c.l.s8.bf16 %v3048_v52 }
 0x3ad   :  { %v2763_v23 = vadd.f32 %v9129_v5, %v2613_v58  ;;  %v2890_v59 = vmax.f32 %v2762_v33, 0.0  ;;  %v3041_v58 = vld [vmem:[#allocation8 + $0x2a8] sm:$0xff] }
 0x3ae   :  { %3706 = vmatmul.mubr.bf16.gmra.mxu0 %v9670_v3  ;;  %v9681_v57 = vpop.f32.mrf.mxu1 }
 0x3af   :  { %v2891_v53 = vmax.f32 %v2763_v23, 0.0  ;;  %v9691_v62 = vpack.c.bf16 %v2890_v59, %v2886_v37  ;;  %v3040_v59 = vld [vmem:[#allocation8 + $0x2a0] sm:$0xff] }
 0x3b0   :  { %v9683_v31 = vpop.f32.mrf.mxu1  ;;  %v3256_v1 = vunpack.c.h.s8.bf16 %v3040_v59 }
 0x3b1   :  { %v9688_v7 = vpack.c.bf16 %v2891_v53, %v2887_v8  ;;  %12624 = vst [vmem:[#allocation84_spill] sm:$0xff] %v9691_v62  ;;  %v3257_v8 = vunpack.c.h.s8.bf16 %v3041_v58 }
 0x3b2   :  { %v9685_v26 = vpop.f32.mrf.mxu1  ;;  %3849 = vmatmul.mubr.bf16.gmra.mxu1 %v9232_v29 }
 0x3b3   :  { %12623 = vst [vmem:[#allocation83_spill] sm:$0xff] %v9688_v7  ;;  %3858 = vmatprep.mubr.bf16.mxu1 %v9249_v51  ;;  %3715 = vmatprep.mubr.bf16.mxu0 %v9688_v7 }
 0x3b4   :  { %v9694_v5 = vpop.f32.mrf.mxu1 }
 0x3b6   :  { %3716 = vmatmul.mubr.bf16.gmra.mxu0 %v9691_v62  ;;  %v9697_v46 = vpop.f32.mrf.mxu1 }
 0x3b7   :  { %3951 = vmatprep.mubr.bf16.mxu0 %v9293_v56 }
 0x3b8   :  { %v9700_v50 = vpop.f32.mrf.mxu1 }
 0x3ba   :  { %v9702_v54 = vpop.f32.mrf.mxu1  ;;  %3859 = vmatmul.mubr.bf16.gmra.mxu1 %v9254_v15  ;;  %v3139_v15 = vunpack.c.l.s8.bf16 %v9659_v47 }
 0x3bb   :  { %3868 = vmatprep.mubr.bf16.mxu1 %v9276_v45 }
 0x3bc   :  { %v9706_v14 = vpop.f32.mrf.mxu1 }
 0x3be   :  { %3952 = vmatmul.mubr.bf16.vlgmr.msra.gmra.mxu0 %v9297_v43  ;;  %v9710_v33 = vpop.f32.mrf.mxu1  ;;  %v3033_v43 = vld [vmem:[#allocation8 + $0x268] sm:$0xff] }
 0x3bf   :  { %4306 = vmatpush1.bf16.msra.mxu0 %v3272_v2  ;;  %3961 = vmatprep.mubr.bf16.mxu0 %v9340_v35  ;;  %v3249_v2 = vunpack.c.l.s8.bf16 %v3041_v58 }
 0x3c0   :  { %v9713_v23 = vpop.f32.mrf.mxu1  ;;  %4307 = vmatprep.subr.bf16.mxu0 %v3265_v25  ;;  %v3248_v25 = vunpack.c.l.s8.bf16 %v3040_v59 }
 0x3c2   :  { %v9715_v53 = vpop.f32.mrf.mxu1  ;;  %3869 = vmatmul.mubr.bf16.gmra.mxu1 %v9266_v18  ;;  %v3241_v18 = vunpack.c.h.s8.bf16 %v3033_v43 }
 0x3c3   :  { %3878 = vmatprep.mubr.bf16.mxu1 %v9330_v20  ;;  %4308 = vmatpush1.bf16.msra.mxu0 %v3264_v22  ;;  %v3032_v20 = vld [vmem:[#allocation8 + $0x260] sm:$0xff] }
 0x3c4   :  { %v9719_v37 = vpop.f32.mrf.mxu1  ;;  %4309 = vmatprep.subr.bf16.mxu0 %v3257_v8  ;;  %v3240_v58 = vunpack.c.h.s8.bf16 %v3032_v20 }
 0x3c6   :  { %3962 = vmatmul.mubr.bf16.gmra.mxu0 %v9344_v4  ;;  %v9722_v52 = vpop.f32.mrf.mxu1  ;;  %v3233_v4 = vunpack.c.l.s8.bf16 %v3033_v43 }
 0x3c7   :  { %3971 = vmatprep.mubr.bf16.mxu0 %v9382_v24  ;;  %4310 = vmatpush1.bf16.msra.mxu0 %v3256_v1  ;;  %v3025_v24 = vld [vmem:[#allocation8 + $0x228] sm:$0xff]  ;;  %v3232_v1 = vunpack.c.l.s8.bf16 %v3032_v20 }
 0x3c8   :  { %v9725_v35 = vpop.f32.mrf.mxu1  ;;  %4311 = vmatprep.subr.bf16.mxu0 %v3249_v2 }
 0x3ca   :  { %v9727_v22 = vpop.f32.mrf.mxu1  ;;  %3879 = vmatmul.mubr.bf16.gmra.mxu1 %v9351_v36  ;;  %v3225_v36 = vunpack.c.h.s8.bf16 %v3025_v24 }
 0x3cb   :  { %3888 = vmatprep.mubr.bf16.mxu1 %v9370_v9  ;;  %4312 = vmatpush1.bf16.msra.mxu0 %v3248_v25  ;;  %v3024_v9 = vld [vmem:[#allocation8 + $0x220] sm:$0xff] }
 0x3cc   :  { %v9731_v8 = vpop.f32.mrf.mxu1  ;;  %4313 = vmatprep.subr.bf16.mxu0 %v3241_v18  ;;  %v3224_v18 = vunpack.c.h.s8.bf16 %v3024_v9 }
 0x3ce   :  { %3972 = vmatmul.mubr.bf16.gmra.mxu0 %v9394_v27  ;;  %v9734_v59 = vpop.f32.mrf.mxu1  ;;  %v3217_v27 = vunpack.c.l.s8.bf16 %v3025_v24 }
 0x3cf   :  { %3981 = vmatprep.mubr.bf16.mxu0 %v9428_v19  ;;  %4314 = vmatpush1.bf16.msra.mxu0 %v3240_v58  ;;  %v3081_v19 = vld [vmem:[#allocation8 + $0x3e8] sm:$0xff] }
 0x3d0   :  { %v9737_v2 = vpop.f32.mrf.mxu1  ;;  %4315 = vmatprep.subr.bf16.mxu0 %v3233_v4  ;;  %v3216_v4 = vunpack.c.l.s8.bf16 %v3024_v9 }
 0x3d2   :  { %v9739_v25 = vpop.f32.mrf.mxu1  ;;  %3889 = vmatmul.mubr.bf16.gmra.mxu1 %v9392_v16  ;;  %v3337_v16 = vunpack.c.h.s8.bf16 %v3081_v19 }
 0x3d3   :  { %3898 = vmatprep.mubr.bf16.mxu1 %v9420_v28  ;;  %4316 = vmatpush1.bf16.msra.mxu0 %v3232_v1  ;;  %v3080_v28 = vld [vmem:[#allocation8 + $0x3e0] sm:$0xff] }
 0x3d4   :  { %v9743_v43 = vpop.f32.mrf.mxu1  ;;  %4317 = vmatprep.subr.bf16.mxu0 %v3225_v36  ;;  %v3336_v36 = vunpack.c.h.s8.bf16 %v3080_v28 }
 0x3d6   :  { %3982 = vmatmul.mubr.bf16.gmra.mxu0 %v9432_v10  ;;  %v9746_v20 = vpop.f32.mrf.mxu1  ;;  %v3329_v10 = vunpack.c.l.s8.bf16 %v3081_v19 }
 0x3d7   :  { %3991 = vmatprep.mubr.bf16.mxu0 %v9462_v21  ;;  %4318 = vmatpush1.bf16.msra.mxu0 %v3224_v18  ;;  %v3073_v21 = vld [vmem:[#allocation8 + $0x3a8] sm:$0xff] }
 0x3d8   :  { %v9749_v58 = vpop.f32.mrf.mxu1  ;;  %4319 = vmatprep.subr.bf16.mxu0 %v3217_v27  ;;  %v3328_v27 = vunpack.c.l.s8.bf16 %v3080_v28 }
 0x3da   :  { %v9751_v1 = vpop.f32.mrf.mxu1  ;;  %3899 = vmatmul.mubr.bf16.gmra.mxu1 %v9452_v41  ;;  %v3321_v41 = vunpack.c.h.s8.bf16 %v3073_v21 }
 0x3db   :  { %3908 = vmatprep.mubr.bf16.mxu1 %v9458_v13  ;;  %4320 = vmatpush1.bf16.msra.mxu0 %v3216_v4  ;;  %v3072_v13 = vld [vmem:[#allocation8 + $0x3a0] sm:$0xff] }
 0x3dc   :  { %v9755_v24 = vpop.f32.mrf.mxu1  ;;  %4321 = vmatprep.subr.bf16.mxu0 %v3337_v16  ;;  %v3320_v16 = vunpack.c.h.s8.bf16 %v3072_v13 }
 0x3de   :  { %3992 = vmatmul.mubr.bf16.gmra.mxu0 %v9466_v11  ;;  %v9758_v9 = vpop.f32.mrf.mxu1  ;;  %v3313_v11 = vunpack.c.l.s8.bf16 %v3073_v21  ;;  %v2979_v21 = vld [vmem:[#allocation8 + $0xb8] sm:$0xff] }
 0x3df   :  { %4001 = vmatprep.mubr.bf16.mxu0 %v9482_v17  ;;  %4322 = vmatpush2.bf16.msra.mxu0 %v3336_v36  ;;  %v3065_v17 = vld [vmem:[#allocation8 + $0x368] sm:$0xff]  ;;  %v2986_v36 = vld [vmem:[#allocation8 + $0xf0] sm:$0xff] }
 0x3e0   :  { %v9761_v18 = vpop.f32.mrf.mxu1  ;;  %4323 = vmatprep.subr.bf16.mxu0 %v3329_v10  ;;  %v3312_v10 = vunpack.c.l.s8.bf16 %v3072_v13  ;;  %v3297_v13 = vunpack.c.l.s8.bf16 %v3065_v17 }
 0x3e2   :  { %v9763_v4 = vpop.f32.mrf.mxu1  ;;  %3909 = vmatmul.mubr.bf16.gmra.mxu1 %v9476_v42  ;;  %v3146_v42 = vunpack.c.h.s8.bf16 %v2986_v36 }
 0x3e3   :  { %4144 = vmatprep.mubr.bf16.mxu1 %v12584_v0  ;;  %4324 = vmatpush2.bf16.msra.mxu0 %v3328_v27  ;;  %v3305_v0 = vunpack.c.h.s8.bf16 %v3065_v17  ;;  %v3064_v27 = vld [vmem:[#allocation8 + $0x360] sm:$0xff]  ;;  %v3123_v17 = vunpack.c.l.s8.bf16 %v2979_v21 }
 0x3e4   :  { %v9767_v19 = vpop.f32.mrf.mxu1  ;;  %4325 = vmatprep.subr.bf16.mxu0 %v3321_v41 }
 0x3e6   :  { %4002 = vmatmul.mubr.bf16.gmra.mxu0 %v9485_v55  ;;  %v9770_v28 = vpop.f32.mrf.mxu1  ;;  %v3304_v55 = vunpack.c.h.s8.bf16 %v3064_v27 }
 0x3e7   :  { %12625 = vst [vmem:[#allocation85_spill] sm:$0xff] %v9770_v28  ;;  %4011 = vmatprep.mubr.bf16.mxu0 %v9506_v6  ;;  %4326 = vmatpush2.bf16.msra.mxu0 %v3320_v16  ;;  %v3057_v16 = vld [vmem:[#allocation8 + $0x328] sm:$0xff]  ;;  %v2978_v28 = vld [vmem:[#allocation8 + $0xb0] sm:$0xff] }
 0x3e8   :  { %v9773_v45 = vpop.f32.mrf.mxu1  ;;  %4327 = vmatprep.subr.bf16.mxu0 %v3313_v11  ;;  %v3138_v11 = vunpack.c.l.s8.bf16 %v2986_v36  ;;  %v12632_v36 = vld [vmem:[#allocation30_spill] sm:$0xff] }
 0x3e9   :  { %12626 = vst [vmem:[#allocation86_spill] sm:$0xff] %v9773_v45  ;;  %v3131_v45 = vunpack.c.h.s8.bf16 %v2979_v21  ;;  %v12636_v21 = vld [vmem:[#allocation68_spill] sm:$0xff] }
 0x3ea   :  { %v9776_v41 = vpop.f32.mrf.mxu1  ;;  %4145 = vmatmul.mubr.bf16.vlgmr.msra.gmra.mxu1 %v12587_v49  ;;  %v3289_v49 = vunpack.c.h.s8.bf16 %v3057_v16 }
 0x3eb   :  { %12627 = vst [vmem:[#allocation87_spill] sm:$0xff] %v9776_v41  ;;  %4154 = vmatprep.mubr.bf16.mxu1 %v12589_v39  ;;  %4328 = vmatpush2.bf16.msra.mxu0 %v3312_v10  ;;  %v3296_v39 = vunpack.c.l.s8.bf16 %v3064_v27  ;;  %v3281_v27 = vunpack.c.l.s8.bf16 %v3057_v16  ;;  %v4884_v16 = vld [vmem:[%s12193_s10] sm:$0xff] }
 0x3ec   :  { %v9780_v6 = vpop.f32.mrf.mxu1  ;;  %4329 = vmatprep.subr.bf16.mxu0 %v3305_v0  ;;  %4499 = vmatpush1.bf16.msra.mxu1 %v3146_v42  ;;  %v3056_v0 = vld [vmem:[#allocation8 + $0x320] sm:$0xff]  ;;  %v3130_v42 = vunpack.c.h.s8.bf16 %v2978_v28  ;;  %v3019_v41 = vld [vmem:[#allocation8 + $0x1f8] sm:$0xff] }
 0x3ed   :  { %12628 = vst [vmem:[#allocation88_spill] sm:$0xff] %v9780_v6  ;;  %4500 = vmatprep.subr.bf16.mxu1 %v3139_v15  ;;  %v12633_v6 = vld [vmem:[#allocation31_spill] sm:$0xff] }
 0x3ee   :  { %4012 = vmatmul.mubr.bf16.gmra.mxu0 %v9513_v61  ;;  %v9783_v47 = vpop.f32.mrf.mxu1  ;;  %v2971_v61 = vld [vmem:[#allocation8 + $0x78] sm:$0xff] }
 0x3ef   :  { %12629 = vst [vmem:[#allocation89_spill] sm:$0xff] %v9783_v47  ;;  %4021 = vmatprep.mubr.bf16.mxu0 %v9539_v34  ;;  %4330 = vmatpush2.bf16.msra.mxu0 %v3304_v55  ;;  %v3288_v34 = vunpack.c.h.s8.bf16 %v3056_v0 }
 0x3f0   :  { %v9786_v10 = vpop.f32.mrf.mxu1  ;;  %4331 = vmatprep.subr.bf16.mxu0 %v3297_v13  ;;  %4501 = vmatpush1.bf16.msra.mxu1 %v3138_v11  ;;  %v3122_v13 = vunpack.c.l.s8.bf16 %v2978_v28  ;;  %v3115_v11 = vunpack.c.h.s8.bf16 %v2971_v61 }
 0x3f1   :  { %12630 = vst [vmem:[#allocation90_spill] sm:$0xff] %v9786_v10  ;;  %4502 = vmatprep.subr.bf16.mxu1 %v3131_v45  ;;  %v2970_v10 = vld [vmem:[#allocation8 + $0x70] sm:$0xff]  ;;  %v9794_v45 = vld [vmem:[#allocation8 + $0x2f8] sm:$0xff] }
 0x3f2   :  { %v9788_v15 = vpop.f32.mrf.mxu1  ;;  %4155 = vmatmul.mubr.bf16.gmra.mxu1 %v12632_v36  ;;  %12635 = vst [vmem:[#allocation93_spill] sm:$0xff] %v9794_v45  ;;  %v3275_v28 = vunpack.c.h.s8.bf16 %v9794_v45  ;;  %v3106_v36 = vunpack.c.l.s8.bf16 %v2970_v10 }
 0x3f3   :  { %12631 = vst [vmem:[#allocation91_spill] sm:$0xff] %v9788_v15  ;;  %4164 = vmatprep.mubr.bf16.mxu1 %v12633_v6  ;;  %4332 = vmatpush2.bf16.msra.mxu0 %v3296_v39  ;;  %v3280_v39 = vunpack.c.l.s8.bf16 %v3056_v0 }
 0x3f4   :  { %v9792_v55 = vpop.f32.mrf.mxu1  ;;  %4333 = vmatprep.subr.bf16.mxu0 %v3289_v49  ;;  %4503 = vmatpush1.bf16.msra.mxu1 %v3130_v42  ;;  %v3114_v49 = vunpack.c.h.s8.bf16 %v2970_v10  ;;  %v3107_v42 = vunpack.c.l.s8.bf16 %v2971_v61  ;;  %v5182_v61 = vld [vmem:[%s12194_s11] sm:$0xff] }
 0x3f5   :  { %12634 = vst [vmem:[#allocation92_spill] sm:$0xff] %v9792_v55  ;;  %4504 = vmatprep.subr.bf16.mxu1 %v3123_v17 }
 0x3f6   :  { %4022 = vmatmul.mubr.bf16.gmra.mxu0 %v12636_v21  ;;  %v9797_v15 = vpop.f32.mrf.mxu1  ;;  %v12640_v21 = vld [vmem:[#allocation32_spill] sm:$0xff] }
 0x3f7   :  { %12637 = vst [vmem:[#allocation94_spill] sm:$0xff] %v9797_v15  ;;  %4031 = vmatprep.mubr.bf16.mxu0 %v9565_v38  ;;  %4334 = vmatpush2.bf16.msra.mxu0 %v3288_v34  ;;  %v2963_v38 = vld [vmem:[#allocation8 + $0x38] sm:$0xff]  ;;  %v12641_v34 = vld [vmem:[#allocation33_spill] sm:$0xff] }
 0x3f8   :  { %v9800_v6 = vpop.f32.mrf.mxu1  ;;  %4335 = vmatprep.subr.bf16.mxu0 %v3281_v27  ;;  %4505 = vmatpush1.bf16.msra.mxu1 %v3122_v13  ;;  %v12643_v27 = vld [vmem:[#allocation18_spill] sm:$0xff] }
 0x3f9   :  { %12638 = vst [vmem:[#allocation95_spill] sm:$0xff] %v9800_v6  ;;  %4506 = vmatprep.subr.bf16.mxu1 %v3115_v11  ;;  %v9813_v13 = vrot.slane %v4884_v16, %v12643_v27  ;;  %v3099_v11 = vunpack.c.h.s8.bf16 %v2963_v38  ;;  %v9828_v55 = vrot.slane %v5182_v61, %v12643_v27  ;;  %v12650_v27 = vld [vmem:[#allocation34_spill] sm:$0xff] }
 0x3fa   :  { %v9806_v17 = vpop.f32.mrf.mxu1  ;;  %4165 = vmatmul.mubr.bf16.gmra.mxu1 %v12640_v21  ;;  %v2962_v21 = vld [vmem:[#allocation8 + $0x30] sm:$0xff] }
 0x3fb   :  { %12639 = vst [vmem:[#allocation96_spill] sm:$0xff] %v9806_v17  ;;  %4174 = vmatprep.mubr.bf16.mxu1 %v12641_v34  ;;  %4336 = vmatpush2.bf16.msra.mxu0 %v3280_v39  ;;  %v12644_v34 = vld [vmem:[#allocation70_spill] sm:$0xff] }
 0x3fc   :  { %v9810_v0 = vpop.f32.mrf.mxu1  ;;  %4507 = vmatpush1.bf16.msra.mxu1 %v3114_v49  ;;  %4691 = vmatprep.subr.bf16.mxu0 %v3275_v28  ;;  %v3567_v6 = vpop.f32.mrf.mxu0  ;;  %v12647_v49 = vld [vmem:[#allocation71_spill] sm:$0xff] }
 0x3fd   :  { %12642 = vst [vmem:[#allocation97_spill] sm:$0xff] %v9810_v0  ;;  %4508 = vmatprep.subr.bf16.mxu1 %v3107_v42  ;;  %v3568_v17 = vadd.f32 %v3567_v6, %v9662_v48  ;;  %v12646_v0 = vld [vmem:[#allocation17_spill] sm:$0xff]  ;;  %v3098_v6 = vunpack.c.h.s8.bf16 %v2962_v21 }
 0x3fe   :  { %4032 = vmatmul.mubr.bf16.gmra.mxu0 %v12644_v34  ;;  %v9820_v39 = vpop.f32.mrf.mxu1  ;;  %v9823_v15 = vrot.slane %v4884_v16, %v12646_v0  ;;  %v3569_v10 = vpop.f32.mrf.mxu0  ;;  %v3091_v34 = vunpack.c.l.s8.bf16 %v2963_v38 }
 0x3ff   :  { %12645 = vst [vmem:[#allocation18_spill] sm:$0xff] %v9820_v39  ;;  %4041 = vmatprep.mubr.bf16.mxu0 %v12647_v49  ;;  %v4926_v28 = vmul.f32 %v9813_v13, %v3568_v17  ;;  %v3570_v42 = vadd.f32 %v3569_v10, %v9675_v12  ;;  %v9835_v39 = vrot.slane %v5182_v61, %v12646_v0  ;;  %v12651_v10 = vld [vmem:[#allocation35_spill] sm:$0xff]  ;;  %v3090_v0 = vunpack.c.l.s8.bf16 %v2962_v21  ;;  %v3018_v61 = vld [vmem:[#allocation8 + $0x1f0] sm:$0xff] }
 0x400   :  { %v9831_v47 = vpop.f32.mrf.mxu1  ;;  %4509 = vmatpush1.bf16.msra.mxu1 %v3106_v36  ;;  %v3571_v48 = vpop.f32.mrf.mxu0 }
 0x401   :  { %12648 = vst [vmem:[#allocation17_spill] sm:$0xff] %v9831_v47  ;;  %4510 = vmatprep.subr.bf16.mxu1 %v3099_v11  ;;  %v4927_v16 = vmul.f32 %v9823_v15, %v3570_v42  ;;  %v3572_v49 = vadd.f32 %v3571_v48, %v9681_v57  ;;  %v5224_v36 = vadd.f32 %v9828_v55, %v4926_v28  ;;  %v3211_v57 = vunpack.c.h.s8.bf16 %v3019_v41  ;;  %v12653_v47 = vld [vmem:[#allocation72_spill] sm:$0xff] }
 0x402   :  { %v9838_v17 = vpop.f32.mrf.mxu1  ;;  %4175 = vmatmul.mubr.bf16.gmra.mxu1 %v12650_v27  ;;  %v3573_v12 = vpop.f32.mrf.mxu0 }
 0x403   :  { %12649 = vst [vmem:[#allocation98_spill] sm:$0xff] %v9838_v17  ;;  %4184 = vmatprep.mubr.bf16.mxu1 %v12651_v10  ;;  %v4934_v11 = vmul.f32 %v9813_v13, %v3572_v49  ;;  %v3574_v38 = vadd.f32 %v3573_v12, %v9683_v31  ;;  %v5225_v48 = vadd.f32 %v9835_v39, %v4927_v16  ;;  %v12655_v49 = vld [vmem:[#allocation73_spill] sm:$0xff]  ;;  %v3210_v16 = vunpack.c.h.s8.bf16 %v3018_v61 }
 0x404   :  { %v9845_v42 = vpop.f32.mrf.mxu1  ;;  %4511 = vmatpush1.bf16.msra.mxu1 %v3098_v6  ;;  %v3577_v10 = vpop.f32.mrf.mxu0  ;;  %v5480_v6 = vmax.f32 %v5224_v36, 0.0 }
 0x405   :  { %12652 = vst [vmem:[#allocation99_spill] sm:$0xff] %v9845_v42  ;;  %4512 = vmatprep.subr.bf16.mxu1 %v3091_v34  ;;  %v5232_v27 = vadd.f32 %v9828_v55, %v4934_v11  ;;  %v4935_v17 = vmul.f32 %v9823_v15, %v3574_v38  ;;  %v3578_v31 = vadd.f32 %v3577_v10, %v9685_v26 }
 0x406   :  { %4042 = vmatmul.mubr.bf16.gmra.mxu0 %v12653_v47  ;;  %v9851_v28 = vpop.f32.mrf.mxu1  ;;  %v3579_v12 = vpop.f32.mrf.mxu0  ;;  %v3203_v47 = vunpack.c.l.s8.bf16 %v3019_v41 }
 0x407   :  { %12654 = vst [vmem:[#allocation100_spill] sm:$0xff] %v9851_v28  ;;  %4051 = vmatprep.mubr.bf16.mxu0 %v12655_v49  ;;  %v5488_v21 = vmax.f32 %v5232_v27, 0.0  ;;  %v5233_v34 = vadd.f32 %v9835_v39, %v4935_v17  ;;  %v4942_v11 = vmul.f32 %v9813_v13, %v3578_v31  ;;  %v3580_v38 = vadd.f32 %v3579_v12, %v9694_v5  ;;  %v12657_v27 = vld [vmem:[#allocation36_spill] sm:$0xff]  ;;  %v3011_v17 = vld [vmem:[#allocation8 + $0x1b8] sm:$0xff] }
 0x408   :  { %v9856_v42 = vpop.f32.mrf.mxu1  ;;  %4513 = vmatpush1.bf16.msra.mxu1 %v3090_v0  ;;  %v5481_v28 = vmax.f32 %v5225_v48, 0.0  ;;  %v3581_v26 = vpop.f32.mrf.mxu0  ;;  %v12658_v0 = vld [vmem:[#allocation37_spill] sm:$0xff]  ;;  %v3202_v48 = vunpack.c.l.s8.bf16 %v3018_v61 }
 0x409   :  { %4514 = vmatprep.subr.bf16.mxu1 %v3211_v57  ;;  %v9860_v45 = vpack.c.bf16 %v5488_v21, %v5480_v6  ;;  %v5489_v36 = vmax.f32 %v5233_v34, 0.0  ;;  %v3582_v49 = vadd.f32 %v3581_v26, %v9697_v46  ;;  %v5240_v31 = vadd.f32 %v9828_v55, %v4942_v11  ;;  %v3010_v46 = vld [vmem:[#allocation8 + $0x1b0] sm:$0xff] }
 0x40a   :  { %v9862_v10 = vpop.f32.mrf.mxu1  ;;  %4185 = vmatmul.mubr.bf16.gmra.mxu1 %v12657_v27  ;;  %v4943_v5 = vmul.f32 %v9823_v15, %v3580_v38  ;;  %v3583_v57 = vpop.f32.mrf.mxu0  ;;  %v3195_v34 = vunpack.c.h.s8.bf16 %v3011_v17  ;;  %v12664_v27 = vld [vmem:[#allocation41_spill] sm:$0xff] }
 0x40b   :  { %12656 = vst [vmem:[#allocation101_spill] sm:$0xff] %v9860_v45  ;;  %4194 = vmatprep.mubr.bf16.mxu1 %v12658_v0  ;;  %v9871_v6 = vpack.c.bf16 %v5489_v36, %v5481_v28  ;;  %v4950_v21 = vmul.f32 %v9813_v13, %v3582_v49  ;;  %v3584_v12 = vadd.f32 %v3583_v57, %v9700_v50  ;;  %v12660_v45 = vld [vmem:[#allocation74_spill] sm:$0xff]  ;;  %v12661_v28 = vld [vmem:[#allocation75_spill] sm:$0xff]  ;;  %v3194_v36 = vunpack.c.h.s8.bf16 %v3010_v46 }
 0x40c   :  { %v9869_v41 = vpop.f32.mrf.mxu1  ;;  %4515 = vmatpush2.bf16.msra.mxu1 %v3210_v16  ;;  %v5496_v16 = vmax.f32 %v5240_v31, 0.0  ;;  %v5241_v49 = vadd.f32 %v9835_v39, %v4943_v5  ;;  %v3187_v57 = vunpack.c.l.s8.bf16 %v3011_v17  ;;  %v12662_v31 = vld [vmem:[#allocation40_spill] sm:$0xff]  ;;  %v3003_v5 = vld [vmem:[#allocation8 + $0x178] sm:$0xff]  ;;  %v3186_v17 = vunpack.c.l.s8.bf16 %v3010_v46 }
 0x40d   :  { %12659 = vst [vmem:[#allocation102_spill] sm:$0xff] %v9871_v6  ;;  %4516 = vmatprep.subr.bf16.mxu1 %v3203_v47  ;;  %v3587_v26 = vpop.f32.mrf.mxu0  ;;  %v5248_v38 = vadd.f32 %v9828_v55, %v4950_v21  ;;  %v4951_v0 = vmul.f32 %v9823_v15, %v3584_v12 }
 0x40e   :  { %4052 = vmatmul.mubr.bf16.gmra.mxu0 %v12660_v45  ;;  %v9876_v11 = vpop.f32.mrf.mxu1  ;;  %v3588_v61 = vadd.f32 %v3587_v26, %v9702_v54 }
 0x40f   :  { %4061 = vmatprep.mubr.bf16.mxu0 %v12661_v28  ;;  %v3589_v50 = vpop.f32.mrf.mxu0  ;;  %v5504_v6 = vmax.f32 %v5248_v38, 0.0  ;;  %v5249_v45 = vadd.f32 %v9835_v39, %v4951_v0  ;;  %v5497_v38 = vmax.f32 %v5241_v49, 0.0 }
 0x410   :  { %v9883_v47 = vpop.f32.mrf.mxu1  ;;  %4517 = vmatpush2.bf16.msra.mxu1 %v3202_v48  ;;  %v4958_v21 = vmul.f32 %v9813_v13, %v3588_v61  ;;  %v3590_v12 = vadd.f32 %v3589_v50, %v9706_v14 }
 0x411   :  { %4518 = vmatprep.subr.bf16.mxu1 %v3195_v34  ;;  %v3591_v54 = vpop.f32.mrf.mxu0  ;;  %v9891_v28 = vpack.c.bf16 %v5504_v6, %v5496_v16  ;;  %v5505_v50 = vmax.f32 %v5249_v45, 0.0  ;;  %v3179_v16 = vunpack.c.h.s8.bf16 %v3003_v5 }
 0x412   :  { %v9888_v26 = vpop.f32.mrf.mxu1  ;;  %4195 = vmatmul.mubr.bf16.gmra.mxu1 %v12662_v31  ;;  %v3592_v48 = vadd.f32 %v3591_v54, %v9710_v33  ;;  %v5256_v0 = vadd.f32 %v9828_v55, %v4958_v21  ;;  %v4959_v61 = vmul.f32 %v9823_v15, %v3590_v12  ;;  %v3002_v33 = vld [vmem:[#allocation8 + $0x170] sm:$0xff] }
 0x413   :  { %12663 = vst [vmem:[#allocation103_spill] sm:$0xff] %v9891_v28  ;;  %4204 = vmatprep.mubr.bf16.mxu1 %v12664_v27  ;;  %v3593_v14 = vpop.f32.mrf.mxu0  ;;  %v12665_v28 = vld [vmem:[#allocation76_spill] sm:$0xff]  ;;  %v9904_v49 = vpack.c.bf16 %v5505_v50, %v5497_v38  ;;  %v3171_v27 = vunpack.c.l.s8.bf16 %v3003_v5  ;;  %v3170_v5 = vunpack.c.l.s8.bf16 %v3002_v33 }
 0x414   :  { %v9897_v34 = vpop.f32.mrf.mxu1  ;;  %4519 = vmatpush2.bf16.msra.mxu1 %v3194_v36  ;;  %v4966_v31 = vmul.f32 %v9813_v13, %v3592_v48  ;;  %v3594_v6 = vadd.f32 %v3593_v14, %v9713_v23  ;;  %v12668_v36 = vld [vmem:[#allocation77_spill] sm:$0xff]  ;;  %v5512_v48 = vmax.f32 %v5256_v0, 0.0  ;;  %v5257_v23 = vadd.f32 %v9835_v39, %v4959_v61  ;;  %v12669_v0 = vld [vmem:[#allocation44_spill] sm:$0xff]  ;;  %v2995_v61 = vld [vmem:[#allocation8 + $0x138] sm:$0xff] }
 0x415   :  { %4520 = vmatprep.subr.bf16.mxu1 %v3187_v57  ;;  %12667 = vst [vmem:[#allocation105_spill] sm:$0xff] %v9904_v49  ;;  %v12671_v49 = vld [vmem:[#allocation45_spill] sm:$0xff] }
 0x416   :  { %v3597_v54 = vpop.f32.mrf.mxu0  ;;  %4062 = vmatmul.mubr.bf16.gmra.mxu0 %v12665_v28  ;;  %v9902_v46 = vpop.f32.mrf.mxu1  ;;  %v5264_v21 = vadd.f32 %v9828_v55, %v4966_v31  ;;  %v4967_v12 = vmul.f32 %v9823_v15, %v3594_v6  ;;  %v3178_v28 = vunpack.c.h.s8.bf16 %v3002_v33 }
 0x417   :  { %12666 = vst [vmem:[#allocation104_spill] sm:$0xff] %v9902_v46  ;;  %v3598_v45 = vadd.f32 %v3597_v54, %v9715_v53  ;;  %4071 = vmatprep.mubr.bf16.mxu0 %v12668_v36 }
 0x418   :  { %v3599_v57 = vpop.f32.mrf.mxu0  ;;  %v9911_v14 = vpop.f32.mrf.mxu1  ;;  %4521 = vmatpush2.bf16.msra.mxu1 %v3186_v17  ;;  %v5520_v46 = vmax.f32 %v5264_v21, 0.0  ;;  %v5265_v38 = vadd.f32 %v9835_v39, %v4967_v12  ;;  %v5513_v21 = vmax.f32 %v5257_v23, 0.0 }
 0x419   :  { %v4974_v31 = vmul.f32 %v9813_v13, %v3598_v45  ;;  %v3600_v50 = vadd.f32 %v3599_v57, %v9719_v37  ;;  %4522 = vmatprep.subr.bf16.mxu1 %v3179_v16 }
 0x41a   :  { %v3601_v53 = vpop.f32.mrf.mxu0  ;;  %v9916_v6 = vpop.f32.mrf.mxu1  ;;  %4205 = vmatmul.mubr.bf16.gmra.mxu1 %v12669_v0  ;;  %v9919_v54 = vpack.c.bf16 %v5520_v46, %v5512_v48  ;;  %v5521_v57 = vmax.f32 %v5265_v38, 0.0  ;;  %v3163_v48 = vunpack.c.h.s8.bf16 %v2995_v61 }
 0x41b   :  { %v3602_v17 = vadd.f32 %v3601_v53, %v9722_v52  ;;  %4214 = vmatprep.mubr.bf16.mxu1 %v12671_v49  ;;  %v5272_v12 = vadd.f32 %v9828_v55, %v4974_v31  ;;  %v4975_v45 = vmul.f32 %v9823_v15, %v3600_v50  ;;  %v2994_v52 = vld [vmem:[#allocation8 + $0x130] sm:$0xff] }
 0x41c   :  { %12670 = vst [vmem:[#allocation106_spill] sm:$0xff] %v9919_v54  ;;  %v3603_v37 = vpop.f32.mrf.mxu0  ;;  %v9925_v16 = vpop.f32.mrf.mxu1  ;;  %4523 = vmatpush2.bf16.msra.mxu1 %v3178_v28  ;;  %v12672_v54 = vld [vmem:[#allocation78_spill] sm:$0xff]  ;;  %v9932_v23 = vpack.c.bf16 %v5521_v57, %v5513_v21 }
 0x41d   :  { %v4982_v0 = vmul.f32 %v9813_v13, %v3602_v17  ;;  %v3604_v46 = vadd.f32 %v3603_v37, %v9725_v35  ;;  %4524 = vmatprep.subr.bf16.mxu1 %v3171_v27  ;;  %v5528_v38 = vmax.f32 %v5272_v12, 0.0  ;;  %v5273_v35 = vadd.f32 %v9835_v39, %v4975_v45 }
 0x41e   :  { %v3607_v53 = vpop.f32.mrf.mxu0  ;;  %4072 = vmatmul.mubr.bf16.gmra.mxu0 %v12672_v54  ;;  %v9930_v33 = vpop.f32.mrf.mxu1  ;;  %12673 = vst [vmem:[#allocation107_spill] sm:$0xff] %v9932_v23  ;;  %v3162_v37 = vunpack.c.h.s8.bf16 %v2994_v52  ;;  %v3155_v54 = vunpack.c.l.s8.bf16 %v2995_v61  ;;  %v3154_v61 = vunpack.c.l.s8.bf16 %v2994_v52 }
 0x41f   :  { %v5280_v31 = vadd.f32 %v9828_v55, %v4982_v0  ;;  %v4983_v50 = vmul.f32 %v9823_v15, %v3604_v46  ;;  %v3608_v28 = vadd.f32 %v3607_v53, %v9727_v22  ;;  %4081 = vmatprep.mubr.bf16.mxu0 %v9646_v60  ;;  %v5529_v53 = vmax.f32 %v5273_v35, 0.0 }
 0x420   :  { %v3609_v27 = vpop.f32.mrf.mxu0  ;;  %v9939_v17 = vpop.f32.mrf.mxu1  ;;  %4525 = vmatpush2.bf16.msra.mxu1 %v3170_v5  ;;  %v12675_v5 = vld [vmem:[#allocation22_spill] sm:$0xff] }
 0x421   :  { %v5536_v49 = vmax.f32 %v5280_v31, 0.0  ;;  %v5281_v21 = vadd.f32 %v9835_v39, %v4983_v50  ;;  %v4990_v0 = vmul.f32 %v9813_v13, %v3608_v28  ;;  %v3610_v57 = vadd.f32 %v3609_v27, %v9731_v8  ;;  %4526 = vmatprep.subr.bf16.mxu1 %v3163_v48 }
 0x422   :  { %v3611_v22 = vpop.f32.mrf.mxu0  ;;  %v9944_v46 = vpop.f32.mrf.mxu1  ;;  %4215 = vmatmul.mubr.bf16.gmra.mxu1 %v12615_v44 }
 0x423   :  { %v9947_v12 = vpack.c.bf16 %v5536_v49, %v5528_v38  ;;  %v3612_v45 = vadd.f32 %v3611_v22, %v9734_v59  ;;  %4224 = vmatprep.mubr.bf16.mxu1 %v12675_v5  ;;  %v5288_v31 = vadd.f32 %v9828_v55, %v4990_v0  ;;  %v4991_v50 = vmul.f32 %v9823_v15, %v3610_v57 }
 0x424   :  { %v3613_v28 = vpop.f32.mrf.mxu0  ;;  %v9953_v8 = vpop.f32.mrf.mxu1  ;;  %4527 = vmatpush2.bf16.msra.mxu1 %v3162_v37  ;;  %v5537_v48 = vmax.f32 %v5281_v21, 0.0 }
 0x425   :  { %12674 = vst [vmem:[#allocation108_spill] sm:$0xff] %v9947_v12  ;;  %v4998_v27 = vmul.f32 %v9813_v13, %v3612_v45  ;;  %v3614_v49 = vadd.f32 %v3613_v28, %v9737_v2  ;;  %4528 = vmatprep.subr.bf16.mxu1 %v3155_v54  ;;  %v5544_v37 = vmax.f32 %v5288_v31, 0.0  ;;  %v5289_v21 = vadd.f32 %v9835_v39, %v4991_v50  ;;  %v12684_v12 = vld [vmem:[#allocation53_spill] sm:$0xff] }
 0x426   :  { %v3617_v38 = vpop.f32.mrf.mxu0  ;;  %4082 = vmatmul.mubr.bf16.gmra.mxu0 %v9649_v40  ;;  %v9958_v59 = vpop.f32.mrf.mxu1  ;;  %v9960_v52 = vpack.c.bf16 %v5537_v48, %v5529_v53 }
 0x427   :  { %v5296_v35 = vadd.f32 %v9828_v55, %v4998_v27  ;;  %v4999_v0 = vmul.f32 %v9823_v15, %v3614_v49  ;;  %v3618_v57 = vadd.f32 %v3617_v38, %v9739_v25  ;;  %4091 = vmatprep.mubr.bf16.mxu0 %v9665_v30  ;;  %v5545_v50 = vmax.f32 %v5289_v21, 0.0  ;;  %v12700_v30 = vld [vmem:[#allocation54_spill] sm:$0xff] }
 0x428   :  { %12676 = vst [vmem:[#allocation109_spill] sm:$0xff] %v9960_v52  ;;  %v3619_v2 = vpop.f32.mrf.mxu0  ;;  %v9967_v54 = vpop.f32.mrf.mxu1  ;;  %4529 = vmatpush2.bf16.msra.mxu1 %v3154_v61 }
 0x429   :  { %v5552_v22 = vmax.f32 %v5296_v35, 0.0  ;;  %v5297_v45 = vadd.f32 %v9835_v39, %v4999_v0  ;;  %v5006_v53 = vmul.f32 %v9813_v13, %v3618_v57  ;;  %v3620_v28 = vadd.f32 %v3619_v2, %v9743_v43 }
 0x42a   :  { %v3621_v48 = vpop.f32.mrf.mxu0  ;;  %v9972_v27 = vpop.f32.mrf.mxu1  ;;  %4225 = vmatmul.mubr.bf16.gmra.mxu1 %v12619_v32  ;;  %v12699_v32 = vld [vmem:[#allocation91_spill] sm:$0xff] }
 0x42b   :  { %v9975_v25 = vpack.c.bf16 %v5552_v22, %v5544_v37  ;;  %v3622_v31 = vadd.f32 %v3621_v48, %v9746_v20  ;;  %4234 = vmatprep.mubr.bf16.mxu1 %v12621_v63  ;;  %v5304_v61 = vadd.f32 %v9828_v55, %v5006_v53  ;;  %v5007_v49 = vmul.f32 %v9823_v15, %v3620_v28  ;;  %v12697_v63 = vld [vmem:[#allocation48_spill] sm:$0xff] }
 0x42c   :  { %v3623_v38 = vpop.f32.mrf.mxu0  ;;  %v9981_v35 = vpop.f32.mrf.mxu1  ;;  %v5553_v43 = vmax.f32 %v5297_v45, 0.0 }
 0x42d   :  { %12677 = vst [vmem:[#allocation110_spill] sm:$0xff] %v9975_v25  ;;  %v5014_v0 = vmul.f32 %v9813_v13, %v3622_v31  ;;  %v3624_v57 = vadd.f32 %v3623_v38, %v9749_v58  ;;  %v5560_v45 = vmax.f32 %v5304_v61, 0.0  ;;  %v5305_v28 = vadd.f32 %v9835_v39, %v5007_v49 }
 0x42e   :  { %v3627_v2 = vpop.f32.mrf.mxu0  ;;  %4092 = vmatmul.mubr.bf16.gmra.mxu0 %v9670_v3  ;;  %v9986_v37 = vpop.f32.mrf.mxu1  ;;  %v9988_v20 = vpack.c.bf16 %v5553_v43, %v5545_v50 }
 0x42f   :  { %v5312_v21 = vadd.f32 %v9828_v55, %v5014_v0  ;;  %v5015_v22 = vmul.f32 %v9823_v15, %v3624_v57  ;;  %v3628_v53 = vadd.f32 %v3627_v2, %v9751_v1  ;;  %4101 = vmatprep.mubr.bf16.mxu0 %v9688_v7  ;;  %v5561_v49 = vmax.f32 %v5305_v28, 0.0  ;;  %v12695_v7 = vld [vmem:[#allocation46_spill] sm:$0xff] }
 0x430   :  { %12678 = vst [vmem:[#allocation111_spill] sm:$0xff] %v9988_v20  ;;  %v3629_v48 = vpop.f32.mrf.mxu0  ;;  %v9995_v58 = vpop.f32.mrf.mxu1 }
 0x431   :  { %v5568_v31 = vmax.f32 %v5312_v21, 0.0  ;;  %v5313_v38 = vadd.f32 %v9835_v39, %v5015_v22  ;;  %v5022_v50 = vmul.f32 %v9813_v13, %v3628_v53  ;;  %v3630_v43 = vadd.f32 %v3629_v48, %v9755_v24 }
 0x432   :  { %v3631_v0 = vpop.f32.mrf.mxu0  ;;  %v10000_v25 = vpop.f32.mrf.mxu1  ;;  %4235 = vmatmul.mubr.bf16.gmra.mxu1 %v9232_v29  ;;  %v3042_v29 = vld [vmem:[#allocation8 + $0x2b0] sm:$0xff] }
 0x433   :  { %v10003_v1 = vpack.c.bf16 %v5568_v31, %v5560_v45  ;;  %v3632_v61 = vadd.f32 %v3631_v0, %v9758_v9  ;;  %4244 = vmatprep.mubr.bf16.mxu1 %v9249_v51  ;;  %v5320_v57 = vadd.f32 %v9828_v55, %v5022_v50  ;;  %v5023_v2 = vmul.f32 %v9823_v15, %v3630_v43 }
 0x434   :  { %v3633_v21 = vpop.f32.mrf.mxu0  ;;  %v10009_v22 = vpop.f32.mrf.mxu1  ;;  %v5569_v24 = vmax.f32 %v5313_v38, 0.0  ;;  %v3258_v3 = vunpack.c.h.s8.bf16 %v3042_v29 }
 0x435   :  { %12679 = vst [vmem:[#allocation112_spill] sm:$0xff] %v10003_v1  ;;  %v5030_v53 = vmul.f32 %v9813_v13, %v3632_v61  ;;  %v3634_v48 = vadd.f32 %v3633_v21, %v9761_v18  ;;  %v5576_v38 = vmax.f32 %v5320_v57, 0.0  ;;  %v5321_v43 = vadd.f32 %v9835_v39, %v5023_v2  ;;  %v3050_v61 = vld [vmem:[#allocation8 + $0x2f0] sm:$0xff]  ;;  %v12683_v2 = vld [vmem:[#allocation85_spill] sm:$0xff] }
 0x436   :  { %v3637_v20 = vpop.f32.mrf.mxu0  ;;  %4102 = vmatmul.mubr.bf16.gmra.mxu0 %v9691_v62  ;;  %v10014_v45 = vpop.f32.mrf.mxu1  ;;  %v10016_v9 = vpack.c.bf16 %v5569_v24, %v5561_v49 }
 0x437   :  { %v5328_v28 = vadd.f32 %v9828_v55, %v5030_v53  ;;  %v5031_v31 = vmul.f32 %v9823_v15, %v3634_v48  ;;  %v3638_v50 = vadd.f32 %v3637_v20, %v9763_v4  ;;  %4337 = vmatprep.mubr.bf16.mxu0 %v9293_v56  ;;  %v12681_v4 = vld [vmem:[#allocation39_spill] sm:$0xff]  ;;  %v5577_v52 = vmax.f32 %v5321_v43, 0.0 }
 0x438   :  { %12680 = vst [vmem:[#allocation113_spill] sm:$0xff] %v10016_v9  ;;  %v3639_v0 = vpop.f32.mrf.mxu0  ;;  %v10023_v18 = vpop.f32.mrf.mxu1 }
 0x439   :  { %v5584_v21 = vmax.f32 %v5328_v28, 0.0  ;;  %v5329_v1 = vadd.f32 %v9835_v39, %v5031_v31  ;;  %v5038_v49 = vmul.f32 %v9813_v13, %v3638_v50  ;;  %v3640_v24 = vadd.f32 %v3639_v0, %v9767_v19  ;;  %v12685_v19 = vld [vmem:[#allocation93_spill] sm:$0xff] }
 0x43a   :  { %v3641_v53 = vpop.f32.mrf.mxu0  ;;  %v10028_v48 = vpop.f32.mrf.mxu1  ;;  %4245 = vmatmul.mubr.bf16.gmra.mxu1 %v12681_v4  ;;  %v3274_v28 = vunpack.c.h.s8.bf16 %v3050_v61  ;;  %v3267_v0 = vunpack.c.l.s8.bf16 %v12685_v19 }
 0x43b   :  { %v10031_v20 = vpack.c.bf16 %v5584_v21, %v5576_v38  ;;  %v5039_v57 = vmul.f32 %v9823_v15, %v3640_v24  ;;  %v3642_v9 = vadd.f32 %v3641_v53, %v12683_v2  ;;  %4254 = vmatprep.mubr.bf16.mxu1 %v12684_v12  ;;  %v5336_v31 = vadd.f32 %v9828_v55, %v5038_v49  ;;  %v12686_v38 = vld [vmem:[#allocation86_spill] sm:$0xff]  ;;  %v12687_v2 = vld [vmem:[#allocation43_spill] sm:$0xff] }
 0x43c   :  { %v3643_v50 = vpop.f32.mrf.mxu0  ;;  %v10037_v23 = vpop.f32.mrf.mxu1  ;;  %v5585_v56 = vmax.f32 %v5329_v1, 0.0  ;;  %v12689_v1 = vld [vmem:[#allocation87_spill] sm:$0xff] }
 0x43d   :  { %12682 = vst [vmem:[#allocation114_spill] sm:$0xff] %v10031_v20  ;;  %v5046_v4 = vmul.f32 %v9813_v13, %v3642_v9  ;;  %v3644_v21 = vadd.f32 %v3643_v50, %v12686_v38  ;;  %v10042_v20 = vld [vmem:[#allocation8 + $0x2b8] sm:$0xff]  ;;  %v5337_v24 = vadd.f32 %v9835_v39, %v5039_v57  ;;  %v5592_v50 = vmax.f32 %v5336_v31, 0.0 }
 0x43e   :  { %v3647_v53 = vpop.f32.mrf.mxu0  ;;  %4338 = vmatmul.mubr.bf16.vlgmr.msra.gmra.mxu0 %v12687_v2  ;;  %v10046_v43 = vpop.f32.mrf.mxu1  ;;  %v10048_v49 = vpack.c.bf16 %v5585_v56, %v5577_v52  ;;  %v12690_v9 = vld [vmem:[#allocation47_spill] sm:$0xff]  ;;  %v3266_v57 = vunpack.c.l.s8.bf16 %v3050_v61  ;;  %v3259_v2 = vunpack.c.h.s8.bf16 %v10042_v20 }
 0x43f   :  { %v5344_v12 = vadd.f32 %v9828_v55, %v5046_v4  ;;  %v5047_v19 = vmul.f32 %v9823_v15, %v3644_v21  ;;  %v3648_v62 = vadd.f32 %v3647_v53, %v12689_v1  ;;  %4692 = vmatpush1.bf16.msra.mxu0 %v3274_v28  ;;  %4347 = vmatprep.mubr.bf16.mxu0 %v12690_v9  ;;  %v12691_v21 = vld [vmem:[#allocation88_spill] sm:$0xff]  ;;  %v5593_v31 = vmax.f32 %v5337_v24, 0.0 }
 0x440   :  { %12688 = vst [vmem:[#allocation85_spill] sm:$0xff] %v10048_v49  ;;  %v3649_v38 = vpop.f32.mrf.mxu0  ;;  %v10054_v51 = vpop.f32.mrf.mxu1  ;;  %4693 = vmatprep.subr.bf16.mxu0 %v3267_v0  ;;  %v12692_v1 = vld [vmem:[#allocation52_spill] sm:$0xff]  ;;  %v12694_v0 = vld [vmem:[#allocation89_spill] sm:$0xff] }
 0x441   :  { %v5600_v56 = vmax.f32 %v5344_v12, 0.0  ;;  %v5345_v52 = vadd.f32 %v9835_v39, %v5047_v19  ;;  %v5054_v4 = vmul.f32 %v9813_v13, %v3648_v62  ;;  %v3650_v49 = vadd.f32 %v3649_v38, %v12691_v21  ;;  %v10067_v12 = vld [vmem:[#allocation10 + $0x38] sm:$0xff] }
 0x442   :  { %v3651_v53 = vpop.f32.mrf.mxu0  ;;  %v10060_v28 = vpop.f32.mrf.mxu1  ;;  %4255 = vmatmul.mubr.bf16.gmra.mxu1 %v12692_v1  ;;  %v5911_v1 = vunpack.c.h.s8.bf16 %v10067_v12 }
 0x443   :  { %v10063_v9 = vpack.c.bf16 %v5600_v56, %v5592_v50  ;;  %v3652_v61 = vadd.f32 %v3651_v53, %v12694_v0  ;;  %4264 = vmatprep.mubr.bf16.mxu1 %v12695_v7  ;;  %v5352_v19 = vadd.f32 %v9828_v55, %v5054_v4  ;;  %v5055_v62 = vmul.f32 %v9823_v15, %v3650_v49  ;;  %v12696_v56 = vld [vmem:[#allocation90_spill] sm:$0xff] }
 0x444   :  { %v3653_v38 = vpop.f32.mrf.mxu0  ;;  %v10071_v21 = vpop.f32.mrf.mxu1  ;;  %4694 = vmatpush1.bf16.msra.mxu0 %v3266_v57  ;;  %v5601_v24 = vmax.f32 %v5345_v52, 0.0  ;;  %v3251_v0 = vunpack.c.l.s8.bf16 %v10042_v20  ;;  %6753 = vmatprep.subr.bf16.mxu1 %v5911_v1  ;;  %v3034_v1 = vld [vmem:[#allocation8 + $0x270] sm:$0xff] }
 0x445   :  { %12693 = vst [vmem:[#allocation93_spill] sm:$0xff] %v10063_v9  ;;  %v5062_v50 = vmul.f32 %v9813_v13, %v3652_v61  ;;  %v3654_v53 = vadd.f32 %v3653_v38, %v12696_v56  ;;  %4695 = vmatprep.subr.bf16.mxu0 %v3259_v2  ;;  %v3035_v9 = vld [vmem:[#allocation8 + $0x278] sm:$0xff]  ;;  %v5608_v2 = vmax.f32 %v5352_v19, 0.0  ;;  %v5353_v20 = vadd.f32 %v9835_v39, %v5055_v62  ;;  %v12702_v19 = vld [vmem:[#allocation25_spill] sm:$0xff] }
 0x446   :  { %v3657_v7 = vpop.f32.mrf.mxu0  ;;  %4348 = vmatmul.mubr.bf16.gmra.mxu0 %v12697_v63  ;;  %v10078_v4 = vpop.f32.mrf.mxu1  ;;  %v10080_v49 = vpack.c.bf16 %v5601_v24, %v5593_v31  ;;  %v3250_v63 = vunpack.c.l.s8.bf16 %v3042_v29  ;;  %v3243_v40 = vunpack.c.h.s8.bf16 %v3035_v9  ;;  %v12705_v29 = vld [vmem:[#allocation26_spill] sm:$0xff]  ;;  %v3242_v5 = vunpack.c.h.s8.bf16 %v3034_v1 }
 0x447   :  { %v5360_v57 = vadd.f32 %v9828_v55, %v5062_v50  ;;  %v5063_v52 = vmul.f32 %v9823_v15, %v3654_v53  ;;  %v3658_v61 = vadd.f32 %v3657_v7, %v12699_v32  ;;  %4357 = vmatprep.mubr.bf16.mxu0 %v12700_v30  ;;  %v12701_v53 = vld [vmem:[#allocation92_spill] sm:$0xff]  ;;  %v12704_v30 = vld [vmem:[#allocation94_spill] sm:$0xff] }
 0x448   :  { %12698 = vst [vmem:[#allocation86_spill] sm:$0xff] %v10080_v49  ;;  %v3659_v38 = vpop.f32.mrf.mxu0  ;;  %v10087_v56 = vpop.f32.mrf.mxu1  ;;  %4696 = vmatpush1.bf16.msra.mxu0 %v3258_v3 }
 0x449   :  { %v5616_v31 = vmax.f32 %v5360_v57, 0.0  ;;  %v5361_v24 = vadd.f32 %v9835_v39, %v5063_v52  ;;  %v5070_v50 = vmul.f32 %v9813_v13, %v3658_v61  ;;  %v3660_v49 = vadd.f32 %v3659_v38, %v12701_v53  ;;  %4697 = vmatprep.subr.bf16.mxu0 %v3251_v0 }
 0x44a   :  { %v3661_v32 = vpop.f32.mrf.mxu0  ;;  %v10092_v7 = vpop.f32.mrf.mxu1  ;;  %4265 = vmatmul.mubr.bf16.gmra.mxu1 %v12702_v19  ;;  %v5609_v57 = vmax.f32 %v5353_v20, 0.0  ;;  %v12707_v19 = vld [vmem:[#allocation95_spill] sm:$0xff] }
 0x44b   :  { %v10095_v62 = vpack.c.bf16 %v5616_v31, %v5608_v2  ;;  %v3662_v3 = vadd.f32 %v3661_v32, %v12704_v30  ;;  %4274 = vmatprep.mubr.bf16.mxu1 %v12705_v29  ;;  %v5368_v52 = vadd.f32 %v9828_v55, %v5070_v50  ;;  %v5071_v61 = vmul.f32 %v9823_v15, %v3660_v49  ;;  %v3027_v30 = vld [vmem:[#allocation8 + $0x238] sm:$0xff] }
 0x44c   :  { %v3663_v44 = vpop.f32.mrf.mxu0  ;;  %v10101_v38 = vpop.f32.mrf.mxu1  ;;  %4698 = vmatpush1.bf16.msra.mxu0 %v3250_v63  ;;  %v5617_v0 = vmax.f32 %v5361_v24, 0.0  ;;  %v3235_v31 = vunpack.c.l.s8.bf16 %v3035_v9  ;;  %v12711_v63 = vld [vmem:[#allocation96_spill] sm:$0xff] }
 0x44d   :  { %12703 = vst [vmem:[#allocation87_spill] sm:$0xff] %v10095_v62  ;;  %12706 = vst [vmem:[#allocation88_spill] sm:$0xff] %v10101_v38  ;;  %v5078_v53 = vmul.f32 %v9813_v13, %v3662_v3  ;;  %v3664_v2 = vadd.f32 %v3663_v44, %v12707_v19  ;;  %4699 = vmatprep.subr.bf16.mxu0 %v3243_v40  ;;  %v12708_v62 = vld [vmem:[#allocation56_spill] sm:$0xff]  ;;  %v12712_v38 = vld [vmem:[#allocation57_spill] sm:$0xff]  ;;  %v5624_v3 = vmax.f32 %v5368_v52, 0.0  ;;  %v3234_v19 = vunpack.c.l.s8.bf16 %v3034_v1 }
 0x44e   :  { %v3667_v32 = vpop.f32.mrf.mxu0  ;;  %4358 = vmatmul.mubr.bf16.gmra.mxu0 %v12708_v62  ;;  %v10106_v20 = vpop.f32.mrf.mxu1  ;;  %v10108_v50 = vpack.c.bf16 %v5617_v0, %v5609_v57  ;;  %v5369_v44 = vadd.f32 %v9835_v39, %v5071_v61  ;;  %v3227_v62 = vunpack.c.h.s8.bf16 %v3027_v30  ;;  %v12716_v52 = vld [vmem:[#allocation55_spill] sm:$0xff] }
 0x44f   :  { %12709 = vst [vmem:[#allocation89_spill] sm:$0xff] %v10106_v20  ;;  %v5376_v49 = vadd.f32 %v9828_v55, %v5078_v53  ;;  %v5079_v29 = vmul.f32 %v9823_v15, %v3664_v2  ;;  %v3668_v24 = vadd.f32 %v3667_v32, %v12711_v63  ;;  %4367 = vmatprep.mubr.bf16.mxu0 %v12712_v38  ;;  %v3026_v20 = vld [vmem:[#allocation8 + $0x230] sm:$0xff]  ;;  %v12714_v2 = vld [vmem:[#allocation97_spill] sm:$0xff]  ;;  %v12719_v1 = vld [vmem:[#allocation23_spill] sm:$0xff] }
 0x450   :  { %12710 = vst [vmem:[#allocation90_spill] sm:$0xff] %v10108_v50  ;;  %v3669_v40 = vpop.f32.mrf.mxu0  ;;  %v10115_v9 = vpop.f32.mrf.mxu1  ;;  %4700 = vmatpush1.bf16.msra.mxu0 %v3242_v5  ;;  %v12718_v38 = vld [vmem:[#allocation18_spill] sm:$0xff] }
 0x451   :  { %12713 = vst [vmem:[#allocation91_spill] sm:$0xff] %v10115_v9  ;;  %v5632_v57 = vmax.f32 %v5376_v49, 0.0  ;;  %v5377_v0 = vadd.f32 %v9835_v39, %v5079_v29  ;;  %v5086_v53 = vmul.f32 %v9813_v13, %v3668_v24  ;;  %v3670_v50 = vadd.f32 %v3669_v40, %v12714_v2  ;;  %4701 = vmatprep.subr.bf16.mxu0 %v3235_v31 }
 0x452   :  { %v3671_v32 = vpop.f32.mrf.mxu0  ;;  %v10120_v63 = vpop.f32.mrf.mxu1  ;;  %4275 = vmatmul.mubr.bf16.gmra.mxu1 %v12716_v52  ;;  %v3226_v9 = vunpack.c.h.s8.bf16 %v3026_v20  ;;  %v5625_v49 = vmax.f32 %v5369_v44, 0.0  ;;  %v12721_v52 = vld [vmem:[#allocation17_spill] sm:$0xff] }
 0x453   :  { %12715 = vst [vmem:[#allocation92_spill] sm:$0xff] %v10120_v63  ;;  %v10123_v61 = vpack.c.bf16 %v5632_v57, %v5624_v3  ;;  %v3672_v5 = vadd.f32 %v3671_v32, %v12718_v38  ;;  %4284 = vmatprep.mubr.bf16.mxu1 %v12719_v1  ;;  %v5384_v29 = vadd.f32 %v9828_v55, %v5086_v53  ;;  %v5633_v31 = vmax.f32 %v5377_v0, 0.0  ;;  %v3083_v38 = vld [vmem:[#allocation8 + $0x3f8] sm:$0xff] }
 0x454   :  { %v5087_v24 = vmul.f32 %v9823_v15, %v3670_v50  ;;  %v3673_v60 = vpop.f32.mrf.mxu0  ;;  %v10129_v40 = vpop.f32.mrf.mxu1  ;;  %4702 = vmatpush1.bf16.msra.mxu0 %v3234_v19  ;;  %v3219_v57 = vunpack.c.l.s8.bf16 %v3027_v30  ;;  %v12725_v19 = vld [vmem:[#allocation98_spill] sm:$0xff] }
 0x455   :  { %12717 = vst [vmem:[#allocation94_spill] sm:$0xff] %v10123_v61  ;;  %12720 = vst [vmem:[#allocation95_spill] sm:$0xff] %v10129_v40  ;;  %v5094_v2 = vmul.f32 %v9813_v13, %v3672_v5  ;;  %v3674_v3 = vadd.f32 %v3673_v60, %v12721_v52  ;;  %4703 = vmatprep.subr.bf16.mxu0 %v3227_v62  ;;  %v12722_v61 = vld [vmem:[#allocation58_spill] sm:$0xff]  ;;  %v10136_v53 = vpack.c.bf16 %v5633_v31, %v5625_v49  ;;  %v12726_v40 = vld [vmem:[#allocation61_spill] sm:$0xff] }
 0x456   :  { %v3677_v32 = vpop.f32.mrf.mxu0  ;;  %4368 = vmatmul.mubr.bf16.gmra.mxu0 %v12722_v61  ;;  %v10134_v44 = vpop.f32.mrf.mxu1  ;;  %v5640_v5 = vmax.f32 %v5384_v29, 0.0  ;;  %v5385_v60 = vadd.f32 %v9835_v39, %v5087_v24  ;;  %v3218_v52 = vunpack.c.l.s8.bf16 %v3026_v20  ;;  %v3339_v61 = vunpack.c.h.s8.bf16 %v3083_v38  ;;  %v12729_v29 = vld [vmem:[#allocation59_spill] sm:$0xff]  ;;  %v12732_v20 = vld [vmem:[#allocation60_spill] sm:$0xff] }
 0x457   :  { %12723 = vst [vmem:[#allocation96_spill] sm:$0xff] %v10134_v44  ;;  %12724 = vst [vmem:[#allocation97_spill] sm:$0xff] %v10136_v53  ;;  %v5392_v50 = vadd.f32 %v9828_v55, %v5094_v2  ;;  %v5095_v1 = vmul.f32 %v9823_v15, %v3674_v3  ;;  %v3678_v0 = vadd.f32 %v3677_v32, %v12725_v19  ;;  %4377 = vmatprep.mubr.bf16.mxu0 %v12726_v40  ;;  %v3082_v44 = vld [vmem:[#allocation8 + $0x3f0] sm:$0xff]  ;;  %v12728_v3 = vld [vmem:[#allocation99_spill] sm:$0xff] }
 0x458   :  { %v3679_v62 = vpop.f32.mrf.mxu0  ;;  %v10143_v30 = vpop.f32.mrf.mxu1  ;;  %4704 = vmatpush1.bf16.msra.mxu0 %v3226_v9  ;;  %v12731_v40 = vld [vmem:[#allocation100_spill] sm:$0xff] }
 0x459   :  { %12727 = vst [vmem:[#allocation18_spill] sm:$0xff] %v10143_v30  ;;  %v5648_v49 = vmax.f32 %v5392_v50, 0.0  ;;  %v5393_v31 = vadd.f32 %v9835_v39, %v5095_v1  ;;  %v5102_v2 = vmul.f32 %v9813_v13, %v3678_v0  ;;  %v3680_v53 = vadd.f32 %v3679_v62, %v12728_v3  ;;  %4705 = vmatprep.subr.bf16.mxu0 %v3219_v57 }
 0x45a   :  { %v3681_v32 = vpop.f32.mrf.mxu0  ;;  %v10148_v19 = vpop.f32.mrf.mxu1  ;;  %4285 = vmatmul.mubr.bf16.gmra.mxu1 %v12729_v29  ;;  %v3338_v30 = vunpack.c.h.s8.bf16 %v3082_v44  ;;  %v5641_v50 = vmax.f32 %v5385_v60, 0.0 }
 0x45b   :  { %v10151_v24 = vpack.c.bf16 %v5648_v49, %v5640_v5  ;;  %v3682_v9 = vadd.f32 %v3681_v32, %v12731_v40  ;;  %4294 = vmatprep.mubr.bf16.mxu1 %v12732_v20  ;;  %v5400_v1 = vadd.f32 %v9828_v55, %v5102_v2  ;;  %v5103_v0 = vmul.f32 %v9823_v15, %v3680_v53  ;;  %v10161_v40 = vld [vmem:[#allocation8 + $0x3b8] sm:$0xff] }
 0x45c   :  { %v3683_v63 = vpop.f32.mrf.mxu0  ;;  %v10157_v62 = vpop.f32.mrf.mxu1  ;;  %4706 = vmatpush1.bf16.msra.mxu0 %v3218_v52  ;;  %v5649_v57 = vmax.f32 %v5393_v31, 0.0  ;;  %v3331_v49 = vunpack.c.l.s8.bf16 %v3083_v38  ;;  %v3323_v20 = vunpack.c.h.s8.bf16 %v10161_v40 }
 0x45d   :  { %12730 = vst [vmem:[#allocation17_spill] sm:$0xff] %v10151_v24  ;;  %v5110_v3 = vmul.f32 %v9813_v13, %v3682_v9  ;;  %v3684_v5 = vadd.f32 %v3683_v63, %v9856_v42  ;;  %4707 = vmatprep.subr.bf16.mxu0 %v3339_v61  ;;  %v12733_v24 = vld [vmem:[#allocation62_spill] sm:$0xff]  ;;  %v12735_v9 = vld [vmem:[#allocation64_spill] sm:$0xff]  ;;  %v5656_v42 = vmax.f32 %v5400_v1, 0.0  ;;  %v5401_v63 = vadd.f32 %v9835_v39, %v5103_v0  ;;  %v12736_v0 = vld [vmem:[#allocation63_spill] sm:$0xff] }
 0x45e   :  { %v3687_v32 = vpop.f32.mrf.mxu0  ;;  %4378 = vmatmul.mubr.bf16.gmra.mxu0 %v12733_v24  ;;  %v10164_v60 = vpop.f32.mrf.mxu1  ;;  %v10166_v2 = vpack.c.bf16 %v5649_v57, %v5641_v50  ;;  %v3330_v24 = vunpack.c.l.s8.bf16 %v3082_v44  ;;  %v10176_v50 = vld [vmem:[#allocation8 + $0x3b0] sm:$0xff] }
 0x45f   :  { %v5408_v53 = vadd.f32 %v9828_v55, %v5110_v3  ;;  %v5111_v52 = vmul.f32 %v9823_v15, %v3684_v5  ;;  %v3688_v31 = vadd.f32 %v3687_v32, %v9862_v10  ;;  %4387 = vmatprep.mubr.bf16.mxu0 %v12735_v9  ;;  %v5657_v9 = vmax.f32 %v5401_v63, 0.0 }
 0x460   :  { %12734 = vst [vmem:[#allocation98_spill] sm:$0xff] %v10166_v2  ;;  %v3689_v61 = vpop.f32.mrf.mxu0  ;;  %v10173_v38 = vpop.f32.mrf.mxu1  ;;  %4708 = vmatpush2.bf16.msra.mxu0 %v3338_v30  ;;  %v12738_v30 = vld [vmem:[#allocation24_spill] sm:$0xff] }
 0x461   :  { %v5664_v57 = vmax.f32 %v5408_v53, 0.0  ;;  %v5409_v3 = vadd.f32 %v9835_v39, %v5111_v52  ;;  %v5118_v5 = vmul.f32 %v9813_v13, %v3688_v31  ;;  %v3690_v10 = vadd.f32 %v3689_v61, %v9869_v41  ;;  %4709 = vmatprep.subr.bf16.mxu0 %v3331_v49  ;;  %v10193_v61 = vld [vmem:[#allocation8 + $0x378] sm:$0xff] }
 0x462   :  { %v3691_v1 = vpop.f32.mrf.mxu0  ;;  %v10181_v32 = vpop.f32.mrf.mxu1  ;;  %4295 = vmatmul.mubr.bf16.gmra.mxu1 %v12736_v0  ;;  %v3322_v53 = vunpack.c.h.s8.bf16 %v10176_v50 }
 0x463   :  { %v10184_v2 = vpack.c.bf16 %v5664_v57, %v5656_v42  ;;  %v3692_v44 = vadd.f32 %v3691_v1, %v9876_v11  ;;  %4530 = vmatprep.mubr.bf16.mxu1 %v12738_v30  ;;  %v5416_v52 = vadd.f32 %v9828_v55, %v5118_v5  ;;  %v5119_v31 = vmul.f32 %v9823_v15, %v3690_v10  ;;  %v10198_v1 = vld [vmem:[#allocation10 + $0x18] sm:$0xff]  ;;  %v12739_v5 = vld [vmem:[#allocation65_spill] sm:$0xff] }
 0x464   :  { %v3693_v41 = vpop.f32.mrf.mxu0  ;;  %v10191_v49 = vpop.f32.mrf.mxu1  ;;  %4710 = vmatpush2.bf16.msra.mxu0 %v3330_v24  ;;  %v5665_v0 = vmax.f32 %v5409_v3, 0.0  ;;  %v3315_v57 = vunpack.c.l.s8.bf16 %v10161_v40  ;;  %v3314_v30 = vunpack.c.l.s8.bf16 %v10176_v50  ;;  %v3307_v40 = vunpack.c.h.s8.bf16 %v10193_v61  ;;  %v10214_v50 = vld [vmem:[#allocation8 + $0x370] sm:$0xff] }
 0x465   :  { %12737 = vst [vmem:[#allocation99_spill] sm:$0xff] %v10184_v2  ;;  %v5126_v42 = vmul.f32 %v9813_v13, %v3692_v44  ;;  %v3694_v11 = vadd.f32 %v3693_v41, %v9883_v47  ;;  %4711 = vmatprep.subr.bf16.mxu0 %v3323_v20  ;;  %v12742_v20 = vld [vmem:[#allocation50_spill] sm:$0xff]  ;;  %v5672_v41 = vmax.f32 %v5416_v52, 0.0  ;;  %v5417_v2 = vadd.f32 %v9835_v39, %v5119_v31 }
 0x466   :  { %v3697_v63 = vpop.f32.mrf.mxu0  ;;  %4388 = vmatmul.mubr.bf16.gmra.mxu0 %v12739_v5  ;;  %v10201_v10 = vpop.f32.mrf.mxu1  ;;  %v10204_v24 = vpack.c.bf16 %v5665_v0, %v5657_v9  ;;  %v5903_v9 = vunpack.c.h.s8.bf16 %v10198_v1  ;;  %v5910_v0 = vunpack.c.l.s8.bf16 %v10067_v12  ;;  %v12748_v12 = vld [vmem:[#allocation28_spill] sm:$0xff] }
 0x467   :  { %12740 = vst [vmem:[#allocation100_spill] sm:$0xff] %v10201_v10  ;;  %v5424_v3 = vadd.f32 %v9828_v55, %v5126_v42  ;;  %v5127_v44 = vmul.f32 %v9823_v15, %v3694_v11  ;;  %v3698_v47 = vadd.f32 %v3697_v63, %v9888_v26  ;;  %4397 = vmatprep.mubr.bf16.mxu0 %v12742_v20 }
 0x468   :  { %12741 = vst [vmem:[#allocation24_spill] sm:$0xff] %v10204_v24  ;;  %v3699_v5 = vpop.f32.mrf.mxu0  ;;  %v10212_v29 = vpop.f32.mrf.mxu1  ;;  %4712 = vmatpush2.bf16.msra.mxu0 %v3322_v53  ;;  %v12745_v24 = vld [vmem:[#allocation27_spill] sm:$0xff]  ;;  %v10224_v53 = vld [vmem:[#allocation10 + $0x30] sm:$0xff] }
 0x469   :  { %12743 = vst [vmem:[#allocation115_spill] sm:$0xff] %v10212_v29  ;;  %v5680_v42 = vmax.f32 %v5424_v3, 0.0  ;;  %v5425_v26 = vadd.f32 %v9835_v39, %v5127_v44  ;;  %v5134_v11 = vmul.f32 %v9813_v13, %v3698_v47  ;;  %v3700_v63 = vadd.f32 %v3699_v5, %v9897_v34  ;;  %4713 = vmatprep.subr.bf16.mxu0 %v3315_v57  ;;  %v12747_v29 = vld [vmem:[#allocation104_spill] sm:$0xff] }
 0x46a   :  { %v3701_v52 = vpop.f32.mrf.mxu0  ;;  %v10221_v31 = vpop.f32.mrf.mxu1  ;;  %4531 = vmatmul.mubr.bf16.vlgmr.msra.gmra.mxu1 %v12745_v24  ;;  %v3306_v3 = vunpack.c.h.s8.bf16 %v10214_v50  ;;  %v5902_v44 = vunpack.c.l.s8.bf16 %v10198_v1  ;;  %v5673_v47 = vmax.f32 %v5417_v2, 0.0  ;;  %v10236_v24 = vld [vmem:[#allocation8 + $0x338] sm:$0xff]  ;;  %v3299_v1 = vunpack.c.l.s8.bf16 %v10193_v61 }
 0x46b   :  { %12744 = vst [vmem:[#allocation116_spill] sm:$0xff] %v10221_v31  ;;  %v10226_v20 = vpack.c.bf16 %v5680_v42, %v5672_v41  ;;  %v3702_v10 = vadd.f32 %v3701_v52, %v12747_v29  ;;  %4540 = vmatprep.mubr.bf16.mxu1 %v12748_v12  ;;  %v5432_v34 = vadd.f32 %v9828_v55, %v5134_v11  ;;  %v5681_v41 = vmax.f32 %v5425_v26, 0.0  ;;  %v10242_v11 = vld [vmem:[#allocation10 + $0x10] sm:$0xff] }
 0x46c   :  { %v5135_v57 = vmul.f32 %v9823_v15, %v3700_v63  ;;  %v3703_v5 = vpop.f32.mrf.mxu0  ;;  %v10234_v31 = vpop.f32.mrf.mxu1  ;;  %4714 = vmatpush2.bf16.msra.mxu0 %v3314_v30  ;;  %6754 = vmatpush3.bf16.msra.mxu1 %v5903_v9  ;;  %v5909_v2 = vunpack.c.h.s8.bf16 %v10224_v53  ;;  %v12749_v52 = vld [vmem:[#allocation66_spill] sm:$0xff]  ;;  %v3298_v9 = vunpack.c.l.s8.bf16 %v10214_v50 }
 0x46d   :  { %12746 = vst [vmem:[#allocation27_spill] sm:$0xff] %v10226_v20  ;;  %v5142_v29 = vmul.f32 %v9813_v13, %v3702_v10  ;;  %v3704_v42 = vadd.f32 %v3703_v5, %v9911_v14  ;;  %4715 = vmatprep.subr.bf16.mxu0 %v3307_v40  ;;  %6755 = vmatprep.subr.bf16.mxu1 %v5910_v0  ;;  %v12751_v40 = vld [vmem:[#allocation67_spill] sm:$0xff]  ;;  %v3291_v0 = vunpack.c.h.s8.bf16 %v10236_v24  ;;  %v5688_v12 = vmax.f32 %v5432_v34, 0.0  ;;  %v10258_v50 = vld [vmem:[#allocation8 + $0x330] sm:$0xff] }
 0x46e   :  { %v3707_v63 = vpop.f32.mrf.mxu0  ;;  %4398 = vmatmul.mubr.bf16.gmra.mxu0 %v12749_v52  ;;  %v10245_v30 = vpop.f32.mrf.mxu1  ;;  %v10248_v26 = vpack.c.bf16 %v5681_v41, %v5673_v47  ;;  %v5433_v5 = vadd.f32 %v9835_v39, %v5135_v57  ;;  %v5901_v47 = vunpack.c.h.s8.bf16 %v10242_v11  ;;  %v5908_v41 = vunpack.c.l.s8.bf16 %v10224_v53 }
 0x46f   :  { %v5440_v10 = vadd.f32 %v9828_v55, %v5142_v29  ;;  %v5143_v14 = vmul.f32 %v9823_v15, %v3704_v42  ;;  %v3708_v61 = vadd.f32 %v3707_v63, %v9916_v6  ;;  %4407 = vmatprep.mubr.bf16.mxu0 %v12751_v40 }
 0x470   :  { %12750 = vst [vmem:[#allocation104_spill] sm:$0xff] %v10248_v26  ;;  %v3709_v20 = vpop.f32.mrf.mxu0  ;;  %v10256_v52 = vpop.f32.mrf.mxu1  ;;  %4716 = vmatpush2.bf16.msra.mxu0 %v3306_v3  ;;  %6756 = vmatpush3.bf16.msra.mxu1 %v5902_v44  ;;  %v12752_v3 = vld [vmem:[#allocation30_spill] sm:$0xff]  ;;  %v10268_v26 = vld [vmem:[#allocation10 + $0x28] sm:$0xff] }
 0x471   :  { %v5696_v29 = vmax.f32 %v5440_v10, 0.0  ;;  %v5441_v6 = vadd.f32 %v9835_v39, %v5143_v14  ;;  %v5150_v42 = vmul.f32 %v9813_v13, %v3708_v61  ;;  %v3710_v34 = vadd.f32 %v3709_v20, %v9925_v16  ;;  %4717 = vmatprep.subr.bf16.mxu0 %v3299_v1  ;;  %6757 = vmatprep.subr.bf16.mxu1 %v5909_v2  ;;  %v12754_v10 = vld [vmem:[#allocation31_spill] sm:$0xff] }
 0x472   :  { %v3711_v57 = vpop.f32.mrf.mxu0  ;;  %v10265_v63 = vpop.f32.mrf.mxu1  ;;  %4541 = vmatmul.mubr.bf16.gmra.mxu1 %v12752_v3  ;;  %v3290_v14 = vunpack.c.h.s8.bf16 %v10258_v50  ;;  %v5900_v61 = vunpack.c.l.s8.bf16 %v10242_v11  ;;  %v5689_v16 = vmax.f32 %v5433_v5, 0.0  ;;  %v10280_v3 = vld [vmem:[#allocation10 + $0x78] sm:$0xff]  ;;  %v3283_v11 = vunpack.c.l.s8.bf16 %v10236_v24 }
 0x473   :  { %v10270_v44 = vpack.c.bf16 %v5696_v29, %v5688_v12  ;;  %v3712_v53 = vadd.f32 %v3711_v57, %v9930_v33  ;;  %4550 = vmatprep.mubr.bf16.mxu1 %v12754_v10  ;;  %v5448_v20 = vadd.f32 %v9828_v55, %v5150_v42  ;;  %v5151_v1 = vmul.f32 %v9823_v15, %v3710_v34  ;;  %v10286_v42 = vld [vmem:[#allocation10 + $0x8] sm:$0xff]  ;;  %v12755_v57 = vld [vmem:[#allocation68_spill] sm:$0xff] }
 0x474   :  { %v3713_v2 = vpop.f32.mrf.mxu0  ;;  %v10278_v40 = vpop.f32.mrf.mxu1  ;;  %4718 = vmatpush2.bf16.msra.mxu0 %v3298_v9  ;;  %6758 = vmatpush3.bf16.msra.mxu1 %v5901_v47  ;;  %v5697_v12 = vmax.f32 %v5441_v6, 0.0  ;;  %v5907_v5 = vunpack.c.h.s8.bf16 %v10268_v26  ;;  %v3282_v47 = vunpack.c.l.s8.bf16 %v10258_v50  ;;  %v5899_v50 = vunpack.c.h.s8.bf16 %v10286_v42 }
 0x475   :  { %12753 = vst [vmem:[#allocation28_spill] sm:$0xff] %v10270_v44  ;;  %v5158_v33 = vmul.f32 %v9813_v13, %v3712_v53  ;;  %v3714_v29 = vadd.f32 %v3713_v2, %v9939_v17  ;;  %4719 = vmatprep.subr.bf16.mxu0 %v3291_v0  ;;  %6759 = vmatprep.subr.bf16.mxu1 %v5908_v41  ;;  %v12757_v0 = vld [vmem:[#allocation69_spill] sm:$0xff]  ;;  %v5927_v41 = vunpack.c.h.s8.bf16 %v10280_v3  ;;  %v5704_v10 = vmax.f32 %v5448_v20, 0.0 }
 0x476   :  { %v3717_v34 = vpop.f32.mrf.mxu0  ;;  %4408 = vmatmul.mubr.bf16.gmra.mxu0 %v12755_v57  ;;  %v10289_v9 = vpop.f32.mrf.mxu1  ;;  %v10292_v6 = vpack.c.bf16 %v5697_v12, %v5689_v16  ;;  %v5449_v2 = vadd.f32 %v9835_v39, %v5151_v1  ;;  %v5906_v16 = vunpack.c.l.s8.bf16 %v10268_v26  ;;  %v12760_v26 = vld [vmem:[#allocation33_spill] sm:$0xff] }
 0x477   :  { %v5456_v53 = vadd.f32 %v9828_v55, %v5158_v33  ;;  %v5159_v17 = vmul.f32 %v9823_v15, %v3714_v29  ;;  %v3718_v24 = vadd.f32 %v3717_v34, %v9944_v46  ;;  %4417 = vmatprep.mubr.bf16.mxu0 %v12757_v0  ;;  %v12758_v34 = vld [vmem:[#allocation32_spill] sm:$0xff] }
 0x478   :  { %12756 = vst [vmem:[#allocation30_spill] sm:$0xff] %v10292_v6  ;;  %v3719_v44 = vpop.f32.mrf.mxu0  ;;  %v10300_v57 = vpop.f32.mrf.mxu1  ;;  %4720 = vmatpush2.bf16.msra.mxu0 %v3290_v14  ;;  %6760 = vmatpush3.bf16.msra.mxu1 %v5900_v61  ;;  %v5868_v14 = vld [vmem:[#allocation10 + $0x20] sm:$0xff] }
 0x479   :  { %v5712_v12 = vmax.f32 %v5456_v53, 0.0  ;;  %v5457_v33 = vadd.f32 %v9835_v39, %v5159_v17  ;;  %v5166_v46 = vmul.f32 %v9813_v13, %v3718_v24  ;;  %v3720_v29 = vadd.f32 %v3719_v44, %v9953_v8  ;;  %4721 = vmatprep.subr.bf16.mxu0 %v3283_v11  ;;  %6761 = vmatprep.subr.bf16.mxu1 %v5907_v5 }
 0x47a   :  { %v3721_v20 = vpop.f32.mrf.mxu0  ;;  %v10307_v1 = vpop.f32.mrf.mxu1  ;;  %4551 = vmatmul.mubr.bf16.gmra.mxu1 %v12758_v34  ;;  %v5898_v53 = vunpack.c.l.s8.bf16 %v10286_v42  ;;  %v5705_v17 = vmax.f32 %v5449_v2, 0.0  ;;  %v12761_v42 = vld [vmem:[#allocation19_spill] sm:$0xff] }
 0x47b   :  { %v10310_v61 = vpack.c.bf16 %v5712_v12, %v5704_v10  ;;  %v3722_v6 = vadd.f32 %v3721_v20, %v9958_v59  ;;  %4560 = vmatprep.mubr.bf16.mxu1 %v12760_v26  ;;  %v5464_v24 = vadd.f32 %v9828_v55, %v5166_v46  ;;  %v5167_v8 = vmul.f32 %v9823_v15, %v3720_v29  ;;  %v7219_v59 = vld [vmem:[%s12193_s10] sm:$0xff] }
 0x47c   :  { %v3723_v44 = vpop.f32.mrf.mxu0  ;;  %v10317_v11 = vpop.f32.mrf.mxu1  ;;  %4722 = vmatpush2.bf16.msra.mxu0 %v3282_v47  ;;  %6762 = vmatpush3.bf16.msra.mxu1 %v5899_v50  ;;  %v5713_v5 = vmax.f32 %v5457_v33, 0.0  ;;  %v10325_v2 = vrot.slane %v7219_v59, %v12761_v42  ;;  %v5905_v46 = vunpack.c.h.s8.bf16 %v5868_v14  ;;  %v5864_v29 = vld [vmem:[#allocation10] sm:$0xff]  ;;  %v12764_v34 = vld [vmem:[#allocation71_spill] sm:$0xff] }
 0x47d   :  { %12759 = vst [vmem:[#allocation31_spill] sm:$0xff] %v10310_v61  ;;  %v5174_v10 = vmul.f32 %v9813_v13, %v3722_v6  ;;  %v3724_v12 = vadd.f32 %v3723_v44, %v9967_v54  ;;  %6865 = vmatprep.subr.bf16.mxu0 %v5927_v41  ;;  %6763 = vmatprep.subr.bf16.mxu1 %v5906_v16  ;;  %v7220_v47 = vld [vmem:[%s12194_s11] sm:$0xff]  ;;  %v12762_v54 = vld [vmem:[#allocation70_spill] sm:$0xff]  ;;  %v5720_v61 = vmax.f32 %v5464_v24, 0.0 }
 0x47e   :  { %v3953_v20 = vpop.f32.mrf.mxu0  ;;  %v10331_v13 = vrot.slane %v7220_v47, %v12761_v42  ;;  %4418 = vmatmul.mubr.bf16.gmra.mxu0 %v12762_v54  ;;  %v10334_v6 = vpop.f32.mrf.mxu1  ;;  %v10336_v50 = vpack.c.bf16 %v5713_v5, %v5705_v17  ;;  %v12765_v26 = vld [vmem:[#allocation20_spill] sm:$0xff]  ;;  %v5465_v42 = vadd.f32 %v9835_v39, %v5167_v8  ;;  %v5897_v17 = vunpack.c.h.s8.bf16 %v5864_v29  ;;  %v12766_v24 = vld [vmem:[#allocation34_spill] sm:$0xff] }
 0x47f   :  { %v5472_v33 = vadd.f32 %v9828_v55, %v5174_v10  ;;  %v5175_v41 = vmul.f32 %v9823_v15, %v3724_v12  ;;  %v3954_v16 = vadd.f32 %v3953_v20, %v9972_v27  ;;  %4427 = vmatprep.mubr.bf16.mxu0 %v12764_v34  ;;  %v10343_v44 = vrot.slane %v7219_v59, %v12765_v26 }
 0x480   :  { %12763 = vst [vmem:[#allocation32_spill] sm:$0xff] %v10336_v50  ;;  %v3955_v0 = vpop.f32.mrf.mxu0  ;;  %v10346_v54 = vpop.f32.mrf.mxu1  ;;  %6764 = vmatpush3.bf16.msra.mxu1 %v5898_v53  ;;  %v5904_v5 = vunpack.c.l.s8.bf16 %v5868_v14  ;;  %v10357_v59 = vrot.slane %v7220_v47, %v12765_v26  ;;  %v12768_v53 = vld [vmem:[#allocation35_spill] sm:$0xff]  ;;  %v5721_v20 = vmax.f32 %v5465_v42, 0.0 }
 0x481   :  { %v5728_v50 = vmax.f32 %v5472_v33, 0.0  ;;  %v5473_v55 = vadd.f32 %v9835_v39, %v5175_v41  ;;  %v4928_v15 = vmul.f32 %v10325_v2, %v3954_v16  ;;  %v3956_v27 = vadd.f32 %v3955_v0, %v9981_v35  ;;  %6765 = vmatprep.subr.bf16.mxu1 %v5905_v46 }
 0x482   :  { %v3957_v10 = vpop.f32.mrf.mxu0  ;;  %v10351_v12 = vpop.f32.mrf.mxu1  ;;  %4561 = vmatmul.mubr.bf16.gmra.mxu1 %v12766_v24  ;;  %v5896_v39 = vunpack.c.l.s8.bf16 %v5864_v29 }
 0x483   :  { %v10354_v8 = vpack.c.bf16 %v5728_v50, %v5720_v61  ;;  %v3958_v14 = vadd.f32 %v3957_v10, %v9986_v37  ;;  %4570 = vmatprep.mubr.bf16.mxu1 %v12768_v53  ;;  %v5226_v33 = vadd.f32 %v10331_v13, %v4928_v15  ;;  %v4929_v35 = vmul.f32 %v10343_v44, %v3956_v27  ;;  %v12769_v37 = vld [vmem:[#allocation72_spill] sm:$0xff] }
 0x484   :  { %v3959_v0 = vpop.f32.mrf.mxu0  ;;  %v10363_v46 = vpop.f32.mrf.mxu1  ;;  %6766 = vmatpush3.bf16.msra.mxu1 %v5897_v17  ;;  %v5729_v41 = vmax.f32 %v5473_v55, 0.0  ;;  %v12771_v17 = vld [vmem:[#allocation73_spill] sm:$0xff] }
 0x485   :  { %12767 = vst [vmem:[#allocation33_spill] sm:$0xff] %v10354_v8  ;;  %v4936_v61 = vmul.f32 %v10325_v2, %v3958_v14  ;;  %v3960_v47 = vadd.f32 %v3959_v0, %v9995_v58  ;;  %6767 = vmatprep.subr.bf16.mxu1 %v5904_v5  ;;  %v5482_v55 = vmax.f32 %v5226_v33, 0.0  ;;  %v5227_v27 = vadd.f32 %v10357_v59, %v4929_v35  ;;  %v12774_v35 = vld [vmem:[#allocation37_spill] sm:$0xff] }
 0x486   :  { %v3963_v50 = vpop.f32.mrf.mxu0  ;;  %4428 = vmatmul.mubr.bf16.gmra.mxu0 %v12769_v37  ;;  %v10368_v16 = vpop.f32.mrf.mxu1  ;;  %v10370_v29 = vpack.c.bf16 %v5729_v41, %v5721_v20  ;;  %v12804_v37 = vld [vmem:[#allocation18_spill] sm:$0xff] }
 0x487   :  { %v5234_v26 = vadd.f32 %v10331_v13, %v4936_v61  ;;  %v4937_v42 = vmul.f32 %v10343_v44, %v3960_v47  ;;  %v3964_v15 = vadd.f32 %v3963_v50, %v10000_v25  ;;  %4437 = vmatprep.mubr.bf16.mxu0 %v12771_v17  ;;  %v12772_v25 = vld [vmem:[#allocation36_spill] sm:$0xff]  ;;  %v5483_v61 = vmax.f32 %v5227_v27, 0.0 }
 0x488   :  { %12770 = vst [vmem:[#allocation19_spill] sm:$0xff] %v10370_v29  ;;  %v3965_v58 = vpop.f32.mrf.mxu0  ;;  %v10377_v5 = vpop.f32.mrf.mxu1  ;;  %6768 = vmatpush3.bf16.msra.mxu1 %v5896_v39 }
 0x489   :  { %v5490_v10 = vmax.f32 %v5234_v26, 0.0  ;;  %v5235_v24 = vadd.f32 %v10357_v59, %v4937_v42  ;;  %v4944_v14 = vmul.f32 %v10325_v2, %v3964_v15  ;;  %v3966_v53 = vadd.f32 %v3965_v58, %v10009_v22 }
 0x48a   :  { %v3967_v20 = vpop.f32.mrf.mxu0  ;;  %v10382_v0 = vpop.f32.mrf.mxu1  ;;  %4571 = vmatmul.mubr.bf16.gmra.mxu1 %v12772_v25 }
 0x48b   :  { %v10385_v41 = vpack.c.bf16 %v5490_v10, %v5482_v55  ;;  %v3968_v33 = vadd.f32 %v3967_v20, %v10014_v45  ;;  %4580 = vmatprep.mubr.bf16.mxu1 %v12774_v35  ;;  %v5242_v39 = vadd.f32 %v10331_v13, %v4944_v14  ;;  %v4945_v47 = vmul.f32 %v10343_v44, %v3966_v53  ;;  %v12775_v55 = vld [vmem:[#allocation74_spill] sm:$0xff]  ;;  %v12777_v20 = vld [vmem:[#allocation75_spill] sm:$0xff] }
 0x48c   :  { %v3969_v50 = vpop.f32.mrf.mxu0  ;;  %v10391_v26 = vpop.f32.mrf.mxu1  ;;  %v5491_v22 = vmax.f32 %v5235_v24, 0.0 }
 0x48d   :  { %12773 = vst [vmem:[#allocation20_spill] sm:$0xff] %v10385_v41  ;;  %v4952_v42 = vmul.f32 %v10325_v2, %v3968_v33  ;;  %v3970_v15 = vadd.f32 %v3969_v50, %v10023_v18  ;;  %v5498_v24 = vmax.f32 %v5242_v39, 0.0  ;;  %v5243_v25 = vadd.f32 %v10357_v59, %v4945_v47  ;;  %v12780_v47 = vld [vmem:[#allocation41_spill] sm:$0xff] }
 0x48e   :  { %v3973_v58 = vpop.f32.mrf.mxu0  ;;  %4438 = vmatmul.mubr.bf16.gmra.mxu0 %v12775_v55  ;;  %v10396_v10 = vpop.f32.mrf.mxu1  ;;  %v10398_v45 = vpack.c.bf16 %v5491_v22, %v5483_v61 }
 0x48f   :  { %v5250_v27 = vadd.f32 %v10331_v13, %v4952_v42  ;;  %v4953_v14 = vmul.f32 %v10343_v44, %v3970_v15  ;;  %v3974_v53 = vadd.f32 %v3973_v58, %v10028_v48  ;;  %4447 = vmatprep.mubr.bf16.mxu0 %v12777_v20  ;;  %v12778_v15 = vld [vmem:[#allocation40_spill] sm:$0xff]  ;;  %v5499_v58 = vmax.f32 %v5243_v25, 0.0 }
 0x490   :  { %12776 = vst [vmem:[#allocation34_spill] sm:$0xff] %v10398_v45  ;;  %v3975_v33 = vpop.f32.mrf.mxu0  ;;  %v10405_v18 = vpop.f32.mrf.mxu1 }
 0x491   :  { %v5506_v35 = vmax.f32 %v5250_v27, 0.0  ;;  %v5251_v50 = vadd.f32 %v10357_v59, %v4953_v14  ;;  %v4960_v61 = vmul.f32 %v10325_v2, %v3974_v53  ;;  %v3976_v22 = vadd.f32 %v3975_v33, %v10037_v23 }
 0x492   :  { %v3977_v42 = vpop.f32.mrf.mxu0  ;;  %v10410_v8 = vpop.f32.mrf.mxu1  ;;  %4581 = vmatmul.mubr.bf16.gmra.mxu1 %v12778_v15 }
 0x493   :  { %v10413_v48 = vpack.c.bf16 %v5506_v35, %v5498_v24  ;;  %v3978_v39 = vadd.f32 %v3977_v42, %v10046_v43  ;;  %4590 = vmatprep.mubr.bf16.mxu1 %v12780_v47  ;;  %v5258_v27 = vadd.f32 %v10331_v13, %v4960_v61  ;;  %v4961_v14 = vmul.f32 %v10343_v44, %v3976_v22  ;;  %v12781_v24 = vld [vmem:[#allocation76_spill] sm:$0xff] }
 0x494   :  { %v3979_v29 = vpop.f32.mrf.mxu0  ;;  %v10419_v53 = vpop.f32.mrf.mxu1  ;;  %v5507_v23 = vmax.f32 %v5251_v50, 0.0 }
 0x495   :  { %12779 = vst [vmem:[#allocation35_spill] sm:$0xff] %v10413_v48  ;;  %v4968_v33 = vmul.f32 %v10325_v2, %v3978_v39  ;;  %v3980_v41 = vadd.f32 %v3979_v29, %v10054_v51  ;;  %v5514_v50 = vmax.f32 %v5258_v27, 0.0  ;;  %v5259_v42 = vadd.f32 %v10357_v59, %v4961_v14  ;;  %v12785_v14 = vld [vmem:[#allocation45_spill] sm:$0xff] }
 0x496   :  { %v3983_v15 = vpop.f32.mrf.mxu0  ;;  %4448 = vmatmul.mubr.bf16.gmra.mxu0 %v12781_v24  ;;  %v10424_v35 = vpop.f32.mrf.mxu1  ;;  %v10426_v43 = vpack.c.bf16 %v5507_v23, %v5499_v58  ;;  %v12794_v24 = vld [vmem:[#allocation91_spill] sm:$0xff] }
 0x497   :  { %v5266_v25 = vadd.f32 %v10331_v13, %v4968_v33  ;;  %v4969_v61 = vmul.f32 %v10343_v44, %v3980_v41  ;;  %v3984_v22 = vadd.f32 %v3983_v15, %v10060_v28  ;;  %4457 = vmatprep.mubr.bf16.mxu0 %v12668_v36  ;;  %v12783_v41 = vld [vmem:[#allocation44_spill] sm:$0xff]  ;;  %v5515_v15 = vmax.f32 %v5259_v42, 0.0 }
 0x498   :  { %12782 = vst [vmem:[#allocation36_spill] sm:$0xff] %v10426_v43  ;;  %v3985_v39 = vpop.f32.mrf.mxu0  ;;  %v10433_v51 = vpop.f32.mrf.mxu1 }
 0x499   :  { %v5522_v29 = vmax.f32 %v5266_v25, 0.0  ;;  %v5267_v47 = vadd.f32 %v10357_v59, %v4969_v61  ;;  %v4976_v58 = vmul.f32 %v10325_v2, %v3984_v22  ;;  %v3986_v23 = vadd.f32 %v3985_v39, %v10071_v21 }
 0x49a   :  { %v3987_v33 = vpop.f32.mrf.mxu0  ;;  %v10438_v48 = vpop.f32.mrf.mxu1  ;;  %4591 = vmatmul.mubr.bf16.gmra.mxu1 %v12783_v41 }
 0x49b   :  { %v10441_v28 = vpack.c.bf16 %v5522_v29, %v5514_v50  ;;  %v3988_v27 = vadd.f32 %v3987_v33, %v10078_v4  ;;  %4600 = vmatprep.mubr.bf16.mxu1 %v12785_v14  ;;  %v5274_v25 = vadd.f32 %v10331_v13, %v4976_v58  ;;  %v4977_v61 = vmul.f32 %v10343_v44, %v3986_v23  ;;  %v12786_v50 = vld [vmem:[#allocation78_spill] sm:$0xff]  ;;  %v12788_v33 = vld [vmem:[#allocation79_spill] sm:$0xff] }
 0x49c   :  { %v3989_v43 = vpop.f32.mrf.mxu0  ;;  %v10447_v22 = vpop.f32.mrf.mxu1  ;;  %v5523_v21 = vmax.f32 %v5267_v47, 0.0 }
 0x49d   :  { %12784 = vst [vmem:[#allocation37_spill] sm:$0xff] %v10441_v28  ;;  %v4984_v39 = vmul.f32 %v10325_v2, %v3988_v27  ;;  %v3990_v45 = vadd.f32 %v3989_v43, %v10087_v56  ;;  %v5530_v47 = vmax.f32 %v5274_v25, 0.0  ;;  %v5275_v27 = vadd.f32 %v10357_v59, %v4977_v61  ;;  %v12792_v25 = vld [vmem:[#allocation89_spill] sm:$0xff]  ;;  %v12793_v61 = vld [vmem:[#allocation22_spill] sm:$0xff] }
 0x49e   :  { %v3993_v41 = vpop.f32.mrf.mxu0  ;;  %4458 = vmatmul.mubr.bf16.gmra.mxu0 %v12786_v50  ;;  %v10452_v29 = vpop.f32.mrf.mxu1  ;;  %v10454_v4 = vpack.c.bf16 %v5523_v21, %v5515_v15  ;;  %v12789_v21 = vld [vmem:[#allocation88_spill] sm:$0xff] }
 0x49f   :  { %v5282_v42 = vadd.f32 %v10331_v13, %v4984_v39  ;;  %v4985_v58 = vmul.f32 %v10343_v44, %v3990_v45  ;;  %v3994_v23 = vadd.f32 %v3993_v41, %v10092_v7  ;;  %4467 = vmatprep.mubr.bf16.mxu0 %v12788_v33  ;;  %v12790_v45 = vld [vmem:[#allocation29_spill] sm:$0xff]  ;;  %v5531_v33 = vmax.f32 %v5275_v27, 0.0 }
 0x4a0   :  { %12787 = vst [vmem:[#allocation40_spill] sm:$0xff] %v10454_v4  ;;  %v3995_v14 = vpop.f32.mrf.mxu0  ;;  %v10461_v56 = vpop.f32.mrf.mxu1 }
 0x4a1   :  { %v5538_v43 = vmax.f32 %v5282_v42, 0.0  ;;  %v5283_v28 = vadd.f32 %v10357_v59, %v4985_v58  ;;  %v4992_v15 = vmul.f32 %v10325_v2, %v3994_v23  ;;  %v3996_v4 = vadd.f32 %v3995_v14, %v12789_v21 }
 0x4a2   :  { %v3997_v39 = vpop.f32.mrf.mxu0  ;;  %v10466_v50 = vpop.f32.mrf.mxu1  ;;  %4601 = vmatmul.mubr.bf16.gmra.mxu1 %v12790_v45 }
 0x4a3   :  { %v10469_v7 = vpack.c.bf16 %v5538_v43, %v5530_v47  ;;  %v3998_v41 = vadd.f32 %v3997_v39, %v12792_v25  ;;  %4610 = vmatprep.mubr.bf16.mxu1 %v12793_v61  ;;  %v5290_v42 = vadd.f32 %v10331_v13, %v4992_v15  ;;  %v4993_v58 = vmul.f32 %v10343_v44, %v3996_v4  ;;  %v12795_v47 = vld [vmem:[#allocation80_spill] sm:$0xff]  ;;  %v12798_v61 = vld [vmem:[#allocation81_spill] sm:$0xff] }
 0x4a4   :  { %v3999_v36 = vpop.f32.mrf.mxu0  ;;  %v10475_v23 = vpop.f32.mrf.mxu1  ;;  %v5539_v14 = vmax.f32 %v5283_v28, 0.0  ;;  %v12797_v4 = vld [vmem:[#allocation92_spill] sm:$0xff] }
 0x4a5   :  { %12791 = vst [vmem:[#allocation41_spill] sm:$0xff] %v10469_v7  ;;  %v5000_v21 = vmul.f32 %v10325_v2, %v3998_v41  ;;  %v4000_v20 = vadd.f32 %v3999_v36, %v12794_v24  ;;  %v5546_v28 = vmax.f32 %v5290_v42, 0.0  ;;  %v5291_v41 = vadd.f32 %v10357_v59, %v4993_v58  ;;  %v12802_v42 = vld [vmem:[#allocation96_spill] sm:$0xff]  ;;  %v12803_v58 = vld [vmem:[#allocation49_spill] sm:$0xff] }
 0x4a6   :  { %v4003_v45 = vpop.f32.mrf.mxu0  ;;  %4468 = vmatmul.mubr.bf16.gmra.mxu0 %v12795_v47  ;;  %v10480_v43 = vpop.f32.mrf.mxu1  ;;  %v10482_v39 = vpack.c.bf16 %v5539_v14, %v5531_v33  ;;  %v12799_v14 = vld [vmem:[#allocation95_spill] sm:$0xff] }
 0x4a7   :  { %v5298_v27 = vadd.f32 %v10331_v13, %v5000_v21  ;;  %v5001_v15 = vmul.f32 %v10343_v44, %v4000_v20  ;;  %v4004_v25 = vadd.f32 %v4003_v45, %v12797_v4  ;;  %4477 = vmatprep.mubr.bf16.mxu0 %v12798_v61  ;;  %v12800_v20 = vld [vmem:[#allocation21_spill] sm:$0xff]  ;;  %v5547_v61 = vmax.f32 %v5291_v41, 0.0 }
 0x4a8   :  { %12796 = vst [vmem:[#allocation44_spill] sm:$0xff] %v10482_v39  ;;  %v4005_v7 = vpop.f32.mrf.mxu0  ;;  %v10489_v36 = vpop.f32.mrf.mxu1 }
 0x4a9   :  { %v5554_v24 = vmax.f32 %v5298_v27, 0.0  ;;  %v5299_v47 = vadd.f32 %v10357_v59, %v5001_v15  ;;  %v5008_v33 = vmul.f32 %v10325_v2, %v4004_v25  ;;  %v4006_v39 = vadd.f32 %v4005_v7, %v12799_v14 }
 0x4aa   :  { %v4007_v21 = vpop.f32.mrf.mxu0  ;;  %v10494_v55 = vpop.f32.mrf.mxu1  ;;  %4611 = vmatmul.mubr.bf16.gmra.mxu1 %v12800_v20 }
 0x4ab   :  { %v10497_v45 = vpack.c.bf16 %v5554_v24, %v5546_v28  ;;  %v4008_v4 = vadd.f32 %v4007_v21, %v12802_v42  ;;  %4620 = vmatprep.mubr.bf16.mxu1 %v12803_v58  ;;  %v5306_v27 = vadd.f32 %v10331_v13, %v5008_v33  ;;  %v5009_v15 = vmul.f32 %v10343_v44, %v4006_v39  ;;  %v12805_v28 = vld [vmem:[#allocation82_spill] sm:$0xff]  ;;  %v12807_v42 = vld [vmem:[#allocation83_spill] sm:$0xff] }
 0x4ac   :  { %v4009_v17 = vpop.f32.mrf.mxu0  ;;  %v10503_v25 = vpop.f32.mrf.mxu1  ;;  %v5555_v7 = vmax.f32 %v5299_v47, 0.0 }
 0x4ad   :  { %12801 = vst [vmem:[#allocation45_spill] sm:$0xff] %v10497_v45  ;;  %v5016_v14 = vmul.f32 %v10325_v2, %v4008_v4  ;;  %v4010_v34 = vadd.f32 %v4009_v17, %v12804_v37  ;;  %v5562_v47 = vmax.f32 %v5306_v27, 0.0  ;;  %v5307_v4 = vadd.f32 %v10357_v59, %v5009_v15  ;;  %v12810_v15 = vld [vmem:[#allocation38_spill] sm:$0xff] }
 0x4ae   :  { %v4013_v20 = vpop.f32.mrf.mxu0  ;;  %4478 = vmatmul.mubr.bf16.gmra.mxu0 %v12805_v28  ;;  %v10508_v24 = vpop.f32.mrf.mxu1  ;;  %v10510_v21 = vpack.c.bf16 %v5555_v7, %v5547_v61 }
 0x4af   :  { %v5314_v41 = vadd.f32 %v10331_v13, %v5016_v14  ;;  %v5017_v33 = vmul.f32 %v10343_v44, %v4010_v34  ;;  %v4014_v39 = vadd.f32 %v4013_v20, %v10148_v19  ;;  %4487 = vmatprep.mubr.bf16.mxu0 %v12807_v42  ;;  %v12808_v34 = vld [vmem:[#allocation51_spill] sm:$0xff]  ;;  %v5563_v20 = vmax.f32 %v5307_v4, 0.0 }
 0x4b0   :  { %12806 = vst [vmem:[#allocation88_spill] sm:$0xff] %v10510_v21  ;;  %v4015_v58 = vpop.f32.mrf.mxu0  ;;  %v10517_v37 = vpop.f32.mrf.mxu1 }
 0x4b1   :  { %v5570_v17 = vmax.f32 %v5314_v41, 0.0  ;;  %v5315_v45 = vadd.f32 %v10357_v59, %v5017_v33  ;;  %v5024_v61 = vmul.f32 %v10325_v2, %v4014_v39  ;;  %v4016_v7 = vadd.f32 %v4015_v58, %v10157_v62 }
 0x4b2   :  { %v4017_v14 = vpop.f32.mrf.mxu0  ;;  %v10522_v21 = vpop.f32.mrf.mxu1  ;;  %4621 = vmatmul.mubr.bf16.gmra.mxu1 %v12808_v34 }
 0x4b3   :  { %v10525_v19 = vpack.c.bf16 %v5570_v17, %v5562_v47  ;;  %v4018_v27 = vadd.f32 %v4017_v14, %v10164_v60  ;;  %4630 = vmatprep.mubr.bf16.mxu1 %v12810_v15  ;;  %v5322_v41 = vadd.f32 %v10331_v13, %v5024_v61  ;;  %v5025_v33 = vmul.f32 %v10343_v44, %v4016_v7  ;;  %v12811_v47 = vld [vmem:[#allocation84_spill] sm:$0xff]  ;;  %v12814_v14 = vld [vmem:[#allocation42_spill] sm:$0xff] }
 0x4b4   :  { %v4019_v42 = vpop.f32.mrf.mxu0  ;;  %v10531_v39 = vpop.f32.mrf.mxu1  ;;  %v5571_v62 = vmax.f32 %v5315_v45, 0.0 }
 0x4b5   :  { %12809 = vst [vmem:[#allocation29_spill] sm:$0xff] %v10525_v19  ;;  %v5032_v58 = vmul.f32 %v10325_v2, %v4018_v27  ;;  %v4020_v28 = vadd.f32 %v4019_v42, %v10173_v38  ;;  %v5578_v45 = vmax.f32 %v5322_v41, 0.0  ;;  %v5323_v27 = vadd.f32 %v10357_v59, %v5025_v33  ;;  %v5875_v42 = vld [vmem:[#allocation10 + $0x58] sm:$0xff]  ;;  %v12819_v33 = vld [vmem:[#allocation100_spill] sm:$0xff] }
 0x4b6   :  { %v4023_v34 = vpop.f32.mrf.mxu0  ;;  %4488 = vmatmul.mubr.bf16.gmra.mxu0 %v12811_v47  ;;  %v10536_v17 = vpop.f32.mrf.mxu1  ;;  %v10538_v60 = vpack.c.bf16 %v5571_v62, %v5563_v20 }
 0x4b7   :  { %12812 = vst [vmem:[#allocation89_spill] sm:$0xff] %v10536_v17  ;;  %v5330_v4 = vadd.f32 %v10331_v13, %v5032_v58  ;;  %v5033_v61 = vmul.f32 %v10343_v44, %v4020_v28  ;;  %v4024_v7 = vadd.f32 %v4023_v34, %v10181_v32  ;;  %4723 = vmatprep.mubr.bf16.mxu0 %v12814_v14  ;;  %v12817_v32 = vld [vmem:[#allocation39_spill] sm:$0xff] }
 0x4b8   :  { %12813 = vst [vmem:[#allocation22_spill] sm:$0xff] %v10538_v60  ;;  %v4025_v15 = vpop.f32.mrf.mxu0  ;;  %v10545_v38 = vpop.f32.mrf.mxu1  ;;  %v12820_v60 = vld [vmem:[#allocation53_spill] sm:$0xff] }
 0x4b9   :  { %12815 = vst [vmem:[#allocation91_spill] sm:$0xff] %v10545_v38  ;;  %v5586_v19 = vmax.f32 %v5330_v4, 0.0  ;;  %v5331_v47 = vadd.f32 %v10357_v59, %v5033_v61  ;;  %v5040_v20 = vmul.f32 %v10325_v2, %v4024_v7  ;;  %v4026_v62 = vadd.f32 %v4025_v15, %v10191_v49 }
 0x4ba   :  { %v4027_v58 = vpop.f32.mrf.mxu0  ;;  %v10550_v28 = vpop.f32.mrf.mxu1  ;;  %4631 = vmatmul.mubr.bf16.gmra.mxu1 %v12817_v32  ;;  %v5919_v4 = vunpack.c.h.s8.bf16 %v5875_v42  ;;  %v5579_v38 = vmax.f32 %v5323_v27, 0.0  ;;  %v5926_v49 = vunpack.c.l.s8.bf16 %v10280_v3 }
 0x4bb   :  { %12816 = vst [vmem:[#allocation92_spill] sm:$0xff] %v10550_v28  ;;  %v10553_v34 = vpack.c.bf16 %v5586_v19, %v5578_v45  ;;  %v5041_v41 = vmul.f32 %v10343_v44, %v4026_v62  ;;  %v4028_v14 = vadd.f32 %v4027_v58, %v12819_v33  ;;  %4640 = vmatprep.mubr.bf16.mxu1 %v12820_v60  ;;  %v5587_v15 = vmax.f32 %v5331_v47, 0.0  ;;  %v12822_v19 = vld [vmem:[#allocation115_spill] sm:$0xff]  ;;  %v12826_v47 = vld [vmem:[#allocation116_spill] sm:$0xff] }
 0x4bc   :  { %v5338_v61 = vadd.f32 %v10331_v13, %v5040_v20  ;;  %v4029_v7 = vpop.f32.mrf.mxu0  ;;  %v10559_v17 = vpop.f32.mrf.mxu1  ;;  %v12823_v60 = vld [vmem:[#allocation43_spill] sm:$0xff] }
 0x4bd   :  { %12818 = vst [vmem:[#allocation95_spill] sm:$0xff] %v10553_v34  ;;  %12821 = vst [vmem:[#allocation21_spill] sm:$0xff] %v10559_v17  ;;  %v5048_v32 = vmul.f32 %v10325_v2, %v4028_v14  ;;  %v4030_v45 = vadd.f32 %v4029_v7, %v12822_v19  ;;  %v10564_v34 = vld [vmem:[#allocation10 + $0x70] sm:$0xff]  ;;  %v5339_v62 = vadd.f32 %v10357_v59, %v5041_v41  ;;  %v12827_v14 = vld [vmem:[#allocation47_spill] sm:$0xff]  ;;  %v5918_v41 = vunpack.c.l.s8.bf16 %v5875_v42 }
 0x4be   :  { %v4033_v58 = vpop.f32.mrf.mxu0  ;;  %4724 = vmatmul.mubr.bf16.vlgmr.msra.gmra.mxu0 %v12823_v60  ;;  %v10568_v27 = vpop.f32.mrf.mxu1  ;;  %v10570_v20 = vpack.c.bf16 %v5587_v15, %v5579_v38  ;;  %v5594_v7 = vmax.f32 %v5338_v61, 0.0  ;;  %v5925_v60 = vunpack.c.h.s8.bf16 %v10564_v34 }
 0x4bf   :  { %12824 = vst [vmem:[#allocation96_spill] sm:$0xff] %v10568_v27  ;;  %v5346_v33 = vadd.f32 %v10331_v13, %v5048_v32  ;;  %v5049_v3 = vmul.f32 %v10343_v44, %v4030_v45  ;;  %v4034_v17 = vadd.f32 %v4033_v58, %v12826_v47  ;;  %6866 = vmatpush3.bf16.msra.mxu0 %v5919_v4  ;;  %v5874_v27 = vld [vmem:[#allocation10 + $0x50] sm:$0xff]  ;;  %v12828_v47 = vld [vmem:[#allocation52_spill] sm:$0xff]  ;;  %v5595_v61 = vmax.f32 %v5339_v62, 0.0 }
 0x4c0   :  { %12825 = vst [vmem:[#allocation49_spill] sm:$0xff] %v10570_v20  ;;  %4733 = vmatprep.mubr.bf16.mxu0 %v12827_v14  ;;  %v4035_v19 = vpop.f32.mrf.mxu0  ;;  %v10576_v28 = vpop.f32.mrf.mxu1  ;;  %6867 = vmatprep.subr.bf16.mxu0 %v5926_v49  ;;  %v12830_v49 = vld [vmem:[#allocation46_spill] sm:$0xff]  ;;  %v5917_v20 = vunpack.c.h.s8.bf16 %v5874_v27 }
 0x4c1   :  { %v5602_v38 = vmax.f32 %v5346_v33, 0.0  ;;  %v5347_v15 = vadd.f32 %v10357_v59, %v5049_v3  ;;  %v5056_v32 = vmul.f32 %v10325_v2, %v4034_v17  ;;  %v4036_v45 = vadd.f32 %v4035_v19, %v10234_v31  ;;  %v10589_v33 = vld [vmem:[#allocation10 + $0xb8] sm:$0xff] }
 0x4c2   :  { %v4037_v58 = vpop.f32.mrf.mxu0  ;;  %v10582_v4 = vpop.f32.mrf.mxu1  ;;  %4641 = vmatmul.mubr.bf16.gmra.mxu1 %v12828_v47  ;;  %v5943_v47 = vunpack.c.h.s8.bf16 %v10589_v33 }
 0x4c3   :  { %v10585_v14 = vpack.c.bf16 %v5602_v38, %v5594_v7  ;;  %v4038_v42 = vadd.f32 %v4037_v58, %v10245_v30  ;;  %4650 = vmatprep.mubr.bf16.mxu1 %v12830_v49  ;;  %v5354_v3 = vadd.f32 %v10331_v13, %v5056_v32  ;;  %v5057_v17 = vmul.f32 %v10343_v44, %v4036_v45  ;;  %v5877_v58 = vld [vmem:[#allocation10 + $0x68] sm:$0xff] }
 0x4c4   :  { %v4039_v31 = vpop.f32.mrf.mxu0  ;;  %v10593_v19 = vpop.f32.mrf.mxu1  ;;  %6868 = vmatpush3.bf16.msra.mxu0 %v5918_v41  ;;  %v5603_v62 = vmax.f32 %v5347_v15, 0.0  ;;  %v5924_v38 = vunpack.c.l.s8.bf16 %v10564_v34  ;;  %6977 = vmatprep.subr.bf16.mxu1 %v5943_v47  ;;  %v5873_v47 = vld [vmem:[#allocation10 + $0x48] sm:$0xff] }
 0x4c5   :  { %12829 = vst [vmem:[#allocation18_spill] sm:$0xff] %v10585_v14  ;;  %12831 = vst [vmem:[#allocation51_spill] sm:$0xff] %v10593_v19  ;;  %v5064_v7 = vmul.f32 %v10325_v2, %v4038_v42  ;;  %v4040_v30 = vadd.f32 %v4039_v31, %v10256_v52  ;;  %6869 = vmatprep.subr.bf16.mxu0 %v5925_v60  ;;  %v12832_v14 = vld [vmem:[#allocation48_spill] sm:$0xff]  ;;  %v12835_v19 = vld [vmem:[#allocation54_spill] sm:$0xff]  ;;  %v5610_v52 = vmax.f32 %v5354_v3, 0.0 }
 0x4c6   :  { %v4043_v49 = vpop.f32.mrf.mxu0  ;;  %4734 = vmatmul.mubr.bf16.gmra.mxu0 %v12832_v14  ;;  %v10600_v32 = vpop.f32.mrf.mxu1  ;;  %v10602_v45 = vpack.c.bf16 %v5603_v62, %v5595_v61  ;;  %v5355_v34 = vadd.f32 %v10357_v59, %v5057_v17  ;;  %v5916_v14 = vunpack.c.l.s8.bf16 %v5874_v27  ;;  %v12836_v3 = vld [vmem:[#allocation25_spill] sm:$0xff]  ;;  %v12838_v27 = vld [vmem:[#allocation26_spill] sm:$0xff] }
 0x4c7   :  { %12833 = vst [vmem:[#allocation38_spill] sm:$0xff] %v10600_v32  ;;  %v5362_v41 = vadd.f32 %v10331_v13, %v5064_v7  ;;  %v5065_v15 = vmul.f32 %v10343_v44, %v4040_v30  ;;  %v4044_v42 = vadd.f32 %v4043_v49, %v10265_v63  ;;  %4743 = vmatprep.mubr.bf16.mxu0 %v12835_v19  ;;  %v5923_v32 = vunpack.c.h.s8.bf16 %v5877_v58 }
 0x4c8   :  { %12834 = vst [vmem:[#allocation42_spill] sm:$0xff] %v10602_v45  ;;  %v4045_v60 = vpop.f32.mrf.mxu0  ;;  %v10609_v31 = vpop.f32.mrf.mxu1  ;;  %6870 = vmatpush3.bf16.msra.mxu0 %v5917_v20  ;;  %v5915_v49 = vunpack.c.h.s8.bf16 %v5873_v47 }
 0x4c9   :  { %v5618_v61 = vmax.f32 %v5362_v41, 0.0  ;;  %v5363_v62 = vadd.f32 %v10357_v59, %v5065_v15  ;;  %v5072_v7 = vmul.f32 %v10325_v2, %v4044_v42  ;;  %v4046_v30 = vadd.f32 %v4045_v60, %v10278_v40  ;;  %6871 = vmatprep.subr.bf16.mxu0 %v5924_v38 }
 0x4ca   :  { %v4047_v63 = vpop.f32.mrf.mxu0  ;;  %v10614_v19 = vpop.f32.mrf.mxu1  ;;  %4651 = vmatmul.mubr.bf16.gmra.mxu1 %v12836_v3  ;;  %v5611_v41 = vmax.f32 %v5355_v34, 0.0  ;;  %v12839_v3 = vld [vmem:[#allocation56_spill] sm:$0xff] }
 0x4cb   :  { %v10617_v17 = vpack.c.bf16 %v5618_v61, %v5610_v52  ;;  %v4048_v20 = vadd.f32 %v4047_v63, %v10289_v9  ;;  %4660 = vmatprep.mubr.bf16.mxu1 %v12838_v27  ;;  %v5370_v15 = vadd.f32 %v10331_v13, %v5072_v7  ;;  %v5073_v42 = vmul.f32 %v10343_v44, %v4046_v30  ;;  %v5876_v9 = vld [vmem:[#allocation10 + $0x60] sm:$0xff] }
 0x4cc   :  { %v4049_v45 = vpop.f32.mrf.mxu0  ;;  %v10623_v40 = vpop.f32.mrf.mxu1  ;;  %6872 = vmatpush3.bf16.msra.mxu0 %v5916_v14  ;;  %v5619_v38 = vmax.f32 %v5363_v62, 0.0  ;;  %v5922_v61 = vunpack.c.l.s8.bf16 %v5877_v58  ;;  %v12841_v62 = vld [vmem:[#allocation57_spill] sm:$0xff] }
 0x4cd   :  { %12837 = vst [vmem:[#allocation39_spill] sm:$0xff] %v10617_v17  ;;  %v5080_v60 = vmul.f32 %v10325_v2, %v4048_v20  ;;  %v4050_v52 = vadd.f32 %v4049_v45, %v10300_v57  ;;  %6873 = vmatprep.subr.bf16.mxu0 %v5923_v32  ;;  %v5626_v20 = vmax.f32 %v5370_v15, 0.0  ;;  %v5371_v57 = vadd.f32 %v10357_v59, %v5073_v42  ;;  %v5872_v17 = vld [vmem:[#allocation10 + $0x40] sm:$0xff]  ;;  %v12842_v15 = vld [vmem:[#allocation55_spill] sm:$0xff] }
 0x4ce   :  { %v4053_v63 = vpop.f32.mrf.mxu0  ;;  %4744 = vmatmul.mubr.bf16.gmra.mxu0 %v12839_v3  ;;  %v10628_v34 = vpop.f32.mrf.mxu1  ;;  %v10630_v7 = vpack.c.bf16 %v5619_v38, %v5611_v41  ;;  %v5914_v45 = vunpack.c.l.s8.bf16 %v5873_v47  ;;  %v5921_v3 = vunpack.c.h.s8.bf16 %v5876_v9  ;;  %v12844_v47 = vld [vmem:[#allocation23_spill] sm:$0xff] }
 0x4cf   :  { %v5378_v30 = vadd.f32 %v10331_v13, %v5080_v60  ;;  %v5081_v27 = vmul.f32 %v10343_v44, %v4050_v52  ;;  %v4054_v14 = vadd.f32 %v4053_v63, %v10307_v1  ;;  %4753 = vmatprep.mubr.bf16.mxu0 %v12841_v62  ;;  %v5913_v62 = vunpack.c.h.s8.bf16 %v5872_v17 }
 0x4d0   :  { %12840 = vst [vmem:[#allocation100_spill] sm:$0xff] %v10630_v7  ;;  %v4055_v58 = vpop.f32.mrf.mxu0  ;;  %v10637_v32 = vpop.f32.mrf.mxu1  ;;  %6874 = vmatpush3.bf16.msra.mxu0 %v5915_v49 }
 0x4d1   :  { %v5634_v41 = vmax.f32 %v5378_v30, 0.0  ;;  %v5379_v38 = vadd.f32 %v10357_v59, %v5081_v27  ;;  %v5088_v60 = vmul.f32 %v10325_v2, %v4054_v14  ;;  %v4056_v52 = vadd.f32 %v4055_v58, %v10317_v11  ;;  %6875 = vmatprep.subr.bf16.mxu0 %v5922_v61 }
 0x4d2   :  { %v4057_v1 = vpop.f32.mrf.mxu0  ;;  %v10642_v63 = vpop.f32.mrf.mxu1  ;;  %4661 = vmatmul.mubr.bf16.gmra.mxu1 %v12842_v15  ;;  %v5627_v30 = vmax.f32 %v5371_v57, 0.0  ;;  %v12845_v15 = vld [vmem:[#allocation58_spill] sm:$0xff] }
 0x4d3   :  { %v10645_v42 = vpack.c.bf16 %v5634_v41, %v5626_v20  ;;  %v4058_v49 = vadd.f32 %v4057_v1, %v10334_v6  ;;  %4670 = vmatprep.mubr.bf16.mxu1 %v12844_v47  ;;  %v5386_v27 = vadd.f32 %v10331_v13, %v5088_v60  ;;  %v5089_v14 = vmul.f32 %v10343_v44, %v4056_v52  ;;  %v10655_v6 = vld [vmem:[#allocation10 + $0xf8] sm:$0xff] }
 0x4d4   :  { %v4059_v7 = vpop.f32.mrf.mxu0  ;;  %v10651_v11 = vpop.f32.mrf.mxu1  ;;  %6876 = vmatpush3.bf16.msra.mxu0 %v5914_v45  ;;  %v5635_v61 = vmax.f32 %v5379_v38, 0.0  ;;  %v5920_v41 = vunpack.c.l.s8.bf16 %v5876_v9  ;;  %v5912_v47 = vunpack.c.l.s8.bf16 %v5872_v17  ;;  %v12850_v17 = vld [vmem:[#allocation60_spill] sm:$0xff] }
 0x4d5   :  { %12843 = vst [vmem:[#allocation53_spill] sm:$0xff] %v10645_v42  ;;  %v5096_v58 = vmul.f32 %v10325_v2, %v4058_v49  ;;  %v4060_v20 = vadd.f32 %v4059_v7, %v10346_v54  ;;  %6877 = vmatprep.subr.bf16.mxu0 %v5921_v3  ;;  %v12847_v49 = vld [vmem:[#allocation61_spill] sm:$0xff]  ;;  %v5642_v54 = vmax.f32 %v5386_v27, 0.0  ;;  %v5387_v9 = vadd.f32 %v10357_v59, %v5089_v14  ;;  %v12848_v27 = vld [vmem:[#allocation59_spill] sm:$0xff] }
 0x4d6   :  { %v4063_v1 = vpop.f32.mrf.mxu0  ;;  %4754 = vmatmul.mubr.bf16.gmra.mxu0 %v12845_v15  ;;  %v10658_v57 = vpop.f32.mrf.mxu1  ;;  %v10660_v60 = vpack.c.bf16 %v5635_v61, %v5627_v30  ;;  %v5959_v15 = vunpack.c.h.s8.bf16 %v10655_v6 }
 0x4d7   :  { %v5394_v52 = vadd.f32 %v10331_v13, %v5096_v58  ;;  %v5097_v45 = vmul.f32 %v10343_v44, %v4060_v20  ;;  %v4064_v38 = vadd.f32 %v4063_v1, %v10351_v12  ;;  %4763 = vmatprep.mubr.bf16.mxu0 %v12847_v49  ;;  %v5643_v49 = vmax.f32 %v5387_v9, 0.0 }
 0x4d8   :  { %12846 = vst [vmem:[#allocation115_spill] sm:$0xff] %v10660_v60  ;;  %v4065_v7 = vpop.f32.mrf.mxu0  ;;  %v10667_v3 = vpop.f32.mrf.mxu1  ;;  %6878 = vmatpush3.bf16.msra.mxu0 %v5913_v62 }
 0x4d9   :  { %v5650_v30 = vmax.f32 %v5394_v52, 0.0  ;;  %v5395_v61 = vadd.f32 %v10357_v59, %v5097_v45  ;;  %v5104_v58 = vmul.f32 %v10325_v2, %v4064_v38  ;;  %v4066_v20 = vadd.f32 %v4065_v7, %v10363_v46  ;;  %6879 = vmatprep.subr.bf16.mxu0 %v5920_v41 }
 0x4da   :  { %v4067_v12 = vpop.f32.mrf.mxu0  ;;  %v10673_v1 = vpop.f32.mrf.mxu1  ;;  %4671 = vmatmul.mubr.bf16.gmra.mxu1 %v12848_v27 }
 0x4db   :  { %v10676_v14 = vpack.c.bf16 %v5650_v30, %v5642_v54  ;;  %v4068_v62 = vadd.f32 %v4067_v12, %v10368_v16  ;;  %4680 = vmatprep.mubr.bf16.mxu1 %v12850_v17  ;;  %v5402_v52 = vadd.f32 %v10331_v13, %v5104_v58  ;;  %v5105_v45 = vmul.f32 %v10343_v44, %v4066_v20  ;;  %v12851_v30 = vld [vmem:[#allocation62_spill] sm:$0xff] }
 0x4dc   :  { %v4069_v38 = vpop.f32.mrf.mxu0  ;;  %v10682_v42 = vpop.f32.mrf.mxu1  ;;  %6880 = vmatpush3.bf16.msra.mxu0 %v5912_v47  ;;  %v5651_v46 = vmax.f32 %v5395_v61, 0.0  ;;  %v12853_v47 = vld [vmem:[#allocation64_spill] sm:$0xff] }
 0x4dd   :  { %12849 = vst [vmem:[#allocation43_spill] sm:$0xff] %v10676_v14  ;;  %v5112_v41 = vmul.f32 %v10325_v2, %v4068_v62  ;;  %v4070_v7 = vadd.f32 %v4069_v38, %v10377_v5  ;;  %7089 = vmatprep.subr.bf16.mxu0 %v5959_v15  ;;  %v5658_v61 = vmax.f32 %v5402_v52, 0.0  ;;  %v5403_v27 = vadd.f32 %v10357_v59, %v5105_v45  ;;  %v12856_v45 = vld [vmem:[#allocation102_spill] sm:$0xff] }
 0x4de   :  { %v4073_v54 = vpop.f32.mrf.mxu0  ;;  %4764 = vmatmul.mubr.bf16.gmra.mxu0 %v12851_v30  ;;  %v10687_v16 = vpop.f32.mrf.mxu1  ;;  %v10689_v9 = vpack.c.bf16 %v5651_v46, %v5643_v49 }
 0x4df   :  { %v5410_v58 = vadd.f32 %v10331_v13, %v5112_v41  ;;  %v5113_v20 = vmul.f32 %v10343_v44, %v4070_v7  ;;  %v4074_v12 = vadd.f32 %v4073_v54, %v10382_v0  ;;  %4773 = vmatprep.mubr.bf16.mxu0 %v12853_v47  ;;  %v12854_v7 = vld [vmem:[#allocation63_spill] sm:$0xff]  ;;  %v5659_v54 = vmax.f32 %v5403_v27, 0.0 }
 0x4e0   :  { %12852 = vst [vmem:[#allocation116_spill] sm:$0xff] %v10689_v9  ;;  %v4075_v5 = vpop.f32.mrf.mxu0  ;;  %v10696_v15 = vpop.f32.mrf.mxu1 }
 0x4e1   :  { %v5666_v62 = vmax.f32 %v5410_v58, 0.0  ;;  %v5411_v17 = vadd.f32 %v10357_v59, %v5113_v20  ;;  %v5120_v49 = vmul.f32 %v10325_v2, %v4074_v12  ;;  %v4076_v38 = vadd.f32 %v4075_v5, %v10391_v26 }
 0x4e2   :  { %v4077_v46 = vpop.f32.mrf.mxu0  ;;  %v10701_v41 = vpop.f32.mrf.mxu1  ;;  %4681 = vmatmul.mubr.bf16.gmra.mxu1 %v12854_v7  ;;  %v5883_v7 = vld [vmem:[#allocation10 + $0x98] sm:$0xff] }
 0x4e3   :  { %v10704_v0 = vpack.c.bf16 %v5666_v62, %v5658_v61  ;;  %v4078_v52 = vadd.f32 %v4077_v46, %v10396_v10  ;;  %5992 = vmatprep.mubr.bf16.mxu1 %v12856_v45  ;;  %v5418_v30 = vadd.f32 %v10331_v13, %v5120_v49  ;;  %v5121_v58 = vmul.f32 %v10343_v44, %v4076_v38  ;;  %v12857_v62 = vld [vmem:[#allocation65_spill] sm:$0xff]  ;;  %v12859_v45 = vld [vmem:[#allocation50_spill] sm:$0xff] }
 0x4e4   :  { %v4079_v20 = vpop.f32.mrf.mxu0  ;;  %v10710_v12 = vpop.f32.mrf.mxu1  ;;  %v5667_v26 = vmax.f32 %v5411_v17, 0.0 }
 0x4e5   :  { %12855 = vst [vmem:[#allocation47_spill] sm:$0xff] %v10704_v0  ;;  %v5128_v47 = vmul.f32 %v10325_v2, %v4078_v52  ;;  %v4080_v5 = vadd.f32 %v4079_v20, %v10405_v18  ;;  %v5674_v17 = vmax.f32 %v5418_v30, 0.0  ;;  %v5419_v52 = vadd.f32 %v10357_v59, %v5121_v58  ;;  %v5886_v30 = vld [vmem:[#allocation10 + $0xb0] sm:$0xff] }
 0x4e6   :  { %v4083_v61 = vpop.f32.mrf.mxu0  ;;  %4774 = vmatmul.mubr.bf16.gmra.mxu0 %v12857_v62  ;;  %v10715_v10 = vpop.f32.mrf.mxu1  ;;  %v10717_v46 = vpack.c.bf16 %v5667_v26, %v5659_v54  ;;  %v5935_v0 = vunpack.c.h.s8.bf16 %v5883_v7  ;;  %v5942_v62 = vunpack.c.l.s8.bf16 %v10589_v33  ;;  %v5934_v33 = vunpack.c.l.s8.bf16 %v5883_v7 }
 0x4e7   :  { %v5426_v27 = vadd.f32 %v10331_v13, %v5128_v47  ;;  %v5129_v49 = vmul.f32 %v10343_v44, %v4080_v5  ;;  %v4084_v38 = vadd.f32 %v4083_v61, %v10410_v8  ;;  %4783 = vmatprep.mubr.bf16.mxu0 %v12859_v45  ;;  %v12860_v61 = vld [vmem:[#allocation101_spill] sm:$0xff] }
 0x4e8   :  { %12858 = vst [vmem:[#allocation52_spill] sm:$0xff] %v10717_v46  ;;  %v4085_v18 = vpop.f32.mrf.mxu0  ;;  %v10724_v20 = vpop.f32.mrf.mxu1  ;;  %v12862_v46 = vld [vmem:[#allocation105_spill] sm:$0xff] }
 0x4e9   :  { %v5682_v14 = vmax.f32 %v5426_v27, 0.0  ;;  %v5427_v54 = vadd.f32 %v10357_v59, %v5129_v49  ;;  %v5136_v26 = vmul.f32 %v10325_v2, %v4084_v38  ;;  %v4086_v47 = vadd.f32 %v4085_v18, %v10419_v53 }
 0x4ea   :  { %v4087_v5 = vpop.f32.mrf.mxu0  ;;  %v10730_v8 = vpop.f32.mrf.mxu1  ;;  %5993 = vmatmul.mubr.bf16.vlgmr.msra.gmra.mxu1 %v12860_v61  ;;  %v5675_v27 = vmax.f32 %v5419_v52, 0.0 }
 0x4eb   :  { %v10733_v58 = vpack.c.bf16 %v5682_v14, %v5674_v17  ;;  %v4088_v45 = vadd.f32 %v4087_v5, %v10424_v35  ;;  %6000 = vmatprep.mubr.bf16.mxu1 %v12862_v46  ;;  %v5434_v49 = vadd.f32 %v10331_v13, %v5136_v26  ;;  %v5137_v38 = vmul.f32 %v10343_v44, %v4086_v47  ;;  %v5882_v35 = vld [vmem:[#allocation10 + $0x90] sm:$0xff] }
 0x4ec   :  { %v4089_v9 = vpop.f32.mrf.mxu0  ;;  %v10739_v53 = vpop.f32.mrf.mxu1  ;;  %6978 = vmatpush3.bf16.msra.mxu1 %v5935_v0  ;;  %v5683_v18 = vmax.f32 %v5427_v54, 0.0  ;;  %v5941_v17 = vunpack.c.h.s8.bf16 %v5886_v30  ;;  %v12863_v46 = vld [vmem:[#allocation66_spill] sm:$0xff]  ;;  %v12865_v54 = vld [vmem:[#allocation67_spill] sm:$0xff] }
 0x4ed   :  { %12861 = vst [vmem:[#allocation46_spill] sm:$0xff] %v10733_v58  ;;  %v5144_v61 = vmul.f32 %v10325_v2, %v4088_v45  ;;  %v4090_v14 = vadd.f32 %v4089_v9, %v10433_v51  ;;  %6979 = vmatprep.subr.bf16.mxu1 %v5942_v62  ;;  %v5690_v45 = vmax.f32 %v5434_v49, 0.0  ;;  %v5435_v51 = vadd.f32 %v10357_v59, %v5137_v38  ;;  %v12866_v49 = vld [vmem:[#allocation103_spill] sm:$0xff]  ;;  %v5885_v38 = vld [vmem:[#allocation10 + $0xa8] sm:$0xff] }
 0x4ee   :  { %v4093_v5 = vpop.f32.mrf.mxu0  ;;  %4784 = vmatmul.mubr.bf16.gmra.mxu0 %v12863_v46  ;;  %v10744_v7 = vpop.f32.mrf.mxu1  ;;  %v10746_v52 = vpack.c.bf16 %v5683_v18, %v5675_v27  ;;  %v5933_v46 = vunpack.c.h.s8.bf16 %v5882_v35  ;;  %v5940_v58 = vunpack.c.l.s8.bf16 %v5886_v30  ;;  %v5932_v30 = vunpack.c.l.s8.bf16 %v5882_v35 }
 0x4ef   :  { %v5442_v26 = vadd.f32 %v10331_v13, %v5144_v61  ;;  %v5145_v47 = vmul.f32 %v10343_v44, %v4090_v14  ;;  %v4094_v0 = vadd.f32 %v4093_v5, %v10438_v48  ;;  %4793 = vmatprep.mubr.bf16.mxu0 %v12865_v54  ;;  %v12868_v54 = vld [vmem:[#allocation107_spill] sm:$0xff] }
 0x4f0   :  { %12864 = vst [vmem:[#allocation48_spill] sm:$0xff] %v10746_v52  ;;  %v4095_v9 = vpop.f32.mrf.mxu0  ;;  %v10753_v62 = vpop.f32.mrf.mxu1  ;;  %6980 = vmatpush3.bf16.msra.mxu1 %v5934_v33 }
 0x4f1   :  { %v5698_v60 = vmax.f32 %v5442_v26, 0.0  ;;  %v5443_v27 = vadd.f32 %v10357_v59, %v5145_v47  ;;  %v5152_v18 = vmul.f32 %v10325_v2, %v4094_v0  ;;  %v4096_v61 = vadd.f32 %v4095_v9, %v10447_v22  ;;  %6981 = vmatprep.subr.bf16.mxu1 %v5941_v17 }
 0x4f2   :  { %v4097_v48 = vpop.f32.mrf.mxu0  ;;  %v10758_v14 = vpop.f32.mrf.mxu1  ;;  %6001 = vmatmul.mubr.bf16.gmra.mxu1 %v12866_v49  ;;  %v5691_v26 = vmax.f32 %v5435_v51, 0.0 }
 0x4f3   :  { %v10761_v5 = vpack.c.bf16 %v5698_v60, %v5690_v45  ;;  %v4098_v33 = vadd.f32 %v4097_v48, %v10452_v29  ;;  %6008 = vmatprep.mubr.bf16.mxu1 %v12868_v54  ;;  %v5450_v47 = vadd.f32 %v10331_v13, %v5152_v18  ;;  %v5153_v0 = vmul.f32 %v10343_v44, %v4096_v61  ;;  %v5881_v29 = vld [vmem:[#allocation10 + $0x88] sm:$0xff]  ;;  %v12869_v54 = vld [vmem:[#allocation68_spill] sm:$0xff] }
 0x4f4   :  { %v4099_v22 = vpop.f32.mrf.mxu0  ;;  %v10767_v17 = vpop.f32.mrf.mxu1  ;;  %6982 = vmatpush3.bf16.msra.mxu1 %v5933_v46  ;;  %v5699_v9 = vmax.f32 %v5443_v27, 0.0  ;;  %v5939_v45 = vunpack.c.h.s8.bf16 %v5885_v38  ;;  %v12871_v27 = vld [vmem:[#allocation69_spill] sm:$0xff] }
 0x4f5   :  { %12867 = vst [vmem:[#allocation54_spill] sm:$0xff] %v10761_v5  ;;  %v5160_v49 = vmul.f32 %v10325_v2, %v4098_v33  ;;  %v4100_v60 = vadd.f32 %v4099_v22, %v10461_v56  ;;  %6983 = vmatprep.subr.bf16.mxu1 %v5940_v58  ;;  %v12872_v33 = vld [vmem:[#allocation16_spill] sm:$0xff]  ;;  %v5706_v58 = vmax.f32 %v5450_v47, 0.0  ;;  %v5451_v22 = vadd.f32 %v10357_v59, %v5153_v0  ;;  %v12875_v47 = vld [vmem:[#allocation106_spill] sm:$0xff] }
 0x4f6   :  { %v4103_v48 = vpop.f32.mrf.mxu0  ;;  %4794 = vmatmul.mubr.bf16.gmra.mxu0 %v12869_v54  ;;  %v10772_v35 = vpop.f32.mrf.mxu1  ;;  %v10774_v51 = vpack.c.bf16 %v5699_v9, %v5691_v26  ;;  %v4904_v56 = vsub.s32 4, %v12872_v33  ;;  %v5931_v54 = vunpack.c.h.s8.bf16 %v5881_v29  ;;  %v5938_v26 = vunpack.c.l.s8.bf16 %v5885_v38  ;;  %v5884_v0 = vld [vmem:[#allocation10 + $0xa0] sm:$0xff] }
 0x4f7   :  { %v5458_v18 = vadd.f32 %v10331_v13, %v5160_v49  ;;  %v5161_v61 = vmul.f32 %v10343_v44, %v4100_v60  ;;  %v4104_v46 = vadd.f32 %v4103_v48, %v10466_v50  ;;  %4803 = vmatprep.mubr.bf16.mxu0 %v12871_v27  ;;  %v4908_v38 = vsub.s32 5, %v12872_v33 }
 0x4f8   :  { %12870 = vst [vmem:[#allocation25_spill] sm:$0xff] %v10774_v51  ;;  %v4105_v5 = vpop.f32.mrf.mxu0  ;;  %v10782_v52 = vpop.f32.mrf.mxu1  ;;  %6984 = vmatpush3.bf16.msra.mxu1 %v5932_v30 }
 0x4f9   :  { %12873 = vst [vmem:[#allocation26_spill] sm:$0xff] %v10782_v52  ;;  %v5714_v9 = vmax.f32 %v5458_v18, 0.0  ;;  %v5459_v49 = vadd.f32 %v10357_v59, %v5161_v61  ;;  %v5168_v60 = vmul.f32 %v10325_v2, %v4104_v46  ;;  %v4106_v50 = vadd.f32 %v4105_v5, %v10475_v23  ;;  %6985 = vmatprep.subr.bf16.mxu1 %v5939_v45  ;;  %v12877_v52 = vld [vmem:[#allocation109_spill] sm:$0xff] }
 0x4fa   :  { %v4107_v48 = vpop.f32.mrf.mxu0  ;;  %v10787_v27 = vpop.f32.mrf.mxu1  ;;  %6009 = vmatmul.mubr.bf16.gmra.mxu1 %v12875_v47  ;;  %v5930_v18 = vunpack.c.l.s8.bf16 %v5881_v29  ;;  %v5707_v61 = vmax.f32 %v5451_v22, 0.0  ;;  %v5937_v29 = vunpack.c.h.s8.bf16 %v5884_v0  ;;  %v5880_v22 = vld [vmem:[#allocation10 + $0x80] sm:$0xff] }
 0x4fb   :  { %12874 = vst [vmem:[#allocation56_spill] sm:$0xff] %v10787_v27  ;;  %v10790_v51 = vpack.c.bf16 %v5714_v9, %v5706_v58  ;;  %v4108_v30 = vadd.f32 %v4107_v48, %v10480_v43  ;;  %6016 = vmatprep.mubr.bf16.mxu1 %v12877_v52  ;;  %v5466_v46 = vadd.f32 %v10331_v13, %v5168_v60  ;;  %v5715_v47 = vmax.f32 %v5459_v49, 0.0  ;;  %v7221_v43 = vld [vmem:[%s12193_s10] sm:$0xff]  ;;  %v12879_v49 = vld [vmem:[#allocation70_spill] sm:$0xff] }
 0x4fc   :  { %v5169_v23 = vmul.f32 %v10343_v44, %v4106_v50  ;;  %v4109_v5 = vpop.f32.mrf.mxu0  ;;  %v10797_v45 = vpop.f32.mrf.mxu1  ;;  %6986 = vmatpush3.bf16.msra.mxu1 %v5931_v54  ;;  %v10804_v52 = vrot.slane %v7221_v43, %v4904_v56  ;;  %v7222_v50 = vld [vmem:[%s12194_s11] sm:$0xff] }
 0x4fd   :  { %12876 = vst [vmem:[#allocation57_spill] sm:$0xff] %v10790_v51  ;;  %12878 = vst [vmem:[#allocation55_spill] sm:$0xff] %v10797_v45  ;;  %v5176_v58 = vmul.f32 %v10325_v2, %v4108_v30  ;;  %v4110_v9 = vadd.f32 %v4109_v5, %v10489_v36  ;;  %6987 = vmatprep.subr.bf16.mxu1 %v5938_v26  ;;  %v10809_v54 = vrot.slane %v7222_v50, %v4904_v56  ;;  %v12881_v5 = vld [vmem:[#allocation71_spill] sm:$0xff] }
 0x4fe   :  { %v4339_v60 = vpop.f32.mrf.mxu0  ;;  %4804 = vmatmul.mubr.bf16.gmra.mxu0 %v12879_v49  ;;  %v10812_v2 = vpop.f32.mrf.mxu1  ;;  %v10814_v36 = vpack.c.bf16 %v5715_v47, %v5707_v61  ;;  %v10820_v51 = vrot.slane %v7221_v43, %v4908_v38  ;;  %v5722_v33 = vmax.f32 %v5466_v46, 0.0  ;;  %v5467_v56 = vadd.f32 %v10357_v59, %v5169_v23  ;;  %v12882_v46 = vld [vmem:[#allocation108_spill] sm:$0xff] }
 0x4ff   :  { %v5474_v48 = vadd.f32 %v10331_v13, %v5176_v58  ;;  %v5177_v30 = vmul.f32 %v10343_v44, %v4110_v9  ;;  %v4340_v26 = vadd.f32 %v4339_v60, %v10494_v55  ;;  %4813 = vmatprep.mubr.bf16.mxu0 %v12881_v5  ;;  %v5929_v49 = vunpack.c.h.s8.bf16 %v5880_v22 }
 0x500   :  { %12880 = vst [vmem:[#allocation23_spill] sm:$0xff] %v10814_v36  ;;  %v4341_v45 = vpop.f32.mrf.mxu0  ;;  %v10823_v27 = vpop.f32.mrf.mxu1  ;;  %6988 = vmatpush3.bf16.msra.mxu1 %v5930_v18  ;;  %v5936_v61 = vunpack.c.l.s8.bf16 %v5884_v0  ;;  %v10833_v43 = vrot.slane %v7222_v50, %v4908_v38  ;;  %v12884_v0 = vld [vmem:[#allocation111_spill] sm:$0xff]  ;;  %v5928_v60 = vunpack.c.l.s8.bf16 %v5880_v22 }
 0x501   :  { %v5730_v47 = vmax.f32 %v5474_v48, 0.0  ;;  %v5475_v13 = vadd.f32 %v10357_v59, %v5177_v30  ;;  %v4930_v44 = vmul.f32 %v10804_v52, %v4340_v26  ;;  %v4342_v55 = vadd.f32 %v4341_v45, %v10503_v25  ;;  %6989 = vmatprep.subr.bf16.mxu1 %v5937_v29 }
 0x502   :  { %v4343_v58 = vpop.f32.mrf.mxu0  ;;  %v10828_v9 = vpop.f32.mrf.mxu1  ;;  %6017 = vmatmul.mubr.bf16.gmra.mxu1 %v12882_v46  ;;  %v5723_v59 = vmax.f32 %v5467_v56, 0.0 }
 0x503   :  { %v10831_v23 = vpack.c.bf16 %v5730_v47, %v5722_v33  ;;  %v4344_v18 = vadd.f32 %v4343_v58, %v10508_v24  ;;  %6024 = vmatprep.mubr.bf16.mxu1 %v12884_v0  ;;  %v5228_v48 = vadd.f32 %v10809_v54, %v4930_v44  ;;  %v4931_v25 = vmul.f32 %v10820_v51, %v4342_v55  ;;  %v12885_v24 = vld [vmem:[#allocation72_spill] sm:$0xff] }
 0x504   :  { %v4345_v45 = vpop.f32.mrf.mxu0  ;;  %v10839_v29 = vpop.f32.mrf.mxu1  ;;  %6990 = vmatpush3.bf16.msra.mxu1 %v5929_v49  ;;  %v5731_v30 = vmax.f32 %v5475_v13, 0.0  ;;  %v12887_v49 = vld [vmem:[#allocation73_spill] sm:$0xff] }
 0x505   :  { %12883 = vst [vmem:[#allocation58_spill] sm:$0xff] %v10831_v23  ;;  %v4938_v33 = vmul.f32 %v10804_v52, %v4344_v18  ;;  %v4346_v38 = vadd.f32 %v4345_v45, %v10517_v37  ;;  %6991 = vmatprep.subr.bf16.mxu1 %v5936_v61  ;;  %v5484_v13 = vmax.f32 %v5228_v48, 0.0  ;;  %v5229_v44 = vadd.f32 %v10833_v43, %v4931_v25  ;;  %v12889_v48 = vld [vmem:[#allocation89_spill] sm:$0xff] }
 0x506   :  { %v4349_v50 = vpop.f32.mrf.mxu0  ;;  %4814 = vmatmul.mubr.bf16.gmra.mxu0 %v12885_v24  ;;  %v10844_v26 = vpop.f32.mrf.mxu1  ;;  %v10846_v22 = vpack.c.bf16 %v5731_v30, %v5723_v59  ;;  %v12890_v30 = vld [vmem:[#allocation113_spill] sm:$0xff] }
 0x507   :  { %v5236_v5 = vadd.f32 %v10809_v54, %v4938_v33  ;;  %v4939_v56 = vmul.f32 %v10820_v51, %v4346_v38  ;;  %v4350_v47 = vadd.f32 %v4349_v50, %v10522_v21  ;;  %4823 = vmatprep.mubr.bf16.mxu0 %v12887_v49  ;;  %v12888_v21 = vld [vmem:[#allocation110_spill] sm:$0xff]  ;;  %v5485_v33 = vmax.f32 %v5229_v44, 0.0 }
 0x508   :  { %12886 = vst [vmem:[#allocation61_spill] sm:$0xff] %v10846_v22  ;;  %v4351_v37 = vpop.f32.mrf.mxu0  ;;  %v10853_v61 = vpop.f32.mrf.mxu1  ;;  %6992 = vmatpush3.bf16.msra.mxu1 %v5928_v60 }
 0x509   :  { %v5492_v55 = vmax.f32 %v5236_v5, 0.0  ;;  %v5237_v58 = vadd.f32 %v10833_v43, %v4939_v56  ;;  %v4946_v46 = vmul.f32 %v10804_v52, %v4350_v47  ;;  %v4352_v18 = vadd.f32 %v4351_v37, %v10531_v39  ;;  %v12891_v56 = vld [vmem:[#allocation91_spill] sm:$0xff] }
 0x50a   :  { %v4353_v0 = vpop.f32.mrf.mxu0  ;;  %v10858_v59 = vpop.f32.mrf.mxu1  ;;  %6025 = vmatmul.mubr.bf16.gmra.mxu1 %v12888_v21  ;;  %v12894_v21 = vld [vmem:[#allocation75_spill] sm:$0xff] }
 0x50b   :  { %v10861_v45 = vpack.c.bf16 %v5492_v55, %v5484_v13  ;;  %v4354_v25 = vadd.f32 %v4353_v0, %v12889_v48  ;;  %6032 = vmatprep.mubr.bf16.mxu1 %v12890_v30  ;;  %v5244_v60 = vadd.f32 %v10809_v54, %v4946_v46  ;;  %v4947_v38 = vmul.f32 %v10820_v51, %v4352_v18  ;;  %v12892_v13 = vld [vmem:[#allocation74_spill] sm:$0xff]  ;;  %v12893_v18 = vld [vmem:[#allocation92_spill] sm:$0xff] }
 0x50c   :  { %v4355_v50 = vpop.f32.mrf.mxu0  ;;  %v10867_v24 = vpop.f32.mrf.mxu1  ;;  %v5493_v39 = vmax.f32 %v5237_v58, 0.0 }
 0x50d   :  { %v4954_v5 = vmul.f32 %v10804_v52, %v4354_v25  ;;  %v4356_v47 = vadd.f32 %v4355_v50, %v12891_v56  ;;  %v5500_v58 = vmax.f32 %v5244_v60, 0.0  ;;  %v5245_v48 = vadd.f32 %v10833_v43, %v4947_v38  ;;  %v12898_v60 = vld [vmem:[#allocation96_spill] sm:$0xff]  ;;  %v12899_v38 = vld [vmem:[#allocation85_spill] sm:$0xff] }
 0x50e   :  { %v4359_v49 = vpop.f32.mrf.mxu0  ;;  %4824 = vmatmul.mubr.bf16.gmra.mxu0 %v12892_v13  ;;  %v10872_v37 = vpop.f32.mrf.mxu1  ;;  %v10874_v55 = vpack.c.bf16 %v5493_v39, %v5485_v33  ;;  %v12895_v39 = vld [vmem:[#allocation21_spill] sm:$0xff] }
 0x50f   :  { %v5252_v44 = vadd.f32 %v10809_v54, %v4954_v5  ;;  %v4955_v46 = vmul.f32 %v10820_v51, %v4356_v47  ;;  %v4360_v0 = vadd.f32 %v4359_v49, %v12893_v18  ;;  %4833 = vmatprep.mubr.bf16.mxu0 %v12894_v21  ;;  %v12896_v47 = vld [vmem:[#allocation112_spill] sm:$0xff]  ;;  %v5501_v21 = vmax.f32 %v5245_v48, 0.0 }
 0x510   :  { %v4361_v25 = vpop.f32.mrf.mxu0  ;;  %v10881_v30 = vpop.f32.mrf.mxu1 }
 0x511   :  { %v5508_v50 = vmax.f32 %v5252_v44, 0.0  ;;  %v5253_v56 = vadd.f32 %v10833_v43, %v4955_v46  ;;  %v4962_v33 = vmul.f32 %v10804_v52, %v4360_v0  ;;  %v4362_v13 = vadd.f32 %v4361_v25, %v12895_v39 }
 0x512   :  { %v4363_v5 = vpop.f32.mrf.mxu0  ;;  %v10886_v23 = vpop.f32.mrf.mxu1  ;;  %6033 = vmatmul.mubr.bf16.gmra.mxu1 %v12896_v47 }
 0x513   :  { %v10889_v49 = vpack.c.bf16 %v5508_v50, %v5500_v58  ;;  %v4364_v18 = vadd.f32 %v4363_v5, %v12898_v60  ;;  %6040 = vmatprep.mubr.bf16.mxu1 %v12899_v38  ;;  %v5260_v44 = vadd.f32 %v10809_v54, %v4962_v33  ;;  %v4963_v46 = vmul.f32 %v10820_v51, %v4362_v13  ;;  %v12900_v58 = vld [vmem:[#allocation76_spill] sm:$0xff]  ;;  %v12902_v60 = vld [vmem:[#allocation77_spill] sm:$0xff] }
 0x514   :  { %v4365_v22 = vpop.f32.mrf.mxu0  ;;  %v10895_v0 = vpop.f32.mrf.mxu1  ;;  %v5509_v25 = vmax.f32 %v5253_v56, 0.0 }
 0x515   :  { %12897 = vst [vmem:[#allocation59_spill] sm:$0xff] %v10889_v49  ;;  %v4970_v39 = vmul.f32 %v10804_v52, %v4364_v18  ;;  %v4366_v36 = vadd.f32 %v4365_v22, %v10576_v28  ;;  %v5516_v56 = vmax.f32 %v5260_v44, 0.0  ;;  %v5261_v18 = vadd.f32 %v10833_v43, %v4963_v46  ;;  %v12908_v44 = vld [vmem:[#allocation38_spill] sm:$0xff] }
 0x516   :  { %v4369_v47 = vpop.f32.mrf.mxu0  ;;  %4834 = vmatmul.mubr.bf16.gmra.mxu0 %v12900_v58  ;;  %v10900_v50 = vpop.f32.mrf.mxu1  ;;  %v10902_v5 = vpack.c.bf16 %v5509_v25, %v5501_v21  ;;  %v12904_v25 = vld [vmem:[#allocation51_spill] sm:$0xff]  ;;  %v12909_v46 = vld [vmem:[#allocation86_spill] sm:$0xff] }
 0x517   :  { %v5268_v48 = vadd.f32 %v10809_v54, %v4970_v39  ;;  %v4971_v33 = vmul.f32 %v10820_v51, %v4366_v36  ;;  %v4370_v13 = vadd.f32 %v4369_v47, %v10582_v4  ;;  %4843 = vmatprep.mubr.bf16.mxu0 %v12902_v60  ;;  %v12906_v36 = vld [vmem:[#allocation114_spill] sm:$0xff]  ;;  %v5517_v60 = vmax.f32 %v5261_v18, 0.0 }
 0x518   :  { %12901 = vst [vmem:[#allocation60_spill] sm:$0xff] %v10902_v5  ;;  %v4371_v38 = vpop.f32.mrf.mxu0  ;;  %v10909_v28 = vpop.f32.mrf.mxu1 }
 0x519   :  { %12903 = vst [vmem:[#allocation62_spill] sm:$0xff] %v10909_v28  ;;  %v5524_v22 = vmax.f32 %v5268_v48, 0.0  ;;  %v5269_v58 = vadd.f32 %v10833_v43, %v4971_v33  ;;  %v4978_v21 = vmul.f32 %v10804_v52, %v4370_v13  ;;  %v4372_v49 = vadd.f32 %v4371_v38, %v12904_v25 }
 0x51a   :  { %v4373_v39 = vpop.f32.mrf.mxu0  ;;  %v10914_v5 = vpop.f32.mrf.mxu1  ;;  %6041 = vmatmul.mubr.bf16.gmra.mxu1 %v12906_v36 }
 0x51b   :  { %12905 = vst [vmem:[#allocation64_spill] sm:$0xff] %v10914_v5  ;;  %v10917_v4 = vpack.c.bf16 %v5524_v22, %v5516_v56  ;;  %v4374_v47 = vadd.f32 %v4373_v39, %v12908_v44  ;;  %6048 = vmatprep.mubr.bf16.mxu1 %v12909_v46  ;;  %v5276_v48 = vadd.f32 %v10809_v54, %v4978_v21  ;;  %v5525_v38 = vmax.f32 %v5269_v58, 0.0  ;;  %v12910_v56 = vld [vmem:[#allocation78_spill] sm:$0xff]  ;;  %v12911_v44 = vld [vmem:[#allocation79_spill] sm:$0xff] }
 0x51c   :  { %v4979_v33 = vmul.f32 %v10820_v51, %v4372_v49  ;;  %v4375_v28 = vpop.f32.mrf.mxu0  ;;  %v10923_v13 = vpop.f32.mrf.mxu1 }
 0x51d   :  { %12907 = vst [vmem:[#allocation63_spill] sm:$0xff] %v10917_v4  ;;  %v4986_v25 = vmul.f32 %v10804_v52, %v4374_v47  ;;  %v4376_v5 = vadd.f32 %v4375_v28, %v10609_v31  ;;  %v10930_v39 = vpack.c.bf16 %v5525_v38, %v5517_v60  ;;  %v5532_v58 = vmax.f32 %v5276_v48, 0.0 }
 0x51e   :  { %v4379_v36 = vpop.f32.mrf.mxu0  ;;  %4844 = vmatmul.mubr.bf16.gmra.mxu0 %v12910_v56  ;;  %v10928_v22 = vpop.f32.mrf.mxu1  ;;  %v5277_v47 = vadd.f32 %v10833_v43, %v4979_v33  ;;  %v12915_v33 = vld [vmem:[#allocation90_spill] sm:$0xff] }
 0x51f   :  { %v5284_v18 = vadd.f32 %v10809_v54, %v4986_v25  ;;  %v4987_v21 = vmul.f32 %v10820_v51, %v4376_v5  ;;  %v4380_v49 = vadd.f32 %v4379_v36, %v10614_v19  ;;  %4853 = vmatprep.mubr.bf16.mxu0 %v12911_v44  ;;  %v12913_v5 = vld [vmem:[#allocation93_spill] sm:$0xff] }
 0x520   :  { %v4381_v46 = vpop.f32.mrf.mxu0  ;;  %v10937_v31 = vpop.f32.mrf.mxu1  ;;  %v5533_v36 = vmax.f32 %v5277_v47, 0.0 }
 0x521   :  { %v5540_v28 = vmax.f32 %v5284_v18, 0.0  ;;  %v5285_v56 = vadd.f32 %v10833_v43, %v4987_v21  ;;  %v4994_v60 = vmul.f32 %v10804_v52, %v4380_v49  ;;  %v4382_v38 = vadd.f32 %v4381_v46, %v10623_v40 }
 0x522   :  { %v4383_v25 = vpop.f32.mrf.mxu0  ;;  %v10942_v4 = vpop.f32.mrf.mxu1  ;;  %6049 = vmatmul.mubr.bf16.gmra.mxu1 %v12913_v5 }
 0x523   :  { %12912 = vst [vmem:[#allocation102_spill] sm:$0xff] %v10942_v4  ;;  %v10945_v19 = vpack.c.bf16 %v5540_v28, %v5532_v58  ;;  %v4384_v48 = vadd.f32 %v4383_v25, %v10628_v34  ;;  %6056 = vmatprep.mubr.bf16.mxu1 %v12915_v33  ;;  %v5292_v18 = vadd.f32 %v10809_v54, %v4994_v60  ;;  %v5541_v40 = vmax.f32 %v5285_v56, 0.0  ;;  %v12916_v58 = vld [vmem:[#allocation80_spill] sm:$0xff]  ;;  %v12917_v25 = vld [vmem:[#allocation81_spill] sm:$0xff] }
 0x524   :  { %v4995_v21 = vmul.f32 %v10820_v51, %v4382_v38  ;;  %v4385_v44 = vpop.f32.mrf.mxu0  ;;  %v10951_v49 = vpop.f32.mrf.mxu1 }
 0x525   :  { %12914 = vst [vmem:[#allocation65_spill] sm:$0xff] %v10945_v19  ;;  %v5002_v46 = vmul.f32 %v10804_v52, %v4384_v48  ;;  %v4386_v4 = vadd.f32 %v4385_v44, %v10637_v32  ;;  %v10958_v34 = vpack.c.bf16 %v5541_v40, %v5533_v36  ;;  %v5548_v56 = vmax.f32 %v5292_v18, 0.0 }
 0x526   :  { %v4389_v5 = vpop.f32.mrf.mxu0  ;;  %4854 = vmatmul.mubr.bf16.gmra.mxu0 %v12916_v58  ;;  %v10956_v28 = vpop.f32.mrf.mxu1  ;;  %v5293_v48 = vadd.f32 %v10833_v43, %v4995_v21  ;;  %v12920_v21 = vld [vmem:[#allocation97_spill] sm:$0xff] }
 0x527   :  { %v5300_v47 = vadd.f32 %v10809_v54, %v5002_v46  ;;  %v5003_v60 = vmul.f32 %v10820_v51, %v4386_v4  ;;  %v4390_v38 = vadd.f32 %v4389_v5, %v10642_v63  ;;  %4863 = vmatprep.mubr.bf16.mxu0 %v12917_v25  ;;  %v12919_v4 = vld [vmem:[#allocation87_spill] sm:$0xff] }
 0x528   :  { %v4391_v33 = vpop.f32.mrf.mxu0  ;;  %v10965_v32 = vpop.f32.mrf.mxu1  ;;  %v5549_v5 = vmax.f32 %v5293_v48, 0.0 }
 0x529   :  { %v5556_v44 = vmax.f32 %v5300_v47, 0.0  ;;  %v5301_v58 = vadd.f32 %v10833_v43, %v5003_v60  ;;  %v5010_v36 = vmul.f32 %v10804_v52, %v4390_v38  ;;  %v4392_v40 = vadd.f32 %v4391_v33, %v10651_v11 }
 0x52a   :  { %v4393_v46 = vpop.f32.mrf.mxu0  ;;  %v10970_v19 = vpop.f32.mrf.mxu1  ;;  %6057 = vmatmul.mubr.bf16.gmra.mxu1 %v12919_v4 }
 0x52b   :  { %12918 = vst [vmem:[#allocation50_spill] sm:$0xff] %v10970_v19  ;;  %v10973_v63 = vpack.c.bf16 %v5556_v44, %v5548_v56  ;;  %v4394_v18 = vadd.f32 %v4393_v46, %v10658_v57  ;;  %6064 = vmatprep.mubr.bf16.mxu1 %v12920_v21  ;;  %v5308_v47 = vadd.f32 %v10809_v54, %v5010_v36  ;;  %v5557_v11 = vmax.f32 %v5301_v58, 0.0  ;;  %v12921_v56 = vld [vmem:[#allocation82_spill] sm:$0xff]  ;;  %v12923_v46 = vld [vmem:[#allocation83_spill] sm:$0xff] }
 0x52c   :  { %v5011_v60 = vmul.f32 %v10820_v51, %v4392_v40  ;;  %v4395_v25 = vpop.f32.mrf.mxu0  ;;  %v10979_v38 = vpop.f32.mrf.mxu1 }
 0x52d   :  { %v5018_v33 = vmul.f32 %v10804_v52, %v4394_v18  ;;  %v4396_v19 = vadd.f32 %v4395_v25, %v10667_v3  ;;  %v10986_v57 = vpack.c.bf16 %v5557_v11, %v5549_v5  ;;  %v5564_v58 = vmax.f32 %v5308_v47, 0.0 }
 0x52e   :  { %v4399_v4 = vpop.f32.mrf.mxu0  ;;  %4864 = vmatmul.mubr.bf16.gmra.mxu0 %v12921_v56  ;;  %v10984_v44 = vpop.f32.mrf.mxu1  ;;  %v5309_v18 = vadd.f32 %v10833_v43, %v5011_v60  ;;  %v12926_v60 = vld [vmem:[#allocation98_spill] sm:$0xff] }
 0x52f   :  { %12922 = vst [vmem:[#allocation101_spill] sm:$0xff] %v10984_v44  ;;  %v5316_v48 = vadd.f32 %v10809_v54, %v5018_v33  ;;  %v5019_v36 = vmul.f32 %v10820_v51, %v4396_v19  ;;  %v4400_v40 = vadd.f32 %v4399_v4, %v10673_v1  ;;  %4873 = vmatprep.mubr.bf16.mxu0 %v12923_v46  ;;  %v12925_v19 = vld [vmem:[#allocation94_spill] sm:$0xff] }
 0x530   :  { %v4401_v21 = vpop.f32.mrf.mxu0  ;;  %v10993_v3 = vpop.f32.mrf.mxu1  ;;  %v5565_v4 = vmax.f32 %v5309_v18, 0.0 }
 0x531   :  { %v5572_v25 = vmax.f32 %v5316_v48, 0.0  ;;  %v5317_v56 = vadd.f32 %v10833_v43, %v5019_v36  ;;  %v5026_v5 = vmul.f32 %v10804_v52, %v4400_v40  ;;  %v4402_v11 = vadd.f32 %v4401_v21, %v10682_v42 }
 0x532   :  { %v4403_v33 = vpop.f32.mrf.mxu0  ;;  %v10998_v44 = vpop.f32.mrf.mxu1  ;;  %6065 = vmatmul.mubr.bf16.gmra.mxu1 %v12925_v19 }
 0x533   :  { %12924 = vst [vmem:[#allocation105_spill] sm:$0xff] %v10998_v44  ;;  %v11001_v1 = vpack.c.bf16 %v5572_v25, %v5564_v58  ;;  %v4404_v47 = vadd.f32 %v4403_v33, %v10687_v16  ;;  %6072 = vmatprep.mubr.bf16.mxu1 %v12926_v60  ;;  %v5324_v48 = vadd.f32 %v10809_v54, %v5026_v5  ;;  %v5573_v42 = vmax.f32 %v5317_v56, 0.0  ;;  %v12928_v58 = vld [vmem:[#allocation84_spill] sm:$0xff]  ;;  %v12930_v33 = vld [vmem:[#allocation34_spill] sm:$0xff] }
 0x534   :  { %v5027_v36 = vmul.f32 %v10820_v51, %v4402_v11  ;;  %v4405_v46 = vpop.f32.mrf.mxu0  ;;  %v11007_v40 = vpop.f32.mrf.mxu1 }
 0x535   :  { %12927 = vst [vmem:[#allocation66_spill] sm:$0xff] %v11007_v40  ;;  %v5034_v21 = vmul.f32 %v10804_v52, %v4404_v47  ;;  %v4406_v44 = vadd.f32 %v4405_v46, %v10696_v15  ;;  %v11014_v16 = vpack.c.bf16 %v5573_v42, %v5565_v4  ;;  %v5580_v56 = vmax.f32 %v5324_v48, 0.0  ;;  %v5891_v46 = vld [vmem:[#allocation10 + $0xd8] sm:$0xff] }
 0x536   :  { %v4409_v19 = vpop.f32.mrf.mxu0  ;;  %4874 = vmatmul.mubr.bf16.gmra.mxu0 %v12928_v58  ;;  %v11012_v25 = vpop.f32.mrf.mxu1  ;;  %v5325_v47 = vadd.f32 %v10833_v43, %v5027_v36  ;;  %v12934_v36 = vld [vmem:[#allocation24_spill] sm:$0xff] }
 0x537   :  { %12929 = vst [vmem:[#allocation67_spill] sm:$0xff] %v11012_v25  ;;  %v5332_v18 = vadd.f32 %v10809_v54, %v5034_v21  ;;  %v5035_v5 = vmul.f32 %v10820_v51, %v4406_v44  ;;  %v4410_v11 = vadd.f32 %v4409_v19, %v10701_v41  ;;  %6153 = vmatprep.mubr.bf16.mxu0 %v12930_v33  ;;  %v12933_v41 = vld [vmem:[#allocation17_spill] sm:$0xff]  ;;  %v5951_v33 = vunpack.c.h.s8.bf16 %v5891_v46 }
 0x538   :  { %v4411_v60 = vpop.f32.mrf.mxu0  ;;  %v11021_v15 = vpop.f32.mrf.mxu1  ;;  %v5581_v40 = vmax.f32 %v5325_v47, 0.0 }
 0x539   :  { %12931 = vst [vmem:[#allocation103_spill] sm:$0xff] %v11021_v15  ;;  %v5588_v58 = vmax.f32 %v5332_v18, 0.0  ;;  %v5333_v25 = vadd.f32 %v10833_v43, %v5035_v5  ;;  %v5042_v4 = vmul.f32 %v10804_v52, %v4410_v11  ;;  %v4412_v42 = vadd.f32 %v4411_v60, %v10710_v12 }
 0x53a   :  { %v4413_v21 = vpop.f32.mrf.mxu0  ;;  %v11026_v44 = vpop.f32.mrf.mxu1  ;;  %6073 = vmatmul.mubr.bf16.gmra.mxu1 %v12933_v41  ;;  %v5958_v18 = vunpack.c.l.s8.bf16 %v10655_v6 }
 0x53b   :  { %12932 = vst [vmem:[#allocation107_spill] sm:$0xff] %v11026_v44  ;;  %v11029_v19 = vpack.c.bf16 %v5588_v58, %v5580_v56  ;;  %v4414_v48 = vadd.f32 %v4413_v21, %v10715_v10  ;;  %6080 = vmatprep.mubr.bf16.mxu1 %v12934_v36  ;;  %v5340_v5 = vadd.f32 %v10809_v54, %v5042_v4  ;;  %v5589_v44 = vmax.f32 %v5333_v25, 0.0  ;;  %v5894_v58 = vld [vmem:[#allocation10 + $0xf0] sm:$0xff]  ;;  %v12936_v21 = vld [vmem:[#allocation20_spill] sm:$0xff] }
 0x53c   :  { %v5043_v11 = vmul.f32 %v10820_v51, %v4412_v42  ;;  %v4415_v12 = vpop.f32.mrf.mxu0  ;;  %v11036_v60 = vpop.f32.mrf.mxu1  ;;  %v12938_v25 = vld [vmem:[#allocation36_spill] sm:$0xff] }
 0x53d   :  { %12935 = vst [vmem:[#allocation68_spill] sm:$0xff] %v11036_v60  ;;  %v5050_v41 = vmul.f32 %v10804_v52, %v4414_v48  ;;  %v4416_v56 = vadd.f32 %v4415_v12, %v10724_v20  ;;  %v11043_v6 = vpack.c.bf16 %v5589_v44, %v5581_v40  ;;  %v5596_v48 = vmax.f32 %v5340_v5, 0.0  ;;  %v5890_v40 = vld [vmem:[#allocation10 + $0xd0] sm:$0xff]  ;;  %v12941_v5 = vld [vmem:[#allocation99_spill] sm:$0xff] }
 0x53e   :  { %v4419_v10 = vpop.f32.mrf.mxu0  ;;  %6154 = vmatmul.mubr.bf16.vlgmr.msra.gmra.mxu0 %v12936_v21  ;;  %v11041_v36 = vpop.f32.mrf.mxu1  ;;  %v5341_v20 = vadd.f32 %v10833_v43, %v5043_v11  ;;  %v5950_v21 = vunpack.c.l.s8.bf16 %v5891_v46  ;;  %v5949_v46 = vunpack.c.h.s8.bf16 %v5890_v40 }
 0x53f   :  { %12937 = vst [vmem:[#allocation69_spill] sm:$0xff] %v11041_v36  ;;  %v5348_v47 = vadd.f32 %v10809_v54, %v5050_v41  ;;  %v5051_v4 = vmul.f32 %v10820_v51, %v4416_v56  ;;  %v4420_v42 = vadd.f32 %v4419_v10, %v10730_v8  ;;  %7090 = vmatpush3.bf16.msra.mxu0 %v5951_v33  ;;  %v5957_v36 = vunpack.c.h.s8.bf16 %v5894_v58 }
 0x540   :  { %6161 = vmatprep.mubr.bf16.mxu0 %v12938_v25  ;;  %v4421_v12 = vpop.f32.mrf.mxu0  ;;  %v11050_v60 = vpop.f32.mrf.mxu1  ;;  %7091 = vmatprep.subr.bf16.mxu0 %v5958_v18  ;;  %v12942_v18 = vld [vmem:[#allocation104_spill] sm:$0xff] }
 0x541   :  { %12939 = vst [vmem:[#allocation106_spill] sm:$0xff] %v11050_v60  ;;  %v5604_v44 = vmax.f32 %v5348_v47, 0.0  ;;  %v5349_v41 = vadd.f32 %v10833_v43, %v5051_v4  ;;  %v5058_v56 = vmul.f32 %v10804_v52, %v4420_v42  ;;  %v4422_v8 = vadd.f32 %v4421_v12, %v10739_v53 }
 0x542   :  { %v4423_v33 = vpop.f32.mrf.mxu0  ;;  %v11055_v10 = vpop.f32.mrf.mxu1  ;;  %6081 = vmatmul.mubr.bf16.gmra.mxu1 %v12941_v5  ;;  %v5597_v60 = vmax.f32 %v5341_v20, 0.0  ;;  %v12944_v5 = vld [vmem:[#allocation35_spill] sm:$0xff] }
 0x543   :  { %12940 = vst [vmem:[#allocation109_spill] sm:$0xff] %v11055_v10  ;;  %v11058_v11 = vpack.c.bf16 %v5604_v44, %v5596_v48  ;;  %v4424_v25 = vadd.f32 %v4423_v33, %v10744_v7  ;;  %6088 = vmatprep.mubr.bf16.mxu1 %v12942_v18  ;;  %v5356_v47 = vadd.f32 %v10809_v54, %v5058_v56  ;;  %v5605_v53 = vmax.f32 %v5349_v41, 0.0  ;;  %v5893_v7 = vld [vmem:[#allocation10 + $0xe8] sm:$0xff]  ;;  %v12946_v41 = vld [vmem:[#allocation40_spill] sm:$0xff] }
 0x544   :  { %v5059_v4 = vmul.f32 %v10820_v51, %v4422_v8  ;;  %v4425_v42 = vpop.f32.mrf.mxu0  ;;  %v11064_v15 = vpop.f32.mrf.mxu1  ;;  %7092 = vmatpush3.bf16.msra.mxu0 %v5950_v21  ;;  %v5956_v44 = vunpack.c.l.s8.bf16 %v5894_v58  ;;  %v5889_v10 = vld [vmem:[#allocation10 + $0xc8] sm:$0xff] }
 0x545   :  { %12943 = vst [vmem:[#allocation70_spill] sm:$0xff] %v11064_v15  ;;  %v5066_v12 = vmul.f32 %v10804_v52, %v4424_v25  ;;  %v4426_v48 = vadd.f32 %v4425_v42, %v10753_v62  ;;  %7093 = vmatprep.subr.bf16.mxu0 %v5957_v36  ;;  %v11071_v56 = vpack.c.bf16 %v5605_v53, %v5597_v60  ;;  %v5612_v25 = vmax.f32 %v5356_v47, 0.0  ;;  %v12948_v47 = vld [vmem:[#allocation27_spill] sm:$0xff] }
 0x546   :  { %v4429_v33 = vpop.f32.mrf.mxu0  ;;  %6162 = vmatmul.mubr.bf16.gmra.mxu0 %v12944_v5  ;;  %v11069_v20 = vpop.f32.mrf.mxu1  ;;  %v5357_v62 = vadd.f32 %v10833_v43, %v5059_v4  ;;  %v5948_v42 = vunpack.c.l.s8.bf16 %v5890_v40  ;;  %v5955_v5 = vunpack.c.h.s8.bf16 %v5893_v7  ;;  %v12949_v40 = vld [vmem:[#allocation30_spill] sm:$0xff] }
 0x547   :  { %12945 = vst [vmem:[#allocation71_spill] sm:$0xff] %v11069_v20  ;;  %v5364_v8 = vadd.f32 %v10809_v54, %v5066_v12  ;;  %v5067_v18 = vmul.f32 %v10820_v51, %v4426_v48  ;;  %v4430_v21 = vadd.f32 %v4429_v33, %v10758_v14  ;;  %6169 = vmatprep.mubr.bf16.mxu0 %v12946_v41  ;;  %v5947_v41 = vunpack.c.h.s8.bf16 %v5889_v10 }
 0x548   :  { %v4431_v58 = vpop.f32.mrf.mxu0  ;;  %v11078_v36 = vpop.f32.mrf.mxu1  ;;  %7094 = vmatpush3.bf16.msra.mxu0 %v5949_v46 }
 0x549   :  { %v5620_v60 = vmax.f32 %v5364_v8, 0.0  ;;  %v5365_v53 = vadd.f32 %v10833_v43, %v5067_v18  ;;  %v5074_v12 = vmul.f32 %v10804_v52, %v4430_v21  ;;  %v4432_v48 = vadd.f32 %v4431_v58, %v10767_v17  ;;  %7095 = vmatprep.subr.bf16.mxu0 %v5956_v44 }
 0x54a   :  { %v4433_v14 = vpop.f32.mrf.mxu0  ;;  %v11083_v33 = vpop.f32.mrf.mxu1  ;;  %6089 = vmatmul.mubr.bf16.gmra.mxu1 %v12948_v47  ;;  %v5613_v8 = vmax.f32 %v5357_v62, 0.0  ;;  %v12951_v47 = vld [vmem:[#allocation26_spill] sm:$0xff] }
 0x54b   :  { %12947 = vst [vmem:[#allocation108_spill] sm:$0xff] %v11083_v33  ;;  %v11086_v4 = vpack.c.bf16 %v5620_v60, %v5612_v25  ;;  %v4434_v46 = vadd.f32 %v4433_v14, %v10772_v35  ;;  %6096 = vmatprep.mubr.bf16.mxu1 %v12949_v40  ;;  %v5372_v18 = vadd.f32 %v10809_v54, %v5074_v12  ;;  %v5621_v44 = vmax.f32 %v5365_v53, 0.0  ;;  %v5892_v35 = vld [vmem:[#allocation10 + $0xe0] sm:$0xff]  ;;  %v12952_v40 = vld [vmem:[#allocation37_spill] sm:$0xff] }
 0x54c   :  { %v5075_v21 = vmul.f32 %v10820_v51, %v4432_v48  ;;  %v4435_v20 = vpop.f32.mrf.mxu0  ;;  %v11092_v17 = vpop.f32.mrf.mxu1  ;;  %7096 = vmatpush3.bf16.msra.mxu0 %v5948_v42  ;;  %v5954_v60 = vunpack.c.l.s8.bf16 %v5893_v7  ;;  %v12954_v42 = vld [vmem:[#allocation56_spill] sm:$0xff] }
 0x54d   :  { %12950 = vst [vmem:[#allocation111_spill] sm:$0xff] %v11092_v17  ;;  %v5082_v58 = vmul.f32 %v10804_v52, %v4434_v46  ;;  %v4436_v25 = vadd.f32 %v4435_v20, %v12951_v47  ;;  %7097 = vmatprep.subr.bf16.mxu0 %v5955_v5  ;;  %v11099_v12 = vpack.c.bf16 %v5621_v44, %v5613_v8  ;;  %v12955_v17 = vld [vmem:[#allocation44_spill] sm:$0xff]  ;;  %v5628_v46 = vmax.f32 %v5372_v18, 0.0 }
 0x54e   :  { %v4439_v14 = vpop.f32.mrf.mxu0  ;;  %6170 = vmatmul.mubr.bf16.gmra.mxu0 %v12952_v40  ;;  %v11097_v62 = vpop.f32.mrf.mxu1  ;;  %v5373_v20 = vadd.f32 %v10833_v43, %v5075_v21  ;;  %v5946_v47 = vunpack.c.l.s8.bf16 %v5889_v10  ;;  %v5953_v40 = vunpack.c.h.s8.bf16 %v5892_v35  ;;  %v12958_v18 = vld [vmem:[#allocation28_spill] sm:$0xff] }
 0x54f   :  { %12953 = vst [vmem:[#allocation72_spill] sm:$0xff] %v11097_v62  ;;  %v5380_v48 = vadd.f32 %v10809_v54, %v5082_v58  ;;  %v5083_v33 = vmul.f32 %v10820_v51, %v4436_v25  ;;  %v4440_v53 = vadd.f32 %v4439_v14, %v12954_v42  ;;  %6177 = vmatprep.mubr.bf16.mxu0 %v12955_v17  ;;  %v5888_v62 = vld [vmem:[#allocation10 + $0xc0] sm:$0xff]  ;;  %v12957_v25 = vld [vmem:[#allocation55_spill] sm:$0xff] }
 0x550   :  { %v4441_v7 = vpop.f32.mrf.mxu0  ;;  %v11106_v5 = vpop.f32.mrf.mxu1  ;;  %7098 = vmatpush3.bf16.msra.mxu0 %v5947_v41  ;;  %v12959_v10 = vld [vmem:[#allocation32_spill] sm:$0xff]  ;;  %v5945_v42 = vunpack.c.h.s8.bf16 %v5888_v62 }
 0x551   :  { %12956 = vst [vmem:[#allocation73_spill] sm:$0xff] %v11106_v5  ;;  %v5636_v8 = vmax.f32 %v5380_v48, 0.0  ;;  %v5381_v44 = vadd.f32 %v10833_v43, %v5083_v33  ;;  %v5090_v58 = vmul.f32 %v10804_v52, %v4440_v53  ;;  %v4442_v15 = vadd.f32 %v4441_v7, %v12957_v25  ;;  %7099 = vmatprep.subr.bf16.mxu0 %v5954_v60 }
 0x552   :  { %v4443_v14 = vpop.f32.mrf.mxu0  ;;  %v11111_v17 = vpop.f32.mrf.mxu1  ;;  %6097 = vmatmul.mubr.bf16.gmra.mxu1 %v12958_v18  ;;  %v5629_v48 = vmax.f32 %v5373_v20, 0.0 }
 0x553   :  { %v11114_v21 = vpack.c.bf16 %v5636_v8, %v5628_v46  ;;  %v4444_v41 = vadd.f32 %v4443_v14, %v10812_v2  ;;  %6104 = vmatprep.mubr.bf16.mxu1 %v12959_v10  ;;  %v5388_v33 = vadd.f32 %v10809_v54, %v5090_v58  ;;  %v5091_v53 = vmul.f32 %v10820_v51, %v4442_v15  ;;  %v12960_v14 = vld [vmem:[#allocation41_spill] sm:$0xff] }
 0x554   :  { %v4445_v5 = vpop.f32.mrf.mxu0  ;;  %v11120_v7 = vpop.f32.mrf.mxu1  ;;  %7100 = vmatpush3.bf16.msra.mxu0 %v5946_v47  ;;  %v5637_v60 = vmax.f32 %v5381_v44, 0.0  ;;  %v5952_v8 = vunpack.c.l.s8.bf16 %v5892_v35  ;;  %v12961_v44 = vld [vmem:[#allocation88_spill] sm:$0xff] }
 0x555   :  { %v5098_v25 = vmul.f32 %v10804_v52, %v4444_v41  ;;  %v4446_v46 = vadd.f32 %v4445_v5, %v10823_v27  ;;  %7101 = vmatprep.subr.bf16.mxu0 %v5953_v40  ;;  %v5644_v41 = vmax.f32 %v5388_v33, 0.0  ;;  %v5389_v27 = vadd.f32 %v10833_v43, %v5091_v53 }
 0x556   :  { %v4449_v2 = vpop.f32.mrf.mxu0  ;;  %6178 = vmatmul.mubr.bf16.gmra.mxu0 %v12960_v14  ;;  %v11125_v18 = vpop.f32.mrf.mxu1  ;;  %v11127_v20 = vpack.c.bf16 %v5637_v60, %v5629_v48  ;;  %v5944_v40 = vunpack.c.l.s8.bf16 %v5888_v62  ;;  %v12964_v14 = vld [vmem:[#allocation19_spill] sm:$0xff] }
 0x557   :  { %v5396_v15 = vadd.f32 %v10809_v54, %v5098_v25  ;;  %v5099_v58 = vmul.f32 %v10820_v51, %v4446_v46  ;;  %v4450_v47 = vadd.f32 %v4449_v2, %v10828_v9  ;;  %6185 = vmatprep.mubr.bf16.mxu0 %v12961_v44  ;;  %v12963_v2 = vld [vmem:[#allocation31_spill] sm:$0xff]  ;;  %v5645_v62 = vmax.f32 %v5389_v27, 0.0 }
 0x558   :  { %v4451_v5 = vpop.f32.mrf.mxu0  ;;  %v11134_v35 = vpop.f32.mrf.mxu1  ;;  %7102 = vmatpush3.bf16.msra.mxu0 %v5945_v42 }
 0x559   :  { %v5652_v10 = vmax.f32 %v5396_v15, 0.0  ;;  %v5397_v48 = vadd.f32 %v10833_v43, %v5099_v58  ;;  %v5106_v60 = vmul.f32 %v10804_v52, %v4450_v47  ;;  %v4452_v25 = vadd.f32 %v4451_v5, %v10839_v29  ;;  %7103 = vmatprep.subr.bf16.mxu0 %v5952_v8  ;;  %v12965_v5 = vld [vmem:[#allocation45_spill] sm:$0xff] }
 0x55a   :  { %v4453_v46 = vpop.f32.mrf.mxu0  ;;  %v11139_v9 = vpop.f32.mrf.mxu1  ;;  %6105 = vmatmul.mubr.bf16.gmra.mxu1 %v12963_v2 }
 0x55b   :  { %12962 = vst [vmem:[#allocation110_spill] sm:$0xff] %v11139_v9  ;;  %v11142_v33 = vpack.c.bf16 %v5652_v10, %v5644_v41  ;;  %v4454_v53 = vadd.f32 %v4453_v46, %v10844_v26  ;;  %6112 = vmatprep.mubr.bf16.mxu1 %v12964_v14  ;;  %v5404_v42 = vadd.f32 %v10809_v54, %v5106_v60  ;;  %v5653_v29 = vmax.f32 %v5397_v48, 0.0  ;;  %v12966_v46 = vld [vmem:[#allocation22_spill] sm:$0xff] }
 0x55c   :  { %v5107_v15 = vmul.f32 %v10820_v51, %v4452_v25  ;;  %v4455_v58 = vpop.f32.mrf.mxu0  ;;  %v11148_v47 = vpop.f32.mrf.mxu1  ;;  %7104 = vmatpush3.bf16.msra.mxu0 %v5944_v40 }
 0x55d   :  { %v5114_v8 = vmul.f32 %v10804_v52, %v4454_v53  ;;  %v4456_v44 = vadd.f32 %v4455_v58, %v10853_v61  ;;  %v11155_v10 = vpack.c.bf16 %v5653_v29, %v5645_v62  ;;  %v5660_v40 = vmax.f32 %v5404_v42, 0.0 }
 0x55e   :  { %v4459_v41 = vpop.f32.mrf.mxu0  ;;  %6186 = vmatmul.mubr.bf16.gmra.mxu0 %v12965_v5  ;;  %v11153_v26 = vpop.f32.mrf.mxu1  ;;  %v5405_v48 = vadd.f32 %v10833_v43, %v5107_v15 }
 0x55f   :  { %v5412_v27 = vadd.f32 %v10809_v54, %v5114_v8  ;;  %v5115_v60 = vmul.f32 %v10820_v51, %v4456_v44  ;;  %v4460_v25 = vadd.f32 %v4459_v41, %v10858_v59  ;;  %6193 = vmatprep.mubr.bf16.mxu0 %v12966_v46  ;;  %v12968_v44 = vld [vmem:[#allocation33_spill] sm:$0xff] }
 0x560   :  { %v4461_v2 = vpop.f32.mrf.mxu0  ;;  %v11162_v61 = vpop.f32.mrf.mxu1  ;;  %v5661_v15 = vmax.f32 %v5405_v48, 0.0 }
 0x561   :  { %v5668_v53 = vmax.f32 %v5412_v27, 0.0  ;;  %v5413_v14 = vadd.f32 %v10833_v43, %v5115_v60  ;;  %v5122_v62 = vmul.f32 %v10804_v52, %v4460_v25  ;;  %v4462_v58 = vadd.f32 %v4461_v2, %v10867_v24 }
 0x562   :  { %v4463_v29 = vpop.f32.mrf.mxu0  ;;  %v11167_v8 = vpop.f32.mrf.mxu1  ;;  %6113 = vmatmul.mubr.bf16.gmra.mxu1 %v12968_v44 }
 0x563   :  { %12967 = vst [vmem:[#allocation89_spill] sm:$0xff] %v11167_v8  ;;  %v11170_v59 = vpack.c.bf16 %v5668_v53, %v5660_v40  ;;  %v4464_v42 = vadd.f32 %v4463_v29, %v10872_v37  ;;  %6314 = vmatprep.mubr.bf16.mxu1 %v10874_v55  ;;  %v5420_v41 = vadd.f32 %v10809_v54, %v5122_v62  ;;  %v5669_v24 = vmax.f32 %v5413_v14, 0.0  ;;  %v12970_v40 = vld [vmem:[#allocation29_spill] sm:$0xff] }
 0x564   :  { %v5123_v5 = vmul.f32 %v10820_v51, %v4462_v58  ;;  %v4465_v27 = vpop.f32.mrf.mxu0  ;;  %v11176_v60 = vpop.f32.mrf.mxu1  ;;  %v12972_v58 = vld [vmem:[#allocation49_spill] sm:$0xff] }
 0x565   :  { %12969 = vst [vmem:[#allocation113_spill] sm:$0xff] %v11176_v60  ;;  %v5130_v25 = vmul.f32 %v10804_v52, %v4464_v42  ;;  %v4466_v46 = vadd.f32 %v4465_v27, %v10881_v30  ;;  %v11183_v37 = vpack.c.bf16 %v5669_v24, %v5661_v15  ;;  %v5676_v14 = vmax.f32 %v5420_v41, 0.0 }
 0x566   :  { %v4469_v2 = vpop.f32.mrf.mxu0  ;;  %6194 = vmatmul.mubr.bf16.gmra.mxu0 %v12970_v40  ;;  %v11181_v53 = vpop.f32.mrf.mxu1  ;;  %v5421_v29 = vadd.f32 %v10833_v43, %v5123_v5  ;;  %v12975_v5 = vld [vmem:[#allocation60_spill] sm:$0xff] }
 0x567   :  { %12971 = vst [vmem:[#allocation91_spill] sm:$0xff] %v11181_v53  ;;  %v5428_v55 = vadd.f32 %v10809_v54, %v5130_v25  ;;  %v5131_v48 = vmul.f32 %v10820_v51, %v4466_v46  ;;  %v4470_v62 = vadd.f32 %v4469_v2, %v10886_v23  ;;  %6201 = vmatprep.mubr.bf16.mxu0 %v12972_v58  ;;  %v13033_v53 = vld [vmem:[#allocation50_spill] sm:$0xff] }
 0x568   :  { %v4471_v44 = vpop.f32.mrf.mxu0  ;;  %v11190_v30 = vpop.f32.mrf.mxu1  ;;  %v5677_v46 = vmax.f32 %v5421_v29, 0.0 }
 0x569   :  { %12973 = vst [vmem:[#allocation74_spill] sm:$0xff] %v11190_v30  ;;  %v5684_v42 = vmax.f32 %v5428_v55, 0.0  ;;  %v5429_v27 = vadd.f32 %v10833_v43, %v5131_v48  ;;  %v5138_v15 = vmul.f32 %v10804_v52, %v4470_v62  ;;  %v4472_v24 = vadd.f32 %v4471_v44, %v10895_v0  ;;  %v12977_v44 = vld [vmem:[#allocation62_spill] sm:$0xff] }
 0x56a   :  { %v4473_v25 = vpop.f32.mrf.mxu0  ;;  %v11195_v40 = vpop.f32.mrf.mxu1  ;;  %6315 = vmatmul.mubr.bf16.vlgmr.msra.gmra.mxu1 %v10861_v45 }
 0x56b   :  { %12974 = vst [vmem:[#allocation92_spill] sm:$0xff] %v11195_v40  ;;  %v11198_v23 = vpack.c.bf16 %v5684_v42, %v5676_v14  ;;  %v4474_v41 = vadd.f32 %v4473_v25, %v10900_v50  ;;  %6322 = vmatprep.mubr.bf16.mxu1 %v12975_v5  ;;  %v5436_v2 = vadd.f32 %v10809_v54, %v5138_v15  ;;  %v5685_v0 = vmax.f32 %v5429_v27, 0.0  ;;  %v12978_v14 = vld [vmem:[#allocation95_spill] sm:$0xff]  ;;  %v12981_v5 = vld [vmem:[#allocation42_spill] sm:$0xff] }
 0x56c   :  { %v5139_v55 = vmul.f32 %v10820_v51, %v4472_v24  ;;  %v4475_v48 = vpop.f32.mrf.mxu0  ;;  %v11204_v62 = vpop.f32.mrf.mxu1  ;;  %v12980_v24 = vld [vmem:[#allocation64_spill] sm:$0xff] }
 0x56d   :  { %12976 = vst [vmem:[#allocation75_spill] sm:$0xff] %v11204_v62  ;;  %v5146_v58 = vmul.f32 %v10804_v52, %v4474_v41  ;;  %v4476_v40 = vadd.f32 %v4475_v48, %v12977_v44  ;;  %v11211_v50 = vpack.c.bf16 %v5685_v0, %v5677_v46  ;;  %v5692_v27 = vmax.f32 %v5436_v2, 0.0 }
 0x56e   :  { %v4479_v45 = vpop.f32.mrf.mxu0  ;;  %6202 = vmatmul.mubr.bf16.gmra.mxu0 %v12978_v14  ;;  %v11209_v42 = vpop.f32.mrf.mxu1  ;;  %v5437_v41 = vadd.f32 %v10833_v43, %v5139_v55 }
 0x56f   :  { %12979 = vst [vmem:[#allocation21_spill] sm:$0xff] %v11209_v42  ;;  %v5444_v29 = vadd.f32 %v10809_v54, %v5146_v58  ;;  %v5147_v15 = vmul.f32 %v10820_v51, %v4476_v40  ;;  %v4480_v25 = vadd.f32 %v4479_v45, %v12980_v24  ;;  %6209 = vmatprep.mubr.bf16.mxu0 %v12981_v5  ;;  %v12984_v40 = vld [vmem:[#allocation59_spill] sm:$0xff] }
 0x570   :  { %v4481_v62 = vpop.f32.mrf.mxu0  ;;  %v11218_v48 = vpop.f32.mrf.mxu1  ;;  %v5693_v55 = vmax.f32 %v5437_v41, 0.0 }
 0x571   :  { %12982 = vst [vmem:[#allocation112_spill] sm:$0xff] %v11218_v48  ;;  %v5700_v44 = vmax.f32 %v5444_v29, 0.0  ;;  %v5445_v14 = vadd.f32 %v10833_v43, %v5147_v15  ;;  %v5154_v46 = vmul.f32 %v10804_v52, %v4480_v25  ;;  %v4482_v0 = vadd.f32 %v4481_v62, %v10923_v13  ;;  %v13032_v48 = vld [vmem:[#allocation103_spill] sm:$0xff] }
 0x572   :  { %v4483_v58 = vpop.f32.mrf.mxu0  ;;  %v11223_v42 = vpop.f32.mrf.mxu1  ;;  %6323 = vmatmul.mubr.bf16.gmra.mxu1 %v12984_v40 }
 0x573   :  { %12983 = vst [vmem:[#allocation96_spill] sm:$0xff] %v11223_v42  ;;  %v11226_v45 = vpack.c.bf16 %v5700_v44, %v5692_v27  ;;  %v4484_v2 = vadd.f32 %v4483_v58, %v10928_v22  ;;  %6330 = vmatprep.mubr.bf16.mxu1 %v10930_v39  ;;  %v5452_v29 = vadd.f32 %v10809_v54, %v5154_v46  ;;  %v5701_v13 = vmax.f32 %v5445_v14, 0.0  ;;  %v12986_v27 = vld [vmem:[#allocation18_spill] sm:$0xff]  ;;  %v12989_v58 = vld [vmem:[#allocation100_spill] sm:$0xff] }
 0x574   :  { %v5155_v15 = vmul.f32 %v10820_v51, %v4482_v0  ;;  %v4485_v24 = vpop.f32.mrf.mxu0  ;;  %v11232_v25 = vpop.f32.mrf.mxu1  ;;  %v12988_v46 = vld [vmem:[#allocation102_spill] sm:$0xff] }
 0x575   :  { %12985 = vst [vmem:[#allocation85_spill] sm:$0xff] %v11232_v25  ;;  %v5162_v62 = vmul.f32 %v10804_v52, %v4484_v2  ;;  %v4486_v5 = vadd.f32 %v4485_v24, %v10937_v31  ;;  %v11239_v22 = vpack.c.bf16 %v5701_v13, %v5693_v55  ;;  %v5708_v14 = vmax.f32 %v5452_v29, 0.0 }
 0x576   :  { %v4489_v40 = vpop.f32.mrf.mxu0  ;;  %6210 = vmatmul.mubr.bf16.gmra.mxu0 %v12986_v27  ;;  %v11237_v44 = vpop.f32.mrf.mxu1  ;;  %v5453_v2 = vadd.f32 %v10833_v43, %v5155_v15 }
 0x577   :  { %12987 = vst [vmem:[#allocation76_spill] sm:$0xff] %v11237_v44  ;;  %v5460_v39 = vadd.f32 %v10809_v54, %v5162_v62  ;;  %v5163_v41 = vmul.f32 %v10820_v51, %v4486_v5  ;;  %v4490_v0 = vadd.f32 %v4489_v40, %v12988_v46  ;;  %6217 = vmatprep.mubr.bf16.mxu0 %v12989_v58  ;;  %v12992_v5 = vld [vmem:[#allocation63_spill] sm:$0xff] }
 0x578   :  { %v4491_v42 = vpop.f32.mrf.mxu0  ;;  %v11246_v31 = vpop.f32.mrf.mxu1  ;;  %v5709_v15 = vmax.f32 %v5453_v2, 0.0 }
 0x579   :  { %12990 = vst [vmem:[#allocation77_spill] sm:$0xff] %v11246_v31  ;;  %v5716_v24 = vmax.f32 %v5460_v39, 0.0  ;;  %v5461_v27 = vadd.f32 %v10833_v43, %v5163_v41  ;;  %v5170_v55 = vmul.f32 %v10804_v52, %v4490_v0  ;;  %v4492_v13 = vadd.f32 %v4491_v42, %v10951_v49 }
 0x57a   :  { %v4493_v62 = vpop.f32.mrf.mxu0  ;;  %v11251_v44 = vpop.f32.mrf.mxu1  ;;  %6331 = vmatmul.mubr.bf16.gmra.mxu1 %v12992_v5 }
 0x57b   :  { %12991 = vst [vmem:[#allocation51_spill] sm:$0xff] %v11251_v44  ;;  %v11254_v40 = vpack.c.bf16 %v5716_v24, %v5708_v14  ;;  %v4494_v29 = vadd.f32 %v4493_v62, %v10956_v28  ;;  %6338 = vmatprep.mubr.bf16.mxu1 %v10958_v34  ;;  %v5171_v39 = vmul.f32 %v10820_v51, %v4492_v13  ;;  %v5717_v0 = vmax.f32 %v5461_v27, 0.0  ;;  %v12994_v14 = vld [vmem:[#allocation39_spill] sm:$0xff]  ;;  %v13022_v44 = vld [vmem:[#allocation25_spill] sm:$0xff] }
 0x57c   :  { %v4495_v46 = vpop.f32.mrf.mxu0  ;;  %v11259_v41 = vpop.f32.mrf.mxu1  ;;  %v5468_v49 = vadd.f32 %v10809_v54, %v5170_v55  ;;  %v12996_v13 = vld [vmem:[#allocation115_spill] sm:$0xff] }
 0x57d   :  { %12993 = vst [vmem:[#allocation114_spill] sm:$0xff] %v11259_v41  ;;  %v5178_v42 = vmul.f32 %v10804_v52, %v4494_v29  ;;  %v4496_v58 = vadd.f32 %v4495_v46, %v10965_v32  ;;  %v11269_v34 = vpack.c.bf16 %v5717_v0, %v5709_v15  ;;  %v5469_v27 = vadd.f32 %v10833_v43, %v5171_v39  ;;  %v12999_v0 = vld [vmem:[#allocation65_spill] sm:$0xff]  ;;  %v13027_v41 = vld [vmem:[#allocation54_spill] sm:$0xff] }
 0x57e   :  { %v11264_v5 = vpop.f32.mrf.mxu0  ;;  %6218 = vmatmul.mubr.bf16.gmra.mxu0 %v12994_v14  ;;  %v11267_v28 = vpop.f32.mrf.mxu1  ;;  %v5724_v32 = vmax.f32 %v5468_v49, 0.0  ;;  %v13002_v49 = vld [vmem:[#allocation53_spill] sm:$0xff] }
 0x57f   :  { %12995 = vst [vmem:[#allocation38_spill] sm:$0xff] %v11267_v28  ;;  %v5476_v2 = vadd.f32 %v10809_v54, %v5178_v42  ;;  %v5179_v24 = vmul.f32 %v10820_v51, %v4496_v58  ;;  %6225 = vmatprep.mubr.bf16.mxu0 %v12996_v13  ;;  %v5725_v51 = vmax.f32 %v5469_v27, 0.0 }
 0x580   :  { %v11275_v55 = vpop.f32.mrf.mxu0  ;;  %v11277_v52 = vpop.f32.mrf.mxu1 }
 0x581   :  { %12997 = vst [vmem:[#allocation86_spill] sm:$0xff] %v11277_v52  ;;  %v5732_v62 = vmax.f32 %v5476_v2, 0.0  ;;  %v5477_v29 = vadd.f32 %v10833_v43, %v5179_v24  ;;  %v13004_v24 = vld [vmem:[#allocation116_spill] sm:$0xff]  ;;  %v13029_v52 = vld [vmem:[#allocation23_spill] sm:$0xff] }
 0x582   :  { %v11280_v46 = vpop.f32.mrf.mxu0  ;;  %v11282_v15 = vpop.f32.mrf.mxu1  ;;  %6339 = vmatmul.mubr.bf16.gmra.mxu1 %v12999_v0 }
 0x583   :  { %12998 = vst [vmem:[#allocation78_spill] sm:$0xff] %v11282_v15  ;;  %v11285_v54 = vpack.c.bf16 %v5732_v62, %v5724_v32  ;;  %6346 = vmatprep.mubr.bf16.mxu1 %v10986_v57  ;;  %v5733_v58 = vmax.f32 %v5477_v29, 0.0 }
 0x584   :  { %v4731_v39 = vpop.f32.mrf.mxu0  ;;  %v11288_v42 = vpop.f32.mrf.mxu1 }
 0x585   :  { %13000 = vst [vmem:[#allocation79_spill] sm:$0xff] %v11285_v54  ;;  %13001 = vst [vmem:[#allocation93_spill] sm:$0xff] %v11288_v42  ;;  %v11295_v2 = vpack.c.bf16 %v5733_v58, %v5725_v51  ;;  %v13008_v51 = vld [vmem:[#allocation43_spill] sm:$0xff] }
 0x586   :  { %v11290_v14 = vpop.f32.mrf.mxu0  ;;  %6226 = vmatmul.mubr.bf16.gmra.mxu0 %v13002_v49  ;;  %v11293_v43 = vpop.f32.mrf.mxu1  ;;  %v13010_v49 = vld [vmem:[#allocation52_spill] sm:$0xff] }
 0x587   :  { %13003 = vst [vmem:[#allocation90_spill] sm:$0xff] %v11293_v43  ;;  %6233 = vmatprep.mubr.bf16.mxu0 %v13004_v24  ;;  %v13016_v43 = vld [vmem:[#allocation48_spill] sm:$0xff] }
 0x588   :  { %v11298_v13 = vpop.f32.mrf.mxu0  ;;  %v11300_v32 = vpop.f32.mrf.mxu1 }
 0x589   :  { %13005 = vst [vmem:[#allocation80_spill] sm:$0xff] %v11300_v32 }
 0x58a   :  { %v11302_v57 = vpop.f32.mrf.mxu0  ;;  %v11304_v27 = vpop.f32.mrf.mxu1  ;;  %6347 = vmatmul.mubr.bf16.gmra.mxu1 %v10973_v63 }
 0x58b   :  { %13006 = vst [vmem:[#allocation81_spill] sm:$0xff] %v11304_v27  ;;  %6354 = vmatprep.mubr.bf16.mxu1 %v11014_v16 }
 0x58c   :  { %v4741_v62 = vpop.f32.mrf.mxu0  ;;  %v11308_v29 = vpop.f32.mrf.mxu1 }
 0x58d   :  { %13007 = vst [vmem:[#allocation87_spill] sm:$0xff] %v11308_v29 }
 0x58e   :  { %v11310_v0 = vpop.f32.mrf.mxu0  ;;  %6234 = vmatmul.mubr.bf16.gmra.mxu0 %v13008_v51  ;;  %v11313_v58 = vpop.f32.mrf.mxu1 }
 0x58f   :  { %13009 = vst [vmem:[#allocation97_spill] sm:$0xff] %v11313_v58  ;;  %6241 = vmatprep.mubr.bf16.mxu0 %v13010_v49  ;;  %v13014_v58 = vld [vmem:[#allocation47_spill] sm:$0xff] }
 0x590   :  { %v11316_v24 = vpop.f32.mrf.mxu0  ;;  %v11318_v15 = vpop.f32.mrf.mxu1 }
 0x591   :  { %13011 = vst [vmem:[#allocation82_spill] sm:$0xff] %v11318_v15 }
 0x592   :  { %v11320_v27 = vpop.f32.mrf.mxu0  ;;  %v11322_v63 = vpop.f32.mrf.mxu1  ;;  %6355 = vmatmul.mubr.bf16.gmra.mxu1 %v11001_v1 }
 0x593   :  { %13012 = vst [vmem:[#allocation83_spill] sm:$0xff] %v11322_v63  ;;  %6362 = vmatprep.mubr.bf16.mxu1 %v11043_v6 }
 0x594   :  { %v11326_v16 = vpop.f32.mrf.mxu0  ;;  %v11328_v29 = vpop.f32.mrf.mxu1 }
 0x595   :  { %13013 = vst [vmem:[#allocation94_spill] sm:$0xff] %v11328_v29 }
 0x596   :  { %v11330_v51 = vpop.f32.mrf.mxu0  ;;  %6242 = vmatmul.mubr.bf16.gmra.mxu0 %v13014_v58  ;;  %v11333_v49 = vpop.f32.mrf.mxu1 }
 0x597   :  { %13015 = vst [vmem:[#allocation98_spill] sm:$0xff] %v11333_v49  ;;  %6249 = vmatprep.mubr.bf16.mxu0 %v13016_v43  ;;  %v13020_v49 = vld [vmem:[#allocation46_spill] sm:$0xff] }
 0x598   :  { %v11336_v15 = vpop.f32.mrf.mxu0  ;;  %v11338_v42 = vpop.f32.mrf.mxu1 }
 0x599   :  { %13017 = vst [vmem:[#allocation84_spill] sm:$0xff] %v11338_v42 }
 0x59a   :  { %v11340_v63 = vpop.f32.mrf.mxu0  ;;  %v11342_v1 = vpop.f32.mrf.mxu1  ;;  %6363 = vmatmul.mubr.bf16.gmra.mxu1 %v11029_v19 }
 0x59b   :  { %13018 = vst [vmem:[#allocation34_spill] sm:$0xff] %v11342_v1  ;;  %6370 = vmatprep.mubr.bf16.mxu1 %v11071_v56  ;;  %v13025_v56 = vld [vmem:[#allocation16_spill] sm:$0xff] }
 0x59c   :  { %v11346_v6 = vpop.f32.mrf.mxu0  ;;  %v11348_v29 = vpop.f32.mrf.mxu1 }
 0x59d   :  { %13019 = vst [vmem:[#allocation17_spill] sm:$0xff] %v11348_v29  ;;  %v4916_v29 = vsub.s32 7, %v13025_v56 }
 0x59e   :  { %v11350_v58 = vpop.f32.mrf.mxu0  ;;  %6250 = vmatmul.mubr.bf16.gmra.mxu0 %v13020_v49  ;;  %v11353_v43 = vpop.f32.mrf.mxu1 }
 0x59f   :  { %13021 = vst [vmem:[#allocation24_spill] sm:$0xff] %v11353_v43  ;;  %6257 = vmatprep.mubr.bf16.mxu0 %v13022_v44  ;;  %v4732_v44 = vadd.f32 %v4731_v39, %v10993_v3 }
 0x5a0   :  { %v11356_v42 = vpop.f32.mrf.mxu0  ;;  %v11358_v32 = vpop.f32.mrf.mxu1 }
 0x5a1   :  { %13023 = vst [vmem:[#allocation20_spill] sm:$0xff] %v11358_v32 }
 0x5a2   :  { %v11360_v1 = vpop.f32.mrf.mxu0  ;;  %v11362_v19 = vpop.f32.mrf.mxu1  ;;  %6371 = vmatmul.mubr.bf16.gmra.mxu1 %v11058_v11  ;;  %v7223_v11 = vld [vmem:[%s12193_s10] sm:$0xff] }
 0x5a3   :  { %13024 = vst [vmem:[#allocation36_spill] sm:$0xff] %v11362_v19  ;;  %6378 = vmatprep.mubr.bf16.mxu1 %v11099_v12  ;;  %v4728_v19 = vadd.f32 %v11275_v55, %v10979_v38  ;;  %v11382_v12 = vrot.slane %v7223_v11, %v4916_v29  ;;  %v7224_v55 = vld [vmem:[%s12194_s11] sm:$0xff] }
 0x5a4   :  { %v11367_v28 = vpop.f32.mrf.mxu0  ;;  %v11369_v49 = vpop.f32.mrf.mxu1 }
 0x5a5   :  { %13026 = vst [vmem:[#allocation99_spill] sm:$0xff] %v11369_v49  ;;  %v4941_v39 = vmul.f32 %v11382_v12, %v4732_v44  ;;  %v4933_v38 = vmul.f32 %v11382_v12, %v4728_v19  ;;  %v4726_v19 = vadd.f32 %v11264_v5, %v13033_v53 }
 0x5a6   :  { %v11372_v43 = vpop.f32.mrf.mxu0  ;;  %6258 = vmatmul.mubr.bf16.gmra.mxu0 %v13027_v41  ;;  %v11375_v32 = vpop.f32.mrf.mxu1  ;;  %v4912_v41 = vsub.s32 6, %v13025_v56 }
 0x5a7   :  { %13028 = vst [vmem:[#allocation104_spill] sm:$0xff] %v11375_v32  ;;  %6265 = vmatprep.mubr.bf16.mxu0 %v13029_v52  ;;  %v11398_v52 = vrot.slane %v7224_v55, %v4916_v29 }
 0x5a8   :  { %v11385_v49 = vpop.f32.mrf.mxu0  ;;  %v11387_v3 = vpop.f32.mrf.mxu1  ;;  %v11409_v54 = vrot.slane %v7223_v11, %v4912_v41 }
 0x5a9   :  { %13030 = vst [vmem:[#allocation35_spill] sm:$0xff] %v11387_v3  ;;  %v13031_v3 = vld [vmem:[#allocation101_spill] sm:$0xff]  ;;  %v5239_v8 = vadd.f32 %v11398_v52, %v4941_v39 }
 0x5aa   :  { %v11391_v32 = vpop.f32.mrf.mxu0  ;;  %v6769_v25 = vpop.f32.mrf.mxu1  ;;  %6379 = vmatmul.mubr.bf16.gmra.mxu1 %v11086_v4  ;;  %v4730_v44 = vadd.f32 %v11280_v46, %v13031_v3  ;;  %v4742_v4 = vadd.f32 %v4741_v62, %v13032_v48  ;;  %v5231_v46 = vadd.f32 %v11398_v52, %v4933_v38  ;;  %v13037_v3 = vld [vmem:[#allocation66_spill] sm:$0xff]  ;;  %v13038_v39 = vld [vmem:[#allocation61_spill] sm:$0xff] }
 0x5ab   :  { %6386 = vmatprep.mubr.bf16.mxu1 %v11127_v20  ;;  %v13036_v20 = vld [vmem:[#allocation57_spill] sm:$0xff]  ;;  %v4738_v30 = vadd.f32 %v11298_v13, %v13037_v3  ;;  %v5495_v11 = vmax.f32 %v5239_v8, 0.0 }
 0x5ac   :  { %v11403_v31 = vpop.f32.mrf.mxu0  ;;  %v6770_v56 = vpop.f32.mrf.mxu1  ;;  %v4940_v48 = vmul.f32 %v11409_v54, %v4730_v44  ;;  %v4957_v5 = vmul.f32 %v11382_v12, %v4742_v4  ;;  %v5487_v13 = vmax.f32 %v5231_v46, 0.0  ;;  %v13040_v4 = vld [vmem:[#allocation67_spill] sm:$0xff]  ;;  %v13042_v46 = vld [vmem:[#allocation105_spill] sm:$0xff] }
 0x5ad   :  { %v11413_v29 = vadd.f32 %v6770_v56, %v6769_v25  ;;  %v4932_v25 = vmul.f32 %v11409_v54, %v4726_v19  ;;  %v11425_v56 = vrot.slane %v7224_v55, %v4912_v41  ;;  %v4949_v44 = vmul.f32 %v11382_v12, %v4738_v30 }
 0x5ae   :  { %v11411_v60 = vpop.f32.mrf.mxu0  ;;  %6266 = vmatmul.mubr.bf16.gmra.mxu0 %v13036_v20  ;;  %v6772_v9 = vpop.f32.mrf.mxu1  ;;  %v4740_v8 = vadd.f32 %v11302_v57, %v13040_v4  ;;  %v5255_v55 = vadd.f32 %v11398_v52, %v4957_v5  ;;  %v4736_v30 = vadd.f32 %v11290_v14, %v13042_v46 }
 0x5af   :  { %13034 = vst [vmem:[#allocation40_spill] sm:$0xff] %v11411_v60  ;;  %13035 = vst [vmem:[#allocation27_spill] sm:$0xff] %v11413_v29  ;;  %6273 = vmatprep.mubr.bf16.mxu0 %v13038_v39  ;;  %v5238_v3 = vadd.f32 %v11425_v56, %v4940_v48  ;;  %v5247_v4 = vadd.f32 %v11398_v52, %v4949_v44  ;;  %v13044_v60 = vld [vmem:[#allocation68_spill] sm:$0xff] }
 0x5b0   :  { %v11421_v62 = vpop.f32.mrf.mxu0  ;;  %v6773_v53 = vpop.f32.mrf.mxu1  ;;  %v4748_v5 = vadd.f32 %v11316_v24, %v13044_v60 }
 0x5b1   :  { %v11429_v38 = vadd.f32 %v6773_v53, %v6772_v9  ;;  %v13041_v9 = vld [vmem:[#allocation106_spill] sm:$0xff]  ;;  %v5743_v53 = vpack.c.bf16 %v5495_v11, %v5487_v13  ;;  %v4956_v11 = vmul.f32 %v11409_v54, %v4740_v8  ;;  %v5503_v60 = vmax.f32 %v5247_v4, 0.0 }
 0x5b2   :  { %v11427_v20 = vpop.f32.mrf.mxu0  ;;  %v6775_v29 = vpop.f32.mrf.mxu1  ;;  %6387 = vmatmul.mubr.bf16.gmra.mxu1 %v11114_v21  ;;  %v4752_v39 = vadd.f32 %v11326_v16, %v13041_v9  ;;  %v5230_v21 = vadd.f32 %v11425_v56, %v4932_v25  ;;  %v5494_v16 = vmax.f32 %v5238_v3, 0.0  ;;  %v5511_v9 = vmax.f32 %v5255_v55, 0.0 }
 0x5b3   :  { %13039 = vst [vmem:[#allocation30_spill] sm:$0xff] %v11429_v38  ;;  %6394 = vmatprep.mubr.bf16.mxu1 %v11155_v10  ;;  %v13043_v38 = vld [vmem:[#allocation58_spill] sm:$0xff]  ;;  %v4965_v24 = vmul.f32 %v11382_v12, %v4748_v5  ;;  %v5254_v8 = vadd.f32 %v11425_v56, %v4956_v11  ;;  %v13046_v5 = vld [vmem:[#allocation107_spill] sm:$0xff] }
 0x5b4   :  { %v11437_v19 = vpop.f32.mrf.mxu0  ;;  %v6776_v41 = vpop.f32.mrf.mxu1  ;;  %v4973_v14 = vmul.f32 %v11382_v12, %v4752_v39  ;;  %v13045_v39 = vld [vmem:[#allocation69_spill] sm:$0xff] }
 0x5b5   :  { %v11447_v48 = vadd.f32 %v6776_v41, %v6775_v29  ;;  %v5486_v29 = vmax.f32 %v5230_v21, 0.0  ;;  %v4948_v41 = vmul.f32 %v11409_v54, %v4736_v30  ;;  %v4750_v55 = vadd.f32 %v11320_v27, %v13045_v39 }
 0x5b6   :  { %v11445_v10 = vpop.f32.mrf.mxu0  ;;  %6274 = vmatmul.mubr.bf16.gmra.mxu0 %v13043_v38  ;;  %v6778_v57 = vpop.f32.mrf.mxu1  ;;  %v5271_v30 = vadd.f32 %v11398_v52, %v4973_v14  ;;  %v5510_v39 = vmax.f32 %v5254_v8, 0.0 }
 0x5b7   :  { %6475 = vmatprep.mubr.bf16.mxu0 %v5743_v53  ;;  %v5742_v3 = vpack.c.bf16 %v5494_v16, %v5486_v29  ;;  %v5246_v4 = vadd.f32 %v11425_v56, %v4948_v41  ;;  %v13047_v29 = vld [vmem:[#allocation70_spill] sm:$0xff] }
 0x5b8   :  { %v11454_v25 = vpop.f32.mrf.mxu0  ;;  %v6779_v13 = vpop.f32.mrf.mxu1  ;;  %v4758_v14 = vadd.f32 %v11336_v15, %v13047_v29  ;;  %v5527_v41 = vmax.f32 %v5271_v30, 0.0 }
 0x5b9   :  { %v11460_v46 = vadd.f32 %v6779_v13, %v6778_v57  ;;  %v4762_v57 = vadd.f32 %v11346_v6, %v11078_v36  ;;  %v5263_v13 = vadd.f32 %v11398_v52, %v4965_v24  ;;  %v4972_v36 = vmul.f32 %v11409_v54, %v4750_v55 }
 0x5ba   :  { %v11458_v38 = vpop.f32.mrf.mxu0  ;;  %v6781_v44 = vpop.f32.mrf.mxu1  ;;  %6395 = vmatmul.mubr.bf16.gmra.mxu1 %v11142_v33  ;;  %v5751_v33 = vpack.c.bf16 %v5511_v9, %v5503_v60  ;;  %v5502_v60 = vmax.f32 %v5246_v4, 0.0  ;;  %v4981_v8 = vmul.f32 %v11382_v12, %v4758_v14  ;;  %v13050_v14 = vld [vmem:[#allocation109_spill] sm:$0xff] }
 0x5bb   :  { %6402 = vmatprep.mubr.bf16.mxu1 %v11183_v37  ;;  %v4746_v37 = vadd.f32 %v11310_v0, %v13046_v5  ;;  %v4989_v0 = vmul.f32 %v11382_v12, %v4762_v57  ;;  %v5519_v15 = vmax.f32 %v5263_v13, 0.0  ;;  %v13048_v57 = vld [vmem:[#allocation71_spill] sm:$0xff] }
 0x5bc   :  { %v11468_v53 = vpop.f32.mrf.mxu0  ;;  %v6782_v21 = vpop.f32.mrf.mxu1  ;;  %v5750_v55 = vpack.c.bf16 %v5510_v39, %v5502_v60  ;;  %v4760_v30 = vadd.f32 %v11340_v63, %v13048_v57  ;;  %v13051_v60 = vld [vmem:[#allocation111_spill] sm:$0xff] }
 0x5bd   :  { %v11478_v11 = vadd.f32 %v6782_v21, %v6781_v44  ;;  %v4964_v44 = vmul.f32 %v11409_v54, %v4746_v37  ;;  %v5287_v37 = vadd.f32 %v11398_v52, %v4989_v0  ;;  %v4768_v0 = vadd.f32 %v11356_v42, %v13051_v60  ;;  %v13053_v60 = vld [vmem:[#allocation108_spill] sm:$0xff] }
 0x5be   :  { %v11476_v16 = vpop.f32.mrf.mxu0  ;;  %6476 = vmatmul.mubr.bf16.vlgmr.msra.gmra.mxu0 %v5742_v3  ;;  %v6784_v27 = vpop.f32.mrf.mxu1 }
 0x5bf   :  { %6483 = vmatprep.mubr.bf16.mxu0 %v5751_v33  ;;  %v5270_v33 = vadd.f32 %v11425_v56, %v4972_v36  ;;  %v5262_v13 = vadd.f32 %v11425_v56, %v4964_v44 }
 0x5c0   :  { %v11484_v6 = vpop.f32.mrf.mxu0  ;;  %v6785_v9 = vpop.f32.mrf.mxu1 }
 0x5c1   :  { %v11490_v21 = vadd.f32 %v6785_v9, %v6784_v27  ;;  %v13049_v27 = vld [vmem:[#allocation73_spill] sm:$0xff]  ;;  %v5279_v9 = vadd.f32 %v11398_v52, %v4981_v8  ;;  %v5526_v57 = vmax.f32 %v5270_v33, 0.0  ;;  %v4997_v33 = vmul.f32 %v11382_v12, %v4768_v0 }
 0x5c2   :  { %v11488_v3 = vpop.f32.mrf.mxu0  ;;  %v6787_v24 = vpop.f32.mrf.mxu1  ;;  %6403 = vmatmul.mubr.bf16.gmra.mxu1 %v11170_v59  ;;  %v4772_v29 = vadd.f32 %v11367_v28, %v13049_v27  ;;  %v5759_v59 = vpack.c.bf16 %v5527_v41, %v5519_v15  ;;  %v4988_v28 = vmul.f32 %v11409_v54, %v4760_v30  ;;  %v5543_v15 = vmax.f32 %v5287_v37, 0.0 }
 0x5c3   :  { %6410 = vmatprep.mubr.bf16.mxu1 %v11211_v50  ;;  %v4756_v50 = vadd.f32 %v11330_v51, %v13050_v14  ;;  %v5518_v27 = vmax.f32 %v5262_v13, 0.0  ;;  %v5535_v42 = vmax.f32 %v5279_v9, 0.0 }
 0x5c4   :  { %v11498_v4 = vpop.f32.mrf.mxu0  ;;  %v6788_v5 = vpop.f32.mrf.mxu1  ;;  %v5005_v51 = vmul.f32 %v11382_v12, %v4772_v29  ;;  %v13052_v29 = vld [vmem:[#allocation72_spill] sm:$0xff] }
 0x5c5   :  { %v11508_v36 = vadd.f32 %v6788_v5, %v6787_v24  ;;  %v4980_v24 = vmul.f32 %v11409_v54, %v4756_v50  ;;  %v5758_v30 = vpack.c.bf16 %v5526_v57, %v5518_v27  ;;  %v4770_v37 = vadd.f32 %v11360_v1, %v13052_v29 }
 0x5c6   :  { %v11506_v39 = vpop.f32.mrf.mxu0  ;;  %6484 = vmatmul.mubr.bf16.gmra.mxu0 %v5750_v55  ;;  %v6790_v63 = vpop.f32.mrf.mxu1  ;;  %v5303_v50 = vadd.f32 %v11398_v52, %v5005_v51 }
 0x5c7   :  { %6491 = vmatprep.mubr.bf16.mxu0 %v5759_v59  ;;  %v5286_v59 = vadd.f32 %v11425_v56, %v4988_v28  ;;  %v5278_v9 = vadd.f32 %v11425_v56, %v4980_v24  ;;  %v5295_v28 = vadd.f32 %v11398_v52, %v4997_v33 }
 0x5c8   :  { %v11514_v41 = vpop.f32.mrf.mxu0  ;;  %v6791_v44 = vpop.f32.mrf.mxu1  ;;  %v5559_v27 = vmax.f32 %v5303_v50, 0.0 }
 0x5c9   :  { %v11520_v5 = vadd.f32 %v6791_v44, %v6790_v63  ;;  %v4782_v63 = vadd.f32 %v11403_v31, %v11134_v35  ;;  %v4778_v44 = vadd.f32 %v11385_v49, %v11120_v7  ;;  %v5542_v51 = vmax.f32 %v5286_v59, 0.0 }
 0x5ca   :  { %v11518_v55 = vpop.f32.mrf.mxu0  ;;  %v6793_v8 = vpop.f32.mrf.mxu1  ;;  %6411 = vmatmul.mubr.bf16.gmra.mxu1 %v11198_v23  ;;  %v5767_v23 = vpack.c.bf16 %v5543_v15, %v5535_v42  ;;  %v5004_v35 = vmul.f32 %v11409_v54, %v4770_v37  ;;  %v5534_v24 = vmax.f32 %v5278_v9, 0.0  ;;  %v5551_v7 = vmax.f32 %v5295_v28, 0.0 }
 0x5cb   :  { %6418 = vmatprep.mubr.bf16.mxu1 %v11239_v22  ;;  %v4766_v22 = vadd.f32 %v11350_v58, %v13053_v60  ;;  %v5021_v58 = vmul.f32 %v11382_v12, %v4782_v63  ;;  %v5013_v49 = vmul.f32 %v11382_v12, %v4778_v44  ;;  %v4780_v37 = vadd.f32 %v11391_v32, %v11125_v18 }
 0x5cc   :  { %v11528_v13 = vpop.f32.mrf.mxu0  ;;  %v6794_v14 = vpop.f32.mrf.mxu1  ;;  %v5766_v59 = vpack.c.bf16 %v5542_v51, %v5534_v24  ;;  %v5302_v29 = vadd.f32 %v11425_v56, %v5004_v35 }
 0x5cd   :  { %v11538_v57 = vadd.f32 %v6794_v14, %v6793_v8  ;;  %v4996_v8 = vmul.f32 %v11409_v54, %v4766_v22  ;;  %v5319_v63 = vadd.f32 %v11398_v52, %v5021_v58  ;;  %v5311_v32 = vadd.f32 %v11398_v52, %v5013_v49 }
 0x5ce   :  { %v11536_v0 = vpop.f32.mrf.mxu0  ;;  %6492 = vmatmul.mubr.bf16.gmra.mxu0 %v5758_v30  ;;  %v6796_v1 = vpop.f32.mrf.mxu1  ;;  %v5558_v28 = vmax.f32 %v5302_v29, 0.0  ;;  %v13054_v29 = vld [vmem:[#allocation74_spill] sm:$0xff] }
 0x5cf   :  { %6499 = vmatprep.mubr.bf16.mxu0 %v5767_v23  ;;  %v4792_v23 = vadd.f32 %v11437_v19, %v11162_v61  ;;  %v5294_v9 = vadd.f32 %v11425_v56, %v4996_v8  ;;  %v5020_v61 = vmul.f32 %v11409_v54, %v4780_v37  ;;  %v4802_v37 = vadd.f32 %v11468_v53, %v13054_v29 }
 0x5d0   :  { %v11544_v31 = vpop.f32.mrf.mxu0  ;;  %v6797_v15 = vpop.f32.mrf.mxu1 }
 0x5d1   :  { %v11550_v30 = vadd.f32 %v6797_v15, %v6796_v1  ;;  %v4788_v1 = vadd.f32 %v11421_v62, %v11148_v47  ;;  %v5550_v51 = vmax.f32 %v5294_v9, 0.0  ;;  %v5567_v47 = vmax.f32 %v5311_v32, 0.0 }
 0x5d2   :  { %v11548_v42 = vpop.f32.mrf.mxu0  ;;  %v6799_v33 = vpop.f32.mrf.mxu1  ;;  %6419 = vmatmul.mubr.bf16.gmra.mxu1 %v11226_v45  ;;  %v5775_v45 = vpack.c.bf16 %v5559_v27, %v5551_v7  ;;  %v5318_v8 = vadd.f32 %v11425_v56, %v5020_v61  ;;  %v5053_v61 = vmul.f32 %v11382_v12, %v4802_v37 }
 0x5d3   :  { %6426 = vmatprep.mubr.bf16.mxu1 %v11269_v34  ;;  %v4776_v34 = vadd.f32 %v11372_v43, %v11111_v17  ;;  %v5037_v17 = vmul.f32 %v11382_v12, %v4792_v23  ;;  %v5575_v43 = vmax.f32 %v5319_v63, 0.0  ;;  %v5029_v62 = vmul.f32 %v11382_v12, %v4788_v1  ;;  %v13055_v63 = vld [vmem:[#allocation110_spill] sm:$0xff]  ;;  %v13056_v23 = vld [vmem:[#allocation40_spill] sm:$0xff] }
 0x5d4   :  { %v11558_v14 = vpop.f32.mrf.mxu0  ;;  %v6800_v50 = vpop.f32.mrf.mxu1  ;;  %v5774_v24 = vpack.c.bf16 %v5558_v28, %v5550_v51  ;;  %v5574_v32 = vmax.f32 %v5318_v8, 0.0  ;;  %v5351_v37 = vadd.f32 %v11398_v52, %v5053_v61 }
 0x5d5   :  { %v11568_v22 = vadd.f32 %v6800_v50, %v6799_v33  ;;  %v5012_v35 = vmul.f32 %v11409_v54, %v4776_v34  ;;  %v4790_v33 = vadd.f32 %v11427_v20, %v11153_v26  ;;  %v5327_v20 = vadd.f32 %v11398_v52, %v5029_v62  ;;  %v13057_v34 = vld [vmem:[#allocation113_spill] sm:$0xff] }
 0x5d6   :  { %v11566_v60 = vpop.f32.mrf.mxu0  ;;  %6500 = vmatmul.mubr.bf16.gmra.mxu0 %v5766_v59  ;;  %v6802_v18 = vpop.f32.mrf.mxu1  ;;  %v5335_v59 = vadd.f32 %v11398_v52, %v5037_v17 }
 0x5d7   :  { %6507 = vmatprep.mubr.bf16.mxu0 %v5775_v45  ;;  %v5310_v50 = vadd.f32 %v11425_v56, %v5012_v35  ;;  %v5036_v53 = vmul.f32 %v11409_v54, %v4790_v33  ;;  %v13059_v33 = vld [vmem:[#allocation91_spill] sm:$0xff] }
 0x5d8   :  { %v11574_v19 = vpop.f32.mrf.mxu0  ;;  %v6803_v44 = vpop.f32.mrf.mxu1 }
 0x5d9   :  { %v11580_v58 = vadd.f32 %v6803_v44, %v6802_v18  ;;  %v4798_v18 = vadd.f32 %v11454_v25, %v13057_v34  ;;  %v5591_v44 = vmax.f32 %v5335_v59, 0.0  ;;  %v5566_v17 = vmax.f32 %v5310_v50, 0.0 }
 0x5da   :  { %v11578_v15 = vpop.f32.mrf.mxu0  ;;  %v6805_v27 = vpop.f32.mrf.mxu1  ;;  %6427 = vmatmul.mubr.bf16.gmra.mxu1 %v11254_v40  ;;  %v5783_v40 = vpack.c.bf16 %v5575_v43, %v5567_v47  ;;  %v13058_v47 = vld [vmem:[#allocation79_spill] sm:$0xff]  ;;  %v5583_v25 = vmax.f32 %v5327_v20, 0.0  ;;  %v5334_v8 = vadd.f32 %v11425_v56, %v5036_v53 }
 0x5db   :  { %6434 = vmatprep.mubr.bf16.mxu1 %v11295_v2  ;;  %v4786_v2 = vadd.f32 %v13056_v23, %v13055_v63  ;;  %v5045_v62 = vmul.f32 %v11382_v12, %v4798_v18 }
 0x5dc   :  { %v11588_v7 = vpop.f32.mrf.mxu0  ;;  %v6806_v49 = vpop.f32.mrf.mxu1  ;;  %v5791_v63 = vpack.c.bf16 %v5591_v44, %v5583_v25 }
 0x5dd   :  { %v11598_v9 = vadd.f32 %v6806_v49, %v6805_v27  ;;  %v5028_v43 = vmul.f32 %v11409_v54, %v4786_v2  ;;  %v4800_v49 = vadd.f32 %v11458_v38, %v13059_v33  ;;  %v13061_v2 = vld [vmem:[#allocation89_spill] sm:$0xff]  ;;  %v5343_v18 = vadd.f32 %v11398_v52, %v5045_v62 }
 0x5de   :  { %v11596_v45 = vpop.f32.mrf.mxu0  ;;  %6508 = vmatmul.mubr.bf16.gmra.mxu0 %v5774_v24  ;;  %v6808_v26 = vpop.f32.mrf.mxu1  ;;  %v5782_v24 = vpack.c.bf16 %v5574_v32, %v5566_v17  ;;  %v13062_v32 = vld [vmem:[#allocation75_spill] sm:$0xff]  ;;  %v5607_v17 = vmax.f32 %v5351_v37, 0.0 }
 0x5df   :  { %6515 = vmatprep.mubr.bf16.mxu0 %v5783_v40  ;;  %v13060_v40 = vld [vmem:[#allocation112_spill] sm:$0xff]  ;;  %v5326_v23 = vadd.f32 %v11425_v56, %v5028_v43  ;;  %v4808_v53 = vadd.f32 %v11484_v6, %v13062_v32 }
 0x5e0   :  { %v11604_v1 = vpop.f32.mrf.mxu0  ;;  %v6809_v28 = vpop.f32.mrf.mxu1  ;;  %v4812_v50 = vadd.f32 %v11498_v4, %v13060_v40  ;;  %v5052_v4 = vmul.f32 %v11409_v54, %v4800_v49  ;;  %v13063_v49 = vld [vmem:[#allocation21_spill] sm:$0xff] }
 0x5e1   :  { %v11610_v35 = vadd.f32 %v6809_v28, %v6808_v26  ;;  %v4796_v26 = vadd.f32 %v11445_v10, %v13061_v2  ;;  %v5590_v28 = vmax.f32 %v5334_v8, 0.0  ;;  %v5582_v43 = vmax.f32 %v5326_v23, 0.0 }
 0x5e2   :  { %v11608_v51 = vpop.f32.mrf.mxu0  ;;  %v6811_v27 = vpop.f32.mrf.mxu1  ;;  %6435 = vmatmul.mubr.bf16.gmra.mxu1 %v13058_v47  ;;  %v5069_v10 = vmul.f32 %v11382_v12, %v4812_v50  ;;  %v5061_v6 = vmul.f32 %v11382_v12, %v4808_v53  ;;  %v5350_v33 = vadd.f32 %v11425_v56, %v5052_v4  ;;  %v13066_v4 = vld [vmem:[#allocation85_spill] sm:$0xff] }
 0x5e3   :  { %v5790_v8 = vpack.c.bf16 %v5590_v28, %v5582_v43 }
 0x5e4   :  { %v11617_v59 = vpop.f32.mrf.mxu0  ;;  %v6812_v29 = vpop.f32.mrf.mxu1  ;;  %v5367_v50 = vadd.f32 %v11398_v52, %v5069_v10  ;;  %v5359_v28 = vadd.f32 %v11398_v52, %v5061_v6  ;;  %v5606_v10 = vmax.f32 %v5350_v33, 0.0 }
 0x5e5   :  { %v11627_v34 = vadd.f32 %v6812_v29, %v6811_v27  ;;  %v5044_v27 = vmul.f32 %v11409_v54, %v4796_v26  ;;  %v4810_v29 = vadd.f32 %v11488_v3, %v13063_v49 }
 0x5e6   :  { %v11625_v20 = vpop.f32.mrf.mxu0  ;;  %6516 = vmatmul.mubr.bf16.gmra.mxu0 %v5782_v24  ;;  %v6814_v38 = vpop.f32.mrf.mxu1  ;;  %v5599_v24 = vmax.f32 %v5343_v18, 0.0 }
 0x5e7   :  { %6523 = vmatprep.mubr.bf16.mxu0 %v5791_v63  ;;  %v13064_v63 = vld [vmem:[#allocation77_spill] sm:$0xff]  ;;  %v5342_v26 = vadd.f32 %v11425_v56, %v5044_v27  ;;  %v5623_v27 = vmax.f32 %v5367_v50, 0.0 }
 0x5e8   :  { %v11633_v61 = vpop.f32.mrf.mxu0  ;;  %v6815_v44 = vpop.f32.mrf.mxu1  ;;  %v4822_v23 = vadd.f32 %v11528_v13, %v13064_v63  ;;  %v5799_v2 = vpack.c.bf16 %v5607_v17, %v5599_v24  ;;  %v5068_v13 = vmul.f32 %v11409_v54, %v4810_v29  ;;  %v13067_v63 = vld [vmem:[#allocation76_spill] sm:$0xff] }
 0x5e9   :  { %v11639_v25 = vadd.f32 %v6815_v44, %v6814_v38  ;;  %v13065_v38 = vld [vmem:[#allocation92_spill] sm:$0xff]  ;;  %v4818_v44 = vadd.f32 %v11514_v41, %v13066_v4  ;;  %v5598_v24 = vmax.f32 %v5342_v26, 0.0 }
 0x5ea   :  { %v11637_v47 = vpop.f32.mrf.mxu0  ;;  %v6817_v62 = vpop.f32.mrf.mxu1  ;;  %v4806_v18 = vadd.f32 %v11476_v16, %v13065_v38  ;;  %v5085_v16 = vmul.f32 %v11382_v12, %v4822_v23  ;;  %v5366_v29 = vadd.f32 %v11425_v56, %v5068_v13  ;;  %v13068_v38 = vld [vmem:[#allocation86_spill] sm:$0xff] }
 0x5eb   :  { %v5077_v41 = vmul.f32 %v11382_v12, %v4818_v44  ;;  %v5798_v33 = vpack.c.bf16 %v5606_v10, %v5598_v24  ;;  %v4832_v50 = vadd.f32 %v11558_v14, %v13068_v38  ;;  %v13070_v10 = vld [vmem:[#allocation114_spill] sm:$0xff] }
 0x5ec   :  { %v11645_v40 = vpop.f32.mrf.mxu0  ;;  %v6818_v37 = vpop.f32.mrf.mxu1  ;;  %v4828_v13 = vadd.f32 %v11544_v31, %v13070_v10 }
 0x5ed   :  { %v11655_v53 = vadd.f32 %v6818_v37, %v6817_v62  ;;  %v5060_v62 = vmul.f32 %v11409_v54, %v4806_v18  ;;  %v5615_v37 = vmax.f32 %v5359_v28, 0.0  ;;  %v5383_v18 = vadd.f32 %v11398_v52, %v5085_v16  ;;  %v13069_v28 = vld [vmem:[#allocation96_spill] sm:$0xff] }
 0x5ee   :  { %v11653_v32 = vpop.f32.mrf.mxu0  ;;  %6524 = vmatmul.mubr.bf16.gmra.mxu0 %v5790_v8  ;;  %v6820_v3 = vpop.f32.mrf.mxu1  ;;  %v4816_v44 = vadd.f32 %v11506_v39, %v13069_v28  ;;  %v5375_v24 = vadd.f32 %v11398_v52, %v5077_v41  ;;  %v13073_v28 = vld [vmem:[#allocation38_spill] sm:$0xff] }
 0x5ef   :  { %6531 = vmatprep.mubr.bf16.mxu0 %v5799_v2  ;;  %v4820_v2 = vadd.f32 %v11518_v55, %v13067_v63  ;;  %v5358_v4 = vadd.f32 %v11425_v56, %v5060_v62  ;;  %v5622_v63 = vmax.f32 %v5366_v29, 0.0 }
 0x5f0   :  { %v11661_v17 = vpop.f32.mrf.mxu0  ;;  %v6821_v43 = vpop.f32.mrf.mxu1  ;;  %v5076_v31 = vmul.f32 %v11409_v54, %v4816_v44  ;;  %v13074_v44 = vld [vmem:[#allocation80_spill] sm:$0xff] }
 0x5f1   :  { %v11667_v49 = vadd.f32 %v6821_v43, %v6820_v3  ;;  %v5807_v3 = vpack.c.bf16 %v5623_v27, %v5615_v37  ;;  %v5084_v16 = vmul.f32 %v11409_v54, %v4820_v2  ;;  %v5101_v27 = vmul.f32 %v11382_v12, %v4832_v50 }
 0x5f2   :  { %v11665_v8 = vpop.f32.mrf.mxu0  ;;  %v6823_v6 = vpop.f32.mrf.mxu1  ;;  %v5639_v37 = vmax.f32 %v5383_v18, 0.0  ;;  %v5614_v38 = vmax.f32 %v5358_v4, 0.0  ;;  %v4830_v50 = vadd.f32 %v11548_v42, %v13073_v28 }
 0x5f3   :  { %v5382_v2 = vadd.f32 %v11425_v56, %v5084_v16  ;;  %v5399_v10 = vadd.f32 %v11398_v52, %v5101_v27  ;;  %v13077_v27 = vld [vmem:[#allocation93_spill] sm:$0xff] }
 0x5f4   :  { %v11675_v23 = vpop.f32.mrf.mxu0  ;;  %v6824_v26 = vpop.f32.mrf.mxu1  ;;  %v5806_v29 = vpack.c.bf16 %v5622_v63, %v5614_v38  ;;  %v4838_v28 = vadd.f32 %v11574_v19, %v13077_v27 }
 0x5f5   :  { %v11685_v55 = vadd.f32 %v6824_v26, %v6823_v6  ;;  %v5093_v6 = vmul.f32 %v11382_v12, %v4828_v13  ;;  %v4842_v13 = vadd.f32 %v11588_v7, %v13074_v44  ;;  %v5100_v7 = vmul.f32 %v11409_v54, %v4830_v50 }
 0x5f6   :  { %v11683_v43 = vpop.f32.mrf.mxu0  ;;  %6532 = vmatmul.mubr.bf16.gmra.mxu0 %v5798_v33  ;;  %v6826_v14 = vpop.f32.mrf.mxu1  ;;  %v5109_v19 = vmul.f32 %v11382_v12, %v4838_v28 }
 0x5f7   :  { %13071 = vst [vmem:[#allocation26_spill] sm:$0xff] %v11685_v55  ;;  %6539 = vmatprep.mubr.bf16.mxu0 %v5807_v3  ;;  %v5631_v3 = vmax.f32 %v5375_v24, 0.0  ;;  %v5391_v63 = vadd.f32 %v11398_v52, %v5093_v6  ;;  %v5117_v44 = vmul.f32 %v11382_v12, %v4842_v13  ;;  %v5398_v27 = vadd.f32 %v11425_v56, %v5100_v7 }
 0x5f8   :  { %v11690_v62 = vpop.f32.mrf.mxu0  ;;  %v6827_v39 = vpop.f32.mrf.mxu1 }
 0x5f9   :  { %v11696_v33 = vadd.f32 %v6827_v39, %v6826_v14  ;;  %v5815_v55 = vpack.c.bf16 %v5639_v37, %v5631_v3  ;;  %v5374_v14 = vadd.f32 %v11425_v56, %v5076_v31  ;;  %v13075_v39 = vld [vmem:[#allocation51_spill] sm:$0xff]  ;;  %v5655_v31 = vmax.f32 %v5399_v10, 0.0  ;;  %v13080_v10 = vld [vmem:[#allocation90_spill] sm:$0xff] }
 0x5fa   :  { %v11694_v26 = vpop.f32.mrf.mxu0  ;;  %v6829_v41 = vpop.f32.mrf.mxu1  ;;  %v4826_v24 = vadd.f32 %v11536_v0, %v13075_v39  ;;  %v4840_v13 = vadd.f32 %v11578_v15, %v13080_v10  ;;  %v5407_v15 = vadd.f32 %v11398_v52, %v5109_v19 }
 0x5fb   :  { %13072 = vst [vmem:[#allocation37_spill] sm:$0xff] %v11696_v33  ;;  %v5638_v33 = vmax.f32 %v5382_v2, 0.0  ;;  %v5630_v6 = vmax.f32 %v5374_v14, 0.0  ;;  %v5415_v14 = vadd.f32 %v11398_v52, %v5117_v44  ;;  %v13084_v44 = vld [vmem:[#allocation30_spill] sm:$0xff] }
 0x5fc   :  { %v11702_v18 = vpop.f32.mrf.mxu0  ;;  %v6830_v4 = vpop.f32.mrf.mxu1 }
 0x5fd   :  { %v11710_v16 = vadd.f32 %v6830_v4, %v6829_v41  ;;  %v5092_v41 = vmul.f32 %v11409_v54, %v4826_v24  ;;  %v5814_v50 = vpack.c.bf16 %v5638_v33, %v5630_v6  ;;  %v13081_v24 = vld [vmem:[#allocation82_spill] sm:$0xff] }
 0x5fe   :  { %v6881_v38 = vpop.f32.mrf.mxu0  ;;  %6540 = vmatmul.mubr.bf16.gmra.mxu0 %v5806_v29  ;;  %v6832_v42 = vpop.f32.mrf.mxu1  ;;  %v5647_v29 = vmax.f32 %v5391_v63, 0.0  ;;  %v4852_v63 = vadd.f32 %v11617_v59, %v13081_v24  ;;  %v5654_v59 = vmax.f32 %v5398_v27, 0.0 }
 0x5ff   :  { %13076 = vst [vmem:[#allocation56_spill] sm:$0xff] %v11710_v16  ;;  %6547 = vmatprep.mubr.bf16.mxu0 %v5815_v55  ;;  %v13079_v55 = vld [vmem:[#allocation27_spill] sm:$0xff]  ;;  %v5390_v28 = vadd.f32 %v11425_v56, %v5092_v41 }
 0x600   :  { %v6882_v37 = vpop.f32.mrf.mxu0  ;;  %v6833_v3 = vpop.f32.mrf.mxu1  ;;  %v5133_v10 = vmul.f32 %v11382_v12, %v4852_v63 }
 0x601   :  { %v6883_v0 = vadd.f32 %v6882_v37, %v6881_v38  ;;  %v11716_v39 = vadd.f32 %v6833_v3, %v6832_v42  ;;  %v5823_v37 = vpack.c.bf16 %v5655_v31, %v5647_v29 }
 0x602   :  { %v6884_v4 = vpop.f32.mrf.mxu0  ;;  %v6835_v16 = vpop.f32.mrf.mxu1 }
 0x603   :  { %13078 = vst [vmem:[#allocation44_spill] sm:$0xff] %v11716_v39  ;;  %v11721_v2 = vadd.f32 %v6883_v0, %v13079_v55  ;;  %v13082_v0 = vld [vmem:[#allocation78_spill] sm:$0xff]  ;;  %v13083_v55 = vld [vmem:[#allocation87_spill] sm:$0xff] }
 0x604   :  { %v6885_v38 = vpop.f32.mrf.mxu0  ;;  %v6836_v42 = vpop.f32.mrf.mxu1  ;;  %v4836_v33 = vadd.f32 %v11566_v60, %v13082_v0  ;;  %v4848_v31 = vadd.f32 %v11604_v1, %v13083_v55  ;;  %v5663_v0 = vmax.f32 %v5407_v15, 0.0  ;;  %v13085_v55 = vld [vmem:[#allocation97_spill] sm:$0xff] }
 0x605   :  { %v6886_v3 = vadd.f32 %v6885_v38, %v6884_v4  ;;  %v11729_v39 = vadd.f32 %v6836_v42, %v6835_v16  ;;  %v5116_v16 = vmul.f32 %v11409_v54, %v4840_v13  ;;  %v5646_v42 = vmax.f32 %v5390_v28, 0.0 }
 0x606   :  { %v6887_v7 = vpop.f32.mrf.mxu0  ;;  %6548 = vmatmul.mubr.bf16.gmra.mxu0 %v5814_v50  ;;  %v6838_v6 = vpop.f32.mrf.mxu1  ;;  %v5671_v50 = vmax.f32 %v5415_v14, 0.0  ;;  %v5108_v19 = vmul.f32 %v11409_v54, %v4836_v33  ;;  %v4850_v63 = vadd.f32 %v11608_v51, %v13085_v55  ;;  %v5431_v33 = vadd.f32 %v11398_v52, %v5133_v10 }
 0x607   :  { %v11738_v29 = vadd.f32 %v6886_v3, %v13084_v44  ;;  %6555 = vmatprep.mubr.bf16.mxu0 %v5823_v37  ;;  %v5125_v3 = vmul.f32 %v11382_v12, %v4848_v31  ;;  %v5822_v13 = vpack.c.bf16 %v5654_v59, %v5646_v42  ;;  %v5414_v37 = vadd.f32 %v11425_v56, %v5116_v16  ;;  %v13088_v16 = vld [vmem:[#allocation94_spill] sm:$0xff] }
 0x608   :  { %v6888_v4 = vpop.f32.mrf.mxu0  ;;  %v6839_v41 = vpop.f32.mrf.mxu1  ;;  %v5831_v31 = vpack.c.bf16 %v5671_v50, %v5663_v0  ;;  %v5132_v50 = vmul.f32 %v11409_v54, %v4850_v63 }
 0x609   :  { %v6889_v60 = vadd.f32 %v6888_v4, %v6887_v7  ;;  %v11742_v38 = vadd.f32 %v6839_v41, %v6838_v6  ;;  %v13086_v7 = vld [vmem:[#allocation84_spill] sm:$0xff]  ;;  %v13087_v4 = vld [vmem:[#allocation81_spill] sm:$0xff]  ;;  %v4858_v41 = vadd.f32 %v11633_v61, %v13088_v16  ;;  %v5670_v10 = vmax.f32 %v5414_v37, 0.0 }
 0x60a   :  { %v6890_v24 = vpop.f32.mrf.mxu0  ;;  %v6841_v1 = vpop.f32.mrf.mxu1  ;;  %v4862_v14 = vadd.f32 %v11645_v40, %v13086_v7  ;;  %v4846_v59 = vadd.f32 %v11596_v45, %v13087_v4  ;;  %v5423_v40 = vadd.f32 %v11398_v52, %v5125_v3  ;;  %v5687_v61 = vmax.f32 %v5431_v33, 0.0  ;;  %v13090_v4 = vld [vmem:[#allocation20_spill] sm:$0xff] }
 0x60b   :  { %v11747_v27 = vadd.f32 %v6889_v60, %v11447_v48  ;;  %v5406_v48 = vadd.f32 %v11425_v56, %v5108_v19  ;;  %v5141_v3 = vmul.f32 %v11382_v12, %v4858_v41 }
 0x60c   :  { %v6891_v28 = vpop.f32.mrf.mxu0  ;;  %v6842_v6 = vpop.f32.mrf.mxu1  ;;  %v5149_v19 = vmul.f32 %v11382_v12, %v4862_v14  ;;  %v5430_v14 = vadd.f32 %v11425_v56, %v5132_v50 }
 0x60d   :  { %v6892_v44 = vadd.f32 %v6891_v28, %v6890_v24  ;;  %v11755_v15 = vadd.f32 %v6842_v6, %v6841_v1  ;;  %v5662_v55 = vmax.f32 %v5406_v48, 0.0  ;;  %v5679_v28 = vmax.f32 %v5423_v40, 0.0  ;;  %v13089_v6 = vld [vmem:[#allocation98_spill] sm:$0xff] }
 0x60e   :  { %v6893_v51 = vpop.f32.mrf.mxu0  ;;  %6556 = vmatmul.mubr.bf16.gmra.mxu0 %v5822_v13  ;;  %v6844_v60 = vpop.f32.mrf.mxu1  ;;  %v5124_v13 = vmul.f32 %v11409_v54, %v4846_v59  ;;  %v4872_v59 = vadd.f32 %v11675_v23, %v13090_v4  ;;  %v5686_v23 = vmax.f32 %v5430_v14, 0.0 }
 0x60f   :  { %v11764_v42 = vadd.f32 %v6892_v44, %v11460_v46  ;;  %6563 = vmatprep.mubr.bf16.mxu0 %v5831_v31  ;;  %v5830_v63 = vpack.c.bf16 %v5670_v10, %v5662_v55  ;;  %v4860_v44 = vadd.f32 %v11637_v47, %v13089_v6  ;;  %v5447_v31 = vadd.f32 %v11398_v52, %v5149_v19  ;;  %v13092_v19 = vld [vmem:[#allocation17_spill] sm:$0xff] }
 0x610   :  { %v6894_v24 = vpop.f32.mrf.mxu0  ;;  %v6845_v1 = vpop.f32.mrf.mxu1  ;;  %v5439_v10 = vadd.f32 %v11398_v52, %v5141_v3 }
 0x611   :  { %v6895_v45 = vadd.f32 %v6894_v24, %v6893_v51  ;;  %v11768_v0 = vadd.f32 %v6845_v1, %v6844_v60  ;;  %v5839_v51 = vpack.c.bf16 %v5687_v61, %v5679_v28  ;;  %v13091_v60 = vld [vmem:[#allocation83_spill] sm:$0xff]  ;;  %v4868_v24 = vadd.f32 %v11661_v17, %v13092_v19 }
 0x612   :  { %v6896_v7 = vpop.f32.mrf.mxu0  ;;  %v6847_v46 = vpop.f32.mrf.mxu1  ;;  %v4856_v40 = vadd.f32 %v11625_v20, %v13091_v60  ;;  %v5165_v20 = vmul.f32 %v11382_v12, %v4872_v59 }
 0x613   :  { %v11773_v37 = vadd.f32 %v6895_v45, %v11478_v11  ;;  %v5422_v11 = vadd.f32 %v11425_v56, %v5124_v13  ;;  %v5148_v45 = vmul.f32 %v11409_v54, %v4860_v44  ;;  %v5703_v13 = vmax.f32 %v5447_v31, 0.0  ;;  %v13093_v31 = vld [vmem:[#allocation24_spill] sm:$0xff] }
 0x614   :  { %v6897_v33 = vpop.f32.mrf.mxu0  ;;  %v6848_v48 = vpop.f32.mrf.mxu1  ;;  %v5140_v28 = vmul.f32 %v11409_v54, %v4856_v40 }
 0x615   :  { %v6898_v16 = vadd.f32 %v6897_v33, %v6896_v7  ;;  %v11781_v41 = vadd.f32 %v6848_v48, %v6847_v46  ;;  %v5678_v46 = vmax.f32 %v5422_v11, 0.0  ;;  %v5446_v33 = vadd.f32 %v11425_v56, %v5148_v45  ;;  %v13094_v11 = vld [vmem:[#allocation35_spill] sm:$0xff] }
 0x616   :  { %v6899_v50 = vpop.f32.mrf.mxu0  ;;  %6564 = vmatmul.mubr.bf16.gmra.mxu0 %v5830_v63  ;;  %v6850_v47 = vpop.f32.mrf.mxu1  ;;  %v5695_v63 = vmax.f32 %v5439_v10, 0.0  ;;  %v4870_v48 = vadd.f32 %v11665_v8, %v13093_v31  ;;  %v4882_v60 = vadd.f32 %v11702_v18, %v13094_v11 }
 0x617   :  { %v11790_v1 = vadd.f32 %v6898_v16, %v11490_v21  ;;  %6571 = vmatprep.mubr.bf16.mxu0 %v5839_v51  ;;  %v5157_v21 = vmul.f32 %v11382_v12, %v4868_v24  ;;  %v5838_v44 = vpack.c.bf16 %v5686_v23, %v5678_v46  ;;  %v5463_v51 = vadd.f32 %v11398_v52, %v5165_v20  ;;  %v13096_v23 = vld [vmem:[#allocation99_spill] sm:$0xff] }
 0x618   :  { %v6900_v61 = vpop.f32.mrf.mxu0  ;;  %v6851_v55 = vpop.f32.mrf.mxu1  ;;  %v5847_v16 = vpack.c.bf16 %v5703_v13, %v5695_v63  ;;  %v4878_v45 = vadd.f32 %v11690_v62, %v13096_v23  ;;  %v5702_v18 = vmax.f32 %v5446_v33, 0.0 }
 0x619   :  { %v6901_v7 = vadd.f32 %v6900_v61, %v6899_v50  ;;  %v11794_v3 = vadd.f32 %v6851_v55, %v6850_v47  ;;  %v13095_v50 = vld [vmem:[#allocation34_spill] sm:$0xff]  ;;  %v5455_v8 = vadd.f32 %v11398_v52, %v5157_v21  ;;  %v5164_v55 = vmul.f32 %v11409_v54, %v4870_v48  ;;  %v13097_v48 = vld [vmem:[#allocation104_spill] sm:$0xff] }
 0x61a   :  { %v6902_v17 = vpop.f32.mrf.mxu0  ;;  %v6853_v6 = vpop.f32.mrf.mxu1  ;;  %v4866_v47 = vadd.f32 %v11653_v32, %v13095_v50 }
 0x61b   :  { %v11799_v14 = vadd.f32 %v6901_v7, %v11508_v36  ;;  %v5438_v36 = vadd.f32 %v11425_v56, %v5140_v28  ;;  %v5181_v7 = vmul.f32 %v11382_v12, %v4882_v60  ;;  %v5719_v28 = vmax.f32 %v5463_v51, 0.0 }
 0x61c   :  { %v6903_v4 = vpop.f32.mrf.mxu0  ;;  %v6854_v59 = vpop.f32.mrf.mxu1  ;;  %v5711_v21 = vmax.f32 %v5455_v8, 0.0  ;;  %v5462_v31 = vadd.f32 %v11425_v56, %v5164_v55 }
 0x61d   :  { %v6904_v40 = vadd.f32 %v6903_v4, %v6902_v17  ;;  %v11807_v10 = vadd.f32 %v6854_v59, %v6853_v6  ;;  %v5694_v63 = vmax.f32 %v5438_v36, 0.0  ;;  %v5156_v17 = vmul.f32 %v11409_v54, %v4866_v47 }
 0x61e   :  { %v6905_v19 = vpop.f32.mrf.mxu0  ;;  %6572 = vmatmul.mubr.bf16.gmra.mxu0 %v5838_v44  ;;  %v6856_v24 = vpop.f32.mrf.mxu1  ;;  %v4880_v4 = vadd.f32 %v11694_v26, %v13097_v48  ;;  %v5479_v51 = vadd.f32 %v11398_v52, %v5181_v7 }
 0x61f   :  { %v11816_v61 = vadd.f32 %v6904_v40, %v11520_v5  ;;  %6579 = vmatprep.mubr.bf16.mxu0 %v5847_v16  ;;  %v5173_v5 = vmul.f32 %v11382_v12, %v4878_v45  ;;  %v5846_v33 = vpack.c.bf16 %v5702_v18, %v5694_v63  ;;  %v5855_v40 = vpack.c.bf16 %v5719_v28, %v5711_v21  ;;  %v13098_v12 = vld [vmem:[#allocation36_spill] sm:$0xff] }
 0x620   :  { %v6906_v13 = vpop.f32.mrf.mxu0  ;;  %v6857_v20 = vpop.f32.mrf.mxu1  ;;  %v5454_v36 = vadd.f32 %v11425_v56, %v5156_v17  ;;  %v5180_v8 = vmul.f32 %v11409_v54, %v4880_v4 }
 0x621   :  { %v6907_v32 = vadd.f32 %v6906_v13, %v6905_v19  ;;  %v11820_v46 = vadd.f32 %v6857_v20, %v6856_v24  ;;  %v5471_v19 = vadd.f32 %v11398_v52, %v5173_v5  ;;  %v5718_v24 = vmax.f32 %v5462_v31, 0.0 }
 0x622   :  { %v6908_v6 = vpop.f32.mrf.mxu0  ;;  %v6859_v62 = vpop.f32.mrf.mxu1  ;;  %v5735_v13 = vmax.f32 %v5479_v51, 0.0  ;;  %v5710_v20 = vmax.f32 %v5454_v36, 0.0  ;;  %v5478_v63 = vadd.f32 %v11425_v56, %v5180_v8 }
 0x623   :  { %v11825_v44 = vadd.f32 %v6907_v32, %v11538_v57  ;;  %v4876_v57 = vadd.f32 %v11683_v43, %v13098_v12  ;;  %v5727_v52 = vmax.f32 %v5471_v19, 0.0 }
 0x624   :  { %v6909_v59 = vpop.f32.mrf.mxu0  ;;  %v6860_v16 = vpop.f32.mrf.mxu1  ;;  %v5854_v28 = vpack.c.bf16 %v5718_v24, %v5710_v20 }
 0x625   :  { %v6910_v11 = vadd.f32 %v6909_v59, %v6908_v6  ;;  %v11831_v60 = vadd.f32 %v6860_v16, %v6859_v62  ;;  %v5172_v43 = vmul.f32 %v11409_v54, %v4876_v57  ;;  %v5863_v21 = vpack.c.bf16 %v5735_v13, %v5727_v52 }
 0x626   :  { %v6911_v50 = vpop.f32.mrf.mxu0  ;;  %6580 = vmatmul.mubr.bf16.gmra.mxu0 %v5846_v33  ;;  %v6862_v47 = vpop.f32.mrf.mxu1 }
 0x627   :  { %v11838_v26 = vadd.f32 %v6910_v11, %v11550_v30  ;;  %6587 = vmatprep.mubr.bf16.mxu0 %v5855_v40  ;;  %v5470_v5 = vadd.f32 %v11425_v56, %v5172_v43 }
 0x628   :  { %v6912_v23 = vpop.f32.mrf.mxu0  ;;  %v6863_v45 = vpop.f32.mrf.mxu1 }
 0x629   :  { %v6913_v18 = vadd.f32 %v6912_v23, %v6911_v50  ;;  %v11841_v55 = vadd.f32 %v6863_v45, %v6862_v47  ;;  %v5726_v16 = vmax.f32 %v5470_v5, 0.0 }
 0x62a   :  { %v6914_v7 = vpop.f32.mrf.mxu0  ;;  %v11844_v32 = vpop.f32.mrf.mxu1 }
 0x62b   :  { %v11847_v30 = vadd.f32 %v6913_v18, %v11568_v22  ;;  %v5734_v22 = vmax.f32 %v5478_v63, 0.0 }
 0x62c   :  { %v6915_v17 = vpop.f32.mrf.mxu0  ;;  %v11850_v6 = vpop.f32.mrf.mxu1 }
 0x62d   :  { %v6916_v62 = vadd.f32 %v6915_v17, %v6914_v7  ;;  %v5862_v56 = vpack.c.bf16 %v5734_v22, %v5726_v16 }
 0x62e   :  { %v6917_v33 = vpop.f32.mrf.mxu0  ;;  %6588 = vmatmul.mubr.bf16.gmra.mxu0 %v5854_v28  ;;  %v11853_v54 = vpop.f32.mrf.mxu1 }
 0x62f   :  { %v11856_v31 = vadd.f32 %v6916_v62, %v11580_v58  ;;  %6595 = vmatprep.mubr.bf16.mxu0 %v5863_v21 }
 0x630   :  { %v6918_v48 = vpop.f32.mrf.mxu0  ;;  %v11858_v4 = vpop.f32.mrf.mxu1 }
 0x631   :  { %v6919_v59 = vadd.f32 %v6918_v48, %v6917_v33 }
 0x632   :  { %v6920_v51 = vpop.f32.mrf.mxu0  ;;  %v11860_v11 = vpop.f32.mrf.mxu1 }
 0x633   :  { %v11863_v40 = vadd.f32 %v6919_v59, %v11598_v9 }
 0x634   :  { %v6921_v36 = vpop.f32.mrf.mxu0  ;;  %v11865_v12 = vpop.f32.mrf.mxu1 }
 0x635   :  { %v6922_v57 = vadd.f32 %v6921_v36, %v6920_v51 }
 0x636   :  { %v6923_v58 = vpop.f32.mrf.mxu0  ;;  %6596 = vmatmul.mubr.bf16.gmra.mxu0 %v5862_v56  ;;  %v11867_v50 = vpop.f32.mrf.mxu1 }
 0x637   :  { %v11870_v47 = vadd.f32 %v6922_v57, %v11610_v35  ;;  %v13103_v57 = vld [vmem:[#allocation26_spill] sm:$0xff] }
 0x638   :  { %v6924_v19 = vpop.f32.mrf.mxu0  ;;  %v11872_v24 = vpop.f32.mrf.mxu1 }
 0x639   :  { %v6925_v8 = vadd.f32 %v6924_v19, %v6923_v58 }
 0x63a   :  { %v6926_v23 = vpop.f32.mrf.mxu0  ;;  %v11874_v45 = vpop.f32.mrf.mxu1 }
 0x63b   :  { %v11877_v9 = vadd.f32 %v6925_v8, %v11627_v34 }
 0x63c   :  { %v6927_v18 = vpop.f32.mrf.mxu0  ;;  %v11879_v13 = vpop.f32.mrf.mxu1 }
 0x63d   :  { %13099 = vst [vmem:[#allocation55_spill] sm:$0xff] %v11877_v9  ;;  %v6928_v20 = vadd.f32 %v6927_v18, %v6926_v23 }
 0x63e   :  { %v6929_v43 = vpop.f32.mrf.mxu0  ;;  %v11881_v7 = vpop.f32.mrf.mxu1 }
 0x63f   :  { %v11884_v35 = vadd.f32 %v6928_v20, %v11639_v25  ;;  %v13105_v20 = vld [vmem:[#allocation37_spill] sm:$0xff] }
 0x640   :  { %v6930_v52 = vpop.f32.mrf.mxu0  ;;  %v11886_v28 = vpop.f32.mrf.mxu1 }
 0x641   :  { %13100 = vst [vmem:[#allocation28_spill] sm:$0xff] %v11884_v35  ;;  %v6931_v63 = vadd.f32 %v6930_v52, %v6929_v43 }
 0x642   :  { %v6932_v17 = vpop.f32.mrf.mxu0  ;;  %v11888_v62 = vpop.f32.mrf.mxu1 }
 0x643   :  { %v11891_v34 = vadd.f32 %v6931_v63, %v11655_v53 }
 0x644   :  { %v6933_v21 = vpop.f32.mrf.mxu0  ;;  %v11893_v5 = vpop.f32.mrf.mxu1 }
 0x645   :  { %13101 = vst [vmem:[#allocation32_spill] sm:$0xff] %v11891_v34  ;;  %v6934_v33 = vadd.f32 %v6933_v21, %v6932_v17 }
 0x646   :  { %v6935_v22 = vpop.f32.mrf.mxu0  ;;  %v11895_v48 = vpop.f32.mrf.mxu1 }
 0x647   :  { %v11898_v25 = vadd.f32 %v6934_v33, %v11667_v49  ;;  %v13107_v33 = vld [vmem:[#allocation56_spill] sm:$0xff] }
 0x648   :  { %v6936_v59 = vpop.f32.mrf.mxu0  ;;  %v11900_v16 = vpop.f32.mrf.mxu1 }
 0x649   :  { %13102 = vst [vmem:[#allocation41_spill] sm:$0xff] %v11898_v25  ;;  %v6937_v51 = vadd.f32 %v6936_v59, %v6935_v22 }
 0x64a   :  { %v6938_v56 = vpop.f32.mrf.mxu0  ;;  %v11902_v36 = vpop.f32.mrf.mxu1 }
 0x64b   :  { %v11905_v53 = vadd.f32 %v6937_v51, %v13103_v57 }
 0x64c   :  { %v6939_v58 = vpop.f32.mrf.mxu0  ;;  %v11907_v19 = vpop.f32.mrf.mxu1 }
 0x64d   :  { %13104 = vst [vmem:[#allocation88_spill] sm:$0xff] %v11905_v53  ;;  %v6940_v8 = vadd.f32 %v6939_v58, %v6938_v56  ;;  %v13109_v53 = vld [vmem:[#allocation44_spill] sm:$0xff] }
 0x64e   :  { %v6941_v23 = vpop.f32.mrf.mxu0  ;;  %v11909_v18 = vpop.f32.mrf.mxu1 }
 0x64f   :  { %v11912_v49 = vadd.f32 %v6940_v8, %v13105_v20 }
 0x650   :  { %v6942_v43 = vpop.f32.mrf.mxu0  ;;  %v11914_v52 = vpop.f32.mrf.mxu1 }
 0x651   :  { %13106 = vst [vmem:[#allocation31_spill] sm:$0xff] %v11912_v49  ;;  %v6943_v63 = vadd.f32 %v6942_v43, %v6941_v23 }
 0x652   :  { %v6944_v17 = vpop.f32.mrf.mxu0  ;;  %v11916_v21 = vpop.f32.mrf.mxu1 }
 0x653   :  { %v11919_v22 = vadd.f32 %v6943_v63, %v13107_v33 }
 0x654   :  { %v6945_v59 = vpop.f32.mrf.mxu0  ;;  %v11921_v51 = vpop.f32.mrf.mxu1 }
 0x655   :  { %13108 = vst [vmem:[#allocation19_spill] sm:$0xff] %v11919_v22  ;;  %v6946_v56 = vadd.f32 %v6945_v59, %v6944_v17 }
 0x656   :  { %v6947_v57 = vpop.f32.mrf.mxu0  ;;  %v11923_v58 = vpop.f32.mrf.mxu1 }
 0x657   :  { %v11926_v8 = vadd.f32 %v6946_v56, %v13109_v53 }
 0x658   :  { %v6948_v20 = vpop.f32.mrf.mxu0  ;;  %v11928_v49 = vpop.f32.mrf.mxu1 }
 0x659   :  { %13110 = vst [vmem:[#allocation45_spill] sm:$0xff] %v11926_v8  ;;  %v6949_v23 = vadd.f32 %v6948_v20, %v6947_v57 }
 0x65a   :  { %v6950_v43 = vpop.f32.mrf.mxu0  ;;  %v11930_v25 = vpop.f32.mrf.mxu1 }
 0x65b   :  { %v11933_v63 = vadd.f32 %v6949_v23, %v11729_v39 }
 0x65c   :  { %v6951_v33 = vpop.f32.mrf.mxu0  ;;  %v11935_v17 = vpop.f32.mrf.mxu1 }
 0x65d   :  { %13111 = vst [vmem:[#allocation22_spill] sm:$0xff] %v11933_v63  ;;  %v6952_v22 = vadd.f32 %v6951_v33, %v6950_v43 }
 0x65e   :  { %v6953_v34 = vpop.f32.mrf.mxu0  ;;  %v11940_v8 = vpop.f32.mrf.mxu1 }
 0x65f   :  { %v11938_v59 = vadd.f32 %v6952_v22, %v11742_v38 }
 0x660   :  { %v6954_v53 = vpop.f32.mrf.mxu0  ;;  %v11945_v39 = vpop.f32.mrf.mxu1 }
 0x661   :  { %13112 = vst [vmem:[#allocation33_spill] sm:$0xff] %v11938_v59  ;;  %v6955_v56 = vadd.f32 %v6954_v53, %v6953_v34 }
 0x662   :  { %v6956_v35 = vpop.f32.mrf.mxu0  ;;  %v11950_v38 = vpop.f32.mrf.mxu1 }
 0x663   :  { %v11943_v57 = vadd.f32 %v6955_v56, %v11755_v15 }
 0x664   :  { %v6957_v20 = vpop.f32.mrf.mxu0  ;;  %v11955_v15 = vpop.f32.mrf.mxu1 }
 0x665   :  { %13113 = vst [vmem:[#allocation29_spill] sm:$0xff] %v11943_v57  ;;  %v6958_v9 = vadd.f32 %v6957_v20, %v6956_v35 }
 0x666   :  { %v6959_v23 = vpop.f32.mrf.mxu0 }
 0x667   :  { %v11948_v43 = vadd.f32 %v6958_v9, %v11768_v0  ;;  %v11960_v0 = vpop.f32.mrf.mxu1 }
 0x668   :  { %v6960_v33 = vpop.f32.mrf.mxu0 }
 0x669   :  { %13114 = vst [vmem:[#allocation49_spill] sm:$0xff] %v11948_v43  ;;  %v6961_v63 = vadd.f32 %v6960_v33, %v6959_v23 }
 0x66a   :  { %v6962_v22 = vpop.f32.mrf.mxu0 }
 0x66b   :  { %v11953_v34 = vadd.f32 %v6961_v63, %v11781_v41  ;;  %v11965_v41 = vpop.f32.mrf.mxu1 }
 0x66c   :  { %v6963_v53 = vpop.f32.mrf.mxu0 }
 0x66d   :  { %13115 = vst [vmem:[#allocation60_spill] sm:$0xff] %v11953_v34  ;;  %v6964_v59 = vadd.f32 %v6963_v53, %v6962_v22 }
 0x66e   :  { %v6965_v56 = vpop.f32.mrf.mxu0 }
 0x66f   :  { %v11958_v35 = vadd.f32 %v6964_v59, %v11794_v3  ;;  %v11970_v3 = vpop.f32.mrf.mxu1 }
 0x670   :  { %v6966_v20 = vpop.f32.mrf.mxu0 }
 0x671   :  { %v6967_v57 = vadd.f32 %v6966_v20, %v6965_v56 }
 0x672   :  { %v6968_v9 = vpop.f32.mrf.mxu0 }
 0x673   :  { %v11963_v23 = vadd.f32 %v6967_v57, %v11807_v10  ;;  %v6995_v10 = vadd.f32 %v11850_v6, %v11844_v32  ;;  %v11990_v32 = vld [vmem:[%s12196_s13] ss:$0 sm:$0xff]  ;;  %s7365_s13 = smov [#allocation11]  }
 0x674   :  { %v6969_v33 = vpop.f32.mrf.mxu0 }
 0x675   :  { %13116 = vst [vmem:[#allocation62_spill] sm:$0xff] %v11963_v23  ;;  %v6970_v43 = vadd.f32 %v6969_v33, %v6968_v9  ;;  %v11977_v9 = vpop.f32.mrf.mxu1 }
 0x676   :  { %v6971_v63 = vpop.f32.mrf.mxu0 }
 0x677   :  { %v11968_v22 = vadd.f32 %v6970_v43, %v11820_v46  ;;  %v6317_v43 = vadd.f32 %v6995_v10, %v11721_v2 }
 0x678   :  { %v6972_v53 = vpop.f32.mrf.mxu0 }
 0x679   :  { %v6973_v34 = vadd.f32 %v6972_v53, %v6971_v63  ;;  %v6998_v63 = vadd.f32 %v11858_v4, %v11853_v54  ;;  %v7001_v54 = vadd.f32 %v11865_v12, %v11860_v11 }
 0x67a   :  { %v6974_v59 = vpop.f32.mrf.mxu0 }
 0x67b   :  { %v11973_v56 = vadd.f32 %v6973_v34, %v11831_v60  ;;  %v11985_v60 = vpop.f32.mrf.mxu1  ;;  %v6320_v2 = vadd.f32 %v6998_v63, %v11738_v29 }
 0x67c   :  { %v6975_v20 = vpop.f32.mrf.mxu0 }
 0x67d   :  { %v6976_v57 = vadd.f32 %v6975_v20, %v6974_v59  ;;  %v12001_v10 = vpop.f32.mrf.mxu1 }
 0x67e   :  { %v7105_v33 = vpop.f32.mrf.mxu0 }
 0x67f   :  { %v11980_v23 = vadd.f32 %v6976_v57, %v11841_v55  ;;  %v11995_v55 = vld [vmem:[%s12197_s14] ss:$0 sm:$0xff]  ;;  %v12008_v11 = vpop.f32.mrf.mxu1  ;;  %s6719_s14 = sshll.u32 %s7365_s13, 4  ;;  %s6720_s14 = int_to_ptr.vmem [resolvable:$true] %s6719_s14 }
 0x680   :  { %v7106_v46 = vpop.f32.mrf.mxu0  ;;  %s7325_s3 = scalar_lea.vmem %s6720_s14, 4096  ;;  %p7330_p12 = scmp.lt.s32.totalorder %s6720_s14, %s6720_s14 }
 0x681   :  { %13117 = vst [vmem:[#allocation95_spill] sm:$0xff] %v11980_v23  ;;  %v7107_v53 = vadd.f32 %v7106_v46, %v7105_v33  ;;  %v7004_v23 = vadd.f32 %v11872_v24, %v11867_v50  ;;  %v12015_v24 = vpop.f32.mrf.mxu1  ;;  %p7326_p11 = scmp.ne.s32.totalorder %s6720_s14, %s7325_s3  ;;  %p7331_p13 = scmp.lt.s32.totalorder %s7325_s3, %s7325_s3 }
 0x682   :  { %v7108_v6 = vpop.f32.mrf.mxu0 }
 0x683   :  { %v6478_v34 = vadd.f32 %v7107_v53, %v6317_v43  ;;  %v6325_v53 = vadd.f32 %v7001_v54, %v11747_v27  ;;  %p7332_p0 = por %p7331_p13, %p7330_p12 }
 0x684   :  { %v7109_v59 = vpop.f32.mrf.mxu0 }
 0x685   :  { %v6611_v4 = vmul.f32 %v11990_v32, %v6478_v34  ;;  %v7110_v20 = vadd.f32 %v7109_v59, %v7108_v6  ;;  %p7333_p1 = pnand %p7332_p0, %p7326_p11 }
 0x686   :  { %v7111_v57 = vpop.f32.mrf.mxu0 }
 0x687   :  { %v6650_v33 = vadd.f32 %v11995_v55, %v6611_v4  ;;  %v6481_v46 = vadd.f32 %v7110_v20, %v6320_v2  ;;  %v6328_v4 = vadd.f32 %v7004_v23, %v11764_v42  ;;  %v7007_v2 = vadd.f32 %v11879_v13, %v11874_v45  ;;  %v12022_v13 = vpop.f32.mrf.mxu1 }
 0x688   :  { %v7112_v43 = vpop.f32.mrf.mxu0 }
 0x689   :  { %6682 = vst [vmem:[#allocation11] sm:$0xff] %v6650_v33  ;;  %v6612_v29 = vmul.f32 %v11990_v32, %v6481_v46  ;;  %v7113_v63 = vadd.f32 %v7112_v43, %v7111_v57  ;;  %v6333_v46 = vadd.f32 %v7007_v2, %v11773_v37  ;;  %v7010_v43 = vadd.f32 %v11886_v28, %v11881_v7  ;;  %v12029_v28 = vpop.f32.mrf.mxu1 }
 0x68a   :  { %v7114_v12 = vpop.f32.mrf.mxu0 }
 0x68b   :  { %v6651_v6 = vadd.f32 %v11995_v55, %v6612_v29  ;;  %v6486_v34 = vadd.f32 %v7113_v63, %v6325_v53 }
 0x68c   :  { %v7115_v59 = vpop.f32.mrf.mxu0 }
 0x68d   :  { %6683 = vst [vmem:[#allocation11 + $0x8] sm:$0xff] %v6651_v6  ;;  %v6613_v27 = vmul.f32 %v11990_v32, %v6486_v34  ;;  %v7116_v50 = vadd.f32 %v7115_v59, %v7114_v12  ;;  %v6336_v12 = vadd.f32 %v7010_v43, %v11790_v1  ;;  %v7013_v6 = vadd.f32 %v11893_v5, %v11888_v62  ;;  %v12036_v5 = vpop.f32.mrf.mxu1 }
 0x68e   :  { %v7117_v54 = vpop.f32.mrf.mxu0  ;;  %v7019_v43 = vadd.f32 %v11907_v19, %v11902_v36 }
 0x68f   :  { %v6652_v20 = vadd.f32 %v11995_v55, %v6613_v27  ;;  %v6489_v57 = vadd.f32 %v7116_v50, %v6328_v4  ;;  %v6341_v27 = vadd.f32 %v7013_v6, %v11799_v14  ;;  %v7016_v50 = vadd.f32 %v11900_v16, %v11895_v48  ;;  %v12043_v16 = vpop.f32.mrf.mxu1 }
 0x690   :  { %v7118_v33 = vpop.f32.mrf.mxu0 }
 0x691   :  { %6684 = vst [vmem:[#allocation11 + $0x10] sm:$0xff] %v6652_v20  ;;  %v6614_v42 = vmul.f32 %v11990_v32, %v6489_v57  ;;  %v7119_v45 = vadd.f32 %v7118_v33, %v7117_v54  ;;  %v12050_v19 = vpop.f32.mrf.mxu1 }
 0x692   :  { %v7120_v23 = vpop.f32.mrf.mxu0 }
 0x693   :  { %v6653_v53 = vadd.f32 %v11995_v55, %v6614_v42  ;;  %v6494_v29 = vadd.f32 %v7119_v45, %v6333_v46  ;;  %v6344_v46 = vadd.f32 %v7016_v50, %v11816_v61 }
 0x694   :  { %v7121_v63 = vpop.f32.mrf.mxu0 }
 0x695   :  { %6685 = vst [vmem:[#allocation11 + $0x18] sm:$0xff] %v6653_v53  ;;  %v6615_v37 = vmul.f32 %v11990_v32, %v6494_v29  ;;  %v7122_v7 = vadd.f32 %v7121_v63, %v7120_v23  ;;  %v6349_v29 = vadd.f32 %v7019_v43, %v11825_v44  ;;  %v7022_v63 = vadd.f32 %v11914_v52, %v11909_v18  ;;  %v12057_v52 = vpop.f32.mrf.mxu1 }
 0x696   :  { %v7123_v34 = vpop.f32.mrf.mxu0  ;;  %v7031_v43 = vadd.f32 %v11935_v17, %v11930_v25 }
 0x697   :  { %v6654_v59 = vadd.f32 %v11995_v55, %v6615_v37  ;;  %v6497_v4 = vadd.f32 %v7122_v7, %v6336_v12 }
 0x698   :  { %v7124_v2 = vpop.f32.mrf.mxu0 }
 0x699   :  { %6686 = vst [vmem:[#allocation11 + $0x20] sm:$0xff] %v6654_v59  ;;  %v6616_v1 = vmul.f32 %v11990_v32, %v6497_v4  ;;  %v7125_v62 = vadd.f32 %v7124_v2, %v7123_v34  ;;  %v6352_v34 = vadd.f32 %v7022_v63, %v11838_v26  ;;  %v7025_v59 = vadd.f32 %v11921_v51, %v11916_v21  ;;  %v12064_v51 = vpop.f32.mrf.mxu1 }
 0x69a   :  { %v7126_v54 = vpop.f32.mrf.mxu0 }
 0x69b   :  { %v6655_v20 = vadd.f32 %v11995_v55, %v6616_v1  ;;  %v6502_v57 = vadd.f32 %v7125_v62, %v6341_v27  ;;  %v6357_v1 = vadd.f32 %v7025_v59, %v11847_v30  ;;  %v7028_v62 = vadd.f32 %v11928_v49, %v11923_v58  ;;  %v12071_v58 = vpop.f32.mrf.mxu1 }
 0x69c   :  { %v7127_v33 = vpop.f32.mrf.mxu0 }
 0x69d   :  { %6687 = vst [vmem:[#allocation11 + $0x28] sm:$0xff] %v6655_v20  ;;  %v6617_v14 = vmul.f32 %v11990_v32, %v6502_v57  ;;  %v7128_v48 = vadd.f32 %v7127_v33, %v7126_v54  ;;  %v12078_v17 = vpop.f32.mrf.mxu1 }
 0x69e   :  { %v7129_v42 = vpop.f32.mrf.mxu0 }
 0x69f   :  { %v6656_v45 = vadd.f32 %v11995_v55, %v6617_v14  ;;  %v6505_v23 = vadd.f32 %v7128_v48, %v6344_v46  ;;  %v6360_v46 = vadd.f32 %v7028_v62, %v11856_v31  ;;  %v13119_v62 = vld [vmem:[#allocation28_spill] sm:$0xff] }
 0x6a0   :  { %v7130_v53 = vpop.f32.mrf.mxu0 }
 0x6a1   :  { %6688 = vst [vmem:[#allocation11 + $0x30] sm:$0xff] %v6656_v45  ;;  %v6618_v61 = vmul.f32 %v11990_v32, %v6505_v23  ;;  %v7131_v36 = vadd.f32 %v7130_v53, %v7129_v42  ;;  %v6365_v23 = vadd.f32 %v7031_v43, %v11863_v40  ;;  %v7034_v53 = vadd.f32 %v11945_v39, %v11940_v8  ;;  %v12085_v39 = vpop.f32.mrf.mxu1  ;;  %v13120_v43 = vld [vmem:[#allocation32_spill] sm:$0xff] }
 0x6a2   :  { %v7132_v12 = vpop.f32.mrf.mxu0 }
 0x6a3   :  { %v6657_v6 = vadd.f32 %v11995_v55, %v6618_v61  ;;  %v6510_v37 = vadd.f32 %v7131_v36, %v6349_v29 }
 0x6a4   :  { %v7133_v7 = vpop.f32.mrf.mxu0 }
 0x6a5   :  { %6689 = vst [vmem:[#allocation11 + $0x38] sm:$0xff] %v6657_v6  ;;  %v6619_v44 = vmul.f32 %v11990_v32, %v6510_v37  ;;  %v7134_v18 = vadd.f32 %v7133_v7, %v7132_v12  ;;  %v6368_v12 = vadd.f32 %v7034_v53, %v11870_v47  ;;  %v7037_v6 = vadd.f32 %v11955_v15, %v11950_v38  ;;  %v12092_v15 = vpop.f32.mrf.mxu1  ;;  %v13121_v53 = vld [vmem:[#allocation41_spill] sm:$0xff] }
 0x6a6   :  { %v7135_v4 = vpop.f32.mrf.mxu0 }
 0x6a7   :  { %v6658_v2 = vadd.f32 %v11995_v55, %v6619_v44  ;;  %v6513_v27 = vadd.f32 %v7134_v18, %v6352_v34  ;;  %v13118_v44 = vld [vmem:[#allocation55_spill] sm:$0xff] }
 0x6a8   :  { %v7136_v50 = vpop.f32.mrf.mxu0  ;;  %v6373_v18 = vadd.f32 %v7037_v6, %v13118_v44  ;;  %v13122_v6 = vld [vmem:[#allocation88_spill] sm:$0xff] }
 0x6a9   :  { %6690 = vst [vmem:[#allocation11 + $0x40] sm:$0xff] %v6658_v2  ;;  %v6620_v26 = vmul.f32 %v11990_v32, %v6513_v27  ;;  %v7137_v21 = vadd.f32 %v7136_v50, %v7135_v4  ;;  %v7040_v4 = vadd.f32 %v11965_v41, %v11960_v0  ;;  %v12099_v41 = vpop.f32.mrf.mxu1 }
 0x6aa   :  { %v7138_v54 = vpop.f32.mrf.mxu0 }
 0x6ab   :  { %v6659_v20 = vadd.f32 %v11995_v55, %v6620_v26  ;;  %v6518_v57 = vadd.f32 %v7137_v21, %v6357_v1  ;;  %v6376_v26 = vadd.f32 %v7040_v4, %v13119_v62  ;;  %v7043_v21 = vadd.f32 %v11977_v9, %v11970_v3  ;;  %v12106_v9 = vpop.f32.mrf.mxu1  ;;  %v13124_v62 = vld [vmem:[#allocation19_spill] sm:$0xff] }
 0x6ac   :  { %v7139_v33 = vpop.f32.mrf.mxu0 }
 0x6ad   :  { %6691 = vst [vmem:[#allocation11 + $0x48] sm:$0xff] %v6659_v20  ;;  %v6621_v30 = vmul.f32 %v11990_v32, %v6518_v57  ;;  %v7140_v49 = vadd.f32 %v7139_v33, %v7138_v54 }
 0x6ae   :  { %v7141_v14 = vpop.f32.mrf.mxu0 }
 0x6af   :  { %v6660_v48 = vadd.f32 %v11995_v55, %v6621_v30  ;;  %v6521_v42 = vadd.f32 %v7140_v49, %v6360_v46  ;;  %v6381_v30 = vadd.f32 %v7043_v21, %v13120_v43  ;;  %v7046_v49 = vadd.f32 %v12001_v10, %v11985_v60  ;;  %v12113_v10 = vpop.f32.mrf.mxu1 }
 0x6b0   :  { %v7142_v45 = vpop.f32.mrf.mxu0  ;;  %v7058_v21 = vadd.f32 %v12057_v52, %v12050_v19 }
 0x6b1   :  { %6692 = vst [vmem:[#allocation11 + $0x50] sm:$0xff] %v6660_v48  ;;  %v6622_v31 = vmul.f32 %v11990_v32, %v6521_v42  ;;  %v7143_v25 = vadd.f32 %v7142_v45, %v7141_v14 }
 0x6b2   :  { %v7144_v29 = vpop.f32.mrf.mxu0 }
 0x6b3   :  { %v6661_v63 = vadd.f32 %v11995_v55, %v6622_v31  ;;  %v6526_v61 = vadd.f32 %v7143_v25, %v6365_v23  ;;  %v6384_v31 = vadd.f32 %v7046_v49, %v13121_v53  ;;  %v7049_v25 = vadd.f32 %v12015_v24, %v12008_v11  ;;  %v12120_v24 = vpop.f32.mrf.mxu1 }
 0x6b4   :  { %v7145_v36 = vpop.f32.mrf.mxu0  ;;  %v7064_v53 = vadd.f32 %v12085_v39, %v12078_v17 }
 0x6b5   :  { %6693 = vst [vmem:[#allocation11 + $0x58] sm:$0xff] %v6661_v63  ;;  %v6623_v40 = vmul.f32 %v11990_v32, %v6526_v61  ;;  %v7146_v8 = vadd.f32 %v7145_v36, %v7144_v29 }
 0x6b6   :  { %v7147_v37 = vpop.f32.mrf.mxu0 }
 0x6b7   :  { %v6662_v7 = vadd.f32 %v11995_v55, %v6623_v40  ;;  %v6529_v34 = vadd.f32 %v7146_v8, %v6368_v12  ;;  %v6389_v40 = vadd.f32 %v7049_v25, %v13122_v6  ;;  %v7052_v8 = vadd.f32 %v12029_v28, %v12022_v13  ;;  %v7072_v28 = vpop.f32.mrf.mxu1 }
 0x6b8   :  { %v7148_v59 = vpop.f32.mrf.mxu0 }
 0x6b9   :  { %6694 = vst [vmem:[#allocation11 + $0x60] sm:$0xff] %v6662_v7  ;;  %v6624_v47 = vmul.f32 %v11990_v32, %v6529_v34  ;;  %v7149_v38 = vadd.f32 %v7148_v59, %v7147_v37 }
 0x6ba   :  { %v7150_v2 = vpop.f32.mrf.mxu0 }
 0x6bb   :  { %v6663_v27 = vadd.f32 %v11995_v55, %v6624_v47  ;;  %v6534_v50 = vadd.f32 %v7149_v38, %v6373_v18  ;;  %v13123_v18 = vld [vmem:[#allocation31_spill] sm:$0xff]  ;;  %v7055_v47 = vadd.f32 %v12043_v16, %v12036_v5  ;;  %v7074_v5 = vpop.f32.mrf.mxu1 }
 0x6bc   :  { %v7151_v1 = vpop.f32.mrf.mxu0  ;;  %v6392_v4 = vadd.f32 %v7052_v8, %v13123_v18 }
 0x6bd   :  { %6695 = vst [vmem:[#allocation11 + $0x68] sm:$0xff] %v6663_v27  ;;  %v6625_v54 = vmul.f32 %v11990_v32, %v6534_v50  ;;  %v7152_v0 = vadd.f32 %v7151_v1, %v7150_v2  ;;  %v7075_v19 = vpop.f32.mrf.mxu1 }
 0x6be   :  { %v7153_v20 = vpop.f32.mrf.mxu0 }
 0x6bf   :  { %v6664_v57 = vadd.f32 %v11995_v55, %v6625_v54  ;;  %v6537_v33 = vadd.f32 %v7152_v0, %v6376_v26  ;;  %v6397_v26 = vadd.f32 %v7055_v47, %v13124_v62 }
 0x6c0   :  { %v7154_v46 = vpop.f32.mrf.mxu0 }
 0x6c1   :  { %6696 = vst [vmem:[#allocation11 + $0x70] sm:$0xff] %v6664_v57  ;;  %v6626_v14 = vmul.f32 %v11990_v32, %v6537_v33  ;;  %v7155_v3 = vadd.f32 %v7154_v46, %v7153_v20  ;;  %v13125_v46 = vld [vmem:[#allocation45_spill] sm:$0xff] }
 0x6c2   :  { %v7156_v48 = vpop.f32.mrf.mxu0  ;;  %v6400_v43 = vadd.f32 %v7058_v21, %v13125_v46 }
 0x6c3   :  { %v6665_v42 = vadd.f32 %v11995_v55, %v6626_v14  ;;  %v6542_v45 = vadd.f32 %v7155_v3, %v6381_v30  ;;  %v7061_v30 = vadd.f32 %v12071_v58, %v12064_v51  ;;  %v7077_v51 = vpop.f32.mrf.mxu1 }
 0x6c4   :  { %v7157_v23 = vpop.f32.mrf.mxu0 }
 0x6c5   :  { %6697 = vst [vmem:[#allocation11 + $0x78] sm:$0xff] %v6665_v42  ;;  %v6627_v29 = vmul.f32 %v11990_v32, %v6542_v45  ;;  %v7158_v60 = vadd.f32 %v7157_v23, %v7156_v48  ;;  %v13126_v45 = vld [vmem:[#allocation22_spill] sm:$0xff]  ;;  %v7078_v17 = vpop.f32.mrf.mxu1 }
 0x6c6   :  { %v7159_v63 = vpop.f32.mrf.mxu0  ;;  %v6405_v23 = vadd.f32 %v7061_v30, %v13126_v45  ;;  %v13131_v45 = vld [vmem:[#allocation62_spill] sm:$0xff] }
 0x6c7   :  { %v6666_v61 = vadd.f32 %v11995_v55, %v6627_v29  ;;  %v6545_v36 = vadd.f32 %v7158_v60, %v6384_v31 }
 0x6c8   :  { %v7160_v12 = vpop.f32.mrf.mxu0 }
 0x6c9   :  { %6698 = vst [vmem:[#allocation11 + $0x80] sm:$0xff] %v6666_v61  ;;  %v6628_v37 = vmul.f32 %v11990_v32, %v6545_v36  ;;  %v7161_v11 = vadd.f32 %v7160_v12, %v7159_v63  ;;  %v13127_v61 = vld [vmem:[#allocation33_spill] sm:$0xff]  ;;  %v7067_v12 = vadd.f32 %v12099_v41, %v12092_v15  ;;  %v7080_v15 = vpop.f32.mrf.mxu1 }
 0x6ca   :  { %v7162_v7 = vpop.f32.mrf.mxu0  ;;  %v6408_v36 = vadd.f32 %v7064_v53, %v13127_v61 }
 0x6cb   :  { %v6667_v34 = vadd.f32 %v11995_v55, %v6628_v37  ;;  %v6550_v59 = vadd.f32 %v7161_v11, %v6389_v40  ;;  %v7081_v62 = vpop.f32.mrf.mxu1 }
 0x6cc   :  { %v7163_v44 = vpop.f32.mrf.mxu0  ;;  %v7082_v53 = vadd.f32 %v7081_v62, %v7080_v15  ;;  %v13132_v15 = vld [vmem:[#allocation95_spill] sm:$0xff] }
 0x6cd   :  { %6699 = vst [vmem:[#allocation11 + $0x88] sm:$0xff] %v6667_v34  ;;  %v6629_v38 = vmul.f32 %v11990_v32, %v6550_v59  ;;  %v7164_v13 = vadd.f32 %v7163_v44, %v7162_v7  ;;  %v13128_v7 = vld [vmem:[#allocation29_spill] sm:$0xff]  ;;  %v7070_v59 = vadd.f32 %v12113_v10, %v12106_v9 }
 0x6ce   :  { %v7165_v2 = vpop.f32.mrf.mxu0  ;;  %v6413_v34 = vadd.f32 %v7067_v12, %v13128_v7 }
 0x6cf   :  { %v6668_v27 = vadd.f32 %v11995_v55, %v6629_v38  ;;  %v6553_v50 = vadd.f32 %v7164_v13, %v6392_v4  ;;  %v13129_v13 = vld [vmem:[#allocation49_spill] sm:$0xff] }
 0x6d0   :  { %v7166_v1 = vpop.f32.mrf.mxu0 }
 0x6d1   :  { %6700 = vst [vmem:[#allocation11 + $0x90] sm:$0xff] %v6668_v27  ;;  %v6630_v54 = vmul.f32 %v11990_v32, %v6553_v50  ;;  %v7167_v0 = vadd.f32 %v7166_v1, %v7165_v2  ;;  %v6416_v2 = vadd.f32 %v7070_v59, %v13129_v13  ;;  %v7073_v27 = vadd.f32 %v7072_v28, %v12120_v24 }
 0x6d2   :  { %v7168_v16 = vpop.f32.mrf.mxu0 }
 0x6d3   :  { %v6669_v20 = vadd.f32 %v11995_v55, %v6630_v54  ;;  %v6558_v57 = vadd.f32 %v7167_v0, %v6397_v26  ;;  %v13130_v54 = vld [vmem:[#allocation60_spill] sm:$0xff] }
 0x6d4   :  { %v7169_v33 = vpop.f32.mrf.mxu0  ;;  %v6421_v0 = vadd.f32 %v7073_v27, %v13130_v54 }
 0x6d5   :  { %6701 = vst [vmem:[#allocation11 + $0x98] sm:$0xff] %v6669_v20  ;;  %v6631_v49 = vmul.f32 %v11990_v32, %v6558_v57  ;;  %v7170_v14 = vadd.f32 %v7169_v33, %v7168_v16  ;;  %v7076_v16 = vadd.f32 %v7075_v19, %v7074_v5  ;;  %v7083_v33 = vpop.f32.mrf.mxu1 }
 0x6d6   :  { %v7171_v52 = vpop.f32.mrf.mxu0 }
 0x6d7   :  { %v6670_v3 = vadd.f32 %v11995_v55, %v6631_v49  ;;  %v6561_v48 = vadd.f32 %v7170_v14, %v6400_v43  ;;  %v6424_v30 = vadd.f32 %v7076_v16, %v11958_v35  ;;  %v7079_v49 = vadd.f32 %v7078_v17, %v7077_v51 }
 0x6d8   :  { %v7172_v42 = vpop.f32.mrf.mxu0 }
 0x6d9   :  { %6702 = vst [vmem:[#allocation11 + $0xa0] sm:$0xff] %v6670_v3  ;;  %v6632_v31 = vmul.f32 %v11990_v32, %v6561_v48  ;;  %v7173_v25 = vadd.f32 %v7172_v42, %v7171_v52  ;;  %v7084_v3 = vpop.f32.mrf.mxu1 }
 0x6da   :  { %v7174_v58 = vpop.f32.mrf.mxu0  ;;  %v7085_v61 = vadd.f32 %v7084_v3, %v7083_v33 }
 0x6db   :  { %v6671_v29 = vadd.f32 %v11995_v55, %v6632_v31  ;;  %v6566_v60 = vadd.f32 %v7173_v25, %v6405_v23  ;;  %v6429_v23 = vadd.f32 %v7079_v49, %v13131_v45 }
 0x6dc   :  { %v7175_v63 = vpop.f32.mrf.mxu0 }
 0x6dd   :  { %6703 = vst [vmem:[#allocation11 + $0xa8] sm:$0xff] %v6671_v29  ;;  %v6633_v6 = vmul.f32 %v11990_v32, %v6566_v60  ;;  %v7176_v40 = vadd.f32 %v7175_v63, %v7174_v58  ;;  %v7086_v58 = vpop.f32.mrf.mxu1  ;;  %v6432_v63 = vadd.f32 %v7082_v53, %v11968_v22 }
 0x6de   :  { %v7177_v39 = vpop.f32.mrf.mxu0 }
 0x6df   :  { %v6672_v8 = vadd.f32 %v11995_v55, %v6633_v6  ;;  %v6569_v37 = vadd.f32 %v7176_v40, %v6408_v36  ;;  %v7087_v6 = vpop.f32.mrf.mxu1 }
 0x6e0   :  { %v7178_v11 = vpop.f32.mrf.mxu0 }
 0x6e1   :  { %6704 = vst [vmem:[#allocation11 + $0xb0] sm:$0xff] %v6672_v8  ;;  %v6634_v44 = vmul.f32 %v11990_v32, %v6569_v37  ;;  %v7179_v18 = vadd.f32 %v7178_v11, %v7177_v39  ;;  %v6437_v37 = vadd.f32 %v7085_v61, %v11973_v56  ;;  %v7088_v11 = vadd.f32 %v7087_v6, %v7086_v58 }
 0x6e2   :  { %v7180_v41 = vpop.f32.mrf.mxu0 }
 0x6e3   :  { %v6673_v4 = vadd.f32 %v11995_v55, %v6634_v44  ;;  %v6574_v47 = vadd.f32 %v7179_v18, %v6413_v34 }
 0x6e4   :  { %v7181_v38 = vpop.f32.mrf.mxu0 }
 0x6e5   :  { %6705 = vst [vmem:[#allocation11 + $0xb8] sm:$0xff] %v6673_v4  ;;  %v6635_v50 = vmul.f32 %v11990_v32, %v6574_v47  ;;  %v7182_v1 = vadd.f32 %v7181_v38, %v7180_v41  ;;  %v6440_v41 = vadd.f32 %v7088_v11, %v13132_v15 }
 0x6e6   :  { %v7183_v9 = vpop.f32.mrf.mxu0 }
 0x6e7   :  { %v6674_v10 = vadd.f32 %v11995_v55, %v6635_v50  ;;  %v6577_v26 = vadd.f32 %v7182_v1, %v6416_v2 }
 0x6e8   :  { %v7184_v21 = vpop.f32.mrf.mxu0 }
 0x6e9   :  { %6706 = vst [vmem:[#allocation11 + $0xc0] sm:$0xff] %v6674_v10  ;;  %v6636_v20 = vmul.f32 %v11990_v32, %v6577_v26  ;;  %v7185_v57 = vadd.f32 %v7184_v21, %v7183_v9 }
 0x6ea   :  { %v7186_v46 = vpop.f32.mrf.mxu0 }
 0x6eb   :  { %v6675_v24 = vadd.f32 %v11995_v55, %v6636_v20  ;;  %v6582_v28 = vadd.f32 %v7185_v57, %v6421_v0 }
 0x6ec   :  { %v7187_v43 = vpop.f32.mrf.mxu0 }
 0x6ed   :  { %6707 = vst [vmem:[#allocation11 + $0xc8] sm:$0xff] %v6675_v24  ;;  %v6637_v14 = vmul.f32 %v11990_v32, %v6582_v28  ;;  %v7188_v52 = vadd.f32 %v7187_v43, %v7186_v46 }
 0x6ee   :  { %v7189_v48 = vpop.f32.mrf.mxu0 }
 0x6ef   :  { %v6676_v5 = vadd.f32 %v11995_v55, %v6637_v14  ;;  %v6585_v19 = vadd.f32 %v7188_v52, %v6424_v30 }
 0x6f0   :  { %v7190_v42 = vpop.f32.mrf.mxu0 }
 0x6f1   :  { %6708 = vst [vmem:[#allocation11 + $0xd0] sm:$0xff] %v6676_v5  ;;  %v6638_v31 = vmul.f32 %v11990_v32, %v6585_v19  ;;  %v7191_v25 = vadd.f32 %v7190_v42, %v7189_v48 }
 0x6f2   :  { %v7192_v35 = vpop.f32.mrf.mxu0 }
 0x6f3   :  { %v6677_v51 = vadd.f32 %v11995_v55, %v6638_v31  ;;  %v6590_v29 = vadd.f32 %v7191_v25, %v6429_v23 }
 0x6f4   :  { %v7193_v60 = vpop.f32.mrf.mxu0 }
 0x6f5   :  { %6709 = vst [vmem:[#allocation11 + $0xd8] sm:$0xff] %v6677_v51  ;;  %v6639_v36 = vmul.f32 %v11990_v32, %v6590_v29  ;;  %v7194_v12 = vadd.f32 %v7193_v60, %v7192_v35 }
 0x6f6   :  { %v7195_v40 = vpop.f32.mrf.mxu0 }
 0x6f7   :  { %v6678_v17 = vadd.f32 %v11995_v55, %v6639_v36  ;;  %v6593_v39 = vadd.f32 %v7194_v12, %v6432_v63 }
 0x6f8   :  { %v7196_v8 = vpop.f32.mrf.mxu0 }
 0x6f9   :  { %6710 = vst [vmem:[#allocation11 + $0xe0] sm:$0xff] %v6678_v17  ;;  %v6640_v7 = vmul.f32 %v11990_v32, %v6593_v39  ;;  %v7197_v34 = vadd.f32 %v7196_v8, %v7195_v40 }
 0x6fa   :  { %v7198_v59 = vpop.f32.mrf.mxu0 }
 0x6fb   :  { %v6679_v22 = vadd.f32 %v11995_v55, %v6640_v7  ;;  %v6598_v44 = vadd.f32 %v7197_v34, %v6437_v37 }
 0x6fc   :  { %v7199_v18 = vpop.f32.mrf.mxu0 }
 0x6fd   :  { %6711 = vst [vmem:[#allocation11 + $0xe8] sm:$0xff] %v6679_v22  ;;  %v6641_v4 = vmul.f32 %v11990_v32, %v6598_v44  ;;  %v7200_v47 = vadd.f32 %v7199_v18, %v7198_v59 }
 0x6ff   :  { %v6680_v38 = vadd.f32 %v11995_v55, %v6641_v4  ;;  %v6601_v13 = vadd.f32 %v7200_v47, %v6440_v41 }
 0x701   :  { %6712 = vst [vmem:[#allocation11 + $0xf0] sm:$0xff] %v6680_v38  ;;  %v6642_v56 = vmul.f32 %v11990_v32, %v6601_v13 }
 0x703   :  { %v6681_v2 = vadd.f32 %v11995_v55, %v6642_v56 }
 0x705   :  { %6713 = vst [vmem:[#allocation11 + $0xf8] sm:$0xff] %v6681_v2 }
 0x706   :  { %7336 = shalt.err (!%p7333_p1)
}
 0x707   :  { %6725 = dma.vmem_to_hbm [thread:$0]  %s6720_s14, 4096, %s12198_s15, [#allocation4], %s7362_s2, %s7362_s2, %s7363_s28  }
 0x708   :  { %7351 = dma.done.wait [#allocation4], 4096  }
 0x709   :  { %7352 = vsyncadd [#allocation4], 4294963200 }
 0x70a   :  { %6729 = vsyncpa [#allocation3], 1 }
 0x70b   :  { %6730 = vsyncpa [#allocation6], 1 }
 0x70c   :  { %6731 = vsyncpa [#allocation9], 1 }
 0x70d   :  { %6732 = vsyncpa [#allocation4], 1 }

</bundles_post_ra>
